<compile_context>
chip_gen: v5e
topology: v5e:2x2
jax: 0.10.0
libtpu: 0.0.40
codegen_flags: <defaults>
</compile_context>

<pallas_src>
import functools

import numpy as np
import jax
import jax.numpy as jnp
from jax.experimental import pallas as pl
from jax.experimental.pallas import tpu as pltpu


# -----------------------------------------------------------------------------
# Fused kernel: whole MSFeature forward for one batch tile per grid step.
# -----------------------------------------------------------------------------
def _msfeature_kernel(*refs, n_pyramids, n_shared, n_feature, img_w, hw_image,
                      batch_tile, act_dtype, mxu_dtype):
    # ref order: x, shared W, shared b, feature W, feature b, spatial mask,
    #            tap boundary masks, output, patch scratch (shared), patch
    #            scratch (feature).
    i = 0
    x_ref = refs[i]; i += 1
    sw = refs[i:i + n_shared]; i += n_shared
    sb = refs[i:i + n_shared]; i += n_shared
    fw = refs[i:i + n_feature]; i += n_feature
    fb = refs[i:i + n_feature]; i += n_feature
    mask_ref = refs[i]; i += 1
    tap_ref = refs[i]; i += 1
    o_ref = refs[i]; i += 1
    patch_sh = refs[i]; i += 1          # (9*Cin_shared_max, N_sh) mxu_dtype
    patch_ft = refs[i]                  # (9*Cin_feature,    N_ft) mxu_dtype

    n_sh = x_ref.shape[-1]              # n_pyramids * batch_tile * H*W
    n_ft = batch_tile * hw_image        # batch_tile * H*W

    # load masks once; feature-stack variants are the first n_ft lanes (the
    # masks are per-image tilings, so any n_ft-wide prefix is the bt-tiling)
    taps_all = tap_ref[...]             # (9, 1, N_sh) act_dtype
    mask_all = mask_ref[...]            # (1, N_sh)    f32
    taps_ft = taps_all[:, :, :n_ft]
    mask_ft = mask_all[:, :n_ft]

    def masked_conv(act, w_ref, b_ref, mask, taps, patch_ref, relu):
        # act: (Cin, N) act_dtype.  Build the (9*Cin, N) im2col patch in the
        # persistent VMEM scratch via 8 lane rolls (XLU) + boundary masks, then
        # ONE deep-K MXU matmul with bf16 inputs / f32 accumulation.
        cin, n = act.shape
        for dy in range(3):
            for dx in range(3):
                off = (dy - 1) * img_w + (dx - 1)   # flattened spatial shift
                t = dy * 3 + dx
                sh = act if off == 0 else pltpu.roll(act, (-off) % n, axis=1)
                if t != 4:                          # centre tap: no boundary
                    sh = sh * taps[t]               # (1, N) sublane broadcast
                patch_ref[t * cin:(t + 1) * cin, :] = sh.astype(mxu_dtype)
        acc = jnp.dot(w_ref[...], patch_ref[:9 * cin, :],
                      preferred_element_type=jnp.float32)   # (Cout, N) f32
        acc = acc + b_ref[...]                      # (Cout, 1) lane broadcast
        if relu:
            acc = jnp.maximum(acc, 0.0)
        return acc * mask                           # spatial mask, f32

    # ---- shared stack: all pyramids of the batch tile lane-concatenated -----
    a = x_ref[0].astype(act_dtype)                  # (C_pad, N_sh)
    for li in range(n_shared):
        a = masked_conv(a, sw[li], sb[li], mask_all, taps_all, patch_sh,
                        relu=(li < n_shared - 1)).astype(act_dtype)

    # ---- pyramid lanes -> channels (torch.cat(fs, dim=1)) -------------------
    f = jnp.concatenate(
        [a[:, p * n_ft:(p + 1) * n_ft] for p in range(n_pyramids)], axis=0)

    # ---- feature stack on the concatenated channels --------------------------
    for li in range(n_feature):
        out = masked_conv(f, fw[li], fb[li], mask_ft, taps_ft, patch_ft,
                          relu=(li < n_feature - 1))
        f = out.astype(act_dtype) if li < n_feature - 1 else out

    o_ref[0] = f.astype(o_ref.dtype)


# -----------------------------------------------------------------------------
# Host-side helpers
# -----------------------------------------------------------------------------
def _make_tap_masks_np(h, w):
    """(9, 1, H*W) f32: 1 where the (dy,dx) shifted source pixel is in-bounds."""
    yy = np.arange(h).reshape(h, 1)
    xx = np.arange(w).reshape(1, w)
    out = np.zeros((9, 1, h * w), np.float32)
    for dy in range(3):
        for dx in range(3):
            oy, ox = dy - 1, dx - 1
            valid = ((yy + oy >= 0) & (yy + oy < h)
                     & (xx + ox >= 0) & (xx + ox < w))
            out[dy * 3 + dx, 0] = valid.reshape(-1).astype(np.float32)
    return out


def _default_batch_tile(batch):
    """Largest batch tile in {8,4,2} that still leaves >=2 grid steps
    (keeps both v7x TensorCores busy via dimension_semantics='parallel')."""
    for bt in (8, 4, 2):
        if batch % bt == 0 and batch // bt >= 2:
            return bt
    return 1


def init_masked_sequential(key, n_inputs, n_feats, n_outputs, depth,
                           n_real_inputs=None, w_dtype=jnp.bfloat16):
    """Weights pre-reshaped to (Cout, 9*Cin) matching the in-kernel im2col
    layout (column = tap*Cin + ci, tap = dy*3+dx) and pre-cast to the MXU input
    dtype on the host.  `n_real_inputs` zeroes sublane-padding input columns."""
    if depth == 1:
        dims = [(n_inputs, n_outputs)]
    else:
        dims = ([(n_inputs, n_feats)]
                + [(n_feats, n_feats)] * (depth - 2)
                + [(n_feats, n_outputs)])
    ws, bs = [], []
    for idx, (cin, cout) in enumerate(dims):
        key, kw = jax.random.split(key)
        real_cin = n_real_inputs if (idx == 0 and n_real_inputs) else cin
        w = (jax.random.normal(kw, (cout, 9, cin), jnp.float32)
             / np.sqrt(9.0 * real_cin))
        if idx == 0 and n_real_inputs is not None and n_real_inputs < cin:
            keep = (jnp.arange(cin) < n_real_inputs).astype(jnp.float32)
            w = w * keep[None, None, :]             # padded channels -> 0
        ws.append(w.reshape(cout, 9 * cin).astype(w_dtype))
        bs.append(jnp.zeros((cout, 1), jnp.float32))
    return ws, bs


# -----------------------------------------------------------------------------
# MSFeature
# -----------------------------------------------------------------------------
class MSFeaturePallas:
    def __init__(self, n_pyramids=3, n_colors=3, n_feats=16, depth=6, seed=0,
                 mxu_dtype=jnp.bfloat16, act_dtype=jnp.float32):
        # mxu_dtype: dtype of the weights + im2col patch (MXU inputs); bf16 is
        #   3-4x faster on every generation (accumulation stays f32).
        # act_dtype: dtype activations are carried in between layers (rolls /
        #   tap-mask multiplies).  jnp.bfloat16 halves VPU/XLU traffic on
        #   v6e/v7x; keep f32 on v5e (no bf16 VALU) or for closer numerics.
        key = jax.random.PRNGKey(seed)
        k_shared, k_feat = jax.random.split(key)
        self.n_pyramids = n_pyramids
        self.n_colors = n_colors
        self.n_feats = n_feats
        self.mxu_dtype = mxu_dtype
        self.act_dtype = act_dtype
        # round the first conv's input channels up to a packed-sublane multiple
        # so every store into the im2col scratch is sublane-aligned
        pack = max(1, 4 // jnp.dtype(mxu_dtype).itemsize)
        align = 8 * pack
        self.c_pad = -(-n_colors // align) * align
        self.sw, self.sb = init_masked_sequential(
            k_shared, self.c_pad, n_feats, n_feats, depth // 2,
            n_real_inputs=n_colors, w_dtype=mxu_dtype)
        n_feats_ex = n_pyramids * n_feats
        self.fw, self.fb = init_masked_sequential(
            k_feat, n_feats_ex, n_feats_ex, n_feats_ex, depth - depth // 2,
            w_dtype=mxu_dtype)

    def __call__(self, xs_nchw, mask_nchw, batch_tile=None):
        """xs_nchw: list of (B, C, H, W); mask_nchw: (1, 1, H, W).
        Returns (B, n_pyramids*n_feats, H, W)."""
        B, C, H, W = xs_nchw[0].shape
        HW = H * W
        P = self.n_pyramids
        n_out = P * self.n_feats
        bt = batch_tile if batch_tile is not None else _default_batch_tile(B)
        assert B % bt == 0, (B, bt)
        n_sh = P * bt * HW                          # shared-stack lane width
        n_ft = bt * HW                              # feature-stack lane width

        # (B//bt, C_pad, P*bt*HW): lane order (pyramid, batch-in-tile, hw)
        x = jnp.stack(xs_nchw, axis=0).reshape(P, B // bt, bt, C, HW)
        x = x.transpose(1, 3, 0, 2, 4).reshape(B // bt, C, n_sh)
        if self.c_pad > C:                          # one up-front channel pad
            x = jnp.pad(x, ((0, 0), (0, self.c_pad - C), (0, 0)))
        x = x.astype(self.act_dtype)

        # masks tiled once per lane-concatenated image (prevents roll leakage
        # across image seams: out-of-image taps are zeroed at the destination)
        mask_img = mask_nchw.reshape(1, HW).astype(jnp.float32)
        mask_sh = jnp.tile(mask_img, (1, P * bt))                   # (1, n_sh)
        taps_sh = jnp.asarray(np.tile(_make_tap_masks_np(H, W), (1, 1, P * bt)),
                              dtype=self.act_dtype)                 # (9,1,n_sh)

        n_shared = len(self.sw)
        n_feature = len(self.fw)

        kernel = functools.partial(
            _msfeature_kernel, n_pyramids=P, n_shared=n_shared,
            n_feature=n_feature, img_w=W, hw_image=HW, batch_tile=bt,
            act_dtype=self.act_dtype, mxu_dtype=self.mxu_dtype)

        def full(arr):                              # whole-array block
            nd = arr.ndim
            return pl.BlockSpec(arr.shape, lambda bi: (0,) * nd)

        in_specs = (
            [pl.BlockSpec((1, self.c_pad, n_sh), lambda bi: (bi, 0, 0))]
            + [full(w) for w in self.sw] + [full(b) for b in self.sb]
            + [full(w) for w in self.fw] + [full(b) for b in self.fb]
            + [full(mask_sh), full(taps_sh)])

        cin_sh_max = max(self.c_pad, self.n_feats)
        scratch_shapes = [
            pltpu.VMEM((9 * cin_sh_max, n_sh), self.mxu_dtype),   # shared patch
            pltpu.VMEM((9 * n_out, n_ft), self.mxu_dtype),        # feature patch
        ]

        # Footprint: ~2 MiB * bt (weights ~0.14 MiB bf16, patch scratches
        # ~0.45 MiB*bt, double-buffered I/O blocks ~0.2 MiB*bt) — well inside
        # the 32 MiB cap below on every generation (v5e/v6e: 128 MiB physical,
        # v7x: 64 MiB physical).
        out = pl.pallas_call(
            kernel,
            out_shape=jax.ShapeDtypeStruct((B // bt, n_out, n_ft), jnp.float32),
            grid=(B // bt,),
            in_specs=in_specs,
            out_specs=pl.BlockSpec((1, n_out, n_ft), lambda bi: (bi, 0, 0)),
            scratch_shapes=scratch_shapes,
            compiler_params=pltpu.CompilerParams(
                dimension_semantics=("parallel",),      # batch tiles -> v7x TCs
                vmem_limit_bytes=32 * 1024 * 1024),
        )(x, *self.sw, *self.sb, *self.fw, *self.fb, mask_sh, taps_sh)

        # (B//bt, n_out, bt*HW) lane order (bt, hw) -> (B, n_out, H, W)
        out = out.reshape(B // bt, n_out, bt, HW).transpose(0, 2, 1, 3)
        return out.reshape(B, n_out, H, W)


if __name__ == "__main__":
    B, C, H, W = 2, 3, 16, 16
    n_pyramids, n_feats, depth = 3, 16, 6

    key = jax.random.PRNGKey(0)
    keys = jax.random.split(key, n_pyramids + 1)
    xs = [jax.random.normal(keys[i], (B, C, H, W), jnp.float32)
          for i in range(n_pyramids)]
    mask = (jax.random.uniform(keys[-1], (1, 1, H, W)) < 0.7).astype(jnp.float32)

    model = MSFeaturePallas(n_pyramids=n_pyramids, n_colors=C,
                            n_feats=n_feats, depth=depth, seed=0)
    out = model(xs, mask)
    out = jax.block_until_ready(out)

    assert out.shape == (B, n_pyramids * n_feats, H, W), out.shape
    assert jnp.all(jnp.isfinite(out))
    print("KERNEL_OK")
</pallas_src>

<mosaic_0001>
module attributes {stable_mosaic.version = 11 : i64} {
  func.func @_msfeature_kernel(%arg0: i32, %arg1: memref<1x16x768xf32, #tpu.memory_space<vmem>>, %arg2: memref<16x144xbf16, #tpu.memory_space<vmem>>, %arg3: memref<16x144xbf16, #tpu.memory_space<vmem>>, %arg4: memref<16x144xbf16, #tpu.memory_space<vmem>>, %arg5: memref<16x1xf32, #tpu.memory_space<vmem>>, %arg6: memref<16x1xf32, #tpu.memory_space<vmem>>, %arg7: memref<16x1xf32, #tpu.memory_space<vmem>>, %arg8: memref<48x432xbf16, #tpu.memory_space<vmem>>, %arg9: memref<48x432xbf16, #tpu.memory_space<vmem>>, %arg10: memref<48x432xbf16, #tpu.memory_space<vmem>>, %arg11: memref<48x1xf32, #tpu.memory_space<vmem>>, %arg12: memref<48x1xf32, #tpu.memory_space<vmem>>, %arg13: memref<48x1xf32, #tpu.memory_space<vmem>>, %arg14: memref<1x768xf32, #tpu.memory_space<vmem>>, %arg15: memref<9x1x768xf32, #tpu.memory_space<vmem>>, %arg16: memref<1x48x256xf32, #tpu.memory_space<vmem>>, %arg17: memref<144x768xbf16, #tpu.memory_space<vmem>>, %arg18: memref<432x256xbf16, #tpu.memory_space<vmem>>) attributes {dimension_semantics = [#tpu.dimension_semantics<parallel>], iteration_bounds = array<i64: 2>, scalar_prefetch = 0 : i64, scratch_operands = 2 : i64, tpu.core_type = #tpu.core_type<tc>, window_params = [{transform_indices = @transform_0, window_bounds = array<i64: 1, 16, 768>}, {pipeline_mode = #tpu.pipeline_mode<synchronous>, transform_indices = @transform_1, window_bounds = array<i64: 16, 144>}, {pipeline_mode = #tpu.pipeline_mode<synchronous>, transform_indices = @transform_2, window_bounds = array<i64: 16, 144>}, {pipeline_mode = #tpu.pipeline_mode<synchronous>, transform_indices = @transform_3, window_bounds = array<i64: 16, 144>}, {pipeline_mode = #tpu.pipeline_mode<synchronous>, transform_indices = @transform_4, window_bounds = array<i64: 16, 1>}, {pipeline_mode = #tpu.pipeline_mode<synchronous>, transform_indices = @transform_5, window_bounds = array<i64: 16, 1>}, {pipeline_mode = #tpu.pipeline_mode<synchronous>, transform_indices = @transform_6, window_bounds = array<i64: 16, 1>}, {pipeline_mode = #tpu.pipeline_mode<synchronous>, transform_indices = @transform_7, window_bounds = array<i64: 48, 432>}, {pipeline_mode = #tpu.pipeline_mode<synchronous>, transform_indices = @transform_8, window_bounds = array<i64: 48, 432>}, {pipeline_mode = #tpu.pipeline_mode<synchronous>, transform_indices = @transform_9, window_bounds = array<i64: 48, 432>}, {pipeline_mode = #tpu.pipeline_mode<synchronous>, transform_indices = @transform_10, window_bounds = array<i64: 48, 1>}, {pipeline_mode = #tpu.pipeline_mode<synchronous>, transform_indices = @transform_11, window_bounds = array<i64: 48, 1>}, {pipeline_mode = #tpu.pipeline_mode<synchronous>, transform_indices = @transform_12, window_bounds = array<i64: 48, 1>}, {pipeline_mode = #tpu.pipeline_mode<synchronous>, transform_indices = @transform_13, window_bounds = array<i64: 1, 768>}, {pipeline_mode = #tpu.pipeline_mode<synchronous>, transform_indices = @transform_14, window_bounds = array<i64: 9, 1, 768>}, {transform_indices = @transform_15, window_bounds = array<i64: 1, 48, 256>}]} {
    %c0 = arith.constant 0 : index
    %c0_0 = arith.constant 0 : index
    %c0_1 = arith.constant 0 : index
    %0 = vector.load %arg15[%c0, %c0_0, %c0_1] : memref<9x1x768xf32, #tpu.memory_space<vmem>>, vector<9x1x768xf32>
    %c0_2 = arith.constant 0 : index
    %c0_3 = arith.constant 0 : index
    %1 = vector.load %arg14[%c0_2, %c0_3] : memref<1x768xf32, #tpu.memory_space<vmem>>, vector<1x768xf32>
    %2 = vector.extract_strided_slice %0 {offsets = [0, 0, 0], sizes = [9, 1, 256], strides = [1, 1, 1]} : vector<9x1x768xf32> to vector<9x1x256xf32>
    %3 = vector.extract_strided_slice %1 {offsets = [0, 0], sizes = [1, 256], strides = [1, 1]} : vector<1x768xf32> to vector<1x256xf32>
    %c0_4 = arith.constant 0 : index
    %c0_5 = arith.constant 0 : index
    %c0_6 = arith.constant 0 : index
    %4 = vector.load %arg1[%c0_4, %c0_5, %c0_6] : memref<1x16x768xf32, #tpu.memory_space<vmem>>, vector<1x16x768xf32>
    %5 = vector.shape_cast %4 : vector<1x16x768xf32> to vector<16x768xf32>
    %c17_i32 = arith.constant 17 : i32
    %6 = tpu.dynamic_rotate %5 by %c17_i32 dim 1 : vector<16x768xf32>, i32 -> vector<16x768xf32>
    %7 = vector.extract_strided_slice %0 {offsets = [0, 0, 0], sizes = [1, 1, 768], strides = [1, 1, 1]} : vector<9x1x768xf32> to vector<1x1x768xf32>
    %8 = vector.shape_cast %7 : vector<1x1x768xf32> to vector<1x768xf32>
    %9 = vector.broadcast %8 : vector<1x768xf32> to vector<16x768xf32>
    %10 = arith.mulf %6, %9 : vector<16x768xf32>
    %11 = arith.truncf %10 : vector<16x768xf32> to vector<16x768xbf16>
    %c0_7 = arith.constant 0 : index
    %c0_8 = arith.constant 0 : index
    %12 = vector.load %arg17[%c0_7, %c0_8] : memref<144x768xbf16, #tpu.memory_space<vmem>>, vector<16x768xbf16>
    tpu.vector_store %arg17[%c0_7, %c0_8], %11 {strides = array<i32>} : memref<144x768xbf16, #tpu.memory_space<vmem>>, vector<16x768xbf16>,
    %c16_i32 = arith.constant 16 : i32
    %13 = tpu.dynamic_rotate %5 by %c16_i32 dim 1 : vector<16x768xf32>, i32 -> vector<16x768xf32>
    %14 = vector.extract_strided_slice %0 {offsets = [1, 0, 0], sizes = [1, 1, 768], strides = [1, 1, 1]} : vector<9x1x768xf32> to vector<1x1x768xf32>
    %15 = vector.shape_cast %14 : vector<1x1x768xf32> to vector<1x768xf32>
    %16 = vector.broadcast %15 : vector<1x768xf32> to vector<16x768xf32>
    %17 = arith.mulf %13, %16 : vector<16x768xf32>
    %18 = arith.truncf %17 : vector<16x768xf32> to vector<16x768xbf16>
    %c16 = arith.constant 16 : index
    %c0_9 = arith.constant 0 : index
    %19 = vector.load %arg17[%c16, %c0_9] : memref<144x768xbf16, #tpu.memory_space<vmem>>, vector<16x768xbf16>
    tpu.vector_store %arg17[%c16, %c0_9], %18 {strides = array<i32>} : memref<144x768xbf16, #tpu.memory_space<vmem>>, vector<16x768xbf16>,
    %c15_i32 = arith.constant 15 : i32
    %20 = tpu.dynamic_rotate %5 by %c15_i32 dim 1 : vector<16x768xf32>, i32 -> vector<16x768xf32>
    %21 = vector.extract_strided_slice %0 {offsets = [2, 0, 0], sizes = [1, 1, 768], strides = [1, 1, 1]} : vector<9x1x768xf32> to vector<1x1x768xf32>
    %22 = vector.shape_cast %21 : vector<1x1x768xf32> to vector<1x768xf32>
    %23 = vector.broadcast %22 : vector<1x768xf32> to vector<16x768xf32>
    %24 = arith.mulf %20, %23 : vector<16x768xf32>
    %25 = arith.truncf %24 : vector<16x768xf32> to vector<16x768xbf16>
    %c32 = arith.constant 32 : index
    %c0_10 = arith.constant 0 : index
    %26 = vector.load %arg17[%c32, %c0_10] : memref<144x768xbf16, #tpu.memory_space<vmem>>, vector<16x768xbf16>
    tpu.vector_store %arg17[%c32, %c0_10], %25 {strides = array<i32>} : memref<144x768xbf16, #tpu.memory_space<vmem>>, vector<16x768xbf16>,
    %c1_i32 = arith.constant 1 : i32
    %27 = tpu.dynamic_rotate %5 by %c1_i32 dim 1 : vector<16x768xf32>, i32 -> vector<16x768xf32>
    %28 = vector.extract_strided_slice %0 {offsets = [3, 0, 0], sizes = [1, 1, 768], strides = [1, 1, 1]} : vector<9x1x768xf32> to vector<1x1x768xf32>
    %29 = vector.shape_cast %28 : vector<1x1x768xf32> to vector<1x768xf32>
    %30 = vector.broadcast %29 : vector<1x768xf32> to vector<16x768xf32>
    %31 = arith.mulf %27, %30 : vector<16x768xf32>
    %32 = arith.truncf %31 : vector<16x768xf32> to vector<16x768xbf16>
    %c48 = arith.constant 48 : index
    %c0_11 = arith.constant 0 : index
    %33 = vector.load %arg17[%c48, %c0_11] : memref<144x768xbf16, #tpu.memory_space<vmem>>, vector<16x768xbf16>
    tpu.vector_store %arg17[%c48, %c0_11], %32 {strides = array<i32>} : memref<144x768xbf16, #tpu.memory_space<vmem>>, vector<16x768xbf16>,
    %34 = arith.truncf %5 : vector<16x768xf32> to vector<16x768xbf16>
    %c64 = arith.constant 64 : index
    %c0_12 = arith.constant 0 : index
    %35 = vector.load %arg17[%c64, %c0_12] : memref<144x768xbf16, #tpu.memory_space<vmem>>, vector<16x768xbf16>
    tpu.vector_store %arg17[%c64, %c0_12], %34 {strides = array<i32>} : memref<144x768xbf16, #tpu.memory_space<vmem>>, vector<16x768xbf16>,
    %c767_i32 = arith.constant 767 : i32
    %36 = tpu.dynamic_rotate %5 by %c767_i32 dim 1 : vector<16x768xf32>, i32 -> vector<16x768xf32>
    %37 = vector.extract_strided_slice %0 {offsets = [5, 0, 0], sizes = [1, 1, 768], strides = [1, 1, 1]} : vector<9x1x768xf32> to vector<1x1x768xf32>
    %38 = vector.shape_cast %37 : vector<1x1x768xf32> to vector<1x768xf32>
    %39 = vector.broadcast %38 : vector<1x768xf32> to vector<16x768xf32>
    %40 = arith.mulf %36, %39 : vector<16x768xf32>
    %41 = arith.truncf %40 : vector<16x768xf32> to vector<16x768xbf16>
    %c80 = arith.constant 80 : index
    %c0_13 = arith.constant 0 : index
    %42 = vector.load %arg17[%c80, %c0_13] : memref<144x768xbf16, #tpu.memory_space<vmem>>, vector<16x768xbf16>
    tpu.vector_store %arg17[%c80, %c0_13], %41 {strides = array<i32>} : memref<144x768xbf16, #tpu.memory_space<vmem>>, vector<16x768xbf16>,
    %c753_i32 = arith.constant 753 : i32
    %43 = tpu.dynamic_rotate %5 by %c753_i32 dim 1 : vector<16x768xf32>, i32 -> vector<16x768xf32>
    %44 = vector.extract_strided_slice %0 {offsets = [6, 0, 0], sizes = [1, 1, 768], strides = [1, 1, 1]} : vector<9x1x768xf32> to vector<1x1x768xf32>
    %45 = vector.shape_cast %44 : vector<1x1x768xf32> to vector<1x768xf32>
    %46 = vector.broadcast %45 : vector<1x768xf32> to vector<16x768xf32>
    %47 = arith.mulf %43, %46 : vector<16x768xf32>
    %48 = arith.truncf %47 : vector<16x768xf32> to vector<16x768xbf16>
    %c96 = arith.constant 96 : index
    %c0_14 = arith.constant 0 : index
    %49 = vector.load %arg17[%c96, %c0_14] : memref<144x768xbf16, #tpu.memory_space<vmem>>, vector<16x768xbf16>
    tpu.vector_store %arg17[%c96, %c0_14], %48 {strides = array<i32>} : memref<144x768xbf16, #tpu.memory_space<vmem>>, vector<16x768xbf16>,
    %c752_i32 = arith.constant 752 : i32
    %50 = tpu.dynamic_rotate %5 by %c752_i32 dim 1 : vector<16x768xf32>, i32 -> vector<16x768xf32>
    %51 = vector.extract_strided_slice %0 {offsets = [7, 0, 0], sizes = [1, 1, 768], strides = [1, 1, 1]} : vector<9x1x768xf32> to vector<1x1x768xf32>
    %52 = vector.shape_cast %51 : vector<1x1x768xf32> to vector<1x768xf32>
    %53 = vector.broadcast %52 : vector<1x768xf32> to vector<16x768xf32>
    %54 = arith.mulf %50, %53 : vector<16x768xf32>
    %55 = arith.truncf %54 : vector<16x768xf32> to vector<16x768xbf16>
    %c112 = arith.constant 112 : index
    %c0_15 = arith.constant 0 : index
    %56 = vector.load %arg17[%c112, %c0_15] : memref<144x768xbf16, #tpu.memory_space<vmem>>, vector<16x768xbf16>
    tpu.vector_store %arg17[%c112, %c0_15], %55 {strides = array<i32>} : memref<144x768xbf16, #tpu.memory_space<vmem>>, vector<16x768xbf16>,
    %c751_i32 = arith.constant 751 : i32
    %57 = tpu.dynamic_rotate %5 by %c751_i32 dim 1 : vector<16x768xf32>, i32 -> vector<16x768xf32>
    %58 = vector.extract_strided_slice %0 {offsets = [8, 0, 0], sizes = [1, 1, 768], strides = [1, 1, 1]} : vector<9x1x768xf32> to vector<1x1x768xf32>
    %59 = vector.shape_cast %58 : vector<1x1x768xf32> to vector<1x768xf32>
    %60 = vector.broadcast %59 : vector<1x768xf32> to vector<16x768xf32>
    %61 = arith.mulf %57, %60 : vector<16x768xf32>
    %62 = arith.truncf %61 : vector<16x768xf32> to vector<16x768xbf16>
    %c128 = arith.constant 128 : index
    %c0_16 = arith.constant 0 : index
    %63 = vector.load %arg17[%c128, %c0_16] : memref<144x768xbf16, #tpu.memory_space<vmem>>, vector<16x768xbf16>
    tpu.vector_store %arg17[%c128, %c0_16], %62 {strides = array<i32>} : memref<144x768xbf16, #tpu.memory_space<vmem>>, vector<16x768xbf16>,
    %c0_17 = arith.constant 0 : index
    %c0_18 = arith.constant 0 : index
    %64 = vector.load %arg2[%c0_17, %c0_18] : memref<16x144xbf16, #tpu.memory_space<vmem>>, vector<16x144xbf16>
    %c0_19 = arith.constant 0 : index
    %c0_20 = arith.constant 0 : index
    %65 = vector.load %arg17[%c0_19, %c0_20] : memref<144x768xbf16, #tpu.memory_space<vmem>>, vector<144x768xbf16>
    %cst = arith.constant dense<0.000000e+00> : vector<16x768xf32>
    %66 = tpu.matmul %64, %65, %cst {dimension_numbers = #tpu.dot_dimension_numbers<[1], [0], [0], [1], [0, 0, 1, 1], [], []>} : vector<16x144xbf16>, vector<144x768xbf16>, vector<16x768xf32> -> vector<16x768xf32>
    %c0_21 = arith.constant 0 : index
    %c0_22 = arith.constant 0 : index
    %67 = vector.load %arg5[%c0_21, %c0_22] : memref<16x1xf32, #tpu.memory_space<vmem>>, vector<16x1xf32>
    %68 = vector.broadcast %67 : vector<16x1xf32> to vector<16x768xf32>
    %69 = arith.addf %66, %68 : vector<16x768xf32>
    %cst_23 = arith.constant 0.000000e+00 : f32
    %70 = vector.broadcast %cst_23 : f32 to vector<16x768xf32>
    %71 = arith.maximumf %69, %70 : vector<16x768xf32>
    %72 = vector.broadcast %1 : vector<1x768xf32> to vector<16x768xf32>
    %73 = arith.mulf %71, %72 : vector<16x768xf32>
    %c17_i32_24 = arith.constant 17 : i32
    %74 = tpu.dynamic_rotate %73 by %c17_i32_24 dim 1 : vector<16x768xf32>, i32 -> vector<16x768xf32>
    %75 = vector.extract_strided_slice %0 {offsets = [0, 0, 0], sizes = [1, 1, 768], strides = [1, 1, 1]} : vector<9x1x768xf32> to vector<1x1x768xf32>
    %76 = vector.shape_cast %75 : vector<1x1x768xf32> to vector<1x768xf32>
    %77 = vector.broadcast %76 : vector<1x768xf32> to vector<16x768xf32>
    %78 = arith.mulf %74, %77 : vector<16x768xf32>
    %79 = arith.truncf %78 : vector<16x768xf32> to vector<16x768xbf16>
    %c0_25 = arith.constant 0 : index
    %c0_26 = arith.constant 0 : index
    %80 = vector.load %arg17[%c0_25, %c0_26] : memref<144x768xbf16, #tpu.memory_space<vmem>>, vector<16x768xbf16>
    tpu.vector_store %arg17[%c0_25, %c0_26], %79 {strides = array<i32>} : memref<144x768xbf16, #tpu.memory_space<vmem>>, vector<16x768xbf16>,
    %c16_i32_27 = arith.constant 16 : i32
    %81 = tpu.dynamic_rotate %73 by %c16_i32_27 dim 1 : vector<16x768xf32>, i32 -> vector<16x768xf32>
    %82 = vector.extract_strided_slice %0 {offsets = [1, 0, 0], sizes = [1, 1, 768], strides = [1, 1, 1]} : vector<9x1x768xf32> to vector<1x1x768xf32>
    %83 = vector.shape_cast %82 : vector<1x1x768xf32> to vector<1x768xf32>
    %84 = vector.broadcast %83 : vector<1x768xf32> to vector<16x768xf32>
    %85 = arith.mulf %81, %84 : vector<16x768xf32>
    %86 = arith.truncf %85 : vector<16x768xf32> to vector<16x768xbf16>
    %c16_28 = arith.constant 16 : index
    %c0_29 = arith.constant 0 : index
    %87 = vector.load %arg17[%c16_28, %c0_29] : memref<144x768xbf16, #tpu.memory_space<vmem>>, vector<16x768xbf16>
    tpu.vector_store %arg17[%c16_28, %c0_29], %86 {strides = array<i32>} : memref<144x768xbf16, #tpu.memory_space<vmem>>, vector<16x768xbf16>,
    %c15_i32_30 = arith.constant 15 : i32
    %88 = tpu.dynamic_rotate %73 by %c15_i32_30 dim 1 : vector<16x768xf32>, i32 -> vector<16x768xf32>
    %89 = vector.extract_strided_slice %0 {offsets = [2, 0, 0], sizes = [1, 1, 768], strides = [1, 1, 1]} : vector<9x1x768xf32> to vector<1x1x768xf32>
    %90 = vector.shape_cast %89 : vector<1x1x768xf32> to vector<1x768xf32>
    %91 = vector.broadcast %90 : vector<1x768xf32> to vector<16x768xf32>
    %92 = arith.mulf %88, %91 : vector<16x768xf32>
    %93 = arith.truncf %92 : vector<16x768xf32> to vector<16x768xbf16>
    %c32_31 = arith.constant 32 : index
    %c0_32 = arith.constant 0 : index
    %94 = vector.load %arg17[%c32_31, %c0_32] : memref<144x768xbf16, #tpu.memory_space<vmem>>, vector<16x768xbf16>
    tpu.vector_store %arg17[%c32_31, %c0_32], %93 {strides = array<i32>} : memref<144x768xbf16, #tpu.memory_space<vmem>>, vector<16x768xbf16>,
    %c1_i32_33 = arith.constant 1 : i32
    %95 = tpu.dynamic_rotate %73 by %c1_i32_33 dim 1 : vector<16x768xf32>, i32 -> vector<16x768xf32>
    %96 = vector.extract_strided_slice %0 {offsets = [3, 0, 0], sizes = [1, 1, 768], strides = [1, 1, 1]} : vector<9x1x768xf32> to vector<1x1x768xf32>
    %97 = vector.shape_cast %96 : vector<1x1x768xf32> to vector<1x768xf32>
    %98 = vector.broadcast %97 : vector<1x768xf32> to vector<16x768xf32>
    %99 = arith.mulf %95, %98 : vector<16x768xf32>
    %100 = arith.truncf %99 : vector<16x768xf32> to vector<16x768xbf16>
    %c48_34 = arith.constant 48 : index
    %c0_35 = arith.constant 0 : index
    %101 = vector.load %arg17[%c48_34, %c0_35] : memref<144x768xbf16, #tpu.memory_space<vmem>>, vector<16x768xbf16>
    tpu.vector_store %arg17[%c48_34, %c0_35], %100 {strides = array<i32>} : memref<144x768xbf16, #tpu.memory_space<vmem>>, vector<16x768xbf16>,
    %102 = arith.truncf %73 : vector<16x768xf32> to vector<16x768xbf16>
    %c64_36 = arith.constant 64 : index
    %c0_37 = arith.constant 0 : index
    %103 = vector.load %arg17[%c64_36, %c0_37] : memref<144x768xbf16, #tpu.memory_space<vmem>>, vector<16x768xbf16>
    tpu.vector_store %arg17[%c64_36, %c0_37], %102 {strides = array<i32>} : memref<144x768xbf16, #tpu.memory_space<vmem>>, vector<16x768xbf16>,
    %c767_i32_38 = arith.constant 767 : i32
    %104 = tpu.dynamic_rotate %73 by %c767_i32_38 dim 1 : vector<16x768xf32>, i32 -> vector<16x768xf32>
    %105 = vector.extract_strided_slice %0 {offsets = [5, 0, 0], sizes = [1, 1, 768], strides = [1, 1, 1]} : vector<9x1x768xf32> to vector<1x1x768xf32>
    %106 = vector.shape_cast %105 : vector<1x1x768xf32> to vector<1x768xf32>
    %107 = vector.broadcast %106 : vector<1x768xf32> to vector<16x768xf32>
    %108 = arith.mulf %104, %107 : vector<16x768xf32>
    %109 = arith.truncf %108 : vector<16x768xf32> to vector<16x768xbf16>
    %c80_39 = arith.constant 80 : index
    %c0_40 = arith.constant 0 : index
    %110 = vector.load %arg17[%c80_39, %c0_40] : memref<144x768xbf16, #tpu.memory_space<vmem>>, vector<16x768xbf16>
    tpu.vector_store %arg17[%c80_39, %c0_40], %109 {strides = array<i32>} : memref<144x768xbf16, #tpu.memory_space<vmem>>, vector<16x768xbf16>,
    %c753_i32_41 = arith.constant 753 : i32
    %111 = tpu.dynamic_rotate %73 by %c753_i32_41 dim 1 : vector<16x768xf32>, i32 -> vector<16x768xf32>
    %112 = vector.extract_strided_slice %0 {offsets = [6, 0, 0], sizes = [1, 1, 768], strides = [1, 1, 1]} : vector<9x1x768xf32> to vector<1x1x768xf32>
    %113 = vector.shape_cast %112 : vector<1x1x768xf32> to vector<1x768xf32>
    %114 = vector.broadcast %113 : vector<1x768xf32> to vector<16x768xf32>
    %115 = arith.mulf %111, %114 : vector<16x768xf32>
    %116 = arith.truncf %115 : vector<16x768xf32> to vector<16x768xbf16>
    %c96_42 = arith.constant 96 : index
    %c0_43 = arith.constant 0 : index
    %117 = vector.load %arg17[%c96_42, %c0_43] : memref<144x768xbf16, #tpu.memory_space<vmem>>, vector<16x768xbf16>
    tpu.vector_store %arg17[%c96_42, %c0_43], %116 {strides = array<i32>} : memref<144x768xbf16, #tpu.memory_space<vmem>>, vector<16x768xbf16>,
    %c752_i32_44 = arith.constant 752 : i32
    %118 = tpu.dynamic_rotate %73 by %c752_i32_44 dim 1 : vector<16x768xf32>, i32 -> vector<16x768xf32>
    %119 = vector.extract_strided_slice %0 {offsets = [7, 0, 0], sizes = [1, 1, 768], strides = [1, 1, 1]} : vector<9x1x768xf32> to vector<1x1x768xf32>
    %120 = vector.shape_cast %119 : vector<1x1x768xf32> to vector<1x768xf32>
    %121 = vector.broadcast %120 : vector<1x768xf32> to vector<16x768xf32>
    %122 = arith.mulf %118, %121 : vector<16x768xf32>
    %123 = arith.truncf %122 : vector<16x768xf32> to vector<16x768xbf16>
    %c112_45 = arith.constant 112 : index
    %c0_46 = arith.constant 0 : index
    %124 = vector.load %arg17[%c112_45, %c0_46] : memref<144x768xbf16, #tpu.memory_space<vmem>>, vector<16x768xbf16>
    tpu.vector_store %arg17[%c112_45, %c0_46], %123 {strides = array<i32>} : memref<144x768xbf16, #tpu.memory_space<vmem>>, vector<16x768xbf16>,
    %c751_i32_47 = arith.constant 751 : i32
    %125 = tpu.dynamic_rotate %73 by %c751_i32_47 dim 1 : vector<16x768xf32>, i32 -> vector<16x768xf32>
    %126 = vector.extract_strided_slice %0 {offsets = [8, 0, 0], sizes = [1, 1, 768], strides = [1, 1, 1]} : vector<9x1x768xf32> to vector<1x1x768xf32>
    %127 = vector.shape_cast %126 : vector<1x1x768xf32> to vector<1x768xf32>
    %128 = vector.broadcast %127 : vector<1x768xf32> to vector<16x768xf32>
    %129 = arith.mulf %125, %128 : vector<16x768xf32>
    %130 = arith.truncf %129 : vector<16x768xf32> to vector<16x768xbf16>
    %c128_48 = arith.constant 128 : index
    %c0_49 = arith.constant 0 : index
    %131 = vector.load %arg17[%c128_48, %c0_49] : memref<144x768xbf16, #tpu.memory_space<vmem>>, vector<16x768xbf16>
    tpu.vector_store %arg17[%c128_48, %c0_49], %130 {strides = array<i32>} : memref<144x768xbf16, #tpu.memory_space<vmem>>, vector<16x768xbf16>,
    %c0_50 = arith.constant 0 : index
    %c0_51 = arith.constant 0 : index
    %132 = vector.load %arg3[%c0_50, %c0_51] : memref<16x144xbf16, #tpu.memory_space<vmem>>, vector<16x144xbf16>
    %c0_52 = arith.constant 0 : index
    %c0_53 = arith.constant 0 : index
    %133 = vector.load %arg17[%c0_52, %c0_53] : memref<144x768xbf16, #tpu.memory_space<vmem>>, vector<144x768xbf16>
    %cst_54 = arith.constant dense<0.000000e+00> : vector<16x768xf32>
    %134 = tpu.matmul %132, %133, %cst_54 {dimension_numbers = #tpu.dot_dimension_numbers<[1], [0], [0], [1], [0, 0, 1, 1], [], []>} : vector<16x144xbf16>, vector<144x768xbf16>, vector<16x768xf32> -> vector<16x768xf32>
    %c0_55 = arith.constant 0 : index
    %c0_56 = arith.constant 0 : index
    %135 = vector.load %arg6[%c0_55, %c0_56] : memref<16x1xf32, #tpu.memory_space<vmem>>, vector<16x1xf32>
    %136 = vector.broadcast %135 : vector<16x1xf32> to vector<16x768xf32>
    %137 = arith.addf %134, %136 : vector<16x768xf32>
    %cst_57 = arith.constant 0.000000e+00 : f32
    %138 = vector.broadcast %cst_57 : f32 to vector<16x768xf32>
    %139 = arith.maximumf %137, %138 : vector<16x768xf32>
    %140 = vector.broadcast %1 : vector<1x768xf32> to vector<16x768xf32>
    %141 = arith.mulf %139, %140 : vector<16x768xf32>
    %c17_i32_58 = arith.constant 17 : i32
    %142 = tpu.dynamic_rotate %141 by %c17_i32_58 dim 1 : vector<16x768xf32>, i32 -> vector<16x768xf32>
    %143 = vector.extract_strided_slice %0 {offsets = [0, 0, 0], sizes = [1, 1, 768], strides = [1, 1, 1]} : vector<9x1x768xf32> to vector<1x1x768xf32>
    %144 = vector.shape_cast %143 : vector<1x1x768xf32> to vector<1x768xf32>
    %145 = vector.broadcast %144 : vector<1x768xf32> to vector<16x768xf32>
    %146 = arith.mulf %142, %145 : vector<16x768xf32>
    %147 = arith.truncf %146 : vector<16x768xf32> to vector<16x768xbf16>
    %c0_59 = arith.constant 0 : index
    %c0_60 = arith.constant 0 : index
    %148 = vector.load %arg17[%c0_59, %c0_60] : memref<144x768xbf16, #tpu.memory_space<vmem>>, vector<16x768xbf16>
    tpu.vector_store %arg17[%c0_59, %c0_60], %147 {strides = array<i32>} : memref<144x768xbf16, #tpu.memory_space<vmem>>, vector<16x768xbf16>,
    %c16_i32_61 = arith.constant 16 : i32
    %149 = tpu.dynamic_rotate %141 by %c16_i32_61 dim 1 : vector<16x768xf32>, i32 -> vector<16x768xf32>
    %150 = vector.extract_strided_slice %0 {offsets = [1, 0, 0], sizes = [1, 1, 768], strides = [1, 1, 1]} : vector<9x1x768xf32> to vector<1x1x768xf32>
    %151 = vector.shape_cast %150 : vector<1x1x768xf32> to vector<1x768xf32>
    %152 = vector.broadcast %151 : vector<1x768xf32> to vector<16x768xf32>
    %153 = arith.mulf %149, %152 : vector<16x768xf32>
    %154 = arith.truncf %153 : vector<16x768xf32> to vector<16x768xbf16>
    %c16_62 = arith.constant 16 : index
    %c0_63 = arith.constant 0 : index
    %155 = vector.load %arg17[%c16_62, %c0_63] : memref<144x768xbf16, #tpu.memory_space<vmem>>, vector<16x768xbf16>
    tpu.vector_store %arg17[%c16_62, %c0_63], %154 {strides = array<i32>} : memref<144x768xbf16, #tpu.memory_space<vmem>>, vector<16x768xbf16>,
    %c15_i32_64 = arith.constant 15 : i32
    %156 = tpu.dynamic_rotate %141 by %c15_i32_64 dim 1 : vector<16x768xf32>, i32 -> vector<16x768xf32>
    %157 = vector.extract_strided_slice %0 {offsets = [2, 0, 0], sizes = [1, 1, 768], strides = [1, 1, 1]} : vector<9x1x768xf32> to vector<1x1x768xf32>
    %158 = vector.shape_cast %157 : vector<1x1x768xf32> to vector<1x768xf32>
    %159 = vector.broadcast %158 : vector<1x768xf32> to vector<16x768xf32>
    %160 = arith.mulf %156, %159 : vector<16x768xf32>
    %161 = arith.truncf %160 : vector<16x768xf32> to vector<16x768xbf16>
    %c32_65 = arith.constant 32 : index
    %c0_66 = arith.constant 0 : index
    %162 = vector.load %arg17[%c32_65, %c0_66] : memref<144x768xbf16, #tpu.memory_space<vmem>>, vector<16x768xbf16>
    tpu.vector_store %arg17[%c32_65, %c0_66], %161 {strides = array<i32>} : memref<144x768xbf16, #tpu.memory_space<vmem>>, vector<16x768xbf16>,
    %c1_i32_67 = arith.constant 1 : i32
    %163 = tpu.dynamic_rotate %141 by %c1_i32_67 dim 1 : vector<16x768xf32>, i32 -> vector<16x768xf32>
    %164 = vector.extract_strided_slice %0 {offsets = [3, 0, 0], sizes = [1, 1, 768], strides = [1, 1, 1]} : vector<9x1x768xf32> to vector<1x1x768xf32>
    %165 = vector.shape_cast %164 : vector<1x1x768xf32> to vector<1x768xf32>
    %166 = vector.broadcast %165 : vector<1x768xf32> to vector<16x768xf32>
    %167 = arith.mulf %163, %166 : vector<16x768xf32>
    %168 = arith.truncf %167 : vector<16x768xf32> to vector<16x768xbf16>
    %c48_68 = arith.constant 48 : index
    %c0_69 = arith.constant 0 : index
    %169 = vector.load %arg17[%c48_68, %c0_69] : memref<144x768xbf16, #tpu.memory_space<vmem>>, vector<16x768xbf16>
    tpu.vector_store %arg17[%c48_68, %c0_69], %168 {strides = array<i32>} : memref<144x768xbf16, #tpu.memory_space<vmem>>, vector<16x768xbf16>,
    %170 = arith.truncf %141 : vector<16x768xf32> to vector<16x768xbf16>
    %c64_70 = arith.constant 64 : index
    %c0_71 = arith.constant 0 : index
    %171 = vector.load %arg17[%c64_70, %c0_71] : memref<144x768xbf16, #tpu.memory_space<vmem>>, vector<16x768xbf16>
    tpu.vector_store %arg17[%c64_70, %c0_71], %170 {strides = array<i32>} : memref<144x768xbf16, #tpu.memory_space<vmem>>, vector<16x768xbf16>,
    %c767_i32_72 = arith.constant 767 : i32
    %172 = tpu.dynamic_rotate %141 by %c767_i32_72 dim 1 : vector<16x768xf32>, i32 -> vector<16x768xf32>
    %173 = vector.extract_strided_slice %0 {offsets = [5, 0, 0], sizes = [1, 1, 768], strides = [1, 1, 1]} : vector<9x1x768xf32> to vector<1x1x768xf32>
    %174 = vector.shape_cast %173 : vector<1x1x768xf32> to vector<1x768xf32>
    %175 = vector.broadcast %174 : vector<1x768xf32> to vector<16x768xf32>
    %176 = arith.mulf %172, %175 : vector<16x768xf32>
    %177 = arith.truncf %176 : vector<16x768xf32> to vector<16x768xbf16>
    %c80_73 = arith.constant 80 : index
    %c0_74 = arith.constant 0 : index
    %178 = vector.load %arg17[%c80_73, %c0_74] : memref<144x768xbf16, #tpu.memory_space<vmem>>, vector<16x768xbf16>
    tpu.vector_store %arg17[%c80_73, %c0_74], %177 {strides = array<i32>} : memref<144x768xbf16, #tpu.memory_space<vmem>>, vector<16x768xbf16>,
    %c753_i32_75 = arith.constant 753 : i32
    %179 = tpu.dynamic_rotate %141 by %c753_i32_75 dim 1 : vector<16x768xf32>, i32 -> vector<16x768xf32>
    %180 = vector.extract_strided_slice %0 {offsets = [6, 0, 0], sizes = [1, 1, 768], strides = [1, 1, 1]} : vector<9x1x768xf32> to vector<1x1x768xf32>
    %181 = vector.shape_cast %180 : vector<1x1x768xf32> to vector<1x768xf32>
    %182 = vector.broadcast %181 : vector<1x768xf32> to vector<16x768xf32>
    %183 = arith.mulf %179, %182 : vector<16x768xf32>
    %184 = arith.truncf %183 : vector<16x768xf32> to vector<16x768xbf16>
    %c96_76 = arith.constant 96 : index
    %c0_77 = arith.constant 0 : index
    %185 = vector.load %arg17[%c96_76, %c0_77] : memref<144x768xbf16, #tpu.memory_space<vmem>>, vector<16x768xbf16>
    tpu.vector_store %arg17[%c96_76, %c0_77], %184 {strides = array<i32>} : memref<144x768xbf16, #tpu.memory_space<vmem>>, vector<16x768xbf16>,
    %c752_i32_78 = arith.constant 752 : i32
    %186 = tpu.dynamic_rotate %141 by %c752_i32_78 dim 1 : vector<16x768xf32>, i32 -> vector<16x768xf32>
    %187 = vector.extract_strided_slice %0 {offsets = [7, 0, 0], sizes = [1, 1, 768], strides = [1, 1, 1]} : vector<9x1x768xf32> to vector<1x1x768xf32>
    %188 = vector.shape_cast %187 : vector<1x1x768xf32> to vector<1x768xf32>
    %189 = vector.broadcast %188 : vector<1x768xf32> to vector<16x768xf32>
    %190 = arith.mulf %186, %189 : vector<16x768xf32>
    %191 = arith.truncf %190 : vector<16x768xf32> to vector<16x768xbf16>
    %c112_79 = arith.constant 112 : index
    %c0_80 = arith.constant 0 : index
    %192 = vector.load %arg17[%c112_79, %c0_80] : memref<144x768xbf16, #tpu.memory_space<vmem>>, vector<16x768xbf16>
    tpu.vector_store %arg17[%c112_79, %c0_80], %191 {strides = array<i32>} : memref<144x768xbf16, #tpu.memory_space<vmem>>, vector<16x768xbf16>,
    %c751_i32_81 = arith.constant 751 : i32
    %193 = tpu.dynamic_rotate %141 by %c751_i32_81 dim 1 : vector<16x768xf32>, i32 -> vector<16x768xf32>
    %194 = vector.extract_strided_slice %0 {offsets = [8, 0, 0], sizes = [1, 1, 768], strides = [1, 1, 1]} : vector<9x1x768xf32> to vector<1x1x768xf32>
    %195 = vector.shape_cast %194 : vector<1x1x768xf32> to vector<1x768xf32>
    %196 = vector.broadcast %195 : vector<1x768xf32> to vector<16x768xf32>
    %197 = arith.mulf %193, %196 : vector<16x768xf32>
    %198 = arith.truncf %197 : vector<16x768xf32> to vector<16x768xbf16>
    %c128_82 = arith.constant 128 : index
    %c0_83 = arith.constant 0 : index
    %199 = vector.load %arg17[%c128_82, %c0_83] : memref<144x768xbf16, #tpu.memory_space<vmem>>, vector<16x768xbf16>
    tpu.vector_store %arg17[%c128_82, %c0_83], %198 {strides = array<i32>} : memref<144x768xbf16, #tpu.memory_space<vmem>>, vector<16x768xbf16>,
    %c0_84 = arith.constant 0 : index
    %c0_85 = arith.constant 0 : index
    %200 = vector.load %arg4[%c0_84, %c0_85] : memref<16x144xbf16, #tpu.memory_space<vmem>>, vector<16x144xbf16>
    %c0_86 = arith.constant 0 : index
    %c0_87 = arith.constant 0 : index
    %201 = vector.load %arg17[%c0_86, %c0_87] : memref<144x768xbf16, #tpu.memory_space<vmem>>, vector<144x768xbf16>
    %cst_88 = arith.constant dense<0.000000e+00> : vector<16x768xf32>
    %202 = tpu.matmul %200, %201, %cst_88 {dimension_numbers = #tpu.dot_dimension_numbers<[1], [0], [0], [1], [0, 0, 1, 1], [], []>} : vector<16x144xbf16>, vector<144x768xbf16>, vector<16x768xf32> -> vector<16x768xf32>
    %c0_89 = arith.constant 0 : index
    %c0_90 = arith.constant 0 : index
    %203 = vector.load %arg7[%c0_89, %c0_90] : memref<16x1xf32, #tpu.memory_space<vmem>>, vector<16x1xf32>
    %204 = vector.broadcast %203 : vector<16x1xf32> to vector<16x768xf32>
    %205 = arith.addf %202, %204 : vector<16x768xf32>
    %206 = vector.broadcast %1 : vector<1x768xf32> to vector<16x768xf32>
    %207 = arith.mulf %205, %206 : vector<16x768xf32>
    %208 = vector.extract_strided_slice %207 {offsets = [0, 0], sizes = [16, 256], strides = [1, 1]} : vector<16x768xf32> to vector<16x256xf32>
    %209 = vector.extract_strided_slice %207 {offsets = [0, 256], sizes = [16, 256], strides = [1, 1]} : vector<16x768xf32> to vector<16x256xf32>
    %210 = vector.extract_strided_slice %207 {offsets = [0, 512], sizes = [16, 256], strides = [1, 1]} : vector<16x768xf32> to vector<16x256xf32>
    %211 = tpu.concatenate %208, %209, %210 in 0 : vector<16x256xf32>, vector<16x256xf32>, vector<16x256xf32> -> vector<48x256xf32>
    %c17_i32_91 = arith.constant 17 : i32
    %212 = tpu.dynamic_rotate %211 by %c17_i32_91 dim 1 : vector<48x256xf32>, i32 -> vector<48x256xf32>
    %213 = vector.extract_strided_slice %2 {offsets = [0, 0, 0], sizes = [1, 1, 256], strides = [1, 1, 1]} : vector<9x1x256xf32> to vector<1x1x256xf32>
    %214 = vector.shape_cast %213 : vector<1x1x256xf32> to vector<1x256xf32>
    %215 = vector.broadcast %214 : vector<1x256xf32> to vector<48x256xf32>
    %216 = arith.mulf %212, %215 : vector<48x256xf32>
    %217 = arith.truncf %216 : vector<48x256xf32> to vector<48x256xbf16>
    %c0_92 = arith.constant 0 : index
    %c0_93 = arith.constant 0 : index
    %218 = vector.load %arg18[%c0_92, %c0_93] : memref<432x256xbf16, #tpu.memory_space<vmem>>, vector<48x256xbf16>
    tpu.vector_store %arg18[%c0_92, %c0_93], %217 {strides = array<i32>} : memref<432x256xbf16, #tpu.memory_space<vmem>>, vector<48x256xbf16>,
    %c16_i32_94 = arith.constant 16 : i32
    %219 = tpu.dynamic_rotate %211 by %c16_i32_94 dim 1 : vector<48x256xf32>, i32 -> vector<48x256xf32>
    %220 = vector.extract_strided_slice %2 {offsets = [1, 0, 0], sizes = [1, 1, 256], strides = [1, 1, 1]} : vector<9x1x256xf32> to vector<1x1x256xf32>
    %221 = vector.shape_cast %220 : vector<1x1x256xf32> to vector<1x256xf32>
    %222 = vector.broadcast %221 : vector<1x256xf32> to vector<48x256xf32>
    %223 = arith.mulf %219, %222 : vector<48x256xf32>
    %224 = arith.truncf %223 : vector<48x256xf32> to vector<48x256xbf16>
    %c48_95 = arith.constant 48 : index
    %c0_96 = arith.constant 0 : index
    %225 = vector.load %arg18[%c48_95, %c0_96] : memref<432x256xbf16, #tpu.memory_space<vmem>>, vector<48x256xbf16>
    tpu.vector_store %arg18[%c48_95, %c0_96], %224 {strides = array<i32>} : memref<432x256xbf16, #tpu.memory_space<vmem>>, vector<48x256xbf16>,
    %c15_i32_97 = arith.constant 15 : i32
    %226 = tpu.dynamic_rotate %211 by %c15_i32_97 dim 1 : vector<48x256xf32>, i32 -> vector<48x256xf32>
    %227 = vector.extract_strided_slice %2 {offsets = [2, 0, 0], sizes = [1, 1, 256], strides = [1, 1, 1]} : vector<9x1x256xf32> to vector<1x1x256xf32>
    %228 = vector.shape_cast %227 : vector<1x1x256xf32> to vector<1x256xf32>
    %229 = vector.broadcast %228 : vector<1x256xf32> to vector<48x256xf32>
    %230 = arith.mulf %226, %229 : vector<48x256xf32>
    %231 = arith.truncf %230 : vector<48x256xf32> to vector<48x256xbf16>
    %c96_98 = arith.constant 96 : index
    %c0_99 = arith.constant 0 : index
    %232 = vector.load %arg18[%c96_98, %c0_99] : memref<432x256xbf16, #tpu.memory_space<vmem>>, vector<48x256xbf16>
    tpu.vector_store %arg18[%c96_98, %c0_99], %231 {strides = array<i32>} : memref<432x256xbf16, #tpu.memory_space<vmem>>, vector<48x256xbf16>,
    %c1_i32_100 = arith.constant 1 : i32
    %233 = tpu.dynamic_rotate %211 by %c1_i32_100 dim 1 : vector<48x256xf32>, i32 -> vector<48x256xf32>
    %234 = vector.extract_strided_slice %2 {offsets = [3, 0, 0], sizes = [1, 1, 256], strides = [1, 1, 1]} : vector<9x1x256xf32> to vector<1x1x256xf32>
    %235 = vector.shape_cast %234 : vector<1x1x256xf32> to vector<1x256xf32>
    %236 = vector.broadcast %235 : vector<1x256xf32> to vector<48x256xf32>
    %237 = arith.mulf %233, %236 : vector<48x256xf32>
    %238 = arith.truncf %237 : vector<48x256xf32> to vector<48x256xbf16>
    %c144 = arith.constant 144 : index
    %c0_101 = arith.constant 0 : index
    %239 = vector.load %arg18[%c144, %c0_101] : memref<432x256xbf16, #tpu.memory_space<vmem>>, vector<48x256xbf16>
    tpu.vector_store %arg18[%c144, %c0_101], %238 {strides = array<i32>} : memref<432x256xbf16, #tpu.memory_space<vmem>>, vector<48x256xbf16>,
    %240 = arith.truncf %211 : vector<48x256xf32> to vector<48x256xbf16>
    %c192 = arith.constant 192 : index
    %c0_102 = arith.constant 0 : index
    %241 = vector.load %arg18[%c192, %c0_102] : memref<432x256xbf16, #tpu.memory_space<vmem>>, vector<48x256xbf16>
    tpu.vector_store %arg18[%c192, %c0_102], %240 {strides = array<i32>} : memref<432x256xbf16, #tpu.memory_space<vmem>>, vector<48x256xbf16>,
    %c255_i32 = arith.constant 255 : i32
    %242 = tpu.dynamic_rotate %211 by %c255_i32 dim 1 : vector<48x256xf32>, i32 -> vector<48x256xf32>
    %243 = vector.extract_strided_slice %2 {offsets = [5, 0, 0], sizes = [1, 1, 256], strides = [1, 1, 1]} : vector<9x1x256xf32> to vector<1x1x256xf32>
    %244 = vector.shape_cast %243 : vector<1x1x256xf32> to vector<1x256xf32>
    %245 = vector.broadcast %244 : vector<1x256xf32> to vector<48x256xf32>
    %246 = arith.mulf %242, %245 : vector<48x256xf32>
    %247 = arith.truncf %246 : vector<48x256xf32> to vector<48x256xbf16>
    %c240 = arith.constant 240 : index
    %c0_103 = arith.constant 0 : index
    %248 = vector.load %arg18[%c240, %c0_103] : memref<432x256xbf16, #tpu.memory_space<vmem>>, vector<48x256xbf16>
    tpu.vector_store %arg18[%c240, %c0_103], %247 {strides = array<i32>} : memref<432x256xbf16, #tpu.memory_space<vmem>>, vector<48x256xbf16>,
    %c241_i32 = arith.constant 241 : i32
    %249 = tpu.dynamic_rotate %211 by %c241_i32 dim 1 : vector<48x256xf32>, i32 -> vector<48x256xf32>
    %250 = vector.extract_strided_slice %2 {offsets = [6, 0, 0], sizes = [1, 1, 256], strides = [1, 1, 1]} : vector<9x1x256xf32> to vector<1x1x256xf32>
    %251 = vector.shape_cast %250 : vector<1x1x256xf32> to vector<1x256xf32>
    %252 = vector.broadcast %251 : vector<1x256xf32> to vector<48x256xf32>
    %253 = arith.mulf %249, %252 : vector<48x256xf32>
    %254 = arith.truncf %253 : vector<48x256xf32> to vector<48x256xbf16>
    %c288 = arith.constant 288 : index
    %c0_104 = arith.constant 0 : index
    %255 = vector.load %arg18[%c288, %c0_104] : memref<432x256xbf16, #tpu.memory_space<vmem>>, vector<48x256xbf16>
    tpu.vector_store %arg18[%c288, %c0_104], %254 {strides = array<i32>} : memref<432x256xbf16, #tpu.memory_space<vmem>>, vector<48x256xbf16>,
    %c240_i32 = arith.constant 240 : i32
    %256 = tpu.dynamic_rotate %211 by %c240_i32 dim 1 : vector<48x256xf32>, i32 -> vector<48x256xf32>
    %257 = vector.extract_strided_slice %2 {offsets = [7, 0, 0], sizes = [1, 1, 256], strides = [1, 1, 1]} : vector<9x1x256xf32> to vector<1x1x256xf32>
    %258 = vector.shape_cast %257 : vector<1x1x256xf32> to vector<1x256xf32>
    %259 = vector.broadcast %258 : vector<1x256xf32> to vector<48x256xf32>
    %260 = arith.mulf %256, %259 : vector<48x256xf32>
    %261 = arith.truncf %260 : vector<48x256xf32> to vector<48x256xbf16>
    %c336 = arith.constant 336 : index
    %c0_105 = arith.constant 0 : index
    %262 = vector.load %arg18[%c336, %c0_105] : memref<432x256xbf16, #tpu.memory_space<vmem>>, vector<48x256xbf16>
    tpu.vector_store %arg18[%c336, %c0_105], %261 {strides = array<i32>} : memref<432x256xbf16, #tpu.memory_space<vmem>>, vector<48x256xbf16>,
    %c239_i32 = arith.constant 239 : i32
    %263 = tpu.dynamic_rotate %211 by %c239_i32 dim 1 : vector<48x256xf32>, i32 -> vector<48x256xf32>
    %264 = vector.extract_strided_slice %2 {offsets = [8, 0, 0], sizes = [1, 1, 256], strides = [1, 1, 1]} : vector<9x1x256xf32> to vector<1x1x256xf32>
    %265 = vector.shape_cast %264 : vector<1x1x256xf32> to vector<1x256xf32>
    %266 = vector.broadcast %265 : vector<1x256xf32> to vector<48x256xf32>
    %267 = arith.mulf %263, %266 : vector<48x256xf32>
    %268 = arith.truncf %267 : vector<48x256xf32> to vector<48x256xbf16>
    %c384 = arith.constant 384 : index
    %c0_106 = arith.constant 0 : index
    %269 = vector.load %arg18[%c384, %c0_106] : memref<432x256xbf16, #tpu.memory_space<vmem>>, vector<48x256xbf16>
    tpu.vector_store %arg18[%c384, %c0_106], %268 {strides = array<i32>} : memref<432x256xbf16, #tpu.memory_space<vmem>>, vector<48x256xbf16>,
    %c0_107 = arith.constant 0 : index
    %c0_108 = arith.constant 0 : index
    %270 = vector.load %arg8[%c0_107, %c0_108] : memref<48x432xbf16, #tpu.memory_space<vmem>>, vector<48x432xbf16>
    %c0_109 = arith.constant 0 : index
    %c0_110 = arith.constant 0 : index
    %271 = vector.load %arg18[%c0_109, %c0_110] : memref<432x256xbf16, #tpu.memory_space<vmem>>, vector<432x256xbf16>
    %cst_111 = arith.constant dense<0.000000e+00> : vector<48x256xf32>
    %272 = tpu.matmul %270, %271, %cst_111 {dimension_numbers = #tpu.dot_dimension_numbers<[1], [0], [0], [1], [0, 0, 1, 1], [], []>} : vector<48x432xbf16>, vector<432x256xbf16>, vector<48x256xf32> -> vector<48x256xf32>
    %c0_112 = arith.constant 0 : index
    %c0_113 = arith.constant 0 : index
    %273 = vector.load %arg11[%c0_112, %c0_113] : memref<48x1xf32, #tpu.memory_space<vmem>>, vector<48x1xf32>
    %274 = vector.broadcast %273 : vector<48x1xf32> to vector<48x256xf32>
    %275 = arith.addf %272, %274 : vector<48x256xf32>
    %cst_114 = arith.constant 0.000000e+00 : f32
    %276 = vector.broadcast %cst_114 : f32 to vector<48x256xf32>
    %277 = arith.maximumf %275, %276 : vector<48x256xf32>
    %278 = vector.broadcast %3 : vector<1x256xf32> to vector<48x256xf32>
    %279 = arith.mulf %277, %278 : vector<48x256xf32>
    %c17_i32_115 = arith.constant 17 : i32
    %280 = tpu.dynamic_rotate %279 by %c17_i32_115 dim 1 : vector<48x256xf32>, i32 -> vector<48x256xf32>
    %281 = vector.extract_strided_slice %2 {offsets = [0, 0, 0], sizes = [1, 1, 256], strides = [1, 1, 1]} : vector<9x1x256xf32> to vector<1x1x256xf32>
    %282 = vector.shape_cast %281 : vector<1x1x256xf32> to vector<1x256xf32>
    %283 = vector.broadcast %282 : vector<1x256xf32> to vector<48x256xf32>
    %284 = arith.mulf %280, %283 : vector<48x256xf32>
    %285 = arith.truncf %284 : vector<48x256xf32> to vector<48x256xbf16>
    %c0_116 = arith.constant 0 : index
    %c0_117 = arith.constant 0 : index
    %286 = vector.load %arg18[%c0_116, %c0_117] : memref<432x256xbf16, #tpu.memory_space<vmem>>, vector<48x256xbf16>
    tpu.vector_store %arg18[%c0_116, %c0_117], %285 {strides = array<i32>} : memref<432x256xbf16, #tpu.memory_space<vmem>>, vector<48x256xbf16>,
    %c16_i32_118 = arith.constant 16 : i32
    %287 = tpu.dynamic_rotate %279 by %c16_i32_118 dim 1 : vector<48x256xf32>, i32 -> vector<48x256xf32>
    %288 = vector.extract_strided_slice %2 {offsets = [1, 0, 0], sizes = [1, 1, 256], strides = [1, 1, 1]} : vector<9x1x256xf32> to vector<1x1x256xf32>
    %289 = vector.shape_cast %288 : vector<1x1x256xf32> to vector<1x256xf32>
    %290 = vector.broadcast %289 : vector<1x256xf32> to vector<48x256xf32>
    %291 = arith.mulf %287, %290 : vector<48x256xf32>
    %292 = arith.truncf %291 : vector<48x256xf32> to vector<48x256xbf16>
    %c48_119 = arith.constant 48 : index
    %c0_120 = arith.constant 0 : index
    %293 = vector.load %arg18[%c48_119, %c0_120] : memref<432x256xbf16, #tpu.memory_space<vmem>>, vector<48x256xbf16>
    tpu.vector_store %arg18[%c48_119, %c0_120], %292 {strides = array<i32>} : memref<432x256xbf16, #tpu.memory_space<vmem>>, vector<48x256xbf16>,
    %c15_i32_121 = arith.constant 15 : i32
    %294 = tpu.dynamic_rotate %279 by %c15_i32_121 dim 1 : vector<48x256xf32>, i32 -> vector<48x256xf32>
    %295 = vector.extract_strided_slice %2 {offsets = [2, 0, 0], sizes = [1, 1, 256], strides = [1, 1, 1]} : vector<9x1x256xf32> to vector<1x1x256xf32>
    %296 = vector.shape_cast %295 : vector<1x1x256xf32> to vector<1x256xf32>
    %297 = vector.broadcast %296 : vector<1x256xf32> to vector<48x256xf32>
    %298 = arith.mulf %294, %297 : vector<48x256xf32>
    %299 = arith.truncf %298 : vector<48x256xf32> to vector<48x256xbf16>
    %c96_122 = arith.constant 96 : index
    %c0_123 = arith.constant 0 : index
    %300 = vector.load %arg18[%c96_122, %c0_123] : memref<432x256xbf16, #tpu.memory_space<vmem>>, vector<48x256xbf16>
    tpu.vector_store %arg18[%c96_122, %c0_123], %299 {strides = array<i32>} : memref<432x256xbf16, #tpu.memory_space<vmem>>, vector<48x256xbf16>,
    %c1_i32_124 = arith.constant 1 : i32
    %301 = tpu.dynamic_rotate %279 by %c1_i32_124 dim 1 : vector<48x256xf32>, i32 -> vector<48x256xf32>
    %302 = vector.extract_strided_slice %2 {offsets = [3, 0, 0], sizes = [1, 1, 256], strides = [1, 1, 1]} : vector<9x1x256xf32> to vector<1x1x256xf32>
    %303 = vector.shape_cast %302 : vector<1x1x256xf32> to vector<1x256xf32>
    %304 = vector.broadcast %303 : vector<1x256xf32> to vector<48x256xf32>
    %305 = arith.mulf %301, %304 : vector<48x256xf32>
    %306 = arith.truncf %305 : vector<48x256xf32> to vector<48x256xbf16>
    %c144_125 = arith.constant 144 : index
    %c0_126 = arith.constant 0 : index
    %307 = vector.load %arg18[%c144_125, %c0_126] : memref<432x256xbf16, #tpu.memory_space<vmem>>, vector<48x256xbf16>
    tpu.vector_store %arg18[%c144_125, %c0_126], %306 {strides = array<i32>} : memref<432x256xbf16, #tpu.memory_space<vmem>>, vector<48x256xbf16>,
    %308 = arith.truncf %279 : vector<48x256xf32> to vector<48x256xbf16>
    %c192_127 = arith.constant 192 : index
    %c0_128 = arith.constant 0 : index
    %309 = vector.load %arg18[%c192_127, %c0_128] : memref<432x256xbf16, #tpu.memory_space<vmem>>, vector<48x256xbf16>
    tpu.vector_store %arg18[%c192_127, %c0_128], %308 {strides = array<i32>} : memref<432x256xbf16, #tpu.memory_space<vmem>>, vector<48x256xbf16>,
    %c255_i32_129 = arith.constant 255 : i32
    %310 = tpu.dynamic_rotate %279 by %c255_i32_129 dim 1 : vector<48x256xf32>, i32 -> vector<48x256xf32>
    %311 = vector.extract_strided_slice %2 {offsets = [5, 0, 0], sizes = [1, 1, 256], strides = [1, 1, 1]} : vector<9x1x256xf32> to vector<1x1x256xf32>
    %312 = vector.shape_cast %311 : vector<1x1x256xf32> to vector<1x256xf32>
    %313 = vector.broadcast %312 : vector<1x256xf32> to vector<48x256xf32>
    %314 = arith.mulf %310, %313 : vector<48x256xf32>
    %315 = arith.truncf %314 : vector<48x256xf32> to vector<48x256xbf16>
    %c240_130 = arith.constant 240 : index
    %c0_131 = arith.constant 0 : index
    %316 = vector.load %arg18[%c240_130, %c0_131] : memref<432x256xbf16, #tpu.memory_space<vmem>>, vector<48x256xbf16>
    tpu.vector_store %arg18[%c240_130, %c0_131], %315 {strides = array<i32>} : memref<432x256xbf16, #tpu.memory_space<vmem>>, vector<48x256xbf16>,
    %c241_i32_132 = arith.constant 241 : i32
    %317 = tpu.dynamic_rotate %279 by %c241_i32_132 dim 1 : vector<48x256xf32>, i32 -> vector<48x256xf32>
    %318 = vector.extract_strided_slice %2 {offsets = [6, 0, 0], sizes = [1, 1, 256], strides = [1, 1, 1]} : vector<9x1x256xf32> to vector<1x1x256xf32>
    %319 = vector.shape_cast %318 : vector<1x1x256xf32> to vector<1x256xf32>
    %320 = vector.broadcast %319 : vector<1x256xf32> to vector<48x256xf32>
    %321 = arith.mulf %317, %320 : vector<48x256xf32>
    %322 = arith.truncf %321 : vector<48x256xf32> to vector<48x256xbf16>
    %c288_133 = arith.constant 288 : index
    %c0_134 = arith.constant 0 : index
    %323 = vector.load %arg18[%c288_133, %c0_134] : memref<432x256xbf16, #tpu.memory_space<vmem>>, vector<48x256xbf16>
    tpu.vector_store %arg18[%c288_133, %c0_134], %322 {strides = array<i32>} : memref<432x256xbf16, #tpu.memory_space<vmem>>, vector<48x256xbf16>,
    %c240_i32_135 = arith.constant 240 : i32
    %324 = tpu.dynamic_rotate %279 by %c240_i32_135 dim 1 : vector<48x256xf32>, i32 -> vector<48x256xf32>
    %325 = vector.extract_strided_slice %2 {offsets = [7, 0, 0], sizes = [1, 1, 256], strides = [1, 1, 1]} : vector<9x1x256xf32> to vector<1x1x256xf32>
    %326 = vector.shape_cast %325 : vector<1x1x256xf32> to vector<1x256xf32>
    %327 = vector.broadcast %326 : vector<1x256xf32> to vector<48x256xf32>
    %328 = arith.mulf %324, %327 : vector<48x256xf32>
    %329 = arith.truncf %328 : vector<48x256xf32> to vector<48x256xbf16>
    %c336_136 = arith.constant 336 : index
    %c0_137 = arith.constant 0 : index
    %330 = vector.load %arg18[%c336_136, %c0_137] : memref<432x256xbf16, #tpu.memory_space<vmem>>, vector<48x256xbf16>
    tpu.vector_store %arg18[%c336_136, %c0_137], %329 {strides = array<i32>} : memref<432x256xbf16, #tpu.memory_space<vmem>>, vector<48x256xbf16>,
    %c239_i32_138 = arith.constant 239 : i32
    %331 = tpu.dynamic_rotate %279 by %c239_i32_138 dim 1 : vector<48x256xf32>, i32 -> vector<48x256xf32>
    %332 = vector.extract_strided_slice %2 {offsets = [8, 0, 0], sizes = [1, 1, 256], strides = [1, 1, 1]} : vector<9x1x256xf32> to vector<1x1x256xf32>
    %333 = vector.shape_cast %332 : vector<1x1x256xf32> to vector<1x256xf32>
    %334 = vector.broadcast %333 : vector<1x256xf32> to vector<48x256xf32>
    %335 = arith.mulf %331, %334 : vector<48x256xf32>
    %336 = arith.truncf %335 : vector<48x256xf32> to vector<48x256xbf16>
    %c384_139 = arith.constant 384 : index
    %c0_140 = arith.constant 0 : index
    %337 = vector.load %arg18[%c384_139, %c0_140] : memref<432x256xbf16, #tpu.memory_space<vmem>>, vector<48x256xbf16>
    tpu.vector_store %arg18[%c384_139, %c0_140], %336 {strides = array<i32>} : memref<432x256xbf16, #tpu.memory_space<vmem>>, vector<48x256xbf16>,
    %c0_141 = arith.constant 0 : index
    %c0_142 = arith.constant 0 : index
    %338 = vector.load %arg9[%c0_141, %c0_142] : memref<48x432xbf16, #tpu.memory_space<vmem>>, vector<48x432xbf16>
    %c0_143 = arith.constant 0 : index
    %c0_144 = arith.constant 0 : index
    %339 = vector.load %arg18[%c0_143, %c0_144] : memref<432x256xbf16, #tpu.memory_space<vmem>>, vector<432x256xbf16>
    %cst_145 = arith.constant dense<0.000000e+00> : vector<48x256xf32>
    %340 = tpu.matmul %338, %339, %cst_145 {dimension_numbers = #tpu.dot_dimension_numbers<[1], [0], [0], [1], [0, 0, 1, 1], [], []>} : vector<48x432xbf16>, vector<432x256xbf16>, vector<48x256xf32> -> vector<48x256xf32>
    %c0_146 = arith.constant 0 : index
    %c0_147 = arith.constant 0 : index
    %341 = vector.load %arg12[%c0_146, %c0_147] : memref<48x1xf32, #tpu.memory_space<vmem>>, vector<48x1xf32>
    %342 = vector.broadcast %341 : vector<48x1xf32> to vector<48x256xf32>
    %343 = arith.addf %340, %342 : vector<48x256xf32>
    %cst_148 = arith.constant 0.000000e+00 : f32
    %344 = vector.broadcast %cst_148 : f32 to vector<48x256xf32>
    %345 = arith.maximumf %343, %344 : vector<48x256xf32>
    %346 = vector.broadcast %3 : vector<1x256xf32> to vector<48x256xf32>
    %347 = arith.mulf %345, %346 : vector<48x256xf32>
    %c17_i32_149 = arith.constant 17 : i32
    %348 = tpu.dynamic_rotate %347 by %c17_i32_149 dim 1 : vector<48x256xf32>, i32 -> vector<48x256xf32>
    %349 = vector.extract_strided_slice %2 {offsets = [0, 0, 0], sizes = [1, 1, 256], strides = [1, 1, 1]} : vector<9x1x256xf32> to vector<1x1x256xf32>
    %350 = vector.shape_cast %349 : vector<1x1x256xf32> to vector<1x256xf32>
    %351 = vector.broadcast %350 : vector<1x256xf32> to vector<48x256xf32>
    %352 = arith.mulf %348, %351 : vector<48x256xf32>
    %353 = arith.truncf %352 : vector<48x256xf32> to vector<48x256xbf16>
    %c0_150 = arith.constant 0 : index
    %c0_151 = arith.constant 0 : index
    %354 = vector.load %arg18[%c0_150, %c0_151] : memref<432x256xbf16, #tpu.memory_space<vmem>>, vector<48x256xbf16>
    tpu.vector_store %arg18[%c0_150, %c0_151], %353 {strides = array<i32>} : memref<432x256xbf16, #tpu.memory_space<vmem>>, vector<48x256xbf16>,
    %c16_i32_152 = arith.constant 16 : i32
    %355 = tpu.dynamic_rotate %347 by %c16_i32_152 dim 1 : vector<48x256xf32>, i32 -> vector<48x256xf32>
    %356 = vector.extract_strided_slice %2 {offsets = [1, 0, 0], sizes = [1, 1, 256], strides = [1, 1, 1]} : vector<9x1x256xf32> to vector<1x1x256xf32>
    %357 = vector.shape_cast %356 : vector<1x1x256xf32> to vector<1x256xf32>
    %358 = vector.broadcast %357 : vector<1x256xf32> to vector<48x256xf32>
    %359 = arith.mulf %355, %358 : vector<48x256xf32>
    %360 = arith.truncf %359 : vector<48x256xf32> to vector<48x256xbf16>
    %c48_153 = arith.constant 48 : index
    %c0_154 = arith.constant 0 : index
    %361 = vector.load %arg18[%c48_153, %c0_154] : memref<432x256xbf16, #tpu.memory_space<vmem>>, vector<48x256xbf16>
    tpu.vector_store %arg18[%c48_153, %c0_154], %360 {strides = array<i32>} : memref<432x256xbf16, #tpu.memory_space<vmem>>, vector<48x256xbf16>,
    %c15_i32_155 = arith.constant 15 : i32
    %362 = tpu.dynamic_rotate %347 by %c15_i32_155 dim 1 : vector<48x256xf32>, i32 -> vector<48x256xf32>
    %363 = vector.extract_strided_slice %2 {offsets = [2, 0, 0], sizes = [1, 1, 256], strides = [1, 1, 1]} : vector<9x1x256xf32> to vector<1x1x256xf32>
    %364 = vector.shape_cast %363 : vector<1x1x256xf32> to vector<1x256xf32>
    %365 = vector.broadcast %364 : vector<1x256xf32> to vector<48x256xf32>
    %366 = arith.mulf %362, %365 : vector<48x256xf32>
    %367 = arith.truncf %366 : vector<48x256xf32> to vector<48x256xbf16>
    %c96_156 = arith.constant 96 : index
    %c0_157 = arith.constant 0 : index
    %368 = vector.load %arg18[%c96_156, %c0_157] : memref<432x256xbf16, #tpu.memory_space<vmem>>, vector<48x256xbf16>
    tpu.vector_store %arg18[%c96_156, %c0_157], %367 {strides = array<i32>} : memref<432x256xbf16, #tpu.memory_space<vmem>>, vector<48x256xbf16>,
    %c1_i32_158 = arith.constant 1 : i32
    %369 = tpu.dynamic_rotate %347 by %c1_i32_158 dim 1 : vector<48x256xf32>, i32 -> vector<48x256xf32>
    %370 = vector.extract_strided_slice %2 {offsets = [3, 0, 0], sizes = [1, 1, 256], strides = [1, 1, 1]} : vector<9x1x256xf32> to vector<1x1x256xf32>
    %371 = vector.shape_cast %370 : vector<1x1x256xf32> to vector<1x256xf32>
    %372 = vector.broadcast %371 : vector<1x256xf32> to vector<48x256xf32>
    %373 = arith.mulf %369, %372 : vector<48x256xf32>
    %374 = arith.truncf %373 : vector<48x256xf32> to vector<48x256xbf16>
    %c144_159 = arith.constant 144 : index
    %c0_160 = arith.constant 0 : index
    %375 = vector.load %arg18[%c144_159, %c0_160] : memref<432x256xbf16, #tpu.memory_space<vmem>>, vector<48x256xbf16>
    tpu.vector_store %arg18[%c144_159, %c0_160], %374 {strides = array<i32>} : memref<432x256xbf16, #tpu.memory_space<vmem>>, vector<48x256xbf16>,
    %376 = arith.truncf %347 : vector<48x256xf32> to vector<48x256xbf16>
    %c192_161 = arith.constant 192 : index
    %c0_162 = arith.constant 0 : index
    %377 = vector.load %arg18[%c192_161, %c0_162] : memref<432x256xbf16, #tpu.memory_space<vmem>>, vector<48x256xbf16>
    tpu.vector_store %arg18[%c192_161, %c0_162], %376 {strides = array<i32>} : memref<432x256xbf16, #tpu.memory_space<vmem>>, vector<48x256xbf16>,
    %c255_i32_163 = arith.constant 255 : i32
    %378 = tpu.dynamic_rotate %347 by %c255_i32_163 dim 1 : vector<48x256xf32>, i32 -> vector<48x256xf32>
    %379 = vector.extract_strided_slice %2 {offsets = [5, 0, 0], sizes = [1, 1, 256], strides = [1, 1, 1]} : vector<9x1x256xf32> to vector<1x1x256xf32>
    %380 = vector.shape_cast %379 : vector<1x1x256xf32> to vector<1x256xf32>
    %381 = vector.broadcast %380 : vector<1x256xf32> to vector<48x256xf32>
    %382 = arith.mulf %378, %381 : vector<48x256xf32>
    %383 = arith.truncf %382 : vector<48x256xf32> to vector<48x256xbf16>
    %c240_164 = arith.constant 240 : index
    %c0_165 = arith.constant 0 : index
    %384 = vector.load %arg18[%c240_164, %c0_165] : memref<432x256xbf16, #tpu.memory_space<vmem>>, vector<48x256xbf16>
    tpu.vector_store %arg18[%c240_164, %c0_165], %383 {strides = array<i32>} : memref<432x256xbf16, #tpu.memory_space<vmem>>, vector<48x256xbf16>,
    %c241_i32_166 = arith.constant 241 : i32
    %385 = tpu.dynamic_rotate %347 by %c241_i32_166 dim 1 : vector<48x256xf32>, i32 -> vector<48x256xf32>
    %386 = vector.extract_strided_slice %2 {offsets = [6, 0, 0], sizes = [1, 1, 256], strides = [1, 1, 1]} : vector<9x1x256xf32> to vector<1x1x256xf32>
    %387 = vector.shape_cast %386 : vector<1x1x256xf32> to vector<1x256xf32>
    %388 = vector.broadcast %387 : vector<1x256xf32> to vector<48x256xf32>
    %389 = arith.mulf %385, %388 : vector<48x256xf32>
    %390 = arith.truncf %389 : vector<48x256xf32> to vector<48x256xbf16>
    %c288_167 = arith.constant 288 : index
    %c0_168 = arith.constant 0 : index
    %391 = vector.load %arg18[%c288_167, %c0_168] : memref<432x256xbf16, #tpu.memory_space<vmem>>, vector<48x256xbf16>
    tpu.vector_store %arg18[%c288_167, %c0_168], %390 {strides = array<i32>} : memref<432x256xbf16, #tpu.memory_space<vmem>>, vector<48x256xbf16>,
    %c240_i32_169 = arith.constant 240 : i32
    %392 = tpu.dynamic_rotate %347 by %c240_i32_169 dim 1 : vector<48x256xf32>, i32 -> vector<48x256xf32>
    %393 = vector.extract_strided_slice %2 {offsets = [7, 0, 0], sizes = [1, 1, 256], strides = [1, 1, 1]} : vector<9x1x256xf32> to vector<1x1x256xf32>
    %394 = vector.shape_cast %393 : vector<1x1x256xf32> to vector<1x256xf32>
    %395 = vector.broadcast %394 : vector<1x256xf32> to vector<48x256xf32>
    %396 = arith.mulf %392, %395 : vector<48x256xf32>
    %397 = arith.truncf %396 : vector<48x256xf32> to vector<48x256xbf16>
    %c336_170 = arith.constant 336 : index
    %c0_171 = arith.constant 0 : index
    %398 = vector.load %arg18[%c336_170, %c0_171] : memref<432x256xbf16, #tpu.memory_space<vmem>>, vector<48x256xbf16>
    tpu.vector_store %arg18[%c336_170, %c0_171], %397 {strides = array<i32>} : memref<432x256xbf16, #tpu.memory_space<vmem>>, vector<48x256xbf16>,
    %c239_i32_172 = arith.constant 239 : i32
    %399 = tpu.dynamic_rotate %347 by %c239_i32_172 dim 1 : vector<48x256xf32>, i32 -> vector<48x256xf32>
    %400 = vector.extract_strided_slice %2 {offsets = [8, 0, 0], sizes = [1, 1, 256], strides = [1, 1, 1]} : vector<9x1x256xf32> to vector<1x1x256xf32>
    %401 = vector.shape_cast %400 : vector<1x1x256xf32> to vector<1x256xf32>
    %402 = vector.broadcast %401 : vector<1x256xf32> to vector<48x256xf32>
    %403 = arith.mulf %399, %402 : vector<48x256xf32>
    %404 = arith.truncf %403 : vector<48x256xf32> to vector<48x256xbf16>
    %c384_173 = arith.constant 384 : index
    %c0_174 = arith.constant 0 : index
    %405 = vector.load %arg18[%c384_173, %c0_174] : memref<432x256xbf16, #tpu.memory_space<vmem>>, vector<48x256xbf16>
    tpu.vector_store %arg18[%c384_173, %c0_174], %404 {strides = array<i32>} : memref<432x256xbf16, #tpu.memory_space<vmem>>, vector<48x256xbf16>,
    %c0_175 = arith.constant 0 : index
    %c0_176 = arith.constant 0 : index
    %406 = vector.load %arg10[%c0_175, %c0_176] : memref<48x432xbf16, #tpu.memory_space<vmem>>, vector<48x432xbf16>
    %c0_177 = arith.constant 0 : index
    %c0_178 = arith.constant 0 : index
    %407 = vector.load %arg18[%c0_177, %c0_178] : memref<432x256xbf16, #tpu.memory_space<vmem>>, vector<432x256xbf16>
    %cst_179 = arith.constant dense<0.000000e+00> : vector<48x256xf32>
    %408 = tpu.matmul %406, %407, %cst_179 {dimension_numbers = #tpu.dot_dimension_numbers<[1], [0], [0], [1], [0, 0, 1, 1], [], []>} : vector<48x432xbf16>, vector<432x256xbf16>, vector<48x256xf32> -> vector<48x256xf32>
    %c0_180 = arith.constant 0 : index
    %c0_181 = arith.constant 0 : index
    %409 = vector.load %arg13[%c0_180, %c0_181] : memref<48x1xf32, #tpu.memory_space<vmem>>, vector<48x1xf32>
    %410 = vector.broadcast %409 : vector<48x1xf32> to vector<48x256xf32>
    %411 = arith.addf %408, %410 : vector<48x256xf32>
    %412 = vector.broadcast %3 : vector<1x256xf32> to vector<48x256xf32>
    %413 = arith.mulf %411, %412 : vector<48x256xf32>
    %c0_182 = arith.constant 0 : index
    %c0_183 = arith.constant 0 : index
    %c0_184 = arith.constant 0 : index
    %414 = vector.load %arg16[%c0_182, %c0_183, %c0_184] : memref<1x48x256xf32, #tpu.memory_space<vmem>>, vector<1x48x256xf32>
    %415 = vector.shape_cast %414 : vector<1x48x256xf32> to vector<48x256xf32>
    %416 = vector.shape_cast %413 : vector<48x256xf32> to vector<1x48x256xf32>
    tpu.vector_store %arg16[%c0_182, %c0_183, %c0_184], %416 {strides = array<i32>} : memref<1x48x256xf32, #tpu.memory_space<vmem>>, vector<1x48x256xf32>,
    return
  }
  func.func @transform_0(%arg0: i32) -> (i32, i32, i32) {
    %c0_i32 = arith.constant 0 : i32
    %c0_i32_0 = arith.constant 0 : i32
    %c0_i32_1 = arith.constant 0 : i32
    return %arg0, %c0_i32, %c0_i32_0 : i32, i32, i32
  }
  func.func @transform_1(%arg0: i32) -> (i32, i32) {
    %c0_i32 = arith.constant 0 : i32
    %c0_i32_0 = arith.constant 0 : i32
    %c0_i32_1 = arith.constant 0 : i32
    return %c0_i32, %c0_i32_0 : i32, i32
  }
  func.func @transform_2(%arg0: i32) -> (i32, i32) {
    %c0_i32 = arith.constant 0 : i32
    %c0_i32_0 = arith.constant 0 : i32
    %c0_i32_1 = arith.constant 0 : i32
    return %c0_i32, %c0_i32_0 : i32, i32
  }
  func.func @transform_3(%arg0: i32) -> (i32, i32) {
    %c0_i32 = arith.constant 0 : i32
    %c0_i32_0 = arith.constant 0 : i32
    %c0_i32_1 = arith.constant 0 : i32
    return %c0_i32, %c0_i32_0 : i32, i32
  }
  func.func @transform_4(%arg0: i32) -> (i32, i32) {
    %c0_i32 = arith.constant 0 : i32
    %c0_i32_0 = arith.constant 0 : i32
    %c0_i32_1 = arith.constant 0 : i32
    return %c0_i32, %c0_i32_0 : i32, i32
  }
  func.func @transform_5(%arg0: i32) -> (i32, i32) {
    %c0_i32 = arith.constant 0 : i32
    %c0_i32_0 = arith.constant 0 : i32
    %c0_i32_1 = arith.constant 0 : i32
    return %c0_i32, %c0_i32_0 : i32, i32
  }
  func.func @transform_6(%arg0: i32) -> (i32, i32) {
    %c0_i32 = arith.constant 0 : i32
    %c0_i32_0 = arith.constant 0 : i32
    %c0_i32_1 = arith.constant 0 : i32
    return %c0_i32, %c0_i32_0 : i32, i32
  }
  func.func @transform_7(%arg0: i32) -> (i32, i32) {
    %c0_i32 = arith.constant 0 : i32
    %c0_i32_0 = arith.constant 0 : i32
    %c0_i32_1 = arith.constant 0 : i32
    return %c0_i32, %c0_i32_0 : i32, i32
  }
  func.func @transform_8(%arg0: i32) -> (i32, i32) {
    %c0_i32 = arith.constant 0 : i32
    %c0_i32_0 = arith.constant 0 : i32
    %c0_i32_1 = arith.constant 0 : i32
    return %c0_i32, %c0_i32_0 : i32, i32
  }
  func.func @transform_9(%arg0: i32) -> (i32, i32) {
    %c0_i32 = arith.constant 0 : i32
    %c0_i32_0 = arith.constant 0 : i32
    %c0_i32_1 = arith.constant 0 : i32
    return %c0_i32, %c0_i32_0 : i32, i32
  }
  func.func @transform_10(%arg0: i32) -> (i32, i32) {
    %c0_i32 = arith.constant 0 : i32
    %c0_i32_0 = arith.constant 0 : i32
    %c0_i32_1 = arith.constant 0 : i32
    return %c0_i32, %c0_i32_0 : i32, i32
  }
  func.func @transform_11(%arg0: i32) -> (i32, i32) {
    %c0_i32 = arith.constant 0 : i32
    %c0_i32_0 = arith.constant 0 : i32
    %c0_i32_1 = arith.constant 0 : i32
    return %c0_i32, %c0_i32_0 : i32, i32
  }
  func.func @transform_12(%arg0: i32) -> (i32, i32) {
    %c0_i32 = arith.constant 0 : i32
    %c0_i32_0 = arith.constant 0 : i32
    %c0_i32_1 = arith.constant 0 : i32
    return %c0_i32, %c0_i32_0 : i32, i32
  }
  func.func @transform_13(%arg0: i32) -> (i32, i32) {
    %c0_i32 = arith.constant 0 : i32
    %c0_i32_0 = arith.constant 0 : i32
    %c0_i32_1 = arith.constant 0 : i32
    return %c0_i32, %c0_i32_0 : i32, i32
  }
  func.func @transform_14(%arg0: i32) -> (i32, i32, i32) {
    %c0_i32 = arith.constant 0 : i32
    %c0_i32_0 = arith.constant 0 : i32
    %c0_i32_1 = arith.constant 0 : i32
    %c0_i32_2 = arith.constant 0 : i32
    return %c0_i32, %c0_i32_0, %c0_i32_1 : i32, i32, i32
  }
  func.func @transform_15(%arg0: i32) -> (i32, i32, i32) {
    %c0_i32 = arith.constant 0 : i32
    %c0_i32_0 = arith.constant 0 : i32
    %c0_i32_1 = arith.constant 0 : i32
    return %arg0, %c0_i32, %c0_i32_0 : i32, i32, i32
  }
}

</mosaic_0001>

<bundles_post_ra>
// kernel: tpu_custom_call.1
= control target key start
LH: loop header
LB: loop body
LE: loop exit
PB: predicated region body
PF: predicated region fallthrough
CT: control target
= control target key end

     0   :  { %s14464_s0 = inlined_call_operand.hbm [shape: f32[2,16,768], index: 0, kind: input, shape index: {}]   ;;  %s14465_s1 = inlined_call_operand.vmem [shape: bf16[16,144], index: 1, kind: input, shape index: {}]   ;;  %s14466_s2 = inlined_call_operand.vmem [shape: bf16[16,144], index: 2, kind: input, shape index: {}]   ;;  %s14467_s3 = inlined_call_operand.vmem [shape: bf16[16,144], index: 3, kind: input, shape index: {}]   ;;  %s14468_s4 = inlined_call_operand.vmem [shape: f32[16,1], index: 4, kind: input, shape index: {}]   ;;  %s14469_s5 = inlined_call_operand.vmem [shape: f32[16,1], index: 5, kind: input, shape index: {}]   ;;  %s14470_s6 = inlined_call_operand.vmem [shape: f32[16,1], index: 6, kind: input, shape index: {}]   ;;  %s14471_s7 = inlined_call_operand.vmem [shape: bf16[48,432], index: 7, kind: input, shape index: {}]   ;;  %s14472_s8 = inlined_call_operand.hbm [shape: bf16[48,432], index: 8, kind: input, shape index: {}]   ;;  %s14473_s9 = inlined_call_operand.hbm [shape: bf16[48,432], index: 9, kind: input, shape index: {}]   ;;  %s14474_s10 = inlined_call_operand.vmem [shape: f32[48,1], index: 10, kind: input, shape index: {}]   ;;  %s14475_s11 = inlined_call_operand.vmem [shape: f32[48,1], index: 11, kind: input, shape index: {}]   ;;  %s14476_s12 = inlined_call_operand.vmem [shape: f32[48,1], index: 12, kind: input, shape index: {}]   ;;  %s14477_s13 = inlined_call_operand.vmem [shape: f32[1,768], index: 13, kind: input, shape index: {}]   ;;  %s14478_s14 = inlined_call_operand.hbm [shape: f32[9,1,768], index: 14, kind: input, shape index: {}]   ;;  %s14479_s15 = inlined_call_operand.hbm [shape: f32[2,48,256], index: 15, kind: output, shape index: {}]  }
   0x1   :  { %14644 = sst [smem:[#allocation68_spill]] %s14472_s8 }
   0x2   :  { %14645 = sst [smem:[#allocation69_spill]] %s14473_s9 }
   0x3   :  { %14646 = sst [smem:[#allocation70_spill]] %s14475_s11 }
   0x4   :  { %14647 = sst [smem:[#allocation71_spill]] %s14476_s12 }
   0x5   :  { %14648 = sst [smem:[#allocation72_spill]] %s14478_s14 }
   0x6   :  { %14649 = sst [smem:[#allocation73_spill]] %s14479_s15 }
   0x7   :  { %20 = vsyncpa [#allocation5], 0 }
   0x8   :  { %22 = vsyncpa [#allocation5 + $0x1], 0 }
   0x9   :  { %23 = vsyncpa [#allocation8], 0 }
   0xa   :  { %24 = vsyncpa [#allocation11], 0 }
   0xb   :  { %25 = vsyncpa [#allocation6], 0 }
   0xc   :  { %27 = vsyncpa [#allocation6 + $0x1], 0  ;;  %s9641_s18 = smov 0   ;;  %s9643_s19 = smov 0  }
   0xd   :  { %s9645_s20 = smov 0   ;;  %s9647_s21 = smov 0  }
   0xe LB: > { %14650 = sst [smem:[#allocation17_spill]] %s9528_s18  ;;  %s9662_s22 = sadd.s32 4294967295, %s9540_s21   ;;  %s9540_s21 = sphi %s9647_s21, %s14854_s21   ;;  %s9536_s20 = sphi %s9645_s20, %s14856_s20   ;;  %s9532_s19 = sphi %s9643_s19, %s14858_s19   ;;  %s9528_s18 = sphi %s9641_s18, %s14857_s18  }
   0xf   : > { %14651 = sst [smem:[#allocation18_spill]] %s9536_s20  ;;  %s7362_s23 = sadd.s32 4294967294, %s9540_s21  }
  0x10   : > { %p53_p0 = scmp.ne.s32.totalorder %s9532_s19, %s9528_s18  ;;  %p54_p1 = scmp.eq.s32.totalorder %s9662_s22, 0 }
  0x11   : > { %p371_p2 = scmp.eq.s32.totalorder %s9662_s22, 1  ;;  %p377_p3 = scmp.eq.s32.totalorder %s7362_s23, 1 }
  0x12   : > { %p9671_p4 = por %p54_p1, %p53_p0  ;;  %p7363_p5 = scmp.ge.s32.totalorder %s9540_s21, 1 }
  0x13   : > { %p9676_p6 = por %p377_p3, %p53_p0  ;;  %p384_p7 = scmp.lt.s32.totalorder %s9540_s21, 3 }
  0x14   : > { %s14655_s8 = sld [smem:[#allocation68_spill]]  ;;  %s9542_s30 = smov [#allocation7]  }
  0x15   : > { %s14653_s25 = scalar_select %p9676_p6, 1, 0 }
  0x16   : > { %p9684_p8 = pnand %p7363_p5, %p384_p7  ;;  %s418_s16 = sshll.u32 %s9542_s30, 4  ;;  %s419_s16 = int_to_ptr.vmem [resolvable:$true] %s418_s16 }
  0x17   : > { %14654 = sst [smem:[#allocation19_spill]] %s14653_s25  ;;  %s9544_s25 = smov 16  }
  0x18   : > { %p9262_p9 = pneg %p9684_p8  ;;  %s14658_s9 = sld [smem:[#allocation69_spill]] }
  0x19   : > { %s9545_s30 = smov [#allocation9]   ;;  %s14659_s14 = sld [smem:[#allocation72_spill]] }
  0x1a   : > { %s416_s28 = sshll.u32 %s14655_s8, 4  ;;  %p9692_p10 = pnand %p9262_p9, %p54_p1  ;;  %s417_s28 = int_to_ptr.hbm [resolvable:$true] %s416_s28 }
  0x1b   : > { %s9543_s8 = smov 256   ;;  %s432_s18 = sshll.u32 %s9545_s30, 4  ;;  %s433_s18 = int_to_ptr.vmem [resolvable:$true] %s432_s18 }
  0x1c   : > { %9265 = dma.hbm_to_vmem [thread:$0]  (!%p9692_p10), %s417_s28, 1536, %s419_s16, [#allocation8], %s9543_s8, %s9543_s8, %s9544_s25  }
  0x1d   : > { %s9546_s23 = smov [#allocation10]   ;;  %s9547_s28 = smov 96  }
  0x1e   : > { %s430_s27 = sshll.u32 %s14658_s9, 4  ;;  %s458_s26 = sshll.u32 %s9546_s23, 4  ;;  %s431_s27 = int_to_ptr.hbm [resolvable:$true] %s430_s27  ;;  %s459_s26 = int_to_ptr.vmem [resolvable:$true] %s458_s26 }
  0x1f   : > { %s456_s11 = sshll.u32 %s14659_s14, 4  ;;  %s9548_s16 = smov 6   ;;  %s457_s11 = int_to_ptr.hbm [resolvable:$true] %s456_s11 }
  0x20   : > { %9268 = dma.hbm_to_vmem [thread:$0]  (!%p9692_p10), %s431_s27, 1536, %s433_s18, [#allocation8], %s9543_s8, %s9543_s8, %s9544_s25  }
  0x21   : > { %9271 = dma.hbm_to_vmem [thread:$0]  (!%p9692_p10), %s457_s11, 864, %s459_s26, [#allocation11], %s9547_s28, %s9547_s28, %s9548_s16  }
  0x22   : > { %s9710_s30 = sadd.s32 1, %s9540_s21   ;;  %s40_s15 = sadd.s32 1, %s9536_s20 }
  0x23   : > { %14660 = sst [smem:[#allocation20_spill]] %s9710_s30  ;;  %s37_s12 = ssub.s32 %s9540_s21, %s9710_s30 }
  0x24   : > { %p38_p12 = scmp.eq.s32.totalorder %s37_s12, 0  ;;  %p47_p13 = scmp.ne.s32.totalorder %s9536_s20, %s9532_s19 }
  0x25   : > { %p48_p0 = scmp.eq.s32.totalorder %s9540_s21, 0  ;;  %p9283_p3 = scmp.lt.s32.totalorder %s9540_s21, 2 }
  0x26   : > { %s9720_s8 = scalar_select %p38_p12, %s9536_s20, %s40_s15  }
  0x27   : > { %p49_p5 = por %p48_p0, %p47_p13  ;;  %p9724_p7 = por %p371_p2, %p47_p13 }
  0x28   : > { %14661 = sst [smem:[#allocation21_spill]] %s9720_s8  ;;  %s472_s25 = sand.u32 1, %s9536_s20  }
  0x29   : > { %s9243_s17 = smul.u32 96, %s9540_s21  ;;  %p9733_p9 = pnand %p9283_p3, %p49_p5 }
  0x2a   : > { %s9242_s11 = smul.u32 96, %s472_s25  ;;  %s473_s9 = scalar_lea.sflag [#allocation5], %s472_s25 }
  0x2b   : > { %s481_s26 = scalar_lea.hbm %s14464_s0, %s9243_s17  ;;  %p9440_p10 = pneg %p9733_p9 }
  0x2c   : > { %s482_s16 = sshll.u32 %s481_s26, 4  ;;  %s476_s12 = scalar_lea.vmem [#allocation4], %s9242_s11  ;;  %s483_s16 = int_to_ptr.hbm [resolvable:$true] %s482_s16 }
  0x2d   : > { %s484_s15 = sshll.u32 %s476_s12, 4  ;;  %s9436_s14 = sshra.s32 %s483_s16, 4  ;;  %s485_s15 = int_to_ptr.vmem [resolvable:$true] %s484_s15  ;;  %s9437_s14 = int_to_ptr.hbm [resolvable:$true] %s9436_s14 }
  0x2e   : > { %s9438_s8 = scalar_lea.hbm %s9437_s14, 96  ;;  %s9443_s23 = scalar_lea.hbm %s14464_s0, 192 }
  0x2f   : > { %p9439_p2 = scmp.ne.s32.totalorder %s9437_s14, %s9438_s8  ;;  %p9444_p0 = scmp.lt.s32.totalorder %s9437_s14, %s14464_s0 }
  0x30   : > { %p9445_p3 = scmp.lt.s32.totalorder %s9443_s23, %s9438_s8 }
  0x31   : > { %p9441_p12 = pnand %p9440_p10, %p9439_p2 }
  0x32   : > { %p9446_p5 = por %p9445_p3, %p9444_p0 }
  0x33   : > { %p9442_p13 = pneg %p9441_p12 }
  0x35   : > { %p9447_p11 = pnand %p9446_p5, %p9442_p13 }
  0x37   : > { %9450 = shalt.err (!%p9447_p11)
}
  0x38   : > { %s9549_s25 = smov 768   ;;  %s9550_s11 = smov 48  }
  0x39   : > { %9275 = dma.hbm_to_vmem [thread:$0]  (!%p9733_p9), %s483_s16, 1536, %s485_s15, %s473_s9, %s9549_s25, %s9549_s25, %s9550_s11  }
  0x3a   : > { %496 = sbr.rel (%p9684_p8) target bundleno = 3163 (0xc5b), region = 80 }
  0x3f   : > { %s9750_s26 = sand.u32 1, %s9532_s19  }
  0x40   : > { %s14510_s14 = smul.u32 96, %s9750_s26  ;;  %s499_s20 = scalar_lea.sflag [#allocation5], %s9750_s26 }
  0x42   : > { %s9756_s30 = scalar_lea.vmem [#allocation4], %s14510_s14 }
  0x43   : > { %9511 = dma.done.wait (%p9671_p4), %s499_s20, 1536  }
  0x44   : > { %9513 = vsyncadd (%p9671_p4), %s499_s20, 4294965760 }
  0x45   : > { %9515 = dma.done.wait (%p54_p1), [#allocation8], 3072  }
  0x46   : > { %9517 = vsyncadd (%p54_p1), [#allocation8], 4294964224 }
  0x47   : > { %9519 = dma.done.wait (%p54_p1), [#allocation11], 864  }
  0x48   : > { %9521 = vsyncadd (%p54_p1), [#allocation11], 4294966432  ;;  %v9771_v0 = vld [vmem:[%s9756_s30 + $0x10] sm:$0xff]  ;;  %v9774_v1 = vld [vmem:[%s9756_s30 + $0x8] sm:$0xff]  ;;  %s9551_s9 = smov 17   ;;  %s9552_s24 = smov 16   ;;  %v611_v17 = vlaneseq }
  0x49   : > { %v9777_v2 = vld [vmem:[%s9756_s30] sm:$0xff]  ;;  %595 = vrot.lane.b32.xlu2 %v9771_v0, %s9551_s9  ;;  %591 = vrot.lane.b32.xlu1 %v9774_v1, %s9551_s9  ;;  %v9789_v4 = vld [vmem:[%s9756_s30 + $0x38] sm:$0xff]  ;;  %s9553_s29 = smov 15   ;;  %s9554_s8 = smov 1   ;;  %vm1540_vm8 = vcmask 130048   ;;  %vm4726_vm9 = vcmask 392192  }
  0x4a   : > { %587 = vrot.lane.b32.xlu0 %v9777_v2, %s9551_s9  ;;  %v9786_v3 = vld [vmem:[%s9756_s30 + $0x40] sm:$0xff]  ;;  %v9792_v5 = vld [vmem:[%s9756_s30 + $0x30] sm:$0xff]  ;;  %v9804_v7 = vld [vmem:[%s9756_s30 + $0x48] sm:$0xff]  ;;  %v9896_v19 = vand.u32 127, %v611_v17  ;;  %s9555_s28 = smov 127   ;;  %s9556_s16 = smov 113  }
  0x4b   : > { %v9801_v6 = vld [vmem:[%s9756_s30 + $0x20] sm:$0xff]  ;;  %v9807_v8 = vld [vmem:[%s9756_s30 + $0x18] sm:$0xff]  ;;  %v9819_v10 = vld [vmem:[%s9756_s30 + $0x28] sm:$0xff]  ;;  %s9557_s12 = smov 112   ;;  %s9558_s15 = smov 111  }
  0x4c   : > { %v9816_v9 = vld [vmem:[%s9756_s30 + $0x58] sm:$0xff]  ;;  %v9822_v11 = vld [vmem:[%s9756_s30 + $0x50] sm:$0xff]  ;;  %v566_v20 = vld [vmem:[#allocation10] sm:$0x3f]  ;;  %vm613_vm0 = vcmp.lt.s32.totalorder %v9896_v19, 17  ;;  %vm687_vm1 = vcmp.lt.s32.totalorder %v9896_v19, 16 }
  0x4d   : > { %v9902_v21 = vperm.slane %v566_v20, 0  ;;  %v9909_v24 = vperm.slane %v566_v20, 1  ;;  %v9921_v31 = vperm.slane %v566_v20, 3  ;;  %v9923_v32 = vperm.slane %v566_v20, 2  ;;  %v567_v17 = vld [vmem:[#allocation10 + $0x6] sm:$0x3f] }
  0x4e   : > { %v9941_v45 = vperm.slane %v566_v20, 4  ;;  %v9951_v49 = vperm.slane %v566_v20, 5  ;;  %vm761_vm2 = vcmp.lt.s32.totalorder %v9896_v19, 15  ;;  %vm835_vm3 = vcmp.lt.s32.totalorder %v9896_v19, 1  ;;  %s14805_s14 = sld [smem:[#allocation70_spill]] }
  0x4f   : > { %vm921_vm4 = vcmp.lt.s32.totalorder %v9896_v19, 127  ;;  %vm1069_vm5 = vcmp.lt.s32.totalorder %v9896_v19, 112  ;;  %vm995_vm6 = vcmp.lt.s32.totalorder %v9896_v19, 113  ;;  %vm1143_vm7 = vcmp.lt.s32.totalorder %v9896_v19, 111 }
  0x51   : > { %597 = vrot.lane.b32.xlu2 %v9786_v3, %s9551_s9  ;;  %593 = vrot.lane.b32.xlu1 %v9789_v4, %s9551_s9 }
  0x52   : > { %589 = vrot.lane.b32.xlu0 %v9792_v5, %s9551_s9 }
  0x59   : > { %603 = vrot.lane.b32.xlu2 %v9801_v6, %s9551_s9  ;;  %601 = vrot.lane.b32.xlu1 %v9804_v7, %s9551_s9 }
  0x5a   : > { %599 = vrot.lane.b32.xlu0 %v9807_v8, %s9551_s9 }
  0x61   : > { %609 = vrot.lane.b32.xlu2 %v9816_v9, %s9551_s9  ;;  %607 = vrot.lane.b32.xlu1 %v9819_v10, %s9551_s9 }
  0x62   : > { %605 = vrot.lane.b32.xlu0 %v9822_v11, %s9551_s9 }
  0x69   : > { %667 = vrot.lane.b32.xlu2 %v9774_v1, %s9552_s24  ;;  %665 = vrot.lane.b32.xlu1 %v9792_v5, %s9552_s24 }
  0x6a   : > { %663 = vrot.lane.b32.xlu0 %v9777_v2, %s9552_s24 }
  0x71   : > { %673 = vrot.lane.b32.xlu2 %v9786_v3, %s9552_s24  ;;  %671 = vrot.lane.b32.xlu1 %v9771_v0, %s9552_s24 }
  0x72   : > { %669 = vrot.lane.b32.xlu0 %v9789_v4, %s9552_s24 }
  0x79   : > { %679 = vrot.lane.b32.xlu2 %v9801_v6, %s9552_s24  ;;  %677 = vrot.lane.b32.xlu1 %v9804_v7, %s9552_s24 }
  0x7a   : > { %675 = vrot.lane.b32.xlu0 %v9807_v8, %s9552_s24 }
  0x81   : > { %685 = vrot.lane.b32.xlu2 %v9816_v9, %s9552_s24  ;;  %683 = vrot.lane.b32.xlu1 %v9819_v10, %s9552_s24 }
  0x82   : > { %681 = vrot.lane.b32.xlu0 %v9822_v11, %s9552_s24 }
  0x89   : > { %741 = vrot.lane.b32.xlu2 %v9774_v1, %s9553_s29  ;;  %739 = vrot.lane.b32.xlu1 %v9792_v5, %s9553_s29 }
  0x8a   : > { %737 = vrot.lane.b32.xlu0 %v9777_v2, %s9553_s29 }
  0x91   : > { %747 = vrot.lane.b32.xlu2 %v9786_v3, %s9553_s29  ;;  %745 = vrot.lane.b32.xlu1 %v9771_v0, %s9553_s29 }
  0x92   : > { %743 = vrot.lane.b32.xlu0 %v9789_v4, %s9553_s29 }
  0x99   : > { %753 = vrot.lane.b32.xlu2 %v9801_v6, %s9553_s29  ;;  %751 = vrot.lane.b32.xlu1 %v9804_v7, %s9553_s29 }
  0x9a   : > { %749 = vrot.lane.b32.xlu0 %v9807_v8, %s9553_s29 }
  0xa1   : > { %759 = vrot.lane.b32.xlu2 %v9816_v9, %s9553_s29  ;;  %757 = vrot.lane.b32.xlu1 %v9819_v10, %s9553_s29 }
  0xa2   : > { %755 = vrot.lane.b32.xlu0 %v9822_v11, %s9553_s29 }
  0xa3   : > { %v596_v12 = vpop.permute.xlu2 %595 }
  0xa9   : > { %815 = vrot.lane.b32.xlu2 %v9774_v1, %s9554_s8  ;;  %813 = vrot.lane.b32.xlu1 %v9792_v5, %s9554_s8 }
  0xaa   : > { %811 = vrot.lane.b32.xlu0 %v9777_v2, %s9554_s8 }
  0xab   : > { %v598_v13 = vpop.permute.xlu2 %597 }
  0xb1   : > { %821 = vrot.lane.b32.xlu2 %v9786_v3, %s9554_s8  ;;  %819 = vrot.lane.b32.xlu1 %v9771_v0, %s9554_s8 }
  0xb2   : > { %817 = vrot.lane.b32.xlu0 %v9789_v4, %s9554_s8 }
  0xb3   : > { %v604_v14 = vpop.permute.xlu2 %603 }
  0xb9   : > { %827 = vrot.lane.b32.xlu2 %v9801_v6, %s9554_s8  ;;  %825 = vrot.lane.b32.xlu1 %v9804_v7, %s9554_s8 }
  0xba   : > { %823 = vrot.lane.b32.xlu0 %v9807_v8, %s9554_s8 }
  0xbb   : > { %v610_v15 = vpop.permute.xlu2 %609  ;;  %v592_v16 = vpop.permute.xlu1 %591 }
  0xbc   : > { %v588_v18 = vpop.permute.xlu0 %587  ;;  %v620_v34 = vsel %vm613_vm0, %v592_v16, %v596_v12 }
  0xbd   : > { %v641_v42 = vmul.f32 %v9923_v32, %v620_v34  ;;  %v622_v47 = vsel %vm613_vm0, %v588_v18, %v592_v16  ;;  %v9996_v34 = vperm.slane %v567_v17, 2 }
  0xbe   : > { %v640_v52 = vmul.f32 %v9909_v24, %v622_v47 }
  0xc1   : > { %833 = vrot.lane.b32.xlu2 %v9816_v9, %s9554_s8  ;;  %831 = vrot.lane.b32.xlu1 %v9819_v10, %s9554_s8 }
  0xc2   : > { %829 = vrot.lane.b32.xlu0 %v9822_v11, %s9554_s8 }
  0xc3   : > { %v9906_v22 = vpop.permute.xlu2 %667  ;;  %v594_v23 = vpop.permute.xlu1 %593 }
  0xc4   : > { %v590_v25 = vpop.permute.xlu0 %589  ;;  %v621_v33 = vsel %vm613_vm0, %v594_v23, %v598_v13 }
  0xc5   : > { %v623_v26 = vsel %vm613_vm0, %v590_v25, %v594_v23  ;;  %v625_v27 = vsel %vm613_vm0, %v610_v15, %v590_v25  ;;  %v647_v39 = vmul.f32 %v9923_v32, %v621_v33 }
  0xc6   : > { %v645_v28 = vmul.f32 %v9902_v21, %v625_v27  ;;  %v646_v29 = vmul.f32 %v9909_v24, %v623_v26  ;;  %v9990_v26 = vperm.slane %v567_v17, 1 }
  0xc8   : > { %v654_v30 = vpack.c.bf16 %v646_v29, %v645_v28 }
  0xc9   : > { %901 = vrot.lane.b32.xlu2 %v9774_v1, %s9555_s28  ;;  %899 = vrot.lane.b32.xlu1 %v9792_v5, %s9555_s28 }
  0xca   : > { %660 = vst [vmem:[#allocation2 + $0x18] sm:$0xff] %v654_v30  ;;  %897 = vrot.lane.b32.xlu0 %v9777_v2, %s9555_s28 }
  0xcb   : > { %v9931_v35 = vpop.permute.xlu2 %673  ;;  %v602_v36 = vpop.permute.xlu1 %601 }
  0xcc   : > { %v619_v37 = vsel %vm613_vm0, %v598_v13, %v602_v36  ;;  %v600_v38 = vpop.permute.xlu0 %599 }
  0xcd   : > { %v648_v40 = vmul.f32 %v9921_v31, %v619_v37  ;;  %v618_v41 = vsel %vm613_vm0, %v596_v12, %v600_v38  ;;  %v616_v48 = vsel %vm613_vm0, %v600_v38, %v604_v14 }
  0xce   : > { %v642_v43 = vmul.f32 %v9921_v31, %v618_v41  ;;  %v643_v53 = vmul.f32 %v9941_v45, %v616_v48 }
  0xcf   : > { %v655_v44 = vpack.c.bf16 %v648_v40, %v647_v39 }
  0xd0   : > { %v652_v46 = vpack.c.bf16 %v642_v43, %v641_v42 }
  0xd1   : > { %661 = vst [vmem:[#allocation2 + $0x20] sm:$0xff] %v655_v44  ;;  %907 = vrot.lane.b32.xlu2 %v9786_v3, %s9555_s28  ;;  %905 = vrot.lane.b32.xlu1 %v9771_v0, %s9555_s28 }
  0xd2   : > { %658 = vst [vmem:[#allocation2 + $0x8] sm:$0xff] %v652_v46  ;;  %903 = vrot.lane.b32.xlu0 %v9789_v4, %s9555_s28 }
  0xd3   : > { %v9955_v50 = vpop.permute.xlu2 %679  ;;  %v608_v51 = vpop.permute.xlu1 %607 }
  0xd4   : > { %v614_v54 = vsel %vm613_vm0, %v604_v14, %v608_v51  ;;  %v624_v55 = vsel %vm613_vm0, %v608_v51, %v588_v18  ;;  %v606_v56 = vpop.permute.xlu0 %605  ;;  %v9982_v18 = vperm.slane %v567_v17, 0 }
  0xd5   : > { %v639_v57 = vmul.f32 %v9902_v21, %v624_v55  ;;  %v644_v58 = vmul.f32 %v9951_v49, %v614_v54  ;;  %v615_v59 = vsel %vm613_vm0, %v606_v56, %v610_v15  ;;  %v617_v60 = vsel %vm613_vm0, %v602_v36, %v606_v56 }
  0xd6   : > { %v649_v61 = vmul.f32 %v9941_v45, %v617_v60  ;;  %v650_v62 = vmul.f32 %v9951_v49, %v615_v59  ;;  %14664 = vst [vmem:[#allocation22_spill] sm:$0xff] %v9982_v18  ;;  %v10002_v36 = vperm.slane %v567_v17, 3  ;;  %v10035_v55 = vperm.slane %v567_v17, 5 }
  0xd7   : > { %v651_v63 = vpack.c.bf16 %v640_v52, %v639_v57  ;;  %v653_v12 = vpack.c.bf16 %v644_v58, %v643_v53  ;;  %v10023_v52 = vperm.slane %v567_v17, 4 }
  0xd8   : > { %v656_v13 = vpack.c.bf16 %v650_v62, %v649_v61  ;;  %14666 = vst [vmem:[#allocation24_spill] sm:$0xff] %v10035_v55 }
  0xd9   : > { %657 = vst [vmem:[#allocation2] sm:$0xff] %v651_v63  ;;  %913 = vrot.lane.b32.xlu2 %v9801_v6, %s9555_s28  ;;  %911 = vrot.lane.b32.xlu1 %v9804_v7, %s9555_s28 }
  0xda   : > { %659 = vst [vmem:[#allocation2 + $0x10] sm:$0xff] %v653_v12  ;;  %909 = vrot.lane.b32.xlu0 %v9807_v8, %s9555_s28 }
  0xdb   : > { %662 = vst [vmem:[#allocation2 + $0x28] sm:$0xff] %v656_v13  ;;  %v686_v14 = vpop.permute.xlu2 %685  ;;  %v666_v15 = vpop.permute.xlu1 %665 }
  0xdc   : > { %v664_v16 = vpop.permute.xlu0 %663  ;;  %v699_v20 = vsel %vm687_vm1, %v686_v14, %v666_v15  ;;  %14665 = vst [vmem:[#allocation23_spill] sm:$0xff] %v10023_v52 }
  0xdd   : > { %v719_v29 = vmul.f32 %v9982_v18, %v699_v20 }
  0xe1   : > { %919 = vrot.lane.b32.xlu2 %v9816_v9, %s9555_s28  ;;  %917 = vrot.lane.b32.xlu1 %v9819_v10, %s9555_s28 }
  0xe2   : > { %915 = vrot.lane.b32.xlu0 %v9822_v11, %s9555_s28 }
  0xe3   : > { %v9988_v23 = vpop.permute.xlu2 %741  ;;  %v672_v25 = vpop.permute.xlu1 %671 }
  0xe4   : > { %v670_v27 = vpop.permute.xlu0 %669  ;;  %v694_v38 = vsel %vm687_vm1, %v9906_v22, %v672_v25 }
  0xe5   : > { %v697_v28 = vsel %vm687_vm1, %v666_v15, %v670_v27  ;;  %v695_v37 = vsel %vm687_vm1, %v670_v27, %v9931_v35  ;;  %v715_v47 = vmul.f32 %v9996_v34, %v694_v38 }
  0xe6   : > { %v720_v30 = vmul.f32 %v9990_v26, %v697_v28  ;;  %v721_v43 = vmul.f32 %v9996_v34, %v695_v37  ;;  %v568_v28 = vld [vmem:[#allocation10 + $0xc] sm:$0x3f] }
  0xe7   : > { %v10075_v38 = vperm.slane %v568_v28, 1 }
  0xe8   : > { %v728_v33 = vpack.c.bf16 %v720_v30, %v719_v29  ;;  %v10067_v29 = vperm.slane %v568_v28, 0 }
  0xe9   : > { %973 = vrot.lane.b32.xlu1 %v9792_v5, %s9556_s16  ;;  %1045 = vrot.lane.b32.xlu2 %v9777_v2, %s9557_s12  ;;  %14668 = vst [vmem:[#allocation26_spill] sm:$0xff] %v10075_v38 }
  0xea   : > { %734 = vst [vmem:[#allocation2 + $0x48] sm:$0xff] %v728_v33  ;;  %971 = vrot.lane.b32.xlu0 %v9777_v2, %s9556_s16 }
  0xeb   : > { %v10012_v39 = vpop.permute.xlu2 %747  ;;  %v678_v40 = vpop.permute.xlu1 %677  ;;  %14667 = vst [vmem:[#allocation25_spill] sm:$0xff] %v10067_v29 }
  0xec   : > { %v693_v41 = vsel %vm687_vm1, %v9931_v35, %v678_v40  ;;  %v676_v42 = vpop.permute.xlu0 %675  ;;  %v696_v35 = vsel %vm687_vm1, %v664_v16, %v9906_v22 }
  0xed   : > { %v722_v44 = vmul.f32 %v10002_v36, %v693_v41  ;;  %v692_v46 = vsel %vm687_vm1, %v672_v25, %v676_v42  ;;  %v690_v54 = vsel %vm687_vm1, %v676_v42, %v9955_v50  ;;  %v714_v57 = vmul.f32 %v9990_v26, %v696_v35 }
  0xee   : > { %v716_v48 = vmul.f32 %v10002_v36, %v692_v46  ;;  %v717_v58 = vmul.f32 %v10023_v52, %v690_v54  ;;  %v10081_v46 = vperm.slane %v568_v28, 2 }
  0xef   : > { %v729_v51 = vpack.c.bf16 %v722_v44, %v721_v43 }
  0xf0   : > { %v726_v53 = vpack.c.bf16 %v716_v48, %v715_v47  ;;  %14669 = vst [vmem:[#allocation27_spill] sm:$0xff] %v10081_v46  ;;  %v10087_v47 = vperm.slane %v568_v28, 3 }
  0xf1   : > { %735 = vst [vmem:[#allocation2 + $0x50] sm:$0xff] %v729_v51  ;;  %1049 = vrot.lane.b32.xlu1 %v9774_v1, %s9557_s12  ;;  %1051 = vrot.lane.b32.xlu2 %v9789_v4, %s9557_s12 }
  0xf2   : > { %732 = vst [vmem:[#allocation2 + $0x38] sm:$0xff] %v726_v53  ;;  %1047 = vrot.lane.b32.xlu0 %v9792_v5, %s9557_s12 }
  0xf3   : > { %v10039_v56 = vpop.permute.xlu2 %753  ;;  %v684_v22 = vpop.permute.xlu1 %683  ;;  %14670 = vst [vmem:[#allocation28_spill] sm:$0xff] %v10087_v47 }
  0xf4   : > { %v688_v59 = vsel %vm687_vm1, %v9955_v50, %v684_v22  ;;  %v698_v60 = vsel %vm687_vm1, %v684_v22, %v664_v16  ;;  %v682_v61 = vpop.permute.xlu0 %681 }
  0xf5   : > { %v713_v62 = vmul.f32 %v9982_v18, %v698_v60  ;;  %v718_v63 = vmul.f32 %v10035_v55, %v688_v59  ;;  %v689_v12 = vsel %vm687_vm1, %v682_v61, %v686_v14  ;;  %v691_v13 = vsel %vm687_vm1, %v678_v40, %v682_v61 }
  0xf6   : > { %v723_v15 = vmul.f32 %v10023_v52, %v691_v13  ;;  %v724_v17 = vmul.f32 %v10035_v55, %v689_v12 }
  0xf7   : > { %v725_v20 = vpack.c.bf16 %v714_v57, %v713_v62  ;;  %v727_v50 = vpack.c.bf16 %v718_v63, %v717_v58  ;;  %v10108_v63 = vperm.slane %v568_v28, 4 }
  0xf8   : > { %v730_v25 = vpack.c.bf16 %v724_v17, %v723_v15  ;;  %v10120_v15 = vperm.slane %v568_v28, 5 }
  0xf9   : > { %731 = vst [vmem:[#allocation2 + $0x30] sm:$0xff] %v725_v20  ;;  %1055 = vrot.lane.b32.xlu1 %v9786_v3, %s9557_s12  ;;  %1057 = vrot.lane.b32.xlu2 %v9807_v8, %s9557_s12 }
  0xfa   : > { %733 = vst [vmem:[#allocation2 + $0x40] sm:$0xff] %v727_v50  ;;  %1053 = vrot.lane.b32.xlu0 %v9771_v0, %s9557_s12 }
  0xfb   : > { %736 = vst [vmem:[#allocation2 + $0x58] sm:$0xff] %v730_v25  ;;  %v760_v14 = vpop.permute.xlu2 %759  ;;  %v740_v16 = vpop.permute.xlu1 %739 }
  0xfc   : > { %v738_v27 = vpop.permute.xlu0 %737  ;;  %v773_v30 = vsel %vm761_vm2, %v760_v14, %v740_v16  ;;  %14671 = vst [vmem:[#allocation29_spill] sm:$0xff] %v10108_v63 }
  0xfd   : > { %v793_v42 = vmul.f32 %v10067_v29, %v773_v30  ;;  %14672 = vst [vmem:[#allocation30_spill] sm:$0xff] %v10120_v15 }
 0x101   : > { %1061 = vrot.lane.b32.xlu1 %v9801_v6, %s9557_s12  ;;  %1063 = vrot.lane.b32.xlu2 %v9822_v11, %s9557_s12 }
 0x102   : > { %1059 = vrot.lane.b32.xlu0 %v9804_v7, %s9557_s12 }
 0x103   : > { %v10073_v33 = vpop.permute.xlu2 %815  ;;  %v746_v37 = vpop.permute.xlu1 %745 }
 0x104   : > { %v744_v40 = vpop.permute.xlu0 %743  ;;  %v768_v51 = vsel %vm761_vm2, %v9988_v23, %v746_v37 }
 0x105   : > { %v771_v41 = vsel %vm761_vm2, %v740_v16, %v744_v40  ;;  %v769_v48 = vsel %vm761_vm2, %v744_v40, %v10012_v39  ;;  %v789_v60 = vmul.f32 %v10081_v46, %v768_v51 }
 0x106   : > { %v794_v43 = vmul.f32 %v10075_v38, %v771_v41  ;;  %v795_v57 = vmul.f32 %v10081_v46, %v769_v48 }
 0x108   : > { %v802_v44 = vpack.c.bf16 %v794_v43, %v793_v42 }
 0x109   : > { %977 = vrot.lane.b32.xlu1 %v9789_v4, %s9556_s16  ;;  %979 = vrot.lane.b32.xlu2 %v9771_v0, %s9556_s16 }
 0x10a   : > { %808 = vst [vmem:[#allocation2 + $0x78] sm:$0xff] %v802_v44  ;;  %975 = vrot.lane.b32.xlu0 %v9774_v1, %s9556_s16 }
 0x10b   : > { %v10097_v53 = vpop.permute.xlu2 %821  ;;  %v752_v35 = vpop.permute.xlu1 %751 }
 0x10c   : > { %v767_v54 = vsel %vm761_vm2, %v10012_v39, %v752_v35  ;;  %v750_v22 = vpop.permute.xlu0 %749  ;;  %v770_v39 = vsel %vm761_vm2, %v738_v27, %v9988_v23 }
 0x10d   : > { %v796_v58 = vmul.f32 %v10087_v47, %v767_v54  ;;  %v766_v59 = vsel %vm761_vm2, %v746_v37, %v750_v22  ;;  %v764_v13 = vsel %vm761_vm2, %v750_v22, %v10039_v56  ;;  %v788_v20 = vmul.f32 %v10075_v38, %v770_v39 }
 0x10e   : > { %v790_v61 = vmul.f32 %v10087_v47, %v766_v59  ;;  %v791_v50 = vmul.f32 %v10108_v63, %v764_v13 }
 0x10f   : > { %v803_v62 = vpack.c.bf16 %v796_v58, %v795_v57 }
 0x110   : > { %v800_v12 = vpack.c.bf16 %v790_v61, %v789_v60 }
 0x111   : > { %809 = vst [vmem:[#allocation2 + $0x80] sm:$0xff] %v803_v62  ;;  %983 = vrot.lane.b32.xlu1 %v9807_v8, %s9556_s16  ;;  %985 = vrot.lane.b32.xlu2 %v9804_v7, %s9556_s16 }
 0x112   : > { %806 = vst [vmem:[#allocation2 + $0x68] sm:$0xff] %v800_v12  ;;  %981 = vrot.lane.b32.xlu0 %v9786_v3, %s9556_s16 }
 0x113   : > { %v10124_v17 = vpop.permute.xlu2 %827  ;;  %v758_v23 = vpop.permute.xlu1 %757 }
 0x114   : > { %v762_v25 = vsel %vm761_vm2, %v10039_v56, %v758_v23  ;;  %v772_v16 = vsel %vm761_vm2, %v758_v23, %v738_v27  ;;  %v756_v28 = vpop.permute.xlu0 %755 }
 0x115   : > { %v787_v30 = vmul.f32 %v10067_v29, %v772_v16  ;;  %v792_v37 = vmul.f32 %v10120_v15, %v762_v25  ;;  %v763_v40 = vsel %vm761_vm2, %v756_v28, %v760_v14  ;;  %v765_v41 = vsel %vm761_vm2, %v752_v35, %v756_v28  ;;  %v569_v35 = vld [vmem:[#allocation10 + $0x12] sm:$0x3f] }
 0x116   : > { %v797_v42 = vmul.f32 %v10108_v63, %v765_v41  ;;  %v798_v43 = vmul.f32 %v10120_v15, %v763_v40  ;;  %v10152_v54 = vperm.slane %v569_v35, 0  ;;  %v10160_v59 = vperm.slane %v569_v35, 1 }
 0x117   : > { %v799_v44 = vpack.c.bf16 %v788_v20, %v787_v30  ;;  %v801_v56 = vpack.c.bf16 %v792_v37, %v791_v50  ;;  %v10166_v13 = vperm.slane %v569_v35, 2  ;;  %v10172_v23 = vperm.slane %v569_v35, 3 }
 0x118   : > { %v804_v48 = vpack.c.bf16 %v798_v43, %v797_v42  ;;  %14673 = vst [vmem:[#allocation31_spill] sm:$0xff] %v10152_v54 }
 0x119   : > { %805 = vst [vmem:[#allocation2 + $0x60] sm:$0xff] %v799_v44  ;;  %989 = vrot.lane.b32.xlu1 %v9822_v11, %s9556_s16  ;;  %1119 = vrot.lane.b32.xlu2 %v9777_v2, %s9558_s15 }
 0x11a   : > { %807 = vst [vmem:[#allocation2 + $0x70] sm:$0xff] %v801_v56  ;;  %987 = vrot.lane.b32.xlu0 %v9801_v6, %s9556_s16  ;;  %v10193_v56 = vperm.slane %v569_v35, 4 }
 0x11b   : > { %810 = vst [vmem:[#allocation2 + $0x88] sm:$0xff] %v804_v48  ;;  %v834_v14 = vpop.permute.xlu2 %833  ;;  %v814_v27 = vpop.permute.xlu1 %813 }
 0x11c   : > { %v812_v51 = vpop.permute.xlu0 %811  ;;  %v847_v22 = vsel %vm835_vm3, %v834_v14, %v814_v27  ;;  %14674 = vst [vmem:[#allocation32_spill] sm:$0xff] %v10160_v59 }
 0x11d   : > { %v867_v62 = vmul.f32 %v10152_v54, %v847_v22  ;;  %14675 = vst [vmem:[#allocation33_spill] sm:$0xff] %v10166_v13  ;;  %v10205_v22 = vperm.slane %v569_v35, 5 }
 0x11e   : > { %14676 = vst [vmem:[#allocation34_spill] sm:$0xff] %v10172_v23 }
 0x11f   : > { %14677 = vst [vmem:[#allocation35_spill] sm:$0xff] %v10193_v56 }
 0x120   : > { %14678 = vst [vmem:[#allocation36_spill] sm:$0xff] %v10205_v22 }
 0x121   : > { %1123 = vrot.lane.b32.xlu1 %v9774_v1, %s9558_s15  ;;  %1125 = vrot.lane.b32.xlu2 %v9789_v4, %s9558_s15 }
 0x122   : > { %1121 = vrot.lane.b32.xlu0 %v9792_v5, %s9558_s15 }
 0x123   : > { %v10158_v57 = vpop.permute.xlu2 %901  ;;  %v820_v58 = vpop.permute.xlu1 %819 }
 0x124   : > { %v818_v60 = vpop.permute.xlu0 %817  ;;  %v842_v50 = vsel %vm835_vm3, %v10073_v33, %v820_v58 }
 0x125   : > { %v845_v61 = vsel %vm835_vm3, %v814_v27, %v818_v60  ;;  %v843_v20 = vsel %vm835_vm3, %v818_v60, %v10097_v53  ;;  %v863_v42 = vmul.f32 %v10166_v13, %v842_v50 }
 0x126   : > { %v868_v12 = vmul.f32 %v10160_v59, %v845_v61  ;;  %v869_v37 = vmul.f32 %v10166_v13, %v843_v20 }
 0x128   : > { %v876_v39 = vpack.c.bf16 %v868_v12, %v867_v62 }
 0x129   : > { %1129 = vrot.lane.b32.xlu1 %v9786_v3, %s9558_s15  ;;  %1065 = vrot.lane.b32.xlu2 %v9819_v10, %s9557_s12 }
 0x12a   : > { %882 = vst [vmem:[#allocation2 + $0xa8] sm:$0xff] %v876_v39  ;;  %1127 = vrot.lane.b32.xlu0 %v9771_v0, %s9558_s15 }
 0x12b   : > { %v10182_v25 = vpop.permute.xlu2 %907  ;;  %v826_v16 = vpop.permute.xlu1 %825 }
 0x12c   : > { %v841_v28 = vsel %vm835_vm3, %v10097_v53, %v826_v16  ;;  %v824_v30 = vpop.permute.xlu0 %823  ;;  %v844_v53 = vsel %vm835_vm3, %v812_v51, %v10073_v33 }
 0x12d   : > { %v870_v40 = vmul.f32 %v10172_v23, %v841_v28  ;;  %v840_v41 = vsel %vm835_vm3, %v820_v58, %v824_v30  ;;  %v838_v27 = vsel %vm835_vm3, %v824_v30, %v10124_v17  ;;  %v862_v60 = vmul.f32 %v10160_v59, %v844_v53 }
 0x12e   : > { %v864_v43 = vmul.f32 %v10172_v23, %v840_v41  ;;  %v865_v61 = vmul.f32 %v10193_v56, %v838_v27 }
 0x12f   : > { %v877_v44 = vpack.c.bf16 %v870_v40, %v869_v37 }
 0x130   : > { %v874_v48 = vpack.c.bf16 %v864_v43, %v863_v42  ;;  %v570_v42 = vld [vmem:[#allocation10 + $0x1e] sm:$0x3f] }
 0x131   : > { %883 = vst [vmem:[#allocation2 + $0xb0] sm:$0xff] %v877_v44  ;;  %991 = vrot.lane.b32.xlu1 %v9819_v10, %s9556_s16  ;;  %993 = vrot.lane.b32.xlu2 %v9816_v9, %s9556_s16  ;;  %v10233_v43 = vperm.slane %v570_v42, 0  ;;  %v10235_v44 = vperm.slane %v570_v42, 1 }
 0x132   : > { %880 = vst [vmem:[#allocation2 + $0x98] sm:$0xff] %v874_v48  ;;  %1067 = vrot.lane.b32.xlu0 %v9816_v9, %s9557_s12 }
 0x133   : > { %v10209_v58 = vpop.permute.xlu2 %913  ;;  %v832_v33 = vpop.permute.xlu1 %831  ;;  %14679 = vst [vmem:[#allocation37_spill] sm:$0xff] %v10233_v43 }
 0x134   : > { %v836_v62 = vsel %vm835_vm3, %v10124_v17, %v832_v33  ;;  %v846_v12 = vsel %vm835_vm3, %v832_v33, %v812_v51  ;;  %v830_v35 = vpop.permute.xlu0 %829  ;;  %14680 = vst [vmem:[#allocation38_spill] sm:$0xff] %v10235_v44 }
 0x135   : > { %v861_v39 = vmul.f32 %v10152_v54, %v846_v12  ;;  %v866_v20 = vmul.f32 %v10205_v22, %v836_v62  ;;  %v837_v50 = vsel %vm835_vm3, %v830_v35, %v834_v14  ;;  %v839_v28 = vsel %vm835_vm3, %v826_v16, %v830_v35 }
 0x136   : > { %v871_v30 = vmul.f32 %v10193_v56, %v839_v28  ;;  %v872_v37 = vmul.f32 %v10205_v22, %v837_v50 }
 0x137   : > { %v873_v40 = vpack.c.bf16 %v862_v60, %v861_v39  ;;  %v875_v17 = vpack.c.bf16 %v866_v20, %v865_v61  ;;  %v10262_v39 = vperm.slane %v570_v42, 3 }
 0x138   : > { %v878_v41 = vpack.c.bf16 %v872_v37, %v871_v30 }
 0x139   : > { %879 = vst [vmem:[#allocation2 + $0x90] sm:$0xff] %v873_v40  ;;  %1133 = vrot.lane.b32.xlu1 %v9804_v7, %s9558_s15  ;;  %1135 = vrot.lane.b32.xlu2 %v9801_v6, %s9558_s15 }
 0x13a   : > { %881 = vst [vmem:[#allocation2 + $0xa0] sm:$0xff] %v875_v17  ;;  %1131 = vrot.lane.b32.xlu0 %v9807_v8, %s9558_s15 }
 0x13b   : > { %884 = vst [vmem:[#allocation2 + $0xb8] sm:$0xff] %v878_v41  ;;  %v920_v14 = vpop.permute.xlu2 %919  ;;  %v900_v51 = vpop.permute.xlu1 %899 }
 0x13c   : > { %v898_v16 = vpop.permute.xlu0 %897  ;;  %14682 = vst [vmem:[#allocation40_spill] sm:$0xff] %v10262_v39 }
 0x13d   : > { %v930_v6 = vsel %vm921_vm4, %v898_v16, %v10158_v57 }
 0x141   : > { %1139 = vrot.lane.b32.xlu1 %v9819_v10, %s9558_s15  ;;  %1141 = vrot.lane.b32.xlu2 %v9816_v9, %s9558_s15  ;;  %v947_v10 = vmul.f32 %v10233_v43, %v930_v6  ;;  %v10271_v6 = vperm.slane %v570_v42, 4 }
 0x142   : > { %1137 = vrot.lane.b32.xlu0 %v9822_v11, %s9558_s15 }
 0x143   : > { %v906_v48 = vpop.permute.xlu1 %905  ;;  %v10246_v53 = vpop.permute.xlu2 %1045  ;;  %14683 = vst [vmem:[#allocation41_spill] sm:$0xff] %v10271_v6 }
 0x144   : > { %v928_v27 = vsel %vm921_vm4, %v10158_v57, %v906_v48  ;;  %v904_v33 = vpop.permute.xlu0 %903  ;;  %v10260_v57 = vperm.slane %v570_v42, 2 }
 0x145   : > { %v948_v60 = vmul.f32 %v10235_v44, %v928_v27  ;;  %v929_v9 = vsel %vm921_vm4, %v904_v33, %v10182_v25  ;;  %v931_v61 = vsel %vm921_vm4, %v900_v51, %v904_v33  ;;  %v10273_v27 = vperm.slane %v570_v42, 5 }
 0x146   : > { %v953_v11 = vmul.f32 %v10233_v43, %v931_v61  ;;  %v954_v62 = vmul.f32 %v10235_v44, %v929_v9  ;;  %14681 = vst [vmem:[#allocation39_spill] sm:$0xff] %v10260_v57  ;;  %v933_v33 = vsel %vm921_vm4, %v920_v14, %v900_v51 }
 0x147   : > { %v959_v12 = vpack.c.bf16 %v948_v60, %v947_v10  ;;  %14684 = vst [vmem:[#allocation42_spill] sm:$0xff] %v10273_v27 }
 0x148   : > { %v962_v35 = vpack.c.bf16 %v954_v62, %v953_v11 }
 0x149   : > { %965 = vst [vmem:[#allocation2 + $0xf0] sm:$0xff] %v959_v12  ;;  %v958_v12 = vmul.f32 %v10273_v27, %v933_v33 }
 0x14a   : > { %968 = vst [vmem:[#allocation2 + $0x108] sm:$0xff] %v962_v35 }
 0x14b   : > { %v912_v20 = vpop.permute.xlu1 %911  ;;  %v1052_v50 = vpop.permute.xlu2 %1051 }
 0x14c   : > { %v910_v28 = vpop.permute.xlu0 %909  ;;  %v927_v10 = vsel %vm921_vm4, %v10182_v25, %v912_v20 }
 0x14d   : > { %v924_v30 = vsel %vm921_vm4, %v910_v28, %v10209_v58  ;;  %v926_v37 = vsel %vm921_vm4, %v906_v48, %v910_v28  ;;  %v955_v35 = vmul.f32 %v10260_v57, %v927_v10  ;;  %v572_v10 = vld [vmem:[#allocation10 + $0x2a] sm:$0x3f] }
 0x14e   : > { %v949_v40 = vmul.f32 %v10260_v57, %v926_v37  ;;  %v950_v17 = vmul.f32 %v10262_v39, %v924_v30  ;;  %v10326_v22 = vperm.slane %v572_v10, 2  ;;  %v10328_v56 = vperm.slane %v572_v10, 3 }
 0x150   : > { %v960_v41 = vpack.c.bf16 %v950_v17, %v949_v40  ;;  %14687 = vst [vmem:[#allocation45_spill] sm:$0xff] %v10326_v22 }
 0x151   : > { %14688 = vst [vmem:[#allocation46_spill] sm:$0xff] %v10328_v56 }
 0x152   : > { %966 = vst [vmem:[#allocation2 + $0xf8] sm:$0xff] %v960_v41 }
 0x153   : > { %v918_v60 = vpop.permute.xlu1 %917  ;;  %v1058_v9 = vpop.permute.xlu2 %1057 }
 0x154   : > { %v922_v48 = vsel %vm921_vm4, %v10209_v58, %v918_v60  ;;  %v932_v61 = vsel %vm921_vm4, %v918_v60, %v898_v16  ;;  %v916_v11 = vpop.permute.xlu0 %915  ;;  %v10306_v60 = vperm.slane %v572_v10, 0 }
 0x155   : > { %v951_v42 = vmul.f32 %v10271_v6, %v922_v48  ;;  %v952_v62 = vmul.f32 %v10273_v27, %v932_v61  ;;  %v923_v51 = vsel %vm921_vm4, %v916_v11, %v920_v14  ;;  %v925_v25 = vsel %vm921_vm4, %v912_v20, %v916_v11 }
 0x156   : > { %v956_v58 = vmul.f32 %v10262_v39, %v925_v25  ;;  %v957_v28 = vmul.f32 %v10271_v6, %v923_v51  ;;  %14685 = vst [vmem:[#allocation43_spill] sm:$0xff] %v10306_v60  ;;  %v10308_v48 = vperm.slane %v572_v10, 1 }
 0x157   : > { %v961_v16 = vpack.c.bf16 %v952_v62, %v951_v42 }
 0x158   : > { %v963_v30 = vpack.c.bf16 %v956_v58, %v955_v35  ;;  %v964_v37 = vpack.c.bf16 %v958_v12, %v957_v28  ;;  %14686 = vst [vmem:[#allocation44_spill] sm:$0xff] %v10308_v48 }
 0x159   : > { %967 = vst [vmem:[#allocation2 + $0x100] sm:$0xff] %v961_v16 }
 0x15a   : > { %969 = vst [vmem:[#allocation2 + $0x110] sm:$0xff] %v963_v30 }
 0x15b   : > { %970 = vst [vmem:[#allocation2 + $0x118] sm:$0xff] %v964_v37  ;;  %v10295_v40 = vpop.permute.xlu1 %973  ;;  %v10297_v14 = vpop.permute.xlu2 %1063 }
 0x15c   : > { %v10299_v17 = vpop.permute.xlu0 %971 }
 0x163   : > { %v1050_v20 = vpop.permute.xlu1 %1049  ;;  %v10301_v41 = vpop.permute.xlu2 %979 }
 0x164   : > { %v10303_v33 = vpop.permute.xlu0 %1047  ;;  %v1078_v11 = vsel %vm1069_vm5, %v10246_v53, %v1050_v20 }
 0x165   : > { %v1079_v61 = vsel %vm1069_vm5, %v10303_v33, %v1052_v50  ;;  %v1095_v28 = vmul.f32 %v10306_v60, %v1078_v11 }
 0x166   : > { %v1101_v12 = vmul.f32 %v10306_v60, %v1079_v61  ;;  %v888_v61 = vpack.c.bf16 %v9789_v4, %v9792_v5 }
 0x168   : > { %894 = vst [vmem:[#allocation2 + $0xd8] sm:$0xff] %v888_v61 }
 0x16b   : > { %v1056_v42 = vpop.permute.xlu1 %1055  ;;  %v10316_v62 = vpop.permute.xlu2 %985 }
 0x16c   : > { %v1077_v51 = vsel %vm1069_vm5, %v1052_v50, %v1056_v42  ;;  %v1054_v25 = vpop.permute.xlu0 %1053  ;;  %v885_v50 = vpack.c.bf16 %v9774_v1, %v9777_v2 }
 0x16d   : > { %v1102_v35 = vmul.f32 %v10308_v48, %v1077_v51  ;;  %v1076_v58 = vsel %vm1069_vm5, %v1050_v20, %v1054_v25  ;;  %v1074_v20 = vsel %vm1069_vm5, %v1054_v25, %v1058_v9 }
 0x16e   : > { %v1096_v16 = vmul.f32 %v10308_v48, %v1076_v58  ;;  %891 = vst [vmem:[#allocation2 + $0xc0] sm:$0xff] %v885_v50  ;;  %v1097_v58 = vmul.f32 %v10326_v22, %v1074_v20 }
 0x16f   : > { %v1110_v30 = vpack.c.bf16 %v1102_v35, %v1101_v12 }
 0x170   : > { %v1107_v37 = vpack.c.bf16 %v1096_v16, %v1095_v28  ;;  %v571_v16 = vld [vmem:[#allocation10 + $0x24] sm:$0x3f] }
 0x171   : > { %1116 = vst [vmem:[#allocation2 + $0x168] sm:$0xff] %v1110_v30  ;;  %v10350_v20 = vperm.slane %v571_v16, 0  ;;  %v10382_v27 = vperm.slane %v571_v16, 2 }
 0x172   : > { %1113 = vst [vmem:[#allocation2 + $0x150] sm:$0xff] %v1107_v37 }
 0x173   : > { %v1062_v11 = vpop.permute.xlu1 %1061  ;;  %v10336_v51 = vpop.permute.xlu2 %1119  ;;  %14689 = vst [vmem:[#allocation47_spill] sm:$0xff] %v10350_v20 }
 0x174   : > { %v1072_v12 = vsel %vm1069_vm5, %v1058_v9, %v1062_v11  ;;  %v1060_v35 = vpop.permute.xlu0 %1059  ;;  %14693 = vst [vmem:[#allocation51_spill] sm:$0xff] %v10382_v27 }
 0x175   : > { %v1098_v1 = vmul.f32 %v10328_v56, %v1072_v12  ;;  %v1073_v2 = vsel %vm1069_vm5, %v1060_v35, %v10297_v14  ;;  %v1075_v4 = vsel %vm1069_vm5, %v1056_v42, %v1060_v35  ;;  %v10352_v12 = vperm.slane %v571_v16, 1 }
 0x176   : > { %v1103_v5 = vmul.f32 %v10326_v22, %v1075_v4  ;;  %v1104_v25 = vmul.f32 %v10328_v56, %v1073_v2  ;;  %v7431_v22 = vld [vmem:[#allocation2 + $0x60] sm:$0xf] }
 0x177   : > { %v1108_v28 = vpack.c.bf16 %v1098_v1, %v1097_v58  ;;  %14690 = vst [vmem:[#allocation48_spill] sm:$0xff] %v10352_v12 }
 0x178   : > { %v1111_v9 = vpack.c.bf16 %v1104_v25, %v1103_v5  ;;  %v8923_v30 = vld [vmem:[#allocation2 + $0x164] sm:$0xf0]  ;;  %v7553_v37 = vld [vmem:[#allocation2 + $0x168] sm:$0xf0] }
 0x179   : > { %1114 = vst [vmem:[#allocation2 + $0x158] sm:$0xff] %v1108_v28  ;;  %v7551_v50 = vld [vmem:[#allocation2 + $0x150] sm:$0xf]  ;;  %v8920_v61 = vld [vmem:[#allocation2 + $0x154] sm:$0xf] }
 0x17a   : > { %1117 = vst [vmem:[#allocation2 + $0x170] sm:$0xff] %v1111_v9  ;;  %v7552_v42 = vor.u32 %v8923_v30, %v7551_v50  ;;  %v7556_v35 = vor.u32 %v8920_v61, %v7553_v37  ;;  %v10364_v9 = vperm.slane %v572_v10, 4  ;;  %v10366_v30 = vperm.slane %v572_v10, 5 }
 0x17b   : > { %v978_v4 = vpop.permute.xlu1 %977  ;;  %v10354_v6 = vpop.permute.xlu2 %1125 }
 0x17c   : > { %v976_v58 = vpop.permute.xlu0 %975  ;;  %1544 = vmatpush.bf16.msra.mxu0 %v7552_v42  ;;  %1572 = vmatpush.bf16.msra.mxu2 %v7556_v35  ;;  %14691 = vst [vmem:[#allocation49_spill] sm:$0xff] %v10364_v9  ;;  %v1005_v61 = vsel %vm995_vm6, %v10295_v40, %v978_v4 }
 0x17d   : > { %v1002_v1 = vsel %vm995_vm6, %v976_v58, %v10301_v41  ;;  %v1004_v2 = vsel %vm995_vm6, %v10299_v17, %v976_v58  ;;  %14692 = vst [vmem:[#allocation50_spill] sm:$0xff] %v10366_v30 }
 0x17e   : > { %v1021_v5 = vmul.f32 %v10350_v20, %v1004_v2  ;;  %v1022_v25 = vmul.f32 %v10352_v12, %v1002_v1 }
 0x180   : > { %v1033_v28 = vpack.c.bf16 %v1022_v25, %v1021_v5  ;;  %v1027_v5 = vmul.f32 %v10350_v20, %v1005_v61 }
 0x182   : > { %1039 = vst [vmem:[#allocation2 + $0x120] sm:$0xff] %v1033_v28 }
 0x183   : > { %v984_v37 = vpop.permute.xlu1 %983  ;;  %v1066_v50 = vpop.permute.xlu2 %1065 }
 0x184   : > { %v1070_v42 = vsel %vm1069_vm5, %v1062_v11, %v1066_v50  ;;  %v1080_v35 = vsel %vm1069_vm5, %v1066_v50, %v10246_v53  ;;  %v982_v58 = vpop.permute.xlu0 %981  ;;  %v10384_v11 = vperm.slane %v571_v16, 3 }
 0x185   : > { %v1099_v1 = vmul.f32 %v10364_v9, %v1070_v42  ;;  %v1100_v10 = vmul.f32 %v10366_v30, %v1080_v35  ;;  %v1003_v2 = vsel %vm995_vm6, %v978_v4, %v982_v58  ;;  %v1001_v53 = vsel %vm995_vm6, %v982_v58, %v10316_v62 }
 0x186   : > { %v1028_v28 = vmul.f32 %v10352_v12, %v1003_v2  ;;  %14694 = vst [vmem:[#allocation52_spill] sm:$0xff] %v10384_v11  ;;  %v10389_v42 = vperm.slane %v571_v16, 4  ;;  %v10391_v35 = vperm.slane %v571_v16, 5  ;;  %v1000_v4 = vsel %vm995_vm6, %v10301_v41, %v984_v37 }
 0x187   : > { %v1109_v25 = vpack.c.bf16 %v1100_v10, %v1099_v1  ;;  %v1029_v10 = vmul.f32 %v10382_v27, %v1001_v53 }
 0x188   : > { %v1036_v50 = vpack.c.bf16 %v1028_v28, %v1027_v5  ;;  %14695 = vst [vmem:[#allocation53_spill] sm:$0xff] %v10389_v42 }
 0x189   : > { %1115 = vst [vmem:[#allocation2 + $0x160] sm:$0xff] %v1109_v25 }
 0x18a   : > { %14696 = vst [vmem:[#allocation54_spill] sm:$0xff] %v10391_v35 }
 0x18b   : > { %1042 = vst [vmem:[#allocation2 + $0x138] sm:$0xff] %v1036_v50  ;;  %v990_v61 = vpop.permute.xlu1 %989  ;;  %v994_v1 = vpop.permute.xlu2 %993 }
 0x18c   : > { %v999_v2 = vsel %vm995_vm6, %v10316_v62, %v990_v61  ;;  %v997_v58 = vsel %vm995_vm6, %v990_v61, %v994_v1  ;;  %v1007_v16 = vsel %vm995_vm6, %v994_v1, %v10295_v40  ;;  %v10405_v5 = vpop.permute.xlu0 %987  ;;  %v1023_v62 = vmul.f32 %v10382_v27, %v1000_v4  ;;  %v7527_v1 = vld [vmem:[#allocation2 + $0x120] sm:$0xf] }
 0x18d   : > { %v1030_v41 = vmul.f32 %v10384_v11, %v999_v2  ;;  %v1031_v25 = vmul.f32 %v10389_v42, %v997_v58  ;;  %v1032_v28 = vmul.f32 %v10391_v35, %v1007_v16  ;;  %v998_v53 = vsel %vm995_vm6, %v984_v37, %v10405_v5  ;;  %v8914_v2 = vld [vmem:[#allocation2 + $0x124] sm:$0xf] }
 0x18e   : > { %v1024_v50 = vmul.f32 %v10384_v11, %v998_v53  ;;  %v886_v40 = vpack.c.bf16 %v9807_v8, %v9771_v0  ;;  %v889_v58 = vpack.c.bf16 %v9804_v7, %v9786_v3  ;;  %v8911_v0 = vld [vmem:[#allocation2 + $0x104] sm:$0xf0]  ;;  %v7505_v8 = vld [vmem:[#allocation2 + $0x108] sm:$0xf0]  ;;  %v7479_v3 = vld [vmem:[#allocation2 + $0xc0] sm:$0xf] }
 0x18f   : > { %v1037_v61 = vpack.c.bf16 %v1030_v41, %v1029_v10  ;;  %v1038_v39 = vpack.c.bf16 %v1032_v28, %v1031_v25  ;;  %v7503_v10 = vld [vmem:[#allocation2 + $0xf0] sm:$0xf]  ;;  %v8908_v41 = vld [vmem:[#allocation2 + $0xf4] sm:$0xf]  ;;  %v8905_v7 = vld [vmem:[#allocation2 + $0xd4] sm:$0xf0] }
 0x190   : > { %v1034_v57 = vpack.c.bf16 %v1024_v50, %v1023_v62  ;;  %892 = vst [vmem:[#allocation2 + $0xc8] sm:$0xff] %v886_v40  ;;  %v10421_v28 = vld [vmem:[#allocation10 + $0x30] sm:$0x3f]  ;;  %v9343_v62 = vld [vmem:[%s9756_s30 + $0x28] sm:$0xff]  ;;  %v7508_v11 = vor.u32 %v8908_v41, %v7505_v8 }
 0x191   : > { %1043 = vst [vmem:[#allocation2 + $0x140] sm:$0xff] %v1037_v61  ;;  %v9344_v61 = vld [vmem:[%s9756_s30 + $0x58] sm:$0xff]  ;;  %v10429_v40 = vperm.slane %v10421_v28, 0 }
 0x192   : > { %1044 = vst [vmem:[#allocation2 + $0x148] sm:$0xff] %v1038_v39  ;;  %v8917_v16 = vld [vmem:[#allocation2 + $0x134] sm:$0xf0]  ;;  %v7529_v56 = vld [vmem:[#allocation2 + $0x138] sm:$0xf0] }
 0x193   : > { %1040 = vst [vmem:[#allocation2 + $0x128] sm:$0xff] %v1034_v57  ;;  %v1124_v37 = vpop.permute.xlu1 %1123  ;;  %v7528_v4 = vor.u32 %v8917_v16, %v7527_v1  ;;  %v7532_v53 = vor.u32 %v8914_v2, %v7529_v56  ;;  %v8902_v57 = vld [vmem:[#allocation2 + $0xc4] sm:$0xf]  ;;  %v7481_v39 = vld [vmem:[#allocation2 + $0xd8] sm:$0xf0]  ;;  %v9345_v1 = vld [vmem:[%s9756_s30 + $0x50] sm:$0xff]  ;;  %v7504_v16 = vor.u32 %v8911_v0, %v7503_v10  ;;  %v10459_v44 = vpop.permute.xlu2 %1135 }
 0x194   : > { %v10419_v25 = vpop.permute.xlu0 %1121  ;;  %895 = vst [vmem:[#allocation2 + $0xe0] sm:$0xff] %v889_v58  ;;  %v9342_v56 = vld [vmem:[%s9756_s30 + $0x20] sm:$0xff]  ;;  %v890_v2 = vpack.c.bf16 %v9344_v61, %v9345_v1  ;;  %v10432_v58 = vperm.slane %v10421_v28, 1  ;;  %v1152_v10 = vsel %vm1143_vm7, %v10336_v51, %v1124_v37  ;;  %v9559_v0 = vmov 0   ;;  %v8899_v1 = vld [vmem:[#allocation2 + $0xa4] sm:$0xf0] }
 0x195   : > { %1545 = vmatpush.bf16.msra.mxu0 %v7528_v4  ;;  %1573 = vmatpush.bf16.msra.mxu2 %v7532_v53  ;;  %v887_v50 = vpack.c.bf16 %v9343_v62, %v9342_v56  ;;  %14697 = vst [vmem:[#allocation55_spill] sm:$0xff] %v10429_v40  ;;  %v7480_v4 = vor.u32 %v8905_v7, %v7479_v3  ;;  %v7455_v7 = vld [vmem:[#allocation2 + $0x90] sm:$0xf]  ;;  %s14848_s30 = smul.u32 96, %s9750_s26 }
 0x196   : > { %14698 = vst [vmem:[#allocation56_spill] sm:$0xff] %v10432_v58  ;;  %v7484_v53 = vor.u32 %v8902_v57, %v7481_v39  ;;  %v1153_v56 = vsel %vm1143_vm7, %v10419_v25, %v10354_v6  ;;  %9339 = vset.pattern.permute.xlu0 %v9559_v0  ;;  %9340 = vset.pattern.permute.xlu1 %v9559_v0  ;;  %v8896_v57 = vld [vmem:[#allocation2 + $0x94] sm:$0xf] }
 0x197   : > { %893 = vst [vmem:[#allocation2 + $0xd0] sm:$0xff] %v887_v50  ;;  %9341 = vset.pattern.permute.xlu2 %v9559_v0  ;;  %v1175_v39 = vmul.f32 %v10429_v40, %v1153_v56  ;;  %v1169_v61 = vmul.f32 %v10429_v40, %v1152_v10  ;;  %v7456_v27 = vor.u32 %v8899_v1, %v7455_v7  ;;  %v8890_v56 = vld [vmem:[#allocation2 + $0x64] sm:$0xf] }
 0x198   : > { %896 = vst [vmem:[#allocation2 + $0xe8] sm:$0xff] %v890_v2  ;;  %v7457_v2 = vld [vmem:[#allocation2 + $0xa8] sm:$0xf0] }
 0x199   : > { %1546 = vmatpush.bf16.msra.mxu0 %v7504_v16  ;;  %1574 = vmatpush.bf16.msra.mxu2 %v7508_v11  ;;  %v1249_v11 = vld [vmem:[%s14468_s4] sm:$0xff] }
 0x19a   : > { %1253 = vperm.xlu0 %9339, %v1249_v11   ;;  %v7460_v11 = vor.u32 %v8896_v57, %v7457_v2 }
 0x19b   : > { %v10441_v41 = vpop.permute.xlu1 %1129 }
 0x19c   : > { %v1151_v8 = vsel %vm1143_vm7, %v10354_v6, %v10441_v41  ;;  %v10450_v3 = vpop.permute.xlu0 %1127 }
 0x19d   : > { %v1176_v62 = vmul.f32 %v10432_v58, %v1151_v8  ;;  %v1150_v50 = vsel %vm1143_vm7, %v1124_v37, %v10450_v3  ;;  %1547 = vmatpush.bf16.msra.mxu0 %v7480_v4  ;;  %1575 = vmatpush.bf16.msra.mxu2 %v7484_v53  ;;  %v8893_v8 = vld [vmem:[#allocation2 + $0x74] sm:$0xf0]  ;;  %v7433_v53 = vld [vmem:[#allocation2 + $0x78] sm:$0xf0] }
 0x19e   : > { %v1170_v6 = vmul.f32 %v10432_v58, %v1150_v50  ;;  %v7432_v4 = vor.u32 %v8893_v8, %v7431_v22  ;;  %v8918_v58 = vld [vmem:[#allocation2 + $0x13c] sm:$0xf0] }
 0x19f   : > { %v1184_v16 = vpack.c.bf16 %v1176_v62, %v1175_v39  ;;  %v7436_v39 = vor.u32 %v8890_v56, %v7433_v53  ;;  %v8876_v53 = vld [vmem:[%s14465_s1 + $0x4] sm:$0xf] }
 0x1a0   : > { %v1181_v0 = vpack.c.bf16 %v1170_v6, %v1169_v61  ;;  %v8884_v6 = vld [vmem:[#allocation2 + $0x34] sm:$0xf] }
 0x1a1   : > { %1190 = vst [vmem:[#allocation2 + $0x198] sm:$0xff] %v1184_v16  ;;  %1548 = vmatpush.bf16.msra.mxu0 %v7456_v27  ;;  %1576 = vmatpush.bf16.msra.mxu2 %v7460_v11  ;;  %v7407_v27 = vld [vmem:[#allocation2 + $0x30] sm:$0xf]  ;;  %v7409_v16 = vld [vmem:[#allocation2 + $0x48] sm:$0xf0] }
 0x1a2   : > { %1187 = vst [vmem:[#allocation2 + $0x180] sm:$0xff] %v1181_v0  ;;  %v7383_v11 = vld [vmem:[#allocation2] sm:$0xf]  ;;  %v7559_v0 = vld [vmem:[#allocation2 + $0x158] sm:$0xf] }
 0x1a3   : > { %v992_v37 = vpop.permute.xlu1 %991 }
 0x1a4   : > { %v996_v10 = vsel %vm995_vm6, %v10405_v5, %v992_v37  ;;  %v1006_v7 = vsel %vm995_vm6, %v992_v37, %v10299_v17  ;;  %v1068_v57 = vpop.permute.xlu0 %1067  ;;  %v8887_v5 = vld [vmem:[#allocation2 + $0x44] sm:$0xf0]  ;;  %v7375_v37 = vld [vmem:[%s14465_s1] sm:$0xf] }
 0x1a5   : > { %v1025_v62 = vmul.f32 %v10389_v42, %v996_v10  ;;  %v1026_v50 = vmul.f32 %v10391_v35, %v1006_v7  ;;  %v1071_v22 = vsel %vm1069_vm5, %v10297_v14, %v1068_v57  ;;  %v1081_v61 = vsel %vm1069_vm5, %v1068_v57, %v10303_v33  ;;  %1549 = vmatpush.bf16.msra.mxu0 %v7432_v4  ;;  %v1250_v17 = vld [vmem:[%s14468_s4 + $0x8] sm:$0xff]  ;;  %v8924_v14 = vld [vmem:[#allocation2 + $0x16c] sm:$0xf0]  ;;  %v8878_v33 = vld [vmem:[#allocation2 + $0x4] sm:$0xf] }
 0x1a6   : > { %v1105_v1 = vmul.f32 %v10364_v9, %v1071_v22  ;;  %v1106_v2 = vmul.f32 %v10366_v30, %v1081_v61  ;;  %1577 = vmatpush.bf16.msra.mxu2 %v7436_v39  ;;  %1258 = vperm.xlu1 %9340, %v1250_v17   ;;  %v7408_v8 = vor.u32 %v8887_v5, %v7407_v27  ;;  %v8877_v4 = vld [vmem:[%s14465_s1 + $0x4] sm:$0xf0]  ;;  %v7377_v27 = vld [vmem:[%s14465_s1 + $0x8] sm:$0xf0]  ;;  %v10493_v22 = vperm.slane %v10421_v28, 2 }
 0x1a7   : > { %v1035_v56 = vpack.c.bf16 %v1026_v50, %v1025_v62  ;;  %v7412_v7 = vor.u32 %v8884_v6, %v7409_v16  ;;  %v10496_v61 = vperm.slane %v10421_v28, 3  ;;  %v8881_v5 = vld [vmem:[#allocation2 + $0x14] sm:$0xf0]  ;;  %v7385_v16 = vld [vmem:[#allocation2 + $0x18] sm:$0xf0]  ;;  %v7560_v35 = vor.u32 %v8924_v14, %v7559_v0  ;;  %v1142_v0 = vpop.permute.xlu2 %1141 }
 0x1a8   : > { %v1112_v10 = vpack.c.bf16 %v1106_v2, %v1105_v1  ;;  %v8929_v57 = vld [vmem:[#allocation2 + $0x194] sm:$0xf0]  ;;  %v7577_v39 = vld [vmem:[#allocation2 + $0x198] sm:$0xf0]  ;;  %14699 = vst [vmem:[#allocation57_spill] sm:$0xff] %v10493_v22  ;;  %v7384_v2 = vor.u32 %v8881_v5, %v7383_v11  ;;  %v10498_v42 = vor.u32 %v8876_v53, %v7377_v27  ;;  %v1155_v27 = vsel %vm1143_vm7, %v1142_v0, %v10419_v25 }
 0x1a9   : > { %1041 = vst [vmem:[#allocation2 + $0x130] sm:$0xff] %v1035_v56  ;;  %1550 = vmatpush.bf16.msra.mxu0 %v7408_v8  ;;  %v7575_v62 = vld [vmem:[#allocation2 + $0x180] sm:$0xf]  ;;  %v8926_v50 = vld [vmem:[#allocation2 + $0x184] sm:$0xf]  ;;  %v7388_v8 = vor.u32 %v8878_v33, %v7385_v16 }
 0x1aa   : > { %1118 = vst [vmem:[#allocation2 + $0x178] sm:$0xff] %v1112_v10  ;;  %1578 = vmatpush.bf16.msra.mxu2 %v7412_v7  ;;  %v7576_v6 = vor.u32 %v8929_v57, %v7575_v62  ;;  %v7580_v17 = vor.u32 %v8926_v50, %v7577_v39  ;;  %v10500_v10 = vor.u32 %v8877_v4, %v7375_v37  ;;  %v7535_v7 = vld [vmem:[#allocation2 + $0x128] sm:$0xf]  ;;  %v10515_v4 = vperm.slane %v10421_v28, 5  ;;  %v8912_v39 = vld [vmem:[#allocation2 + $0x10c] sm:$0xf0] }
 0x1ab   : > { %14700 = vst [vmem:[#allocation58_spill] sm:$0xff] %v10496_v61  ;;  %v1134_v1 = vpop.permute.xlu1 %1133  ;;  %v7536_v37 = vor.u32 %v8918_v58, %v7535_v7  ;;  %v7487_v58 = vld [vmem:[#allocation2 + $0xc8] sm:$0xf]  ;;  %v8906_v50 = vld [vmem:[#allocation2 + $0xdc] sm:$0xf0] }
 0x1ac   : > { %v1132_v56 = vpop.permute.xlu0 %1131  ;;  %1565 = vmatpush.bf16.msra.mxu1 %v7576_v6  ;;  %1593 = vmatpush.bf16.msra.mxu3 %v7580_v17  ;;  %14701 = vst [vmem:[#allocation59_spill] sm:$0xff] %v10515_v4  ;;  %v7511_v6 = vld [vmem:[#allocation2 + $0xf8] sm:$0xf] }
 0x1ad   : > { %v1146_v57 = vsel %vm1143_vm7, %v1132_v56, %v10459_v44  ;;  %v1148_v11 = vsel %vm1143_vm7, %v10450_v3, %v1132_v56  ;;  %1551 = vmatpush.bf16.msra.mxu0 %v7384_v2  ;;  %v7567_v3 = vld [vmem:[#allocation2 + $0x160] sm:$0xf]  ;;  %v7512_v2 = vor.u32 %v8912_v39, %v7511_v6  ;;  %v1180_v56 = vmul.f32 %v10515_v4, %v1155_v27  ;;  %v8907_v6 = vld [vmem:[#allocation2 + $0xe4] sm:$0xf0] }
 0x1ae   : > { %v1171_v14 = vmul.f32 %v10493_v22, %v1148_v11  ;;  %v1172_v33 = vmul.f32 %v10496_v61, %v1146_v57  ;;  %1579 = vmatpush.bf16.msra.mxu2 %v7388_v8  ;;  %v7488_v57 = vor.u32 %v8906_v50, %v7487_v58  ;;  %v7519_v27 = vld [vmem:[#allocation2 + $0x100] sm:$0xf] }
 0x1af   : > { %7598 = vmatmul.msk.bf16.vlgmr.msra.gmra.mxu3 %vm1540_vm8, %v10498_v42  ;;  %7597 = vmatmul.msk.bf16.vlgmr.msra.gmra.mxu1 %vm1540_vm8, %v10498_v42 }
 0x1b0   : > { %1600 = vmatpush.bf16.msrb.mxu1 %v7560_v35  ;;  %v1182_v53 = vpack.c.bf16 %v1172_v33, %v1171_v14  ;;  %1552 = vmatmul.bf16.vlgmr.msra.gmra.mxu0 %v10500_v10  ;;  %v10519_v35 = vperm.slane %v10421_v28, 4  ;;  %v1149_v28 = vsel %vm1143_vm7, %v10441_v41, %v1134_v1  ;;  %v7543_v16 = vld [vmem:[#allocation2 + $0x130] sm:$0xf] }
 0x1b1   : > { %1580 = vmatmul.bf16.vlgmr.msra.gmra.mxu2 %v10500_v10  ;;  %v8925_v62 = vld [vmem:[#allocation2 + $0x174] sm:$0xf0] }
 0x1b2   : > { %14702 = vst [vmem:[#allocation60_spill] sm:$0xff] %v10519_v35  ;;  %v7568_v5 = vor.u32 %v8925_v62, %v7567_v3  ;;  %v8913_v62 = vld [vmem:[#allocation2 + $0x114] sm:$0xf0] }
 0x1b3   : > { %1188 = vst [vmem:[#allocation2 + $0x188] sm:$0xff] %v1182_v53  ;;  %v1140_v17 = vpop.permute.xlu1 %1139 }
 0x1b4   : > { %1601 = vmatpush.bf16.msrb.mxu1 %v7536_v37  ;;  %v1144_v25 = vsel %vm1143_vm7, %v10459_v44, %v1140_v17  ;;  %v1154_v8 = vsel %vm1143_vm7, %v1140_v17, %v10336_v51  ;;  %v1138_v7 = vpop.permute.xlu0 %1137  ;;  %1656 = vmatpush.bf16.msrb.mxu2 %v7568_v5  ;;  %v8919_v37 = vld [vmem:[#allocation2 + $0x144] sm:$0xf0]  ;;  %v1177_v44 = vmul.f32 %v10493_v22, %v1149_v28  ;;  %v7463_v5 = vld [vmem:[#allocation2 + $0x98] sm:$0xf] }
 0x1b5   : > { %v1173_v11 = vmul.f32 %v10519_v35, %v1144_v25  ;;  %v1174_v41 = vmul.f32 %v10515_v4, %v1154_v8  ;;  %v1145_v14 = vsel %vm1143_vm7, %v1138_v7, %v1142_v0  ;;  %v1147_v33 = vsel %vm1143_vm7, %v1134_v1, %v1138_v7  ;;  %v8900_v0 = vld [vmem:[#allocation2 + $0xac] sm:$0xf0]  ;;  %v7439_v25 = vld [vmem:[#allocation2 + $0x68] sm:$0xf]  ;;  %v7415_v8 = vld [vmem:[#allocation2 + $0x38] sm:$0xf] }
 0x1b6   : > { %v1178_v53 = vmul.f32 %v10496_v61, %v1147_v33  ;;  %v1179_v51 = vmul.f32 %v10519_v35, %v1145_v14  ;;  %v7544_v3 = vor.u32 %v8919_v37, %v7543_v16  ;;  %v7495_v1 = vld [vmem:[#allocation2 + $0xd0] sm:$0xf]  ;;  %v7520_v17 = vor.u32 %v8913_v62, %v7519_v27  ;;  %v8894_v16 = vld [vmem:[#allocation2 + $0x7c] sm:$0xf0]  ;;  %v8921_v14 = vld [vmem:[#allocation2 + $0x15c] sm:$0xf] }
 0x1b7   : > { %v1183_v39 = vpack.c.bf16 %v1174_v41, %v1173_v11  ;;  %v7464_v28 = vor.u32 %v8900_v0, %v7463_v5  ;;  %v8888_v7 = vld [vmem:[#allocation2 + $0x4c] sm:$0xf0]  ;;  %v7440_v11 = vor.u32 %v8894_v16, %v7439_v25  ;;  %v8901_v41 = vld [vmem:[#allocation2 + $0xb4] sm:$0xf0]  ;;  %v7569_v37 = vld [vmem:[#allocation2 + $0x178] sm:$0xf0] }
 0x1b8   : > { %1602 = vmatpush.bf16.msrb.mxu1 %v7512_v2  ;;  %v1185_v58 = vpack.c.bf16 %v1178_v53, %v1177_v44  ;;  %v1186_v50 = vpack.c.bf16 %v1180_v56, %v1179_v51  ;;  %1657 = vmatpush.bf16.msrb.mxu2 %v7544_v3  ;;  %v7496_v2 = vor.u32 %v8907_v6, %v7495_v1  ;;  %v7471_v56 = vld [vmem:[#allocation2 + $0xa0] sm:$0xf]  ;;  %v7447_v1 = vld [vmem:[#allocation2 + $0x70] sm:$0xf]  ;;  %v8895_v6 = vld [vmem:[#allocation2 + $0x84] sm:$0xf0] }
 0x1b9   : > { %1189 = vst [vmem:[#allocation2 + $0x190] sm:$0xff] %v1183_v39  ;;  %v7472_v27 = vor.u32 %v8901_v41, %v7471_v56  ;;  %v7416_v62 = vor.u32 %v8888_v7, %v7415_v8  ;;  %v8916_v25 = vld [vmem:[#allocation2 + $0x134] sm:$0xf]  ;;  %v7448_v8 = vor.u32 %v8895_v6, %v7447_v1  ;;  %v7545_v56 = vld [vmem:[#allocation2 + $0x148] sm:$0xf0] }
 0x1ba   : > { %1191 = vst [vmem:[#allocation2 + $0x1a0] sm:$0xff] %v1185_v58  ;;  %v7583_v33 = vld [vmem:[#allocation2 + $0x188] sm:$0xf]  ;;  %v8927_v53 = vld [vmem:[#allocation2 + $0x18c] sm:$0xf] }
 0x1bb   : > { %1192 = vst [vmem:[#allocation2 + $0x1a8] sm:$0xff] %v1186_v50  ;;  %v8922_v58 = vld [vmem:[#allocation2 + $0x164] sm:$0xf]  ;;  %v8882_v50 = vld [vmem:[#allocation2 + $0x1c] sm:$0xf0] }
 0x1bc   : > { %1603 = vmatpush.bf16.msrb.mxu1 %v7488_v57  ;;  %1658 = vmatpush.bf16.msrb.mxu2 %v7520_v17  ;;  %v7561_v57 = vld [vmem:[#allocation2 + $0x170] sm:$0xf0]  ;;  %v7572_v0 = vor.u32 %v8922_v58, %v7569_v37  ;;  %v7391_v17 = vld [vmem:[#allocation2 + $0x8] sm:$0xf]  ;;  %v7423_v41 = vld [vmem:[#allocation2 + $0x40] sm:$0xf] }
 0x1bd   : > { %v7564_v5 = vor.u32 %v8921_v14, %v7561_v57  ;;  %v7392_v7 = vor.u32 %v8882_v50, %v7391_v17  ;;  %v8889_v57 = vld [vmem:[#allocation2 + $0x54] sm:$0xf0]  ;;  %v7497_v1 = vld [vmem:[#allocation2 + $0xe8] sm:$0xf0] }
 0x1be   : > { %v7424_v58 = vor.u32 %v8889_v57, %v7423_v41  ;;  %v7473_v41 = vld [vmem:[#allocation2 + $0xb8] sm:$0xf0]  ;;  %v7441_v57 = vld [vmem:[#allocation2 + $0x80] sm:$0xf0] }
 0x1c0   : > { %1604 = vmatpush.bf16.msrb.mxu1 %v7464_v28  ;;  %1659 = vmatpush.bf16.msrb.mxu2 %v7496_v2  ;;  %v8915_v28 = vld [vmem:[#allocation2 + $0x12c] sm:$0xf]  ;;  %v7537_v2 = vld [vmem:[#allocation2 + $0x140] sm:$0xf0]  ;;  %v7591_v16 = vld [vmem:[#allocation2 + $0x190] sm:$0xf] }
 0x1c1   : > { %v8930_v44 = vld [vmem:[#allocation2 + $0x19c] sm:$0xf0]  ;;  %v7585_v51 = vld [vmem:[#allocation2 + $0x1a0] sm:$0xf0]  ;;  %v7540_v14 = vor.u32 %v8915_v28, %v7537_v2  ;;  %v8928_v37 = vld [vmem:[#allocation2 + $0x194] sm:$0xf] }
 0x1c2   : > { %v7584_v3 = vor.u32 %v8930_v44, %v7583_v33  ;;  %v7588_v39 = vor.u32 %v8927_v53, %v7585_v51  ;;  %v7548_v33 = vor.u32 %v8916_v25, %v7545_v56  ;;  %v7593_v44 = vld [vmem:[#allocation2 + $0x1a8] sm:$0xf0]  ;;  %v7513_v51 = vld [vmem:[#allocation2 + $0x110] sm:$0xf0]  ;;  %v7399_v28 = vld [vmem:[#allocation2 + $0x10] sm:$0xf] }
 0x1c3   : > { %v7596_v50 = vor.u32 %v8928_v37, %v7593_v44  ;;  %v8883_v2 = vld [vmem:[#allocation2 + $0x24] sm:$0xf0]  ;;  %v8898_v56 = vld [vmem:[#allocation2 + $0xa4] sm:$0xf]  ;;  %v8891_v37 = vld [vmem:[#allocation2 + $0x6c] sm:$0xf] }
 0x1c4   : > { %1605 = vmatpush.bf16.msrb.mxu1 %v7440_v11  ;;  %1621 = vmatpush.bf16.msrb.mxu3 %v7584_v3  ;;  %v8931_v11 = vld [vmem:[#allocation2 + $0x1a4] sm:$0xf0]  ;;  %v8910_v3 = vld [vmem:[#allocation2 + $0x104] sm:$0xf]  ;;  %v8892_v44 = vld [vmem:[#allocation2 + $0x74] sm:$0xf] }
 0x1c5   : > { %1649 = vmatpush.bf16.msrb.mxu0 %v7588_v39  ;;  %1660 = vmatpush.bf16.msrb.mxu2 %v7472_v27  ;;  %v7592_v53 = vor.u32 %v8931_v11, %v7591_v16  ;;  %v7521_v39 = vld [vmem:[#allocation2 + $0x118] sm:$0xf0]  ;;  %v7400_v11 = vor.u32 %v8883_v2, %v7399_v28 }
 0x1c6   : > { %v8909_v27 = vld [vmem:[#allocation2 + $0xfc] sm:$0xf]  ;;  %v7524_v17 = vor.u32 %v8910_v3, %v7521_v39  ;;  %v7417_v39 = vld [vmem:[#allocation2 + $0x50] sm:$0xf0] }
 0x1c7   : > { %7599 = vmatmul.msk.bf16.vlgmr.msrb.gmra.mxu3 %vm1540_vm8, %v10498_v42  ;;  %v7516_v6 = vor.u32 %v8909_v27, %v7513_v51  ;;  %v7444_v51 = vor.u32 %v8891_v37, %v7441_v57  ;;  %v8885_v27 = vld [vmem:[#allocation2 + $0x3c] sm:$0xf] }
 0x1c8   : > { %1606 = vmatpush.bf16.msrb.mxu1 %v7416_v62  ;;  %1628 = vmatpush.bf16.msra.mxu3 %v7564_v5  ;;  %v8903_v62 = vld [vmem:[#allocation2 + $0xcc] sm:$0xf]  ;;  %v7489_v5 = vld [vmem:[#allocation2 + $0xe0] sm:$0xf0] }
 0x1c9   : > { %1684 = vmatpush.bf16.msra.mxu0 %v7572_v0  ;;  %1661 = vmatpush.bf16.msrb.mxu2 %v7448_v8  ;;  %v8904_v0 = vld [vmem:[#allocation2 + $0xd4] sm:$0xf]  ;;  %v7492_v25 = vor.u32 %v8903_v62, %v7489_v5  ;;  %v8886_v62 = vld [vmem:[#allocation2 + $0x44] sm:$0xf] }
 0x1ca   : > { %7600 = vmatmul.msk.bf16.vlgmr.msrb.gmra.mxu0 %vm1540_vm8, %v10498_v42  ;;  %v7500_v16 = vor.u32 %v8904_v0, %v7497_v1  ;;  %v7465_v8 = vld [vmem:[#allocation2 + $0xb0] sm:$0xf0]  ;;  %v7393_v0 = vld [vmem:[#allocation2 + $0x20] sm:$0xf0]  ;;  %v8879_v1 = vld [vmem:[#allocation2 + $0xc] sm:$0xf] }
 0x1cb   : > { %v7396_v28 = vor.u32 %v8879_v1, %v7393_v0 }
 0x1cc   : > { %1607 = vmatpush.bf16.msrb.mxu1 %v7392_v7  ;;  %1629 = vmatpush.bf16.msra.mxu3 %v7540_v14  ;;  %v8897_v7 = vld [vmem:[#allocation2 + $0x9c] sm:$0xf] }
 0x1cd   : > { %1685 = vmatpush.bf16.msra.mxu0 %v7548_v33  ;;  %1662 = vmatpush.bf16.msrb.mxu2 %v7424_v58  ;;  %v7468_v14 = vor.u32 %v8897_v7, %v7465_v8  ;;  %v7476_v33 = vor.u32 %v8898_v56, %v7473_v41  ;;  %v7425_v58 = vld [vmem:[#allocation2 + $0x58] sm:$0xf0] }
 0x1ce   : > { %v7428_v5 = vor.u32 %v8886_v62, %v7425_v58 }
 0x1cf   : > { %1608 = vmatmul.bf16.vlgmr.msrb.gmra.mxu1 %v10500_v10 }
 0x1d0   : > { %1677 = vmatpush.bf16.msra.mxu1 %v7592_v53  ;;  %1630 = vmatpush.bf16.msra.mxu3 %v7516_v6  ;;  %v7449_v53 = vld [vmem:[#allocation2 + $0x88] sm:$0xf0]  ;;  %v8880_v6 = vld [vmem:[#allocation2 + $0x14] sm:$0xf] }
 0x1d1   : > { %1686 = vmatpush.bf16.msra.mxu0 %v7524_v17  ;;  %1663 = vmatpush.bf16.msrb.mxu2 %v7400_v11  ;;  %v7452_v3 = vor.u32 %v8892_v44, %v7449_v53  ;;  %v7401_v17 = vld [vmem:[#allocation2 + $0x28] sm:$0xf0]  ;;  %v10561_v11 = vld [vmem:[%s14477_s13] sm:$0x3f] }
 0x1d2   : > { %v7404_v2 = vor.u32 %v8880_v6, %v7401_v17  ;;  %v10565_v41 = vperm.slane %v10561_v11, 0 }
 0x1d4   : > { %1705 = vmatpush.bf16.msrb.mxu1 %v7596_v50  ;;  %1631 = vmatpush.bf16.msra.mxu3 %v7492_v25  ;;  %v7420_v50 = vor.u32 %v8885_v27, %v7417_v39  ;;  %14703 = vst [vmem:[#allocation61_spill] sm:$0xff] %v10565_v41 }
 0x1d5   : > { %1687 = vmatpush.bf16.msra.mxu0 %v7500_v16  ;;  %1664 = vmatmul.bf16.vlgmr.msrb.gmra.mxu2 %v10500_v10 }
 0x1d8   : > { %1632 = vmatpush.bf16.msra.mxu3 %v7468_v14 }
 0x1d9   : > { %1688 = vmatpush.bf16.msra.mxu0 %v7476_v33 }
 0x1dc   : > { %1633 = vmatpush.bf16.msra.mxu3 %v7444_v51  ;;  %v10578_v51 = vperm.slane %v10561_v11, 1 }
 0x1dd   : > { %1689 = vmatpush.bf16.msra.mxu0 %v7452_v3 }
 0x1de   : > { %14704 = vst [vmem:[#allocation62_spill] sm:$0xff] %v10578_v51 }
 0x1df   : > { %7601 = vmatmul.msk.bf16.vlgmr.msra.gmra.mxu1 %vm1540_vm8, %v10498_v42 }
 0x1e0   : > { %1634 = vmatpush.bf16.msra.mxu3 %v7420_v50 }
 0x1e1   : > { %1690 = vmatpush.bf16.msra.mxu0 %v7428_v5 }
 0x1e4   : > { %1635 = vmatpush.bf16.msra.mxu3 %v7396_v28 }
 0x1e5   : > { %1691 = vmatpush.bf16.msra.mxu0 %v7404_v2 }
 0x1e7   : > { %1636 = vmatmul.bf16.vlgmr.msra.gmra.mxu3 %v10500_v10 }
 0x1e8   : > { %1692 = vmatmul.bf16.vlgmr.msra.gmra.mxu0 %v10500_v10 }
 0x1ef   : > { %7602 = vmatmul.msk.bf16.vlgmr.msrb.gmra.mxu1 %vm1540_vm8, %v10498_v42 }
 0x20c   : > { %v10556_v25 = vpop.permute.xlu0 %1253 }
 0x218   : > { %v10570_v57 = vpop.permute.xlu1 %1258 }
 0x22c   : > { %v1567_v8 = vpop.f32.mrf.mxu1 }
 0x22d   : > { %v1553_v16 = vpop.f32.mrf.mxu0 }
 0x22e   : > { %v1554_v7 = vadd.f32 %v1553_v16, %v10556_v25 }
 0x230   : > { %v1568_v56 = vadd.f32 %v1567_v8, %v1554_v7 }
 0x232   : > { %v1712_v14 = vmax.f32 %v1568_v56, 0.0  ;;  %v1595_v10 = vpop.f32.mrf.mxu3 }
 0x234   : > { %v10568_v33 = vmul.f32 %v10565_v41, %v1712_v14  ;;  %v1581_v42 = vpop.f32.mrf.mxu2  ;;  %v1569_v39 = vpop.f32.mrf.mxu1 }
 0x235   : > { %v1582_v37 = vadd.f32 %v1581_v42, %v10556_v25  ;;  %v1555_v44 = vpop.f32.mrf.mxu0  ;;  %v10605_v42 = vperm.slane %v10561_v11, 2 }
 0x236   : > { %1809 = vrot.lane.b32.xlu0 %v10568_v33, %s9552_s24  ;;  %1749 = vrot.lane.b32.xlu2 %v10568_v33, %s9551_s9  ;;  %v1556_v3 = vadd.f32 %v1555_v44, %v10570_v57 }
 0x237   : > { %v1596_v53 = vadd.f32 %v1595_v10, %v1582_v37  ;;  %14705 = vst [vmem:[#allocation63_spill] sm:$0xff] %v10605_v42 }
 0x238   : > { %v1570_v58 = vadd.f32 %v1569_v39, %v1556_v3 }
 0x239   : > { %v1713_v27 = vmax.f32 %v1596_v53, 0.0 }
 0x23a   : > { %v1597_v5 = vpop.f32.mrf.mxu3  ;;  %v1718_v6 = vmax.f32 %v1570_v58, 0.0 }
 0x23b   : > { %v10582_v62 = vmul.f32 %v10578_v51, %v1713_v27 }
 0x23c   : > { %v1583_v50 = vpop.f32.mrf.mxu2  ;;  %v10592_v2 = vmul.f32 %v10565_v41, %v1718_v6 }
 0x23d   : > { %v1989_v0 = vpack.c.bf16 %v10582_v62, %v10568_v33  ;;  %v1584_v1 = vadd.f32 %v1583_v50, %v10570_v57 }
 0x23e   : > { %1869 = vrot.lane.b32.xlu0 %v10568_v33, %s9553_s29  ;;  %1753 = vrot.lane.b32.xlu2 %v10582_v62, %s9551_s9 }
 0x23f   : > { %1995 = vst [vmem:[#allocation2 + $0xc0] sm:$0xff] %v1989_v0  ;;  %v1598_v17 = vadd.f32 %v1597_v5, %v1584_v1 }
 0x241   : > { %v1719_v28 = vmax.f32 %v1598_v17, 0.0 }
 0x243   : > { %v10595_v16 = vmul.f32 %v10578_v51, %v1719_v28 }
 0x245   : > { %v1992_v8 = vpack.c.bf16 %v10595_v16, %v10592_v2 }
 0x246   : > { %1755 = vrot.lane.b32.xlu0 %v10595_v16, %s9551_s9  ;;  %1813 = vrot.lane.b32.xlu2 %v10582_v62, %s9552_s24 }
 0x247   : > { %1998 = vst [vmem:[#allocation2 + $0xd8] sm:$0xff] %v1992_v8  ;;  %v1651_v44 = vpop.f32.mrf.mxu0 }
 0x24a   : > { %v1623_v14 = vpop.f32.mrf.mxu3 }
 0x24c   : > { %v1609_v7 = vpop.f32.mrf.mxu1 }
 0x24d   : > { %v1610_v56 = vadd.f32 %v1609_v7, %v10556_v25 }
 0x24e   : > { %1873 = vrot.lane.b32.xlu2 %v10582_v62, %s9553_s29 }
 0x24f   : > { %v1624_v10 = vadd.f32 %v1623_v14, %v1610_v56  ;;  %v1653_v0 = vpop.f32.mrf.mxu0  ;;  %v10628_v14 = vperm.slane %v10561_v11, 4 }
 0x251   : > { %v1714_v37 = vmax.f32 %v1624_v10, 0.0  ;;  %14706 = vst [vmem:[#allocation64_spill] sm:$0xff] %v10628_v14 }
 0x252   : > { %v1625_v27 = vpop.f32.mrf.mxu3 }
 0x253   : > { %v10610_v53 = vmul.f32 %v10605_v42, %v1714_v37 }
 0x254   : > { %v1611_v3 = vpop.f32.mrf.mxu1 }
 0x255   : > { %v1612_v39 = vadd.f32 %v1611_v3, %v10570_v57  ;;  %1757 = vrot.lane.b32.xlu1 %v10610_v53, %s9551_s9 }
 0x257   : > { %v1626_v58 = vadd.f32 %v1625_v27, %v1612_v39 }
 0x258   : > { %v1665_v1 = vpop.f32.mrf.mxu2 }
 0x259   : > { %v1720_v50 = vmax.f32 %v1626_v58, 0.0  ;;  %v1666_v17 = vadd.f32 %v1665_v1, %v10556_v25 }
 0x25b   : > { %v10616_v5 = vmul.f32 %v10605_v42, %v1720_v50 }
 0x25c   : > { %v1679_v6 = vpop.f32.mrf.mxu1 }
 0x25d   : > { %1817 = vrot.lane.b32.xlu1 %v10610_v53, %s9552_s24  ;;  %1759 = vrot.lane.b32.xlu2 %v10616_v5, %s9551_s9  ;;  %v1680_v28 = vadd.f32 %v1679_v6, %v1666_v17  ;;  %v10637_v6 = vperm.slane %v10561_v11, 5 }
 0x25f   : > { %v1716_v56 = vmax.f32 %v1680_v28, 0.0  ;;  %14707 = vst [vmem:[#allocation65_spill] sm:$0xff] %v10637_v6  ;;  %v10644_v28 = vperm.slane %v10561_v11, 3 }
 0x260   : > { %v1667_v10 = vpop.f32.mrf.mxu2 }
 0x261   : > { %v10631_v37 = vmul.f32 %v10628_v14, %v1716_v56  ;;  %v1668_v50 = vadd.f32 %v1667_v10, %v10570_v57  ;;  %14708 = vst [vmem:[#allocation66_spill] sm:$0xff] %v10644_v28 }
 0x264   : > { %v1681_v8 = vpop.f32.mrf.mxu1 }
 0x265   : > { %1751 = vrot.lane.b32.xlu1 %v10592_v2, %s9551_s9  ;;  %1819 = vrot.lane.b32.xlu2 %v10616_v5, %s9552_s24  ;;  %v1693_v7 = vpop.f32.mrf.mxu0 }
 0x266   : > { %v1694_v3 = vadd.f32 %v1693_v7, %v10556_v25 }
 0x26a   : > { %v1637_v39 = vpop.f32.mrf.mxu3 }
 0x26b   : > { %v1638_v27 = vadd.f32 %v1637_v39, %v10556_v25  ;;  %v1682_v39 = vadd.f32 %v1681_v8, %v1668_v50 }
 0x26c   : > { %v1707_v58 = vpop.f32.mrf.mxu1 }
 0x26d   : > { %v1708_v1 = vadd.f32 %v1707_v58, %v1694_v3  ;;  %1811 = vrot.lane.b32.xlu1 %v10592_v2, %s9552_s24  ;;  %1765 = vrot.lane.b32.xlu2 %v10631_v37, %s9551_s9  ;;  %v1652_v17 = vadd.f32 %v1651_v44, %v1638_v27  ;;  %v1695_v25 = vpop.f32.mrf.mxu0  ;;  %v1722_v27 = vmax.f32 %v1682_v39, 0.0 }
 0x26e   : > { %v1696_v58 = vadd.f32 %v1695_v25, %v10570_v57 }
 0x26f   : > { %v1717_v7 = vmax.f32 %v1708_v1, 0.0  ;;  %v1715_v56 = vmax.f32 %v1652_v17, 0.0 }
 0x271   : > { %v10647_v10 = vmul.f32 %v10637_v6, %v1717_v7  ;;  %v10650_v3 = vmul.f32 %v10644_v28, %v1715_v56  ;;  %v10665_v56 = vmul.f32 %v10628_v14, %v1722_v27 }
 0x272   : > { %v1639_v41 = vpop.f32.mrf.mxu3 }
 0x273   : > { %v1991_v42 = vpack.c.bf16 %v10647_v10, %v10631_v37  ;;  %v1990_v11 = vpack.c.bf16 %v10650_v3, %v10610_v53  ;;  %v1640_v44 = vadd.f32 %v1639_v41, %v10570_v57  ;;  %1761 = vrot.lane.b32.xlu0 %v10650_v3, %s9551_s9 }
 0x274   : > { %v1709_v8 = vpop.f32.mrf.mxu1 }
 0x275   : > { %1997 = vst [vmem:[#allocation2 + $0xd0] sm:$0xff] %v1991_v42  ;;  %v1710_v50 = vadd.f32 %v1709_v8, %v1696_v58  ;;  %1871 = vrot.lane.b32.xlu1 %v10592_v2, %s9553_s29  ;;  %1825 = vrot.lane.b32.xlu2 %v10631_v37, %s9552_s24  ;;  %v1654_v1 = vadd.f32 %v1653_v0, %v1640_v44 }
 0x276   : > { %1996 = vst [vmem:[#allocation2 + $0xc8] sm:$0xff] %v1990_v11 }
 0x277   : > { %v1723_v17 = vmax.f32 %v1710_v50, 0.0  ;;  %v1721_v7 = vmax.f32 %v1654_v1, 0.0 }
 0x279   : > { %v10668_v41 = vmul.f32 %v10637_v6, %v1723_v17  ;;  %v10671_v57 = vmul.f32 %v10644_v28, %v1721_v7 }
 0x27b   : > { %v1994_v42 = vpack.c.bf16 %v10668_v41, %v10665_v56  ;;  %v1993_v25 = vpack.c.bf16 %v10671_v57, %v10616_v5  ;;  %1815 = vrot.lane.b32.xlu0 %v10595_v16, %s9552_s24 }
 0x27d   : > { %2000 = vst [vmem:[#allocation2 + $0xe8] sm:$0xff] %v1994_v42  ;;  %1763 = vrot.lane.b32.xlu1 %v10671_v57, %s9551_s9  ;;  %1879 = vrot.lane.b32.xlu2 %v10616_v5, %s9553_s29 }
 0x27e   : > { %1999 = vst [vmem:[#allocation2 + $0xe0] sm:$0xff] %v1993_v25 }
 0x283   : > { %1821 = vrot.lane.b32.xlu0 %v10650_v3, %s9552_s24 }
 0x285   : > { %1823 = vrot.lane.b32.xlu1 %v10671_v57, %s9552_s24  ;;  %1771 = vrot.lane.b32.xlu2 %v10668_v41, %s9551_s9 }
 0x28b   : > { %1767 = vrot.lane.b32.xlu0 %v10665_v56, %s9551_s9 }
 0x28d   : > { %1769 = vrot.lane.b32.xlu1 %v10647_v10, %s9551_s9  ;;  %1831 = vrot.lane.b32.xlu2 %v10668_v41, %s9552_s24 }
 0x290   : > { %v10695_v0 = vpop.permute.xlu2 %1749 }
 0x293   : > { %1827 = vrot.lane.b32.xlu0 %v10665_v56, %s9552_s24 }
 0x295   : > { %1829 = vrot.lane.b32.xlu1 %v10647_v10, %s9552_s24  ;;  %1885 = vrot.lane.b32.xlu2 %v10631_v37, %s9553_s29 }
 0x298   : > { %v10703_v39 = vpop.permute.xlu2 %1753 }
 0x29b   : > { %1875 = vrot.lane.b32.xlu0 %v10595_v16, %s9553_s29 }
 0x29d   : > { %1877 = vrot.lane.b32.xlu1 %v10610_v53, %s9553_s29  ;;  %1891 = vrot.lane.b32.xlu2 %v10668_v41, %s9553_s29 }
 0x2a0   : > { %v10713_v58 = vpop.permute.xlu2 %1813 }
 0x2a3   : > { %1881 = vrot.lane.b32.xlu0 %v10650_v3, %s9553_s29 }
 0x2a5   : > { %1883 = vrot.lane.b32.xlu1 %v10671_v57, %s9553_s29  ;;  %1933 = vrot.lane.b32.xlu2 %v10582_v62, %s9554_s8 }
 0x2a8   : > { %v10725_v11 = vpop.permute.xlu2 %1873  ;;  %v10749_v1 = vpop.permute.xlu0 %1809 }
 0x2ab   : > { %1887 = vrot.lane.b32.xlu0 %v10665_v56, %s9553_s29 }
 0x2ad   : > { %1889 = vrot.lane.b32.xlu1 %v10647_v10, %s9553_s29  ;;  %1939 = vrot.lane.b32.xlu2 %v10616_v5, %s9554_s8 }
 0x2b0   : > { %v10759_v42 = vpop.permute.xlu0 %1869 }
 0x2b3   : > { %1929 = vrot.lane.b32.xlu0 %v10568_v33, %s9554_s8 }
 0x2b5   : > { %1931 = vrot.lane.b32.xlu1 %v10592_v2, %s9554_s8  ;;  %2123 = vrot.lane.b32.xlu2 %v10592_v2, %s9557_s12 }
 0x2b7   : > { %v1760_v44 = vpop.permute.xlu2 %1759 }
 0x2b8   : > { %v1756_v6 = vpop.permute.xlu0 %1755 }
 0x2bb   : > { %1935 = vrot.lane.b32.xlu0 %v10595_v16, %s9554_s8 }
 0x2bd   : > { %1937 = vrot.lane.b32.xlu1 %v10610_v53, %s9554_s8  ;;  %2129 = vrot.lane.b32.xlu2 %v10610_v53, %s9557_s12 }
 0x2bf   : > { %v10739_v8 = vpop.permute.xlu2 %1819 }
 0x2c3   : > { %1941 = vrot.lane.b32.xlu0 %v10650_v3, %s9554_s8 }
 0x2c5   : > { %2121 = vrot.lane.b32.xlu1 %v10568_v33, %s9557_s12  ;;  %2063 = vrot.lane.b32.xlu2 %v10592_v2, %s9556_s16 }
 0x2c7   : > { %v1758_v27 = vpop.permute.xlu1 %1757  ;;  %v10747_v50 = vpop.permute.xlu2 %1765 }
 0x2c8   : > { %v1779_v30 = vsel %vm613_vm0, %v10703_v39, %v1758_v27 }
 0x2cb   : > { %2125 = vrot.lane.b32.xlu0 %v10582_v62, %s9557_s12 }
 0x2cd   : > { %2127 = vrot.lane.b32.xlu1 %v10595_v16, %s9557_s12  ;;  %2069 = vrot.lane.b32.xlu2 %v10610_v53, %s9556_s16 }
 0x2cf   : > { %v1818_v17 = vpop.permute.xlu1 %1817  ;;  %v10757_v7 = vpop.permute.xlu2 %1825 }
 0x2d3   : > { %2131 = vrot.lane.b32.xlu0 %v10616_v5, %s9557_s12 }
 0x2d5   : > { %2061 = vrot.lane.b32.xlu1 %v10568_v33, %s9556_s16  ;;  %2003 = vrot.lane.b32.xlu2 %v10592_v2, %s9555_s28 }
 0x2d7   : > { %v1752_v25 = vpop.permute.xlu1 %1751  ;;  %v10767_v14 = vpop.permute.xlu2 %1879 }
 0x2d8   : > { %v1782_v28 = vsel %vm613_vm0, %v1752_v25, %v1756_v6 }
 0x2d9   : > { %v1792_v61 = vmul.f32 %v1782_v28, %v9909_v24 }
 0x2db   : > { %2065 = vrot.lane.b32.xlu0 %v10582_v62, %s9556_s16 }
 0x2dd   : > { %2067 = vrot.lane.b32.xlu1 %v10595_v16, %s9556_s16  ;;  %2009 = vrot.lane.b32.xlu2 %v10610_v53, %s9555_s28 }
 0x2df   : > { %v1812_v51 = vpop.permute.xlu1 %1811  ;;  %v1772_v35 = vpop.permute.xlu2 %1771 }
 0x2e0   : > { %v1784_v4 = vsel %vm613_vm0, %v1772_v35, %v1752_v25 }
 0x2e1   : > { %v1791_v22 = vmul.f32 %v1784_v4, %v9902_v21 }
 0x2e3   : > { %v1800_v40 = vpack.c.bf16 %v1792_v61, %v1791_v22  ;;  %2071 = vrot.lane.b32.xlu0 %v10616_v5, %s9556_s16  ;;  %v1787_v61 = vmul.f32 %v1779_v30, %v9923_v32  ;;  %v1780_v30 = vsel %vm613_vm0, %v1756_v6, %v1760_v44 }
 0x2e4   : > { %v1793_v54 = vmul.f32 %v1780_v30, %v9923_v32 }
 0x2e5   : > { %1806 = vst [vmem:[#allocation2 + $0x18] sm:$0xff] %v1800_v40  ;;  %2001 = vrot.lane.b32.xlu1 %v10568_v33, %s9555_s28  ;;  %2135 = vrot.lane.b32.xlu2 %v10671_v57, %s9557_s12  ;;  %v1762_v25 = vpop.permute.xlu0 %1761 }
 0x2e6   : > { %v1777_v28 = vsel %vm613_vm0, %v1758_v27, %v1762_v25 }
 0x2e7   : > { %v10792_v4 = vpop.permute.xlu1 %1871  ;;  %v10794_v22 = vpop.permute.xlu2 %1831  ;;  %v1788_v9 = vmul.f32 %v1777_v28, %v9921_v31 }
 0x2e8   : > { %v1844_v40 = vsel %vm687_vm1, %v10794_v22, %v1812_v51 }
 0x2e9   : > { %v1798_v43 = vpack.c.bf16 %v1788_v9, %v1787_v61  ;;  %v1851_v61 = vmul.f32 %v1844_v40, %v9982_v18 }
 0x2eb   : > { %1804 = vst [vmem:[#allocation2 + $0x8] sm:$0xff] %v1798_v43  ;;  %2005 = vrot.lane.b32.xlu0 %v10582_v62, %s9555_s28 }
 0x2ed   : > { %2007 = vrot.lane.b32.xlu1 %v10595_v16, %s9555_s28  ;;  %1949 = vrot.lane.b32.xlu2 %v10647_v10, %s9554_s8  ;;  %v1816_v27 = vpop.permute.xlu0 %1815 }
 0x2ee   : > { %v1842_v43 = vsel %vm687_vm1, %v1812_v51, %v1816_v27  ;;  %v1839_v51 = vsel %vm687_vm1, %v10713_v58, %v1818_v17 }
 0x2ef   : > { %v1764_v9 = vpop.permute.xlu1 %1763  ;;  %v10811_v28 = vpop.permute.xlu2 %1885  ;;  %v1852_v12 = vmul.f32 %v1842_v43, %v9990_v26 }
 0x2f0   : > { %v1778_v20 = vsel %vm613_vm0, %v1760_v44, %v1764_v9  ;;  %v1847_v44 = vmul.f32 %v1839_v51, %v9996_v34 }
 0x2f1   : > { %v1794_v59 = vmul.f32 %v1778_v20, %v9921_v31  ;;  %v1860_v48 = vpack.c.bf16 %v1852_v12, %v1851_v61  ;;  %v1840_v20 = vsel %vm687_vm1, %v1816_v27, %v10739_v8 }
 0x2f2   : > { %v1853_v43 = vmul.f32 %v1840_v20, %v9996_v34 }
 0x2f3   : > { %v1801_v6 = vpack.c.bf16 %v1794_v59, %v1793_v54  ;;  %1866 = vst [vmem:[#allocation2 + $0x48] sm:$0xff] %v1860_v48  ;;  %2011 = vrot.lane.b32.xlu0 %v10616_v5, %s9555_s28 }
 0x2f5   : > { %1807 = vst [vmem:[#allocation2 + $0x20] sm:$0xff] %v1801_v6  ;;  %2133 = vrot.lane.b32.xlu1 %v10650_v3, %s9557_s12  ;;  %2075 = vrot.lane.b32.xlu2 %v10671_v57, %s9556_s16  ;;  %v1822_v54 = vpop.permute.xlu0 %1821 }
 0x2f6   : > { %v1837_v59 = vsel %vm687_vm1, %v1818_v17, %v1822_v54  ;;  %v1775_v17 = vsel %vm613_vm0, %v1762_v25, %v10747_v50 }
 0x2f7   : > { %v1824_v48 = vpop.permute.xlu1 %1823  ;;  %v10833_v12 = vpop.permute.xlu2 %1891  ;;  %v1848_v40 = vmul.f32 %v1837_v59, %v10002_v36 }
 0x2f8   : > { %v1838_v30 = vsel %vm687_vm1, %v10739_v8, %v1824_v48  ;;  %v1781_v8 = vsel %vm613_vm0, %v10695_v0, %v10703_v39 }
 0x2f9   : > { %v1854_v61 = vmul.f32 %v1838_v30, %v10002_v36  ;;  %v1858_v27 = vpack.c.bf16 %v1848_v40, %v1847_v44 }
 0x2fb   : > { %v1861_v6 = vpack.c.bf16 %v1854_v61, %v1853_v43  ;;  %1864 = vst [vmem:[#allocation2 + $0x38] sm:$0xff] %v1858_v27  ;;  %2137 = vrot.lane.b32.xlu0 %v10631_v37, %s9557_s12  ;;  %v1789_v61 = vmul.f32 %v1775_v17, %v9941_v45 }
 0x2fd   : > { %1867 = vst [vmem:[#allocation2 + $0x50] sm:$0xff] %v1861_v6  ;;  %2139 = vrot.lane.b32.xlu1 %v10665_v56, %s9557_s12  ;;  %2013 = vrot.lane.b32.xlu2 %v10650_v3, %s9555_s28  ;;  %v1768_v51 = vpop.permute.xlu0 %1767 }
 0x2fe   : > { %v1774_v20 = vsel %vm613_vm0, %v1768_v51, %v1772_v35  ;;  %v1776_v59 = vsel %vm613_vm0, %v1764_v9, %v1768_v51  ;;  %v1786_v35 = vmul.f32 %v1781_v8, %v9909_v24 }
 0x2ff   : > { %v1770_v44 = vpop.permute.xlu1 %1769  ;;  %v10859_v40 = vpop.permute.xlu2 %1933  ;;  %v1795_v30 = vmul.f32 %v1776_v59, %v9941_v45  ;;  %v1796_v43 = vmul.f32 %v1774_v20, %v9951_v49 }
 0x300   : > { %v1773_v39 = vsel %vm613_vm0, %v10747_v50, %v1770_v44  ;;  %v1783_v25 = vsel %vm613_vm0, %v1770_v44, %v10695_v0  ;;  %v1841_v0 = vsel %vm687_vm1, %v10749_v1, %v10713_v58  ;;  %v1835_v50 = vsel %vm687_vm1, %v1822_v54, %v10757_v7 }
 0x301   : > { %v1785_v9 = vmul.f32 %v1783_v25, %v9902_v21  ;;  %v1790_v27 = vmul.f32 %v1773_v39, %v9951_v49  ;;  %v1802_v6 = vpack.c.bf16 %v1796_v43, %v1795_v30  ;;  %v1849_v25 = vmul.f32 %v1835_v50, %v10023_v52 }
 0x303   : > { %v1797_v51 = vpack.c.bf16 %v1786_v35, %v1785_v9  ;;  %v1799_v59 = vpack.c.bf16 %v1790_v27, %v1789_v61  ;;  %1808 = vst [vmem:[#allocation2 + $0x28] sm:$0xff] %v1802_v6  ;;  %1951 = vrot.lane.b32.xlu0 %v10668_v41, %s9554_s8 }
 0x305   : > { %1803 = vst [vmem:[#allocation2] sm:$0xff] %v1797_v51  ;;  %2073 = vrot.lane.b32.xlu1 %v10650_v3, %s9556_s16  ;;  %2019 = vrot.lane.b32.xlu2 %v10665_v56, %s9555_s28  ;;  %v1828_v8 = vpop.permute.xlu0 %1827 }
 0x306   : > { %1805 = vst [vmem:[#allocation2 + $0x10] sm:$0xff] %v1799_v59  ;;  %v1834_v17 = vsel %vm687_vm1, %v1828_v8, %v10794_v22  ;;  %v1836_v20 = vsel %vm687_vm1, %v1824_v48, %v1828_v8  ;;  %v1846_v22 = vmul.f32 %v1841_v0, %v9990_v26 }
 0x307   : > { %v1830_v44 = vpop.permute.xlu1 %1829  ;;  %v10891_v30 = vpop.permute.xlu2 %1939  ;;  %v1855_v43 = vmul.f32 %v1836_v20, %v10023_v52  ;;  %v1856_v58 = vmul.f32 %v1834_v17, %v10035_v55 }
 0x308   : > { %v1833_v54 = vsel %vm687_vm1, %v10757_v7, %v1830_v44  ;;  %v1843_v39 = vsel %vm687_vm1, %v1830_v44, %v10749_v1  ;;  %v1904_v1 = vsel %vm761_vm2, %v10833_v12, %v10792_v4 }
 0x309   : > { %v1845_v48 = vmul.f32 %v1843_v39, %v9982_v18  ;;  %v1850_v35 = vmul.f32 %v1833_v54, %v10035_v55  ;;  %v1862_v61 = vpack.c.bf16 %v1856_v58, %v1855_v43  ;;  %v1911_v0 = vmul.f32 %v1904_v1, %v10067_v29  ;;  %v7711_v55 = vld [vmem:[#allocation2 + $0xd8] sm:$0xf0]  ;;  %v7639_v18 = vld [vmem:[#allocation2 + $0x48] sm:$0xf0] }
 0x30b   : > { %v1857_v9 = vpack.c.bf16 %v1846_v22, %v1845_v48  ;;  %v1859_v27 = vpack.c.bf16 %v1850_v35, %v1849_v25  ;;  %1868 = vst [vmem:[#allocation2 + $0x58] sm:$0xff] %v1862_v61  ;;  %2077 = vrot.lane.b32.xlu0 %v10631_v37, %s9556_s16 }
 0x30d   : > { %1863 = vst [vmem:[#allocation2 + $0x30] sm:$0xff] %v1857_v9  ;;  %2079 = vrot.lane.b32.xlu1 %v10665_v56, %s9556_s16  ;;  %2185 = vrot.lane.b32.xlu2 %v10582_v62, %s9558_s15  ;;  %v1876_v7 = vpop.permute.xlu0 %1875 }
 0x30e   : > { %1865 = vst [vmem:[#allocation2 + $0x40] sm:$0xff] %v1859_v27  ;;  %v1902_v6 = vsel %vm761_vm2, %v10792_v4, %v1876_v7  ;;  %v1900_v4 = vsel %vm761_vm2, %v1876_v7, %v10767_v14 }
 0x30f   : > { %v1878_v51 = vpop.permute.xlu1 %1877  ;;  %v10918_v59 = vpop.permute.xlu2 %2123  ;;  %v1912_v50 = vmul.f32 %v1902_v6, %v10075_v38 }
 0x310   : > { %v1899_v62 = vsel %vm761_vm2, %v10725_v11, %v1878_v51 }
 0x311   : > { %v1920_v8 = vpack.c.bf16 %v1912_v50, %v1911_v0  ;;  %v1907_v58 = vmul.f32 %v1899_v62, %v10081_v46 }
 0x313   : > { %1926 = vst [vmem:[#allocation2 + $0x78] sm:$0xff] %v1920_v8  ;;  %2015 = vrot.lane.b32.xlu0 %v10671_v57, %s9555_s28 }
 0x315   : > { %2017 = vrot.lane.b32.xlu1 %v10631_v37, %s9555_s28  ;;  %2191 = vrot.lane.b32.xlu2 %v10616_v5, %s9558_s15  ;;  %v1882_v17 = vpop.permute.xlu0 %1881  ;;  %v1913_v5 = vmul.f32 %v1900_v4, %v10081_v46 }
 0x316   : > { %v1897_v20 = vsel %vm761_vm2, %v1878_v51, %v1882_v17  ;;  %v1895_v35 = vsel %vm761_vm2, %v1882_v17, %v10811_v28 }
 0x317   : > { %v1884_v44 = vpop.permute.xlu1 %1883  ;;  %v10936_v43 = vpop.permute.xlu2 %2129  ;;  %v1908_v54 = vmul.f32 %v1897_v20, %v10087_v47  ;;  %v1909_v51 = vmul.f32 %v1895_v35, %v10108_v63 }
 0x318   : > { %v1898_v39 = vsel %vm761_vm2, %v10767_v14, %v1884_v44  ;;  %v1901_v14 = vsel %vm761_vm2, %v10759_v42, %v10725_v11 }
 0x319   : > { %v1914_v22 = vmul.f32 %v1898_v39, %v10087_v47  ;;  %v1918_v25 = vpack.c.bf16 %v1908_v54, %v1907_v58 }
 0x31b   : > { %v1921_v48 = vpack.c.bf16 %v1914_v22, %v1913_v5  ;;  %1924 = vst [vmem:[#allocation2 + $0x68] sm:$0xff] %v1918_v25  ;;  %2181 = vrot.lane.b32.xlu0 %v10568_v33, %s9558_s15 }
 0x31d   : > { %1927 = vst [vmem:[#allocation2 + $0x80] sm:$0xff] %v1921_v48  ;;  %2183 = vrot.lane.b32.xlu1 %v10592_v2, %s9558_s15  ;;  %2143 = vrot.lane.b32.xlu2 %v10668_v41, %s9557_s12  ;;  %v1888_v61 = vpop.permute.xlu0 %1887 }
 0x31e   : > { %v1894_v33 = vsel %vm761_vm2, %v1888_v61, %v10833_v12  ;;  %v1896_v2 = vsel %vm761_vm2, %v1884_v44, %v1888_v61  ;;  %v1906_v12 = vmul.f32 %v1901_v14, %v10075_v38 }
 0x31f   : > { %v1890_v9 = vpop.permute.xlu1 %1889  ;;  %v10963_v27 = vpop.permute.xlu2 %2063  ;;  %v1915_v1 = vmul.f32 %v1896_v2, %v10108_v63  ;;  %v1916_v7 = vmul.f32 %v1894_v33, %v10120_v15 }
 0x320   : > { %v1893_v11 = vsel %vm761_vm2, %v10811_v28, %v1890_v9  ;;  %v1903_v6 = vsel %vm761_vm2, %v1890_v9, %v10759_v42  ;;  %v14709_v9 = vld [vmem:[#allocation44_spill] sm:$0xff] }
 0x321   : > { %v1905_v0 = vmul.f32 %v1903_v6, %v10067_v29  ;;  %v1910_v50 = vmul.f32 %v1893_v11, %v10120_v15  ;;  %v1922_v8 = vpack.c.bf16 %v1916_v7, %v1915_v1 }
 0x323   : > { %v1917_v62 = vpack.c.bf16 %v1906_v12, %v1905_v0  ;;  %v1919_v4 = vpack.c.bf16 %v1910_v50, %v1909_v51  ;;  %1928 = vst [vmem:[#allocation2 + $0x88] sm:$0xff] %v1922_v8  ;;  %2187 = vrot.lane.b32.xlu0 %v10595_v16, %s9558_s15  ;;  %v14710_v8 = vld [vmem:[#allocation32_spill] sm:$0xff] }
 0x325   : > { %1923 = vst [vmem:[#allocation2 + $0x60] sm:$0xff] %v1917_v62  ;;  %2189 = vrot.lane.b32.xlu1 %v10610_v53, %s9558_s15  ;;  %2021 = vrot.lane.b32.xlu2 %v10647_v10, %s9555_s28  ;;  %v1930_v42 = vpop.permute.xlu0 %1929  ;;  %v14711_v62 = vld [vmem:[#allocation31_spill] sm:$0xff] }
 0x326   : > { %1925 = vst [vmem:[#allocation2 + $0x70] sm:$0xff] %v1919_v4  ;;  %v1961_v7 = vsel %vm835_vm3, %v1930_v42, %v10859_v40 }
 0x327   : > { %v10983_v28 = vpop.permute.xlu1 %1931  ;;  %v10985_v17 = vpop.permute.xlu2 %2069 }
 0x32b   : > { %1943 = vrot.lane.b32.xlu0 %v10671_v57, %s9554_s8 }
 0x32d   : > { %2141 = vrot.lane.b32.xlu1 %v10647_v10, %s9557_s12  ;;  %2195 = vrot.lane.b32.xlu2 %v10671_v57, %s9558_s15  ;;  %v10993_v16 = vpop.permute.xlu0 %1935 }
 0x32f   : > { %v1938_v53 = vpop.permute.xlu1 %1937  ;;  %v10995_v20 = vpop.permute.xlu2 %2003 }
 0x330   : > { %v1959_v44 = vsel %vm835_vm3, %v10859_v40, %v1938_v53  ;;  %v1966_v40 = vmul.f32 %v1961_v7, %v14710_v8 }
 0x331   : > { %v1967_v5 = vmul.f32 %v1959_v44, %v10166_v13 }
 0x333   : > { %2081 = vrot.lane.b32.xlu0 %v10647_v10, %s9556_s16 }
 0x335   : > { %2083 = vrot.lane.b32.xlu1 %v10668_v41, %s9556_s16  ;;  %1945 = vrot.lane.b32.xlu2 %v10631_v37, %s9554_s8  ;;  %v11006_v58 = vpop.permute.xlu0 %1941 }
 0x336   : > { %v1957_v57 = vsel %vm835_vm3, %v1938_v53, %v11006_v58 }
 0x337   : > { %v11011_v54 = vpop.permute.xlu1 %2121  ;;  %v11013_v39 = vpop.permute.xlu2 %2009  ;;  %v1968_v22 = vmul.f32 %v1957_v57, %v10172_v23 }
 0x339   : > { %v1978_v25 = vpack.c.bf16 %v1968_v22, %v1967_v5 }
 0x33b   : > { %1984 = vst [vmem:[#allocation2 + $0x98] sm:$0xff] %v1978_v25  ;;  %2023 = vrot.lane.b32.xlu0 %v10668_v41, %s9555_s28 }
 0x33d   : > { %2193 = vrot.lane.b32.xlu1 %v10650_v3, %s9558_s15  ;;  %2203 = vrot.lane.b32.xlu2 %v10668_v41, %s9558_s15  ;;  %v2126_v48 = vpop.permute.xlu0 %2125 }
 0x33e   : > { %v2151_v14 = vsel %vm1069_vm5, %v2126_v48, %v10936_v43  ;;  %v2153_v35 = vsel %vm1069_vm5, %v11011_v54, %v2126_v48  ;;  %v14712_v48 = vld [vmem:[#allocation47_spill] sm:$0xff] }
 0x33f   : > { %v2128_v61 = vpop.permute.xlu1 %2127  ;;  %v11029_v33 = vpop.permute.xlu2 %2135  ;;  %v2157_v2 = vmul.f32 %v2153_v35, %v10306_v60  ;;  %v2158_v1 = vmul.f32 %v2151_v14, %v14709_v9  ;;  %v14713_v35 = vld [vmem:[#allocation48_spill] sm:$0xff] }
 0x340   : > { %v2154_v41 = vsel %vm1069_vm5, %v10918_v59, %v2128_v61 }
 0x341   : > { %v2169_v3 = vpack.c.bf16 %v2158_v1, %v2157_v2  ;;  %v2163_v51 = vmul.f32 %v2154_v41, %v10306_v60  ;;  %v2298_v2 = vld [vmem:[%s14469_s5 + $0x8] sm:$0xff] }
 0x343   : > { %2175 = vst [vmem:[#allocation2 + $0x150] sm:$0xff] %v2169_v3  ;;  %2197 = vrot.lane.b32.xlu0 %v10631_v37, %s9558_s15 }
 0x345   : > { %2199 = vrot.lane.b32.xlu1 %v10665_v56, %s9558_s15  ;;  %v11043_v11 = vpop.permute.xlu0 %2131 }
 0x346   : > { %v2152_v6 = vsel %vm1069_vm5, %v2128_v61, %v11043_v11 }
 0x347   : > { %v11048_v12 = vpop.permute.xlu1 %2061  ;;  %v11050_v37 = vpop.permute.xlu2 %1949  ;;  %v2164_v0 = vmul.f32 %v2152_v6, %v14709_v9 }
 0x348   : > { %v1963_v50 = vsel %vm835_vm3, %v11050_v37, %v1930_v42 }
 0x349   : > { %v1965_v4 = vmul.f32 %v1963_v50, %v14711_v62  ;;  %v2172_v53 = vpack.c.bf16 %v2164_v0, %v2163_v51 }
 0x34a   : > { %v7781_v1 = vld [vmem:[#allocation2 + $0x150] sm:$0xf]  ;;  %v8976_v41 = vld [vmem:[#allocation2 + $0x154] sm:$0xf] }
 0x34b   : > { %v1977_v44 = vpack.c.bf16 %v1966_v40, %v1965_v4  ;;  %2178 = vst [vmem:[#allocation2 + $0x168] sm:$0xff] %v2172_v53  ;;  %1947 = vrot.lane.b32.xlu0 %v10665_v56, %s9554_s8 }
 0x34d   : > { %1983 = vst [vmem:[#allocation2 + $0x90] sm:$0xff] %v1977_v44  ;;  %2201 = vrot.lane.b32.xlu1 %v10647_v10, %s9558_s15  ;;  %v2066_v57 = vpop.permute.xlu0 %2065  ;;  %v2297_v10 = vld [vmem:[%s14469_s5] sm:$0xff] }
 0x34e   : > { %v2091_v5 = vsel %vm995_vm6, %v2066_v57, %v10985_v17  ;;  %v2093_v42 = vsel %vm995_vm6, %v11048_v12, %v2066_v57 }
 0x34f   : > { %v2068_v22 = vpop.permute.xlu1 %2067  ;;  %v11069_v25 = vpop.permute.xlu2 %2075  ;;  %v2097_v14 = vmul.f32 %v2093_v42, %v14712_v48  ;;  %v2098_v56 = vmul.f32 %v2091_v5, %v14713_v35 }
 0x350   : > { %v2094_v0 = vsel %vm995_vm6, %v10963_v27, %v2068_v22 }
 0x351   : > { %v2109_v61 = vpack.c.bf16 %v2098_v56, %v2097_v14  ;;  %v2103_v44 = vmul.f32 %v2094_v0, %v14712_v48 }
 0x352   : > { %v8979_v3 = vld [vmem:[#allocation2 + $0x164] sm:$0xf0]  ;;  %v7783_v7 = vld [vmem:[#allocation2 + $0x168] sm:$0xf0] }
 0x353   : > { %2115 = vst [vmem:[#allocation2 + $0x120] sm:$0xff] %v2109_v61  ;;  %2301 = vperm.xlu0 %9339, %v2297_v10   ;;  %v7782_v6 = vor.u32 %v8979_v3, %v7781_v1  ;;  %v7786_v51 = vor.u32 %v8976_v41, %v7783_v7  ;;  %v14714_v61 = vld [vmem:[#allocation37_spill] sm:$0xff]  ;;  %v14715_v1 = vld [vmem:[#allocation38_spill] sm:$0xff] }
 0x355   : > { %2306 = vperm.xlu1 %9340, %v2298_v2   ;;  %v11082_v50 = vpop.permute.xlu0 %2071  ;;  %2591 = vmatpush.bf16.msrb.mxu3 %v7782_v6 }
 0x356   : > { %2619 = vmatpush.bf16.msra.mxu1 %v7786_v51  ;;  %v2092_v40 = vsel %vm995_vm6, %v2068_v22, %v11082_v50 }
 0x357   : > { %v11087_v4 = vpop.permute.xlu1 %2001  ;;  %v11089_v53 = vpop.permute.xlu2 %2013  ;;  %v2104_v57 = vmul.f32 %v2092_v40, %v14713_v35 }
 0x359   : > { %v2112_v5 = vpack.c.bf16 %v2104_v57, %v2103_v44 }
 0x35a   : > { %v7757_v7 = vld [vmem:[#allocation2 + $0x120] sm:$0xf]  ;;  %v8970_v51 = vld [vmem:[#allocation2 + $0x124] sm:$0xf] }
 0x35b   : > { %2118 = vst [vmem:[#allocation2 + $0x138] sm:$0xff] %v2112_v5 }
 0x35d   : > { %v2006_v42 = vpop.permute.xlu0 %2005 }
 0x35e   : > { %v2031_v14 = vsel %vm921_vm4, %v2006_v42, %v11013_v39  ;;  %v2033_v56 = vsel %vm921_vm4, %v11087_v4, %v2006_v42 }
 0x35f   : > { %v2008_v22 = vpop.permute.xlu1 %2007  ;;  %v11099_v10 = vpop.permute.xlu2 %2019  ;;  %v2037_v2 = vmul.f32 %v2033_v56, %v14714_v61  ;;  %v2038_v3 = vmul.f32 %v2031_v14, %v14715_v1 }
 0x360   : > { %v2034_v57 = vsel %vm921_vm4, %v10995_v20, %v2008_v22 }
 0x361   : > { %v2049_v41 = vpack.c.bf16 %v2038_v3, %v2037_v2  ;;  %v2043_v2 = vmul.f32 %v2034_v57, %v14714_v61 }
 0x362   : > { %v8973_v6 = vld [vmem:[#allocation2 + $0x134] sm:$0xf0]  ;;  %v7759_v0 = vld [vmem:[#allocation2 + $0x138] sm:$0xf0] }
 0x363   : > { %2055 = vst [vmem:[#allocation2 + $0xf0] sm:$0xff] %v2049_v41  ;;  %v7758_v40 = vor.u32 %v8973_v6, %v7757_v7  ;;  %v7762_v44 = vor.u32 %v8970_v51, %v7759_v0  ;;  %v2150_v6 = vsel %vm1069_vm5, %v11043_v11, %v11029_v33 }
 0x365   : > { %v11106_v5 = vpop.permute.xlu0 %2011  ;;  %2592 = vmatpush.bf16.msrb.mxu3 %v7758_v40  ;;  %2620 = vmatpush.bf16.msra.mxu1 %v7762_v44  ;;  %v14716_v44 = vld [vmem:[#allocation45_spill] sm:$0xff] }
 0x366   : > { %v2032_v42 = vsel %vm921_vm4, %v2008_v22, %v11106_v5 }
 0x367   : > { %v2134_v14 = vpop.permute.xlu1 %2133  ;;  %v11111_v56 = vpop.permute.xlu2 %2185  ;;  %v2044_v3 = vmul.f32 %v2032_v42, %v14715_v1  ;;  %v14717_v42 = vld [vmem:[#allocation46_spill] sm:$0xff] }
 0x368   : > { %v2149_v7 = vsel %vm1069_vm5, %v10936_v43, %v2134_v14 }
 0x369   : > { %v2052_v41 = vpack.c.bf16 %v2044_v3, %v2043_v2  ;;  %v2159_v57 = vmul.f32 %v2149_v7, %v14716_v44  ;;  %v2165_v3 = vmul.f32 %v2150_v6, %v14716_v44  ;;  %v8961_v7 = vld [vmem:[#allocation2 + $0xd4] sm:$0xf0]  ;;  %v14725_v44 = vld [vmem:[#allocation41_spill] sm:$0xff] }
 0x36a   : > { %v7733_v15 = vld [vmem:[#allocation2 + $0xf0] sm:$0xf] }
 0x36b   : > { %2058 = vst [vmem:[#allocation2 + $0x108] sm:$0xff] %v2052_v41 }
 0x36d   : > { %v11122_v51 = vpop.permute.xlu0 %2137 }
 0x36e   : > { %v2147_v22 = vsel %vm1069_vm5, %v2134_v14, %v11122_v51  ;;  %v8964_v14 = vld [vmem:[#allocation2 + $0xf4] sm:$0xf] }
 0x36f   : > { %v2140_v0 = vpop.permute.xlu1 %2139  ;;  %v11127_v40 = vpop.permute.xlu2 %2191  ;;  %v2160_v2 = vmul.f32 %v2147_v22, %v14717_v42  ;;  %v7709_v22 = vld [vmem:[#allocation2 + $0xc0] sm:$0xf] }
 0x370   : > { %v2148_v43 = vsel %vm1069_vm5, %v11029_v33, %v2140_v0  ;;  %v1962_v33 = vsel %vm835_vm3, %v10983_v28, %v10993_v16 }
 0x371   : > { %v2166_v11 = vmul.f32 %v2148_v43, %v14717_v42  ;;  %v2170_v41 = vpack.c.bf16 %v2160_v2, %v2159_v57  ;;  %v8958_v57 = vld [vmem:[#allocation2 + $0xc4] sm:$0xf]  ;;  %v7710_v2 = vor.u32 %v8961_v7, %v7709_v22 }
 0x372   : > { %v8967_v47 = vld [vmem:[#allocation2 + $0x104] sm:$0xf0]  ;;  %v7735_v46 = vld [vmem:[#allocation2 + $0x108] sm:$0xf0]  ;;  %v7714_v43 = vor.u32 %v8958_v57, %v7711_v55  ;;  %v14720_v57 = vld [vmem:[#allocation51_spill] sm:$0xff] }
 0x373   : > { %v2173_v63 = vpack.c.bf16 %v2166_v11, %v2165_v3  ;;  %2176 = vst [vmem:[#allocation2 + $0x158] sm:$0xff] %v2170_v41  ;;  %v7734_v29 = vor.u32 %v8967_v47, %v7733_v15  ;;  %v7738_v38 = vor.u32 %v8964_v14, %v7735_v46  ;;  %v1972_v3 = vmul.f32 %v1962_v33, %v14710_v8  ;;  %v14719_v14 = vld [vmem:[#allocation50_spill] sm:$0xff] }
 0x375   : > { %2179 = vst [vmem:[#allocation2 + $0x170] sm:$0xff] %v2173_v63  ;;  %v11140_v6 = vpop.permute.xlu0 %1951  ;;  %2593 = vmatpush.bf16.msrb.mxu3 %v7734_v29  ;;  %2621 = vmatpush.bf16.msra.mxu1 %v7738_v38  ;;  %v14718_v38 = vld [vmem:[#allocation49_spill] sm:$0xff] }
 0x376   : > { %v1964_v47 = vsel %vm835_vm3, %v11140_v6, %v10983_v28 }
 0x377   : > { %v2074_v46 = vpop.permute.xlu1 %2073  ;;  %v2144_v15 = vpop.permute.xlu2 %2143  ;;  %v1971_v11 = vmul.f32 %v1964_v47, %v14711_v62 }
 0x378   : > { %v2146_v63 = vsel %vm1069_vm5, %v2140_v0, %v2144_v15  ;;  %v2156_v29 = vsel %vm1069_vm5, %v2144_v15, %v10918_v59  ;;  %v2089_v55 = vsel %vm995_vm6, %v10985_v17, %v2074_v46  ;;  %v2090_v0 = vsel %vm995_vm6, %v11082_v50, %v11069_v25  ;;  %v14721_v15 = vld [vmem:[#allocation52_spill] sm:$0xff] }
 0x379   : > { %v2167_v41 = vmul.f32 %v2146_v63, %v14718_v38  ;;  %v2168_v42 = vmul.f32 %v2156_v29, %v14719_v14  ;;  %v1980_v28 = vpack.c.bf16 %v1972_v3, %v1971_v11  ;;  %2594 = vmatpush.bf16.msrb.mxu3 %v7710_v2  ;;  %2622 = vmatpush.bf16.msra.mxu1 %v7714_v43  ;;  %v7685_v11 = vld [vmem:[#allocation2 + $0x90] sm:$0xf]  ;;  %v8952_v29 = vld [vmem:[#allocation2 + $0x94] sm:$0xf] }
 0x37a   : > { %v2099_v47 = vmul.f32 %v2089_v55, %v14720_v57  ;;  %v2105_v50 = vmul.f32 %v2090_v0, %v14720_v57  ;;  %v7661_v55 = vld [vmem:[#allocation2 + $0x60] sm:$0xf]  ;;  %v14724_v57 = vld [vmem:[#allocation42_spill] sm:$0xff] }
 0x37b   : > { %v2174_v7 = vpack.c.bf16 %v2168_v42, %v2167_v41  ;;  %1986 = vst [vmem:[#allocation2 + $0xa8] sm:$0xff] %v1980_v28 }
 0x37d   : > { %2180 = vst [vmem:[#allocation2 + $0x178] sm:$0xff] %v2174_v7  ;;  %v11162_v59 = vpop.permute.xlu0 %2077 }
 0x37e   : > { %v2087_v33 = vsel %vm995_vm6, %v2074_v46, %v11162_v59 }
 0x37f   : > { %v11167_v22 = vpop.permute.xlu1 %2079  ;;  %v2022_v42 = vpop.permute.xlu2 %2021  ;;  %v2100_v2 = vmul.f32 %v2087_v33, %v14721_v15  ;;  %v8946_v33 = vld [vmem:[#allocation2 + $0x64] sm:$0xf] }
 0x380   : > { %v2088_v17 = vsel %vm995_vm6, %v11069_v25, %v11167_v22  ;;  %v2029_v25 = vsel %vm921_vm4, %v11013_v39, %v11089_v53  ;;  %v2035_v0 = vsel %vm921_vm4, %v2022_v42, %v11087_v4 }
 0x381   : > { %v2106_v43 = vmul.f32 %v2088_v17, %v14721_v15  ;;  %v2110_v3 = vpack.c.bf16 %v2100_v2, %v2099_v47  ;;  %v8949_v2 = vld [vmem:[#allocation2 + $0x74] sm:$0xf0]  ;;  %v7663_v17 = vld [vmem:[#allocation2 + $0x78] sm:$0xf0] }
 0x382   : > { %v8955_v46 = vld [vmem:[#allocation2 + $0xa4] sm:$0xf0]  ;;  %v7687_v41 = vld [vmem:[#allocation2 + $0xa8] sm:$0xf0]  ;;  %v7662_v39 = vor.u32 %v8949_v2, %v7661_v55  ;;  %v8940_v2 = vld [vmem:[#allocation2 + $0x34] sm:$0xf] }
 0x383   : > { %v2113_v63 = vpack.c.bf16 %v2106_v43, %v2105_v50  ;;  %2116 = vst [vmem:[#allocation2 + $0x128] sm:$0xff] %v2110_v3  ;;  %v7686_v28 = vor.u32 %v8955_v46, %v7685_v11  ;;  %v7690_v7 = vor.u32 %v8952_v29, %v7687_v41  ;;  %v14722_v46 = vld [vmem:[#allocation39_spill] sm:$0xff]  ;;  %v14723_v29 = vld [vmem:[#allocation40_spill] sm:$0xff] }
 0x384   : > { %v2039_v15 = vmul.f32 %v2029_v25, %v14722_v46  ;;  %v7613_v25 = vld [vmem:[#allocation2] sm:$0xf] }
 0x385   : > { %2119 = vst [vmem:[#allocation2 + $0x140] sm:$0xff] %v2113_v63  ;;  %v2016_v47 = vpop.permute.xlu0 %2015  ;;  %2595 = vmatpush.bf16.msrb.mxu3 %v7686_v28  ;;  %2623 = vmatpush.bf16.msra.mxu1 %v7690_v7  ;;  %v7666_v63 = vor.u32 %v8946_v33, %v7663_v17  ;;  %v7637_v33 = vld [vmem:[#allocation2 + $0x30] sm:$0xf] }
 0x386   : > { %v2028_v50 = vsel %vm921_vm4, %v2016_v47, %v11099_v10  ;;  %v2030_v43 = vsel %vm921_vm4, %v11106_v5, %v2016_v47  ;;  %v2042_v5 = vmul.f32 %v2035_v0, %v14724_v57 }
 0x387   : > { %v2018_v3 = vpop.permute.xlu1 %2017  ;;  %v11190_v11 = vpop.permute.xlu2 %2195  ;;  %v2045_v4 = vmul.f32 %v2030_v43, %v14722_v46  ;;  %v2046_v41 = vmul.f32 %v2028_v50, %v14723_v29 }
 0x388   : > { %v2025_v28 = vsel %vm921_vm4, %v2018_v3, %v2022_v42  ;;  %v2027_v7 = vsel %vm921_vm4, %v11089_v53, %v2018_v3  ;;  %v8943_v42 = vld [vmem:[#allocation2 + $0x44] sm:$0xf0]  ;;  %v7642_v53 = vor.u32 %v8940_v2, %v7639_v18  ;;  %v8934_v3 = vld [vmem:[#allocation2 + $0x4] sm:$0xf]  ;;  %v8937_v18 = vld [vmem:[#allocation2 + $0x14] sm:$0xf0] }
 0x389   : > { %v2040_v47 = vmul.f32 %v2027_v7, %v14723_v29  ;;  %v2041_v55 = vmul.f32 %v2025_v28, %v14725_v44  ;;  %v2053_v17 = vpack.c.bf16 %v2046_v41, %v2045_v4  ;;  %2596 = vmatpush.bf16.msrb.mxu3 %v7662_v39  ;;  %2624 = vmatpush.bf16.msra.mxu1 %v7666_v63  ;;  %v7605_v39 = vld [vmem:[%s14466_s2] sm:$0xf]  ;;  %v7615_v41 = vld [vmem:[#allocation2 + $0x18] sm:$0xf0] }
 0x38a   : > { %v7638_v52 = vor.u32 %v8943_v42, %v7637_v33  ;;  %v7614_v7 = vor.u32 %v8937_v18, %v7613_v25  ;;  %v14727_v33 = vld [vmem:[#allocation36_spill] sm:$0xff]  ;;  %v14728_v25 = vld [vmem:[#allocation55_spill] sm:$0xff] }
 0x38b   : > { %v2050_v50 = vpack.c.bf16 %v2040_v47, %v2039_v15  ;;  %v2051_v43 = vpack.c.bf16 %v2042_v5, %v2041_v55  ;;  %2059 = vst [vmem:[#allocation2 + $0x110] sm:$0xff] %v2053_v17  ;;  %v8933_v15 = vld [vmem:[%s14466_s2 + $0x4] sm:$0xf0]  ;;  %v7618_v5 = vor.u32 %v8934_v3, %v7615_v41  ;;  %v14726_v47 = vld [vmem:[#allocation35_spill] sm:$0xff] }
 0x38c   : > { %v11221_v17 = vor.u32 %v8933_v15, %v7605_v39  ;;  %v14729_v39 = vld [vmem:[#allocation56_spill] sm:$0xff] }
 0x38d   : > { %2056 = vst [vmem:[#allocation2 + $0xf8] sm:$0xff] %v2050_v50  ;;  %v11203_v0 = vpop.permute.xlu0 %2181  ;;  %2597 = vmatpush.bf16.msrb.mxu3 %v7638_v52  ;;  %2625 = vmatpush.bf16.msra.mxu1 %v7642_v53 }
 0x38e   : > { %2057 = vst [vmem:[#allocation2 + $0x100] sm:$0xff] %v2051_v43 }
 0x38f   : > { %v11211_v63 = vpop.permute.xlu1 %2183  ;;  %v1946_v4 = vpop.permute.xlu2 %1945 }
 0x390   : > { %v1953_v28 = vsel %vm835_vm3, %v1946_v4, %v11050_v37  ;;  %v1955_v52 = vsel %vm835_vm3, %v11006_v58, %v1946_v4  ;;  %v2213_v58 = vsel %vm1143_vm7, %v11203_v0, %v11111_v56 }
 0x391   : > { %v1969_v55 = vmul.f32 %v1955_v52, %v14726_v47  ;;  %v1970_v2 = vmul.f32 %v1953_v28, %v14727_v33  ;;  %2598 = vmatpush.bf16.msrb.mxu3 %v7614_v7  ;;  %2626 = vmatpush.bf16.msra.mxu1 %v7618_v5  ;;  %v2217_v18 = vmul.f32 %v2213_v58, %v14728_v25 }
 0x392   : > { %v1960_v7 = vsel %vm835_vm3, %v10993_v16, %v10891_v30 }
 0x393   : > { %v1979_v50 = vpack.c.bf16 %v1970_v2, %v1969_v55  ;;  %v1973_v2 = vmul.f32 %v1960_v7, %v10166_v13 }
 0x394   : > { %2599 = vmatmul.bf16.vlgmr.msrb.gmra.mxu3 %v11221_v17  ;;  %2627 = vmatmul.bf16.vlgmr.msra.gmra.mxu1 %v11221_v17 }
 0x395   : > { %1985 = vst [vmem:[#allocation2 + $0xa0] sm:$0xff] %v1979_v50  ;;  %v2188_v37 = vpop.permute.xlu0 %2187 }
 0x396   : > { %v2212_v43 = vsel %vm1143_vm7, %v2188_v37, %v11127_v40  ;;  %v2214_v42 = vsel %vm1143_vm7, %v11211_v63, %v2188_v37 }
 0x397   : > { %v11235_v53 = vpop.permute.xlu1 %2189  ;;  %v2223_v3 = vmul.f32 %v2214_v42, %v14728_v25  ;;  %v2224_v15 = vmul.f32 %v2212_v43, %v14729_v39 }
 0x398   : > { %v2211_v4 = vsel %vm1143_vm7, %v11111_v56, %v11235_v53 }
 0x399   : > { %v2218_v41 = vmul.f32 %v2211_v4, %v14729_v39  ;;  %v2232_v28 = vpack.c.bf16 %v2224_v15, %v2223_v3  ;;  %v8980_v3 = vld [vmem:[#allocation2 + $0x16c] sm:$0xf0]  ;;  %v8932_v15 = vld [vmem:[%s14466_s2 + $0x4] sm:$0xf] }
 0x39b   : > { %v2229_v52 = vpack.c.bf16 %v2218_v41, %v2217_v18  ;;  %2238 = vst [vmem:[#allocation2 + $0x198] sm:$0xff] %v2232_v28 }
 0x39d   : > { %2235 = vst [vmem:[#allocation2 + $0x180] sm:$0xff] %v2229_v52  ;;  %v11249_v5 = vpop.permute.xlu0 %1943 }
 0x39e   : > { %v1958_v56 = vsel %vm835_vm3, %v10891_v30, %v11249_v5  ;;  %v7791_v30 = vld [vmem:[#allocation2 + $0x170] sm:$0xf0] }
 0x39f   : > { %v2142_v55 = vpop.permute.xlu1 %2141  ;;  %v1974_v50 = vmul.f32 %v1958_v56, %v10172_v23  ;;  %v7789_v56 = vld [vmem:[#allocation2 + $0x158] sm:$0xf] }
 0x3a0   : > { %v2145_v58 = vsel %vm1069_vm5, %v11122_v51, %v2142_v55  ;;  %v2155_v16 = vsel %vm1069_vm5, %v2142_v55, %v11011_v54  ;;  %v7607_v51 = vld [vmem:[%s14466_s2 + $0x8] sm:$0xf0] }
 0x3a1   : > { %v2161_v37 = vmul.f32 %v2145_v58, %v14718_v38  ;;  %v2162_v43 = vmul.f32 %v2155_v16, %v14719_v14  ;;  %v1981_v42 = vpack.c.bf16 %v1974_v50, %v1973_v2  ;;  %v7790_v2 = vor.u32 %v8980_v3, %v7789_v56  ;;  %v8977_v50 = vld [vmem:[#allocation2 + $0x15c] sm:$0xf] }
 0x3a2   : > { %v8985_v18 = vld [vmem:[#allocation2 + $0x194] sm:$0xf0]  ;;  %v7807_v41 = vld [vmem:[#allocation2 + $0x198] sm:$0xf0]  ;;  %v11271_v58 = vor.u32 %v8932_v15, %v7607_v51  ;;  %v7767_v51 = vld [vmem:[#allocation2 + $0x140] sm:$0xf0] }
 0x3a3   : > { %v2171_v4 = vpack.c.bf16 %v2162_v43, %v2161_v37  ;;  %1987 = vst [vmem:[#allocation2 + $0xb0] sm:$0xff] %v1981_v42  ;;  %v7794_v42 = vor.u32 %v8977_v50, %v7791_v30  ;;  %v7765_v30 = vld [vmem:[#allocation2 + $0x128] sm:$0xf]  ;;  %v8968_v50 = vld [vmem:[#allocation2 + $0x10c] sm:$0xf0] }
 0x3a4   : > { %v7805_v54 = vld [vmem:[#allocation2 + $0x180] sm:$0xf]  ;;  %v8982_v28 = vld [vmem:[#allocation2 + $0x184] sm:$0xf] }
 0x3a5   : > { %2177 = vst [vmem:[#allocation2 + $0x160] sm:$0xff] %v2171_v4  ;;  %v7806_v52 = vor.u32 %v8985_v18, %v7805_v54  ;;  %v7810_v7 = vor.u32 %v8982_v28, %v7807_v41  ;;  %v2082_v55 = vpop.permute.xlu0 %2081  ;;  %v8974_v4 = vld [vmem:[#allocation2 + $0x13c] sm:$0xf0]  ;;  %v14730_v18 = vld [vmem:[#allocation53_spill] sm:$0xff]  ;;  %v14731_v54 = vld [vmem:[#allocation54_spill] sm:$0xff] }
 0x3a6   : > { %v2085_v16 = vsel %vm995_vm6, %v11162_v59, %v2082_v55  ;;  %v2095_v37 = vsel %vm995_vm6, %v2082_v55, %v11048_v12 }
 0x3a7   : > { %v2084_v43 = vpop.permute.xlu1 %2083  ;;  %2612 = vmatpush.bf16.msra.mxu2 %v7806_v52  ;;  %2640 = vmatpush.bf16.msrb.mxu0 %v7810_v7  ;;  %v2101_v41 = vmul.f32 %v2085_v16, %v14730_v18  ;;  %v2102_v3 = vmul.f32 %v2095_v37, %v14731_v54  ;;  %v8971_v7 = vld [vmem:[#allocation2 + $0x12c] sm:$0xf] }
 0x3a8   : > { %v2086_v15 = vsel %vm995_vm6, %v11167_v22, %v2084_v43  ;;  %v2096_v59 = vsel %vm995_vm6, %v2084_v43, %v10963_v27  ;;  %v7766_v22 = vor.u32 %v8974_v4, %v7765_v30  ;;  %v7770_v55 = vor.u32 %v8971_v7, %v7767_v51  ;;  %v7741_v27 = vld [vmem:[#allocation2 + $0xf8] sm:$0xf]  ;;  %v7743_v43 = vld [vmem:[#allocation2 + $0x110] sm:$0xf0]  ;;  %v2204_v7 = vpop.permute.xlu2 %2203 }
 0x3a9   : > { %v2107_v12 = vmul.f32 %v2086_v15, %v14730_v18  ;;  %v2108_v28 = vmul.f32 %v2096_v59, %v14731_v54  ;;  %v2111_v52 = vpack.c.bf16 %v2102_v3, %v2101_v41  ;;  %v7742_v37 = vor.u32 %v8968_v50, %v7741_v27  ;;  %v8962_v15 = vld [vmem:[#allocation2 + $0xdc] sm:$0xf0]  ;;  %v7693_v27 = vld [vmem:[#allocation2 + $0x98] sm:$0xf] }
 0x3aa   : > { %7827 = vmatmul.msk.bf16.vlgmr.msra.gmra.mxu2 %vm1540_vm8, %v11271_v58  ;;  %7828 = vmatmul.msk.bf16.vlgmr.msrb.gmra.mxu0 %vm1540_vm8, %v11271_v58  ;;  %v2216_v50 = vsel %vm1143_vm7, %v2204_v7, %v11211_v63 }
 0x3ab   : > { %2647 = vmatpush.bf16.msrb.mxu2 %v7790_v2  ;;  %2675 = vmatpush.bf16.msra.mxu0 %v7794_v42  ;;  %v2114_v56 = vpack.c.bf16 %v2108_v28, %v2107_v12  ;;  %2117 = vst [vmem:[#allocation2 + $0x130] sm:$0xff] %v2111_v52  ;;  %v8965_v2 = vld [vmem:[#allocation2 + $0xfc] sm:$0xf]  ;;  %v7719_v12 = vld [vmem:[#allocation2 + $0xe0] sm:$0xf0] }
 0x3ac   : > { %v7746_v3 = vor.u32 %v8965_v2, %v7743_v43  ;;  %v7717_v28 = vld [vmem:[#allocation2 + $0xc8] sm:$0xf]  ;;  %v2210_v2 = vsel %vm1143_vm7, %v11127_v40, %v11190_v11  ;;  %v8953_v43 = vld [vmem:[#allocation2 + $0x9c] sm:$0xf] }
 0x3ad   : > { %2120 = vst [vmem:[#allocation2 + $0x148] sm:$0xff] %v2114_v56  ;;  %v2024_v16 = vpop.permute.xlu0 %2023  ;;  %v7718_v52 = vor.u32 %v8962_v15, %v7717_v28  ;;  %v8956_v56 = vld [vmem:[#allocation2 + $0xac] sm:$0xf0]  ;;  %v7671_v28 = vld [vmem:[#allocation2 + $0x80] sm:$0xf0] }
 0x3ae   : > { %v2026_v42 = vsel %vm921_vm4, %v11099_v10, %v2024_v16  ;;  %v2036_v4 = vsel %vm921_vm4, %v2024_v16, %v10995_v20  ;;  %v7695_v20 = vld [vmem:[#allocation2 + $0xb0] sm:$0xf0] }
 0x3af   : > { %2648 = vmatpush.bf16.msrb.mxu2 %v7766_v22  ;;  %2676 = vmatpush.bf16.msra.mxu0 %v7770_v55  ;;  %v2194_v41 = vpop.permute.xlu1 %2193  ;;  %v2047_v59 = vmul.f32 %v2026_v42, %v14725_v44  ;;  %v2048_v51 = vmul.f32 %v2036_v4, %v14724_v57  ;;  %v8959_v22 = vld [vmem:[#allocation2 + $0xcc] sm:$0xf]  ;;  %v8944_v57 = vld [vmem:[#allocation2 + $0x4c] sm:$0xf0] }
 0x3b0   : > { %v7722_v10 = vor.u32 %v8959_v22, %v7719_v12  ;;  %v2209_v55 = vsel %vm1143_vm7, %v11235_v53, %v2194_v41  ;;  %v8950_v53 = vld [vmem:[#allocation2 + $0x7c] sm:$0xf0]  ;;  %v14732_v15 = vld [vmem:[#allocation57_spill] sm:$0xff] }
 0x3b1   : > { %v2054_v30 = vpack.c.bf16 %v2048_v51, %v2047_v59  ;;  %v2219_v59 = vmul.f32 %v2209_v55, %v14732_v15  ;;  %v14733_v51 = vld [vmem:[#allocation58_spill] sm:$0xff] }
 0x3b3   : > { %2649 = vmatpush.bf16.msrb.mxu2 %v7742_v37  ;;  %2677 = vmatpush.bf16.msra.mxu0 %v7746_v3  ;;  %2060 = vst [vmem:[#allocation2 + $0x118] sm:$0xff] %v2054_v30  ;;  %v7694_v37 = vor.u32 %v8956_v56, %v7693_v27  ;;  %v7698_v3 = vor.u32 %v8953_v43, %v7695_v20  ;;  %v7669_v20 = vld [vmem:[#allocation2 + $0x68] sm:$0xf]  ;;  %v8947_v43 = vld [vmem:[#allocation2 + $0x6c] sm:$0xf] }
 0x3b4   : > { %v2225_v30 = vmul.f32 %v2210_v2, %v14732_v15  ;;  %v7670_v27 = vor.u32 %v8950_v53, %v7669_v20  ;;  %v7674_v23 = vor.u32 %v8947_v43, %v7671_v28  ;;  %v7645_v2 = vld [vmem:[#allocation2 + $0x38] sm:$0xf]  ;;  %v8935_v20 = vld [vmem:[#allocation2 + $0xc] sm:$0xf] }
 0x3b5   : > { %v2198_v16 = vpop.permute.xlu0 %2197 }
 0x3b6   : > { %v2207_v42 = vsel %vm1143_vm7, %v2194_v41, %v2198_v16 }
 0x3b7   : > { %2650 = vmatpush.bf16.msrb.mxu2 %v7718_v52  ;;  %2678 = vmatpush.bf16.msra.mxu0 %v7722_v10  ;;  %v2200_v4 = vpop.permute.xlu1 %2199  ;;  %v2220_v12 = vmul.f32 %v2207_v42, %v14733_v51  ;;  %v14734_v52 = vld [vmem:[#allocation59_spill] sm:$0xff]  ;;  %v14735_v10 = vld [vmem:[#allocation60_spill] sm:$0xff] }
 0x3b8   : > { %v2206_v40 = vsel %vm1143_vm7, %v2200_v4, %v2204_v7  ;;  %v2208_v63 = vsel %vm1143_vm7, %v11190_v11, %v2200_v4  ;;  %v2228_v41 = vmul.f32 %v2216_v50, %v14734_v52  ;;  %v7647_v11 = vld [vmem:[#allocation2 + $0x50] sm:$0xf0]  ;;  %v8941_v4 = vld [vmem:[#allocation2 + $0x3c] sm:$0xf] }
 0x3b9   : > { %v2226_v22 = vmul.f32 %v2208_v63, %v14733_v51  ;;  %v2227_v56 = vmul.f32 %v2206_v40, %v14735_v10  ;;  %v2230_v55 = vpack.c.bf16 %v2220_v12, %v2219_v59  ;;  %v7650_v12 = vor.u32 %v8941_v4, %v7647_v11  ;;  %v8938_v40 = vld [vmem:[#allocation2 + $0x1c] sm:$0xf0]  ;;  %v7799_v4 = vld [vmem:[#allocation2 + $0x178] sm:$0xf0] }
 0x3bb   : > { %2651 = vmatpush.bf16.msrb.mxu2 %v7694_v37  ;;  %2679 = vmatpush.bf16.msra.mxu0 %v7698_v3  ;;  %v2233_v7 = vpack.c.bf16 %v2226_v22, %v2225_v30  ;;  %v2234_v42 = vpack.c.bf16 %v2228_v41, %v2227_v56  ;;  %2236 = vst [vmem:[#allocation2 + $0x188] sm:$0xff] %v2230_v55  ;;  %v7621_v41 = vld [vmem:[#allocation2 + $0x8] sm:$0xf]  ;;  %v7797_v55 = vld [vmem:[#allocation2 + $0x160] sm:$0xf] }
 0x3bc   : > { %v7646_v37 = vor.u32 %v8944_v57, %v7645_v2  ;;  %v7622_v56 = vor.u32 %v8938_v40, %v7621_v41  ;;  %v7773_v40 = vld [vmem:[#allocation2 + $0x130] sm:$0xf] }
 0x3bd   : > { %2239 = vst [vmem:[#allocation2 + $0x1a0] sm:$0xff] %v2233_v7  ;;  %v1948_v50 = vpop.permute.xlu0 %1947 }
 0x3be   : > { %2240 = vst [vmem:[#allocation2 + $0x1a8] sm:$0xff] %v2234_v42  ;;  %v1954_v3 = vsel %vm835_vm3, %v1948_v50, %v11140_v6  ;;  %v1956_v53 = vsel %vm835_vm3, %v11249_v5, %v1948_v50  ;;  %v7623_v6 = vld [vmem:[#allocation2 + $0x20] sm:$0xf0] }
 0x3bf   : > { %2652 = vmatpush.bf16.msrb.mxu2 %v7670_v27  ;;  %2680 = vmatpush.bf16.msra.mxu0 %v7674_v23  ;;  %v2202_v59 = vpop.permute.xlu1 %2201  ;;  %v1975_v63 = vmul.f32 %v1956_v53, %v14726_v47  ;;  %v1976_v23 = vmul.f32 %v1954_v3, %v14727_v33  ;;  %v7626_v43 = vor.u32 %v8935_v20, %v7623_v6  ;;  %v8978_v42 = vld [vmem:[#allocation2 + $0x164] sm:$0xf]  ;;  %v8969_v6 = vld [vmem:[#allocation2 + $0x114] sm:$0xf0] }
 0x3c0   : > { %v2205_v28 = vsel %vm1143_vm7, %v2198_v16, %v2202_v59  ;;  %v2215_v57 = vsel %vm1143_vm7, %v2202_v59, %v11203_v0  ;;  %v7802_v53 = vor.u32 %v8978_v42, %v7799_v4  ;;  %v8975_v59 = vld [vmem:[#allocation2 + $0x144] sm:$0xf0]  ;;  %v7727_v42 = vld [vmem:[#allocation2 + $0xe8] sm:$0xf0] }
 0x3c1   : > { %v2221_v30 = vmul.f32 %v2205_v28, %v14735_v10  ;;  %v2222_v5 = vmul.f32 %v2215_v57, %v14734_v52  ;;  %v1982_v22 = vpack.c.bf16 %v1976_v23, %v1975_v63  ;;  %v8972_v63 = vld [vmem:[#allocation2 + $0x134] sm:$0xf]  ;;  %v7774_v23 = vor.u32 %v8975_v59, %v7773_v40  ;;  %v7677_v40 = vld [vmem:[#allocation2 + $0x70] sm:$0xf] }
 0x3c2   : > { %v7813_v7 = vld [vmem:[#allocation2 + $0x188] sm:$0xf]  ;;  %v8983_v16 = vld [vmem:[#allocation2 + $0x18c] sm:$0xf] }
 0x3c3   : > { %2653 = vmatpush.bf16.msrb.mxu2 %v7646_v37  ;;  %2681 = vmatpush.bf16.msra.mxu0 %v7650_v12  ;;  %v2231_v27 = vpack.c.bf16 %v2222_v5, %v2221_v30  ;;  %1988 = vst [vmem:[#allocation2 + $0xb8] sm:$0xff] %v1982_v22  ;;  %v8981_v37 = vld [vmem:[#allocation2 + $0x174] sm:$0xf0]  ;;  %v7775_v12 = vld [vmem:[#allocation2 + $0x148] sm:$0xf0] }
 0x3c4   : > { %v8986_v0 = vld [vmem:[#allocation2 + $0x19c] sm:$0xf0]  ;;  %v7815_v11 = vld [vmem:[#allocation2 + $0x1a0] sm:$0xf0]  ;;  %v7798_v3 = vor.u32 %v8981_v37, %v7797_v55  ;;  %v7778_v28 = vor.u32 %v8972_v63, %v7775_v12  ;;  %v7751_v30 = vld [vmem:[#allocation2 + $0x118] sm:$0xf0] }
 0x3c5   : > { %2237 = vst [vmem:[#allocation2 + $0x190] sm:$0xff] %v2231_v27  ;;  %v7814_v2 = vor.u32 %v8986_v0, %v7813_v7  ;;  %v7818_v50 = vor.u32 %v8983_v16, %v7815_v11  ;;  %v8987_v57 = vld [vmem:[#allocation2 + $0x1a4] sm:$0xf0]  ;;  %v7823_v22 = vld [vmem:[#allocation2 + $0x1a8] sm:$0xf0] }
 0x3c6   : > { %v7749_v55 = vld [vmem:[#allocation2 + $0x100] sm:$0xf]  ;;  %v8966_v27 = vld [vmem:[#allocation2 + $0x104] sm:$0xf]  ;;  %v8963_v16 = vld [vmem:[#allocation2 + $0xe4] sm:$0xf0] }
 0x3c7   : > { %2654 = vmatpush.bf16.msrb.mxu2 %v7622_v56  ;;  %2682 = vmatpush.bf16.msra.mxu0 %v7626_v43  ;;  %v7750_v43 = vor.u32 %v8969_v6, %v7749_v55  ;;  %v7754_v7 = vor.u32 %v8966_v27, %v7751_v30  ;;  %v7725_v0 = vld [vmem:[#allocation2 + $0xd0] sm:$0xf]  ;;  %v8960_v11 = vld [vmem:[#allocation2 + $0xd4] sm:$0xf]  ;;  %v7653_v30 = vld [vmem:[#allocation2 + $0x40] sm:$0xf] }
 0x3c8   : > { %2668 = vmatpush.bf16.msra.mxu3 %v7814_v2  ;;  %2696 = vmatpush.bf16.msrb.mxu1 %v7818_v50  ;;  %v7726_v2 = vor.u32 %v8963_v16, %v7725_v0  ;;  %v7730_v50 = vor.u32 %v8960_v11, %v7727_v42  ;;  %v8948_v63 = vld [vmem:[#allocation2 + $0x74] sm:$0xf]  ;;  %v7629_v55 = vld [vmem:[#allocation2 + $0x10] sm:$0xf]  ;;  %v11351_v0 = vpop.permute.xlu0 %2301 }
 0x3c9   : > { %v8936_v27 = vld [vmem:[#allocation2 + $0x14] sm:$0xf] }
 0x3ca   : > { %2655 = vmatmul.bf16.vlgmr.msrb.gmra.mxu2 %v11221_v17  ;;  %2683 = vmatmul.bf16.vlgmr.msra.gmra.mxu0 %v11221_v17  ;;  %v8957_v37 = vld [vmem:[#allocation2 + $0xb4] sm:$0xf0]  ;;  %v7703_v4 = vld [vmem:[#allocation2 + $0xb8] sm:$0xf0] }
 0x3cb   : > { %7829 = vmatmul.msk.bf16.vlgmr.msra.gmra.mxu3 %vm1540_vm8, %v11271_v58  ;;  %7830 = vmatmul.msk.bf16.vlgmr.msrb.gmra.mxu1 %vm1540_vm8, %v11271_v58 }
 0x3cc   : > { %2703 = vmatpush.bf16.msrb.mxu3 %v7798_v3  ;;  %2731 = vmatpush.bf16.msra.mxu1 %v7802_v53  ;;  %v7821_v5 = vld [vmem:[#allocation2 + $0x190] sm:$0xf]  ;;  %v8984_v41 = vld [vmem:[#allocation2 + $0x194] sm:$0xf]  ;;  %v7701_v3 = vld [vmem:[#allocation2 + $0xa0] sm:$0xf] }
 0x3cd   : > { %v7822_v56 = vor.u32 %v8987_v57, %v7821_v5  ;;  %v7826_v20 = vor.u32 %v8984_v41, %v7823_v22  ;;  %v8954_v53 = vld [vmem:[#allocation2 + $0xa4] sm:$0xf]  ;;  %v7702_v59 = vor.u32 %v8957_v37, %v7701_v3  ;;  %v8945_v41 = vld [vmem:[#allocation2 + $0x54] sm:$0xf0]  ;;  %v7655_v22 = vld [vmem:[#allocation2 + $0x58] sm:$0xf0] }
 0x3ce   : > { %v7706_v12 = vor.u32 %v8954_v53, %v7703_v4  ;;  %v8942_v5 = vld [vmem:[#allocation2 + $0x44] sm:$0xf]  ;;  %v14736_v53 = vld [vmem:[#allocation62_spill] sm:$0xff] }
 0x3cf   : > { %2724 = vmatpush.bf16.msra.mxu2 %v7822_v56  ;;  %2752 = vmatpush.bf16.msrb.mxu0 %v7826_v20  ;;  %v7654_v56 = vor.u32 %v8945_v41, %v7653_v30  ;;  %v7658_v20 = vor.u32 %v8942_v5, %v7655_v22  ;;  %v14737_v30 = vld [vmem:[#allocation61_spill] sm:$0xff] }
 0x3d0   : > { %2704 = vmatpush.bf16.msrb.mxu3 %v7774_v23  ;;  %2732 = vmatpush.bf16.msra.mxu1 %v7778_v28  ;;  %v8951_v23 = vld [vmem:[#allocation2 + $0x84] sm:$0xf0]  ;;  %v7679_v28 = vld [vmem:[#allocation2 + $0x88] sm:$0xf0] }
 0x3d1   : > { %v7678_v57 = vor.u32 %v8951_v23, %v7677_v40  ;;  %v7682_v6 = vor.u32 %v8948_v63, %v7679_v28 }
 0x3d4   : > { %2705 = vmatpush.bf16.msrb.mxu3 %v7750_v43  ;;  %2733 = vmatpush.bf16.msra.mxu1 %v7754_v7  ;;  %v8939_v43 = vld [vmem:[#allocation2 + $0x24] sm:$0xf0] }
 0x3d5   : > { %v7630_v7 = vor.u32 %v8939_v43, %v7629_v55 }
 0x3d8   : > { %2706 = vmatpush.bf16.msrb.mxu3 %v7726_v2  ;;  %2734 = vmatpush.bf16.msra.mxu1 %v7730_v50 }
 0x3da   : > { %7831 = vmatmul.msk.bf16.vlgmr.msra.gmra.mxu2 %vm1540_vm8, %v11271_v58  ;;  %7832 = vmatmul.msk.bf16.vlgmr.msrb.gmra.mxu0 %vm1540_vm8, %v11271_v58  ;;  %v7631_v58 = vld [vmem:[#allocation2 + $0x28] sm:$0xf0] }
 0x3db   : > { %v7634_v16 = vor.u32 %v8936_v27, %v7631_v58 }
 0x3dc   : > { %2707 = vmatpush.bf16.msrb.mxu3 %v7702_v59  ;;  %2735 = vmatpush.bf16.msra.mxu1 %v7706_v12 }
 0x3e0   : > { %2708 = vmatpush.bf16.msrb.mxu3 %v7678_v57  ;;  %2736 = vmatpush.bf16.msra.mxu1 %v7682_v6 }
 0x3e4   : > { %2709 = vmatpush.bf16.msrb.mxu3 %v7654_v56  ;;  %2737 = vmatpush.bf16.msra.mxu1 %v7658_v20 }
 0x3e8   : > { %2710 = vmatpush.bf16.msrb.mxu3 %v7630_v7  ;;  %2738 = vmatpush.bf16.msra.mxu1 %v7634_v16 }
 0x3eb   : > { %2711 = vmatmul.bf16.vlgmr.msrb.gmra.mxu3 %v11221_v17  ;;  %2739 = vmatmul.bf16.vlgmr.msra.gmra.mxu1 %v11221_v17  ;;  %v11362_v17 = vpop.permute.xlu1 %2306 }
 0x411   : > { %v2628_v42 = vpop.f32.mrf.mxu1 }
 0x412   : > { %v2629_v11 = vadd.f32 %v2628_v42, %v11351_v0 }
 0x417   : > { %v2600_v2 = vpop.f32.mrf.mxu3 }
 0x418   : > { %v2601_v3 = vadd.f32 %v2600_v2, %v11351_v0 }
 0x419   : > { %v2630_v12 = vpop.f32.mrf.mxu1 }
 0x41a   : > { %v2631_v28 = vadd.f32 %v2630_v12, %v11362_v17 }
 0x41f   : > { %v2602_v6 = vpop.f32.mrf.mxu3 }
 0x420   : > { %v2603_v22 = vadd.f32 %v2602_v6, %v11362_v17  ;;  %v14738_v6 = vld [vmem:[#allocation66_spill] sm:$0xff] }
 0x427   : > { %v2642_v50 = vpop.f32.mrf.mxu0 }
 0x428   : > { %v2643_v37 = vadd.f32 %v2642_v50, %v2629_v11 }
 0x42a   : > { %v2760_v4 = vmax.f32 %v2643_v37, 0.0 }
 0x42c   : > { %v11356_v59 = vmul.f32 %v2760_v4, %v14736_v53 }
 0x42d   : > { %v2614_v40 = vpop.f32.mrf.mxu2 }
 0x42e   : > { %v2615_v63 = vadd.f32 %v2614_v40, %v2601_v3  ;;  %3159 = vrot.lane.b32.xlu2 %v11356_v59, %s9557_s12  ;;  %2787 = vrot.lane.b32.xlu1 %v11356_v59, %s9551_s9 }
 0x42f   : > { %v2644_v23 = vpop.f32.mrf.mxu0 }
 0x430   : > { %v2759_v57 = vmax.f32 %v2615_v63, 0.0  ;;  %v2645_v41 = vadd.f32 %v2644_v23, %v2631_v28 }
 0x432   : > { %v11366_v5 = vmul.f32 %v2759_v57, %v14737_v30  ;;  %v2766_v55 = vmax.f32 %v2645_v41, 0.0 }
 0x434   : > { %v3023_v56 = vpack.c.bf16 %v11356_v59, %v11366_v5  ;;  %3155 = vrot.lane.b32.xlu0 %v11366_v5, %s9557_s12  ;;  %v11378_v58 = vmul.f32 %v2766_v55, %v14736_v53 }
 0x435   : > { %v2616_v20 = vpop.f32.mrf.mxu2 }
 0x436   : > { %3029 = vst [vmem:[#allocation2 + $0xc0] sm:$0xff] %v3023_v56  ;;  %v2617_v27 = vadd.f32 %v2616_v20, %v2603_v22  ;;  %3099 = vrot.lane.b32.xlu2 %v11356_v59, %s9556_s16  ;;  %2847 = vrot.lane.b32.xlu1 %v11356_v59, %s9552_s24  ;;  %v14739_v22 = vld [vmem:[#allocation63_spill] sm:$0xff] }
 0x438   : > { %v2765_v43 = vmax.f32 %v2617_v27, 0.0 }
 0x43a   : > { %v11381_v7 = vmul.f32 %v2765_v43, %v14737_v30 }
 0x43c   : > { %v3026_v16 = vpack.c.bf16 %v11378_v58, %v11381_v7  ;;  %3095 = vrot.lane.b32.xlu0 %v11366_v5, %s9556_s16 }
 0x43e   : > { %3032 = vst [vmem:[#allocation2 + $0xd8] sm:$0xff] %v3026_v16  ;;  %3039 = vrot.lane.b32.xlu2 %v11356_v59, %s9555_s28  ;;  %3157 = vrot.lane.b32.xlu1 %v11381_v7, %s9557_s12 }
 0x444   : > { %3035 = vrot.lane.b32.xlu0 %v11366_v5, %s9555_s28 }
 0x446   : > { %2967 = vrot.lane.b32.xlu2 %v11356_v59, %s9554_s8  ;;  %3097 = vrot.lane.b32.xlu1 %v11381_v7, %s9556_s16 }
 0x447   : > { %v2684_v42 = vpop.f32.mrf.mxu0 }
 0x448   : > { %v2685_v11 = vadd.f32 %v2684_v42, %v11351_v0  ;;  %v2698_v2 = vpop.f32.mrf.mxu1 }
 0x44a   : > { %v2699_v50 = vadd.f32 %v2698_v2, %v2685_v11 }
 0x44c   : > { %2963 = vrot.lane.b32.xlu0 %v11366_v5, %s9554_s8  ;;  %v2762_v40 = vmax.f32 %v2699_v50, 0.0 }
 0x44d   : > { %v2656_v37 = vpop.f32.mrf.mxu2 }
 0x44e   : > { %v2657_v4 = vadd.f32 %v2656_v37, %v11351_v0  ;;  %v2670_v12 = vpop.f32.mrf.mxu3  ;;  %2783 = vrot.lane.b32.xlu2 %v11366_v5, %s9551_s9  ;;  %3037 = vrot.lane.b32.xlu1 %v11381_v7, %s9555_s28  ;;  %v11407_v41 = vmul.f32 %v2762_v40, %v14738_v6 }
 0x44f   : > { %v2686_v3 = vpop.f32.mrf.mxu0 }
 0x450   : > { %v2687_v63 = vadd.f32 %v2686_v3, %v11362_v17  ;;  %v2671_v23 = vadd.f32 %v2670_v12, %v2657_v4  ;;  %v2700_v57 = vpop.f32.mrf.mxu1 }
 0x452   : > { %v2761_v28 = vmax.f32 %v2671_v23, 0.0  ;;  %v2701_v20 = vadd.f32 %v2700_v57, %v2687_v63 }
 0x454   : > { %v11410_v56 = vmul.f32 %v2761_v28, %v14739_v22  ;;  %3161 = vrot.lane.b32.xlu0 %v11378_v58, %s9557_s12  ;;  %v2768_v42 = vmax.f32 %v2701_v20, 0.0 }
 0x455   : > { %v2658_v55 = vpop.f32.mrf.mxu2 }
 0x456   : > { %v2659_v27 = vadd.f32 %v2658_v55, %v11362_v17  ;;  %v3024_v43 = vpack.c.bf16 %v11407_v41, %v11410_v56  ;;  %v2672_v16 = vpop.f32.mrf.mxu3  ;;  %2843 = vrot.lane.b32.xlu2 %v11366_v5, %s9552_s24  ;;  %2965 = vrot.lane.b32.xlu1 %v11381_v7, %s9554_s8  ;;  %v11422_v50 = vmul.f32 %v2768_v42, %v14738_v6 }
 0x457   : > { %v2754_v12 = vpop.f32.mrf.mxu0 }
 0x458   : > { %3030 = vst [vmem:[#allocation2 + $0xc8] sm:$0xff] %v3024_v43  ;;  %v2673_v11 = vadd.f32 %v2672_v16, %v2659_v27 }
 0x45a   : > { %v2767_v2 = vmax.f32 %v2673_v11, 0.0  ;;  %v14740_v11 = vld [vmem:[#allocation65_spill] sm:$0xff] }
 0x45c   : > { %v11425_v37 = vmul.f32 %v2767_v2, %v14739_v22  ;;  %3101 = vrot.lane.b32.xlu0 %v11378_v58, %s9556_s16 }
 0x45d   : > { %v2726_v63 = vpop.f32.mrf.mxu2 }
 0x45e   : > { %v3027_v4 = vpack.c.bf16 %v11422_v50, %v11425_v37  ;;  %2903 = vrot.lane.b32.xlu2 %v11366_v5, %s9553_s29  ;;  %3163 = vrot.lane.b32.xlu1 %v11410_v56, %s9557_s12 }
 0x45f   : > { %v2756_v16 = vpop.f32.mrf.mxu0 }
 0x460   : > { %3033 = vst [vmem:[#allocation2 + $0xe0] sm:$0xff] %v3027_v4 }
 0x464   : > { %3041 = vrot.lane.b32.xlu0 %v11378_v58, %s9555_s28 }
 0x466   : > { %2789 = vrot.lane.b32.xlu2 %v11378_v58, %s9551_s9  ;;  %3103 = vrot.lane.b32.xlu1 %v11410_v56, %s9556_s16 }
 0x468   : > { %v2740_v3 = vpop.f32.mrf.mxu1 }
 0x469   : > { %v2741_v40 = vadd.f32 %v2740_v3, %v11351_v0 }
 0x46b   : > { %v2755_v23 = vadd.f32 %v2754_v12, %v2741_v40  ;;  %v2728_v40 = vpop.f32.mrf.mxu2 }
 0x46c   : > { %2969 = vrot.lane.b32.xlu0 %v11378_v58, %s9554_s8 }
 0x46d   : > { %v2764_v55 = vmax.f32 %v2755_v23, 0.0 }
 0x46e   : > { %v2712_v28 = vpop.f32.mrf.mxu3  ;;  %2849 = vrot.lane.b32.xlu2 %v11378_v58, %s9552_s24  ;;  %3043 = vrot.lane.b32.xlu1 %v11410_v56, %s9555_s28 }
 0x46f   : > { %v2713_v57 = vadd.f32 %v2712_v28, %v11351_v0  ;;  %v11451_v2 = vmul.f32 %v2764_v55, %v14740_v11  ;;  %v14741_v0 = vld [vmem:[#allocation64_spill] sm:$0xff] }
 0x470   : > { %v2742_v20 = vpop.f32.mrf.mxu1 }
 0x471   : > { %v2727_v27 = vadd.f32 %v2726_v63, %v2713_v57  ;;  %v2743_v43 = vadd.f32 %v2742_v20, %v11362_v17 }
 0x473   : > { %v2763_v42 = vmax.f32 %v2727_v27, 0.0  ;;  %v2757_v3 = vadd.f32 %v2756_v16, %v2743_v43 }
 0x474   : > { %2785 = vrot.lane.b32.xlu0 %v11381_v7, %s9551_s9 }
 0x475   : > { %v11454_v4 = vmul.f32 %v2763_v42, %v14741_v0  ;;  %v2770_v28 = vmax.f32 %v2757_v3, 0.0 }
 0x476   : > { %v2714_v12 = vpop.f32.mrf.mxu3  ;;  %2795 = vrot.lane.b32.xlu2 %v11407_v41, %s9551_s9  ;;  %2793 = vrot.lane.b32.xlu1 %v11425_v37, %s9551_s9 }
 0x477   : > { %v3025_v63 = vpack.c.bf16 %v11451_v2, %v11454_v4  ;;  %v2715_v23 = vadd.f32 %v2714_v12, %v11362_v17  ;;  %v11466_v55 = vmul.f32 %v2770_v28, %v14740_v11 }
 0x479   : > { %3031 = vst [vmem:[#allocation2 + $0xd0] sm:$0xff] %v3025_v63  ;;  %v2729_v57 = vadd.f32 %v2728_v40, %v2715_v23 }
 0x47b   : > { %v2769_v20 = vmax.f32 %v2729_v57, 0.0 }
 0x47c   : > { %2845 = vrot.lane.b32.xlu0 %v11381_v7, %s9552_s24 }
 0x47d   : > { %v11469_v27 = vmul.f32 %v2769_v20, %v14741_v0 }
 0x47e   : > { %2855 = vrot.lane.b32.xlu2 %v11407_v41, %s9552_s24  ;;  %2853 = vrot.lane.b32.xlu1 %v11425_v37, %s9552_s24 }
 0x47f   : > { %v3028_v17 = vpack.c.bf16 %v11466_v55, %v11469_v27 }
 0x481   : > { %3034 = vst [vmem:[#allocation2 + $0xe8] sm:$0xff] %v3028_v17 }
 0x484   : > { %2791 = vrot.lane.b32.xlu0 %v11410_v56, %s9551_s9 }
 0x486   : > { %3165 = vrot.lane.b32.xlu2 %v11425_v37, %s9557_s12  ;;  %3169 = vrot.lane.b32.xlu1 %v11422_v50, %s9557_s12 }
 0x488   : > { %v3160_v43 = vpop.permute.xlu2 %3159 }
 0x48c   : > { %2851 = vrot.lane.b32.xlu0 %v11410_v56, %s9552_s24 }
 0x48e   : > { %3105 = vrot.lane.b32.xlu2 %v11425_v37, %s9556_s16  ;;  %2983 = vrot.lane.b32.xlu1 %v11451_v2, %s9554_s8 }
 0x490   : > { %v3100_v16 = vpop.permute.xlu2 %3099 }
 0x494   : > { %2797 = vrot.lane.b32.xlu0 %v11422_v50, %s9551_s9 }
 0x496   : > { %3045 = vrot.lane.b32.xlu2 %v11425_v37, %s9555_s28  ;;  %2799 = vrot.lane.b32.xlu1 %v11454_v4, %s9551_s9 }
 0x498   : > { %v11497_v42 = vpop.permute.xlu2 %3039 }
 0x49c   : > { %2857 = vrot.lane.b32.xlu0 %v11422_v50, %s9552_s24 }
 0x49e   : > { %3171 = vrot.lane.b32.xlu2 %v11454_v4, %s9557_s12  ;;  %2859 = vrot.lane.b32.xlu1 %v11454_v4, %s9552_s24 }
 0x4a0   : > { %v11505_v3 = vpop.permute.xlu2 %2967  ;;  %v11507_v12 = vpop.permute.xlu1 %2787 }
 0x4a4   : > { %2803 = vrot.lane.b32.xlu0 %v11451_v2, %s9551_s9 }
 0x4a6   : > { %v11511_v40 = vpop.permute.xlu0 %3155  ;;  %2907 = vrot.lane.b32.xlu2 %v11356_v59, %s9553_s29  ;;  %2805 = vrot.lane.b32.xlu1 %v11466_v55, %s9551_s9 }
 0x4a7   : > { %v3187_v15 = vsel %vm1069_vm5, %v11511_v40, %v3160_v43 }
 0x4a8   : > { %v11517_v63 = vpop.permute.xlu2 %2783  ;;  %v11519_v23 = vpop.permute.xlu1 %2847  ;;  %v3191_v13 = vmul.f32 %v3187_v15, %v10306_v60 }
 0x4ac   : > { %2863 = vrot.lane.b32.xlu0 %v11451_v2, %s9552_s24 }
 0x4ae   : > { %v11523_v28 = vpop.permute.xlu0 %3095  ;;  %2985 = vrot.lane.b32.xlu2 %v11466_v55, %s9554_s8  ;;  %2865 = vrot.lane.b32.xlu1 %v11466_v55, %s9552_s24 }
 0x4af   : > { %14742 = vst [vmem:[#allocation32_spill] sm:$0xff] %v11523_v28 }
 0x4b0   : > { %v11529_v57 = vpop.permute.xlu2 %2843  ;;  %v11531_v20 = vpop.permute.xlu1 %3157 }
 0x4b1   : > { %14743 = vst [vmem:[#allocation31_spill] sm:$0xff] %v11531_v20 }
 0x4b4   : > { %3167 = vrot.lane.b32.xlu0 %v11407_v41, %s9557_s12 }
 0x4b6   : > { %v11535_v17 = vpop.permute.xlu0 %3035  ;;  %2801 = vrot.lane.b32.xlu2 %v11469_v27, %s9551_s9  ;;  %2905 = vrot.lane.b32.xlu1 %v11381_v7, %s9553_s29 }
 0x4b7   : > { %14744 = vst [vmem:[#allocation49_spill] sm:$0xff] %v11535_v17 }
 0x4b8   : > { %v11541_v0 = vpop.permute.xlu2 %2903  ;;  %v11543_v11 = vpop.permute.xlu1 %3097 }
 0x4b9   : > { %14745 = vst [vmem:[#allocation39_spill] sm:$0xff] %v11543_v11 }
 0x4bc   : > { %3173 = vrot.lane.b32.xlu0 %v11469_v27, %s9557_s12 }
 0x4be   : > { %v11547_v22 = vpop.permute.xlu0 %2963  ;;  %2861 = vrot.lane.b32.xlu2 %v11469_v27, %s9552_s24  ;;  %2923 = vrot.lane.b32.xlu1 %v11451_v2, %s9553_s29 }
 0x4c0   : > { %v11553_v6 = vpop.permute.xlu2 %2789  ;;  %v11555_v30 = vpop.permute.xlu1 %3037 }
 0x4c1   : > { %14746 = vst [vmem:[#allocation67_spill] sm:$0xff] %v11555_v30 }
 0x4c4   : > { %2909 = vrot.lane.b32.xlu0 %v11378_v58, %s9553_s29 }
 0x4c6   : > { %v3162_v53 = vpop.permute.xlu0 %3161  ;;  %2925 = vrot.lane.b32.xlu2 %v11466_v55, %s9553_s29  ;;  %3109 = vrot.lane.b32.xlu1 %v11422_v50, %s9556_s16 }
 0x4c8   : > { %v11563_v52 = vpop.permute.xlu2 %2849  ;;  %v11565_v10 = vpop.permute.xlu1 %2965 }
 0x4cc   : > { %3107 = vrot.lane.b32.xlu0 %v11407_v41, %s9556_s16 }
 0x4ce   : > { %v3102_v51 = vpop.permute.xlu0 %3101  ;;  %3111 = vrot.lane.b32.xlu2 %v11454_v4, %s9556_s16  ;;  %3047 = vrot.lane.b32.xlu1 %v11407_v41, %s9555_s28 }
 0x4d0   : > { %v11576_v33 = vpop.permute.xlu2 %2795  ;;  %v11578_v47 = vpop.permute.xlu1 %3163 }
 0x4d1   : > { %v3185_v44 = vsel %vm1069_vm5, %v3160_v43, %v11578_v47  ;;  %v3127_v43 = vsel %vm995_vm6, %v11523_v28, %v3100_v16 }
 0x4d2   : > { %v3192_v39 = vmul.f32 %v3185_v44, %v14709_v9  ;;  %v3131_v44 = vmul.f32 %v3127_v43, %v14712_v48  ;;  %v3188_v43 = vsel %vm1069_vm5, %v11531_v20, %v3162_v53 }
 0x4d4   : > { %v3203_v54 = vpack.c.bf16 %v3192_v39, %v3191_v13  ;;  %3113 = vrot.lane.b32.xlu0 %v11469_v27, %s9556_s16 }
 0x4d6   : > { %3209 = vst [vmem:[#allocation2 + $0x150] sm:$0xff] %v3203_v54  ;;  %v3042_v18 = vpop.permute.xlu0 %3041  ;;  %3049 = vrot.lane.b32.xlu2 %v11422_v50, %s9555_s28  ;;  %3053 = vrot.lane.b32.xlu1 %v11469_v27, %s9555_s28 }
 0x4d8   : > { %v11594_v25 = vpop.permute.xlu2 %2855  ;;  %v11596_v15 = vpop.permute.xlu1 %3103 }
 0x4d9   : > { %v3125_v13 = vsel %vm995_vm6, %v3100_v16, %v11596_v15  ;;  %v3067_v16 = vsel %vm921_vm4, %v11535_v17, %v11497_v42 }
 0x4da   : > { %v3132_v39 = vmul.f32 %v3125_v13, %v14713_v35 }
 0x4dc   : > { %v3143_v54 = vpack.c.bf16 %v3132_v39, %v3131_v44  ;;  %3051 = vrot.lane.b32.xlu0 %v11454_v4, %s9555_s28  ;;  %v3071_v39 = vmul.f32 %v3067_v16, %v14714_v61 }
 0x4de   : > { %3149 = vst [vmem:[#allocation2 + $0x120] sm:$0xff] %v3143_v54  ;;  %v11605_v29 = vpop.permute.xlu0 %2969  ;;  %3215 = vrot.lane.b32.xlu2 %v11366_v5, %s9558_s15  ;;  %3219 = vrot.lane.b32.xlu1 %v11356_v59, %s9558_s15  ;;  %v3197_v54 = vmul.f32 %v3188_v43, %v10306_v60  ;;  %v8011_v43 = vld [vmem:[#allocation2 + $0x150] sm:$0xf] }
 0x4e0   : > { %v11618_v13 = vpop.permute.xlu2 %3165  ;;  %v11620_v44 = vpop.permute.xlu1 %3043 }
 0x4e1   : > { %v3186_v5 = vsel %vm1069_vm5, %v3162_v53, %v11618_v13  ;;  %v3065_v59 = vsel %vm921_vm4, %v11497_v42, %v11620_v44  ;;  %v3128_v42 = vsel %vm995_vm6, %v11543_v11, %v3102_v51 }
 0x4e2   : > { %v3198_v17 = vmul.f32 %v3186_v5, %v14709_v9  ;;  %v3072_v20 = vmul.f32 %v3065_v59, %v14715_v1  ;;  %v9032_v59 = vld [vmem:[#allocation2 + $0x154] sm:$0xf] }
 0x4e4   : > { %v3206_v28 = vpack.c.bf16 %v3198_v17, %v3197_v54  ;;  %v3083_v14 = vpack.c.bf16 %v3072_v20, %v3071_v39  ;;  %3217 = vrot.lane.b32.xlu0 %v11381_v7, %s9558_s15 }
 0x4e6   : > { %3212 = vst [vmem:[#allocation2 + $0x168] sm:$0xff] %v3206_v28  ;;  %v11635_v53 = vpop.permute.xlu0 %2785  ;;  %3221 = vrot.lane.b32.xlu2 %v11378_v58, %s9558_s15  ;;  %3225 = vrot.lane.b32.xlu1 %v11425_v37, %s9558_s15  ;;  %v3137_v28 = vmul.f32 %v3128_v42, %v14712_v48  ;;  %v3068_v42 = vsel %vm921_vm4, %v11555_v30, %v3042_v18 }
 0x4e7   : > { %3089 = vst [vmem:[#allocation2 + $0xf0] sm:$0xff] %v3083_v14 }
 0x4e8   : > { %v11644_v16 = vpop.permute.xlu2 %3105  ;;  %v11646_v20 = vpop.permute.xlu1 %2793 }
 0x4e9   : > { %v3126_v7 = vsel %vm995_vm6, %v3102_v51, %v11644_v16 }
 0x4ea   : > { %v3138_v58 = vmul.f32 %v3126_v7, %v14713_v35 }
 0x4ec   : > { %v3146_v17 = vpack.c.bf16 %v3138_v58, %v3137_v28  ;;  %3223 = vrot.lane.b32.xlu0 %v11410_v56, %s9558_s15 }
 0x4ed   : > { %v9035_v5 = vld [vmem:[#allocation2 + $0x164] sm:$0xf0]  ;;  %v8013_v14 = vld [vmem:[#allocation2 + $0x168] sm:$0xf0] }
 0x4ee   : > { %3152 = vst [vmem:[#allocation2 + $0x138] sm:$0xff] %v3146_v17  ;;  %v11655_v39 = vpop.permute.xlu0 %2845  ;;  %3175 = vrot.lane.b32.xlu2 %v11451_v2, %s9557_s12  ;;  %2971 = vrot.lane.b32.xlu1 %v11410_v56, %s9554_s8  ;;  %v8012_v51 = vor.u32 %v9035_v5, %v8011_v43  ;;  %v8016_v54 = vor.u32 %v9032_v59, %v8013_v14  ;;  %v7987_v5 = vld [vmem:[#allocation2 + $0x120] sm:$0xf]  ;;  %v9026_v14 = vld [vmem:[#allocation2 + $0x124] sm:$0xf] }
 0x4ef   : > { %v3077_v17 = vmul.f32 %v3068_v42, %v14714_v61 }
 0x4f0   : > { %v11664_v7 = vpop.permute.xlu2 %3045  ;;  %3625 = vmatpush.bf16.msrb.mxu2 %v8012_v51  ;;  %3653 = vmatpush.bf16.msra.mxu0 %v8016_v54  ;;  %v11666_v28 = vpop.permute.xlu1 %2853 }
 0x4f1   : > { %v3066_v58 = vsel %vm921_vm4, %v3042_v18, %v11664_v7 }
 0x4f2   : > { %v3078_v35 = vmul.f32 %v3066_v58, %v14715_v1  ;;  %v7939_v1 = vld [vmem:[#allocation2 + $0xc0] sm:$0xf] }
 0x4f4   : > { %v3086_v43 = vpack.c.bf16 %v3078_v35, %v3077_v17  ;;  %3177 = vrot.lane.b32.xlu0 %v11466_v55, %s9557_s12 }
 0x4f5   : > { %v9029_v59 = vld [vmem:[#allocation2 + $0x134] sm:$0xf0]  ;;  %v7989_v48 = vld [vmem:[#allocation2 + $0x138] sm:$0xf0] }
 0x4f6   : > { %3092 = vst [vmem:[#allocation2 + $0x108] sm:$0xff] %v3086_v43  ;;  %v2792_v51 = vpop.permute.xlu0 %2791  ;;  %2973 = vrot.lane.b32.xlu2 %v11425_v37, %s9554_s8  ;;  %2977 = vrot.lane.b32.xlu1 %v11422_v50, %s9554_s8  ;;  %v7988_v18 = vor.u32 %v9029_v59, %v7987_v5  ;;  %v7992_v54 = vor.u32 %v9026_v14, %v7989_v48  ;;  %v7963_v48 = vld [vmem:[#allocation2 + $0xf0] sm:$0xf]  ;;  %v9020_v14 = vld [vmem:[#allocation2 + $0xf4] sm:$0xf] }
 0x4f7   : > { %v2811_v35 = vsel %vm613_vm0, %v2792_v51, %v11576_v33  ;;  %v2813_v42 = vsel %vm613_vm0, %v11507_v12, %v2792_v51 }
 0x4f8   : > { %v2821_v58 = vmul.f32 %v2813_v42, %v9923_v32  ;;  %v2822_v17 = vmul.f32 %v2811_v35, %v9921_v31  ;;  %v11687_v43 = vpop.permute.xlu2 %3171  ;;  %3626 = vmatpush.bf16.msrb.mxu2 %v7988_v18  ;;  %3654 = vmatpush.bf16.msra.mxu0 %v7992_v54  ;;  %v11689_v9 = vpop.permute.xlu1 %3169  ;;  %v2995_v35 = vsel %vm835_vm3, %v11547_v22, %v11505_v3 }
 0x4fa   : > { %v2832_v5 = vpack.c.bf16 %v2822_v17, %v2821_v58  ;;  %v9017_v17 = vld [vmem:[#allocation2 + $0xd4] sm:$0xf0] }
 0x4fb   : > { %v7940_v30 = vor.u32 %v9017_v17, %v7939_v1 }
 0x4fc   : > { %2838 = vst [vmem:[#allocation2 + $0x8] sm:$0xff] %v2832_v5  ;;  %2975 = vrot.lane.b32.xlu0 %v11407_v41, %s9554_s8 }
 0x4fd   : > { %v9023_v59 = vld [vmem:[#allocation2 + $0x104] sm:$0xf0]  ;;  %v7965_v60 = vld [vmem:[#allocation2 + $0x108] sm:$0xf0] }
 0x4fe   : > { %v2852_v51 = vpop.permute.xlu0 %2851  ;;  %3115 = vrot.lane.b32.xlu2 %v11451_v2, %s9556_s16  ;;  %2911 = vrot.lane.b32.xlu1 %v11410_v56, %s9553_s29  ;;  %v7964_v18 = vor.u32 %v9023_v59, %v7963_v48  ;;  %v7968_v54 = vor.u32 %v9020_v14, %v7965_v60  ;;  %v7941_v59 = vld [vmem:[#allocation2 + $0xd8] sm:$0xf0] }
 0x4ff   : > { %v2871_v42 = vsel %vm687_vm1, %v2852_v51, %v11594_v25  ;;  %v2873_v58 = vsel %vm687_vm1, %v11519_v23, %v2852_v51  ;;  %v3000_v51 = vmul.f32 %v2995_v35, %v14710_v8 }
 0x500   : > { %v2881_v5 = vmul.f32 %v2873_v58, %v9996_v34  ;;  %v2882_v56 = vmul.f32 %v2871_v42, %v10002_v36  ;;  %v11709_v48 = vpop.permute.xlu2 %2907  ;;  %3627 = vmatpush.bf16.msrb.mxu2 %v7964_v18  ;;  %3655 = vmatpush.bf16.msra.mxu0 %v7968_v54  ;;  %v11711_v60 = vpop.permute.xlu1 %2983  ;;  %v9014_v42 = vld [vmem:[#allocation2 + $0xc4] sm:$0xf] }
 0x501   : > { %v2997_v14 = vsel %vm835_vm3, %v11711_v60, %v11547_v22  ;;  %v7944_v11 = vor.u32 %v9014_v42, %v7941_v59  ;;  %v2814_v22 = vsel %vm613_vm0, %v11553_v6, %v11646_v20 }
 0x502   : > { %v2892_v61 = vpack.c.bf16 %v2882_v56, %v2881_v5  ;;  %v2999_v58 = vmul.f32 %v2997_v14, %v14711_v62 }
 0x504   : > { %2898 = vst [vmem:[#allocation2 + $0x38] sm:$0xff] %v2892_v61  ;;  %v3011_v18 = vpack.c.bf16 %v3000_v51, %v2999_v58  ;;  %3117 = vrot.lane.b32.xlu0 %v11466_v55, %s9556_s16  ;;  %3628 = vmatpush.bf16.msrb.mxu2 %v7940_v30  ;;  %v2996_v61 = vsel %vm835_vm3, %v11565_v10, %v11605_v29 }
 0x505   : > { %3656 = vmatpush.bf16.msra.mxu0 %v7944_v11  ;;  %v2827_v30 = vmul.f32 %v2814_v22, %v9923_v32  ;;  %v3006_v5 = vmul.f32 %v2996_v61, %v14710_v8  ;;  %v2815_v22 = vsel %vm613_vm0, %v11517_v63, %v11507_v12 }
 0x506   : > { %3017 = vst [vmem:[#allocation2 + $0x90] sm:$0xff] %v3011_v18  ;;  %v2798_v54 = vpop.permute.xlu0 %2797  ;;  %2913 = vrot.lane.b32.xlu2 %v11425_v37, %s9553_s29  ;;  %2917 = vrot.lane.b32.xlu1 %v11422_v50, %s9553_s29 }
 0x507   : > { %v2812_v1 = vsel %vm613_vm0, %v11646_v20, %v2798_v54 }
 0x508   : > { %v2828_v11 = vmul.f32 %v2812_v1, %v9921_v31  ;;  %v11738_v35 = vpop.permute.xlu2 %2985  ;;  %v2800_v17 = vpop.permute.xlu1 %2799  ;;  %v2874_v31 = vsel %vm687_vm1, %v11563_v52, %v11666_v28  ;;  %v2820_v1 = vmul.f32 %v2815_v22, %v9909_v24 }
 0x509   : > { %v2998_v37 = vsel %vm835_vm3, %v11738_v35, %v11565_v10  ;;  %v2887_v20 = vmul.f32 %v2874_v31, %v9996_v34 }
 0x50a   : > { %v2835_v56 = vpack.c.bf16 %v2828_v11, %v2827_v30  ;;  %v3005_v59 = vmul.f32 %v2998_v37, %v14711_v62 }
 0x50c   : > { %2841 = vst [vmem:[#allocation2 + $0x20] sm:$0xff] %v2835_v56  ;;  %v3014_v14 = vpack.c.bf16 %v3006_v5, %v3005_v59  ;;  %2915 = vrot.lane.b32.xlu0 %v11407_v41, %s9553_s29 }
 0x50d   : > { %v9008_v61 = vld [vmem:[#allocation2 + $0x94] sm:$0xf] }
 0x50e   : > { %3020 = vst [vmem:[#allocation2 + $0xa8] sm:$0xff] %v3014_v14  ;;  %v2858_v32 = vpop.permute.xlu0 %2857  ;;  %3055 = vrot.lane.b32.xlu2 %v11451_v2, %s9555_s28  ;;  %3227 = vrot.lane.b32.xlu1 %v11407_v41, %s9558_s15  ;;  %v2809_v41 = vsel %vm613_vm0, %v11576_v33, %v2800_v17  ;;  %v2816_v33 = vsel %vm613_vm0, %v11635_v53, %v11553_v6 }
 0x50f   : > { %v2872_v10 = vsel %vm687_vm1, %v11666_v28, %v2858_v32  ;;  %v7915_v28 = vld [vmem:[#allocation2 + $0x90] sm:$0xf]  ;;  %v2823_v37 = vmul.f32 %v2809_v41, %v9941_v45 }
 0x510   : > { %v2888_v51 = vmul.f32 %v2872_v10, %v10002_v36  ;;  %v2802_v58 = vpop.permute.xlu2 %2801  ;;  %v2860_v42 = vpop.permute.xlu1 %2859 }
 0x512   : > { %v2895_v18 = vpack.c.bf16 %v2888_v51, %v2887_v20 }
 0x514   : > { %2901 = vst [vmem:[#allocation2 + $0x50] sm:$0xff] %v2895_v18  ;;  %3057 = vrot.lane.b32.xlu0 %v11466_v55, %s9555_s28 }
 0x515   : > { %v9011_v34 = vld [vmem:[#allocation2 + $0xa4] sm:$0xf0]  ;;  %v7917_v36 = vld [vmem:[#allocation2 + $0xa8] sm:$0xf0] }
 0x516   : > { %v2804_v30 = vpop.permute.xlu0 %2803  ;;  %3229 = vrot.lane.b32.xlu2 %v11422_v50, %s9558_s15  ;;  %3233 = vrot.lane.b32.xlu1 %v11469_v27, %s9558_s15  ;;  %v7916_v12 = vor.u32 %v9011_v34, %v7915_v28  ;;  %v7920_v11 = vor.u32 %v9008_v61, %v7917_v36  ;;  %v2810_v50 = vsel %vm613_vm0, %v2798_v54, %v2802_v58  ;;  %v14747_v61 = vld [vmem:[#allocation23_spill] sm:$0xff]  ;;  %v14748_v36 = vld [vmem:[#allocation22_spill] sm:$0xff] }
 0x517   : > { %v2807_v5 = vsel %vm613_vm0, %v2800_v17, %v2804_v30  ;;  %v2817_v56 = vsel %vm613_vm0, %v2804_v30, %v11517_v63  ;;  %v2826_v63 = vmul.f32 %v2816_v33, %v9909_v24  ;;  %v2829_v18 = vmul.f32 %v2810_v50, %v9941_v45  ;;  %v14749_v30 = vld [vmem:[#allocation24_spill] sm:$0xff] }
 0x518   : > { %v2819_v59 = vmul.f32 %v2817_v56, %v9902_v21  ;;  %v2824_v14 = vmul.f32 %v2807_v5, %v9951_v49  ;;  %v2862_v31 = vpop.permute.xlu2 %2861  ;;  %v2806_v10 = vpop.permute.xlu1 %2805  ;;  %3629 = vmatpush.bf16.msrb.mxu2 %v7916_v12  ;;  %3657 = vmatpush.bf16.msra.mxu0 %v7920_v11  ;;  %v2876_v45 = vsel %vm687_vm1, %v11655_v39, %v11563_v52 }
 0x519   : > { %v2808_v6 = vsel %vm613_vm0, %v2802_v58, %v2806_v10  ;;  %v2818_v17 = vsel %vm613_vm0, %v2806_v10, %v11635_v53  ;;  %v2875_v53 = vsel %vm687_vm1, %v11529_v57, %v11519_v23  ;;  %v2869_v58 = vsel %vm687_vm1, %v11594_v25, %v2860_v42 }
 0x51a   : > { %v2831_v20 = vpack.c.bf16 %v2820_v1, %v2819_v59  ;;  %v2833_v51 = vpack.c.bf16 %v2824_v14, %v2823_v37  ;;  %v2825_v54 = vmul.f32 %v2818_v17, %v9902_v21  ;;  %v2830_v22 = vmul.f32 %v2808_v6, %v9951_v49  ;;  %v14750_v17 = vld [vmem:[#allocation45_spill] sm:$0xff] }
 0x51b   : > { %v2870_v49 = vsel %vm687_vm1, %v2858_v32, %v2862_v31  ;;  %v2880_v52 = vmul.f32 %v2875_v53, %v9990_v26  ;;  %v2883_v32 = vmul.f32 %v2869_v58, %v14747_v61 }
 0x51c   : > { %2837 = vst [vmem:[#allocation2] sm:$0xff] %v2831_v20  ;;  %v2834_v41 = vpack.c.bf16 %v2826_v63, %v2825_v54  ;;  %3231 = vrot.lane.b32.xlu0 %v11454_v4, %s9558_s15  ;;  %v2836_v28 = vpack.c.bf16 %v2830_v22, %v2829_v18  ;;  %v2889_v37 = vmul.f32 %v2870_v49, %v14747_v61  ;;  %v14751_v20 = vld [vmem:[#allocation46_spill] sm:$0xff] }
 0x51d   : > { %2839 = vst [vmem:[#allocation2 + $0x10] sm:$0xff] %v2833_v51  ;;  %v14752_v49 = vld [vmem:[#allocation26_spill] sm:$0xff] }
 0x51e   : > { %2840 = vst [vmem:[#allocation2 + $0x18] sm:$0xff] %v2834_v41  ;;  %v2864_v34 = vpop.permute.xlu0 %2863  ;;  %2979 = vrot.lane.b32.xlu2 %v11454_v4, %s9554_s8  ;;  %2919 = vrot.lane.b32.xlu1 %v11454_v4, %s9553_s29  ;;  %v2886_v4 = vmul.f32 %v2876_v45, %v9990_v26  ;;  %v3332_v45 = vld [vmem:[%s14470_s6 + $0x8] sm:$0xff] }
 0x51f   : > { %2842 = vst [vmem:[#allocation2 + $0x28] sm:$0xff] %v2836_v28  ;;  %v2867_v25 = vsel %vm687_vm1, %v2860_v42, %v2864_v34  ;;  %v2877_v23 = vsel %vm687_vm1, %v2864_v34, %v11529_v57 }
 0x520   : > { %v2879_v1 = vmul.f32 %v2877_v23, %v14748_v36  ;;  %v2884_v12 = vmul.f32 %v2867_v25, %v14749_v30  ;;  %v11826_v11 = vpop.permute.xlu2 %2925  ;;  %v2866_v33 = vpop.permute.xlu1 %2865 }
 0x521   : > { %v2868_v42 = vsel %vm687_vm1, %v2862_v31, %v2866_v33  ;;  %v2878_v57 = vsel %vm687_vm1, %v2866_v33, %v11655_v39 }
 0x522   : > { %v2891_v5 = vpack.c.bf16 %v2880_v52, %v2879_v1  ;;  %v2893_v56 = vpack.c.bf16 %v2884_v12, %v2883_v32  ;;  %v2885_v50 = vmul.f32 %v2878_v57, %v14748_v36  ;;  %v2890_v59 = vmul.f32 %v2868_v42, %v14749_v30 }
 0x524   : > { %2897 = vst [vmem:[#allocation2 + $0x30] sm:$0xff] %v2891_v5  ;;  %v2894_v14 = vpack.c.bf16 %v2886_v4, %v2885_v50  ;;  %v2896_v10 = vpack.c.bf16 %v2890_v59, %v2889_v37  ;;  %2981 = vrot.lane.b32.xlu0 %v11469_v27, %s9554_s8  ;;  %v14754_v5 = vld [vmem:[#allocation51_spill] sm:$0xff]  ;;  %v14755_v50 = vld [vmem:[#allocation52_spill] sm:$0xff] }
 0x525   : > { %2899 = vst [vmem:[#allocation2 + $0x40] sm:$0xff] %v2893_v56 }
 0x526   : > { %2900 = vst [vmem:[#allocation2 + $0x48] sm:$0xff] %v2894_v14  ;;  %v3168_v6 = vpop.permute.xlu0 %3167  ;;  %2921 = vrot.lane.b32.xlu2 %v11469_v27, %s9553_s29  ;;  %3237 = vrot.lane.b32.xlu1 %v11466_v55, %s9558_s15  ;;  %v3184_v55 = vsel %vm1069_vm5, %v11618_v13, %v11689_v9 }
 0x527   : > { %2902 = vst [vmem:[#allocation2 + $0x58] sm:$0xff] %v2896_v10  ;;  %v3181_v39 = vsel %vm1069_vm5, %v3168_v6, %v11687_v43  ;;  %v3183_v31 = vsel %vm1069_vm5, %v11578_v47, %v3168_v6  ;;  %v2935_v47 = vsel %vm761_vm2, %v11541_v0, %v11709_v48  ;;  %v3199_v53 = vmul.f32 %v3184_v55, %v14750_v17 }
 0x528   : > { %v3193_v63 = vmul.f32 %v3183_v31, %v14750_v17  ;;  %v3194_v51 = vmul.f32 %v3181_v39, %v14751_v20  ;;  %v11851_v54 = vpop.permute.xlu2 %3111  ;;  %v2906_v18 = vpop.permute.xlu1 %2905  ;;  %v2940_v34 = vmul.f32 %v2935_v47, %v14752_v49 }
 0x529   : > { %v2938_v61 = vsel %vm761_vm2, %v11826_v11, %v2906_v18 }
 0x52a   : > { %v3204_v27 = vpack.c.bf16 %v3194_v51, %v3193_v63 }
 0x52c   : > { %3210 = vst [vmem:[#allocation2 + $0x158] sm:$0xff] %v3204_v27  ;;  %3235 = vrot.lane.b32.xlu0 %v11451_v2, %s9558_s15 }
 0x52d   : > { %v7869_v27 = vld [vmem:[#allocation2 + $0x48] sm:$0xf0] }
 0x52e   : > { %v11859_v22 = vpop.permute.xlu0 %3173 }
 0x52f   : > { %v3182_v41 = vsel %vm1069_vm5, %v11689_v9, %v11859_v22  ;;  %v14753_v9 = vld [vmem:[#allocation25_spill] sm:$0xff] }
 0x530   : > { %v3200_v2 = vmul.f32 %v3182_v41, %v14751_v20  ;;  %v3050_v58 = vpop.permute.xlu2 %3049  ;;  %v11871_v28 = vpop.permute.xlu1 %2923  ;;  %v2945_v1 = vmul.f32 %v2938_v61, %v14753_v9 }
 0x531   : > { %v2937_v13 = vsel %vm761_vm2, %v11871_v28, %v11541_v0  ;;  %v3064_v55 = vsel %vm921_vm4, %v11664_v7, %v3050_v58 }
 0x532   : > { %v3207_v25 = vpack.c.bf16 %v3200_v2, %v3199_v53  ;;  %v2939_v23 = vmul.f32 %v2937_v13, %v14753_v9  ;;  %v7867_v53 = vld [vmem:[#allocation2 + $0x30] sm:$0xf]  ;;  %v8996_v2 = vld [vmem:[#allocation2 + $0x34] sm:$0xf]  ;;  %v3079_v7 = vmul.f32 %v3064_v55, %v14722_v46 }
 0x534   : > { %3213 = vst [vmem:[#allocation2 + $0x170] sm:$0xff] %v3207_v25  ;;  %v2951_v52 = vpack.c.bf16 %v2940_v34, %v2939_v23  ;;  %3340 = vperm.xlu0 %9339, %v3332_v45   ;;  %v7872_v23 = vor.u32 %v8996_v2, %v7869_v27  ;;  %v14758_v2 = vld [vmem:[#allocation32_spill] sm:$0xff] }
 0x536   : > { %2957 = vst [vmem:[#allocation2 + $0x60] sm:$0xff] %v2951_v52  ;;  %v11885_v32 = vpop.permute.xlu0 %2909 }
 0x537   : > { %v2936_v0 = vsel %vm761_vm2, %v2906_v18, %v11885_v32 }
 0x538   : > { %v2946_v30 = vmul.f32 %v2936_v0, %v14752_v49  ;;  %v11892_v12 = vpop.permute.xlu2 %3215  ;;  %v3110_v33 = vpop.permute.xlu1 %3109 }
 0x539   : > { %v3124_v18 = vsel %vm995_vm6, %v11644_v16, %v3110_v33 }
 0x53a   : > { %v2954_v4 = vpack.c.bf16 %v2946_v30, %v2945_v1  ;;  %v3139_v13 = vmul.f32 %v3124_v18, %v14754_v5  ;;  %v8993_v1 = vld [vmem:[#allocation2 + $0x14] sm:$0xf0] }
 0x53c   : > { %2960 = vst [vmem:[#allocation2 + $0x78] sm:$0xff] %v2954_v4  ;;  %v14756_v4 = vld [vmem:[#allocation50_spill] sm:$0xff] }
 0x53d   : > { %v7891_v39 = vld [vmem:[#allocation2 + $0x60] sm:$0xf]  ;;  %v9002_v17 = vld [vmem:[#allocation2 + $0x64] sm:$0xf] }
 0x53e   : > { %v3108_v37 = vpop.permute.xlu0 %3107 }
 0x53f   : > { %v3121_v42 = vsel %vm995_vm6, %v3108_v37, %v11851_v54  ;;  %v3123_v57 = vsel %vm995_vm6, %v11596_v15, %v3108_v37  ;;  %v8999_v15 = vld [vmem:[#allocation2 + $0x44] sm:$0xf0] }
 0x540   : > { %v3133_v56 = vmul.f32 %v3123_v57, %v14754_v5  ;;  %v3134_v59 = vmul.f32 %v3121_v42, %v14755_v50  ;;  %v11902_v14 = vpop.permute.xlu2 %3221  ;;  %v3048_v10 = vpop.permute.xlu1 %3047  ;;  %v7868_v25 = vor.u32 %v8999_v15, %v7867_v53  ;;  %v14757_v42 = vld [vmem:[#allocation40_spill] sm:$0xff]  ;;  %v7845_v5 = vld [vmem:[#allocation2 + $0x18] sm:$0xf0] }
 0x542   : > { %v3144_v6 = vpack.c.bf16 %v3134_v59, %v3133_v56 }
 0x543   : > { %v9005_v31 = vld [vmem:[#allocation2 + $0x74] sm:$0xf0]  ;;  %v7893_v63 = vld [vmem:[#allocation2 + $0x78] sm:$0xf0] }
 0x544   : > { %3150 = vst [vmem:[#allocation2 + $0x128] sm:$0xff] %v3144_v6  ;;  %v7892_v20 = vor.u32 %v9005_v31, %v7891_v39  ;;  %v7896_v51 = vor.u32 %v9002_v17, %v7893_v63  ;;  %v8990_v6 = vld [vmem:[#allocation2 + $0x4] sm:$0xf]  ;;  %v3063_v39 = vsel %vm921_vm4, %v11620_v44, %v3048_v10 }
 0x545   : > { %v7848_v31 = vor.u32 %v8990_v6, %v7845_v5 }
 0x546   : > { %v11910_v47 = vpop.permute.xlu0 %3113  ;;  %3630 = vmatpush.bf16.msrb.mxu2 %v7892_v20  ;;  %3658 = vmatpush.bf16.msra.mxu0 %v7896_v51  ;;  %v3073_v51 = vmul.f32 %v3063_v39, %v14722_v46 }
 0x547   : > { %v3122_v41 = vsel %vm995_vm6, %v3110_v33, %v11910_v47 }
 0x548   : > { %v3140_v16 = vmul.f32 %v3122_v41, %v14755_v50  ;;  %v3176_v45 = vpop.permute.xlu2 %3175  ;;  %v11917_v34 = vpop.permute.xlu1 %3053 }
 0x549   : > { %v3179_v52 = vsel %vm1069_vm5, %v11687_v43, %v3176_v45  ;;  %v3189_v61 = vsel %vm1069_vm5, %v3176_v45, %v11511_v40  ;;  %v3062_v0 = vsel %vm921_vm4, %v3050_v58, %v11917_v34  ;;  %v7835_v43 = vld [vmem:[%s14467_s3] sm:$0xf]  ;;  %v8989_v40 = vld [vmem:[%s14467_s3 + $0x4] sm:$0xf0] }
 0x54a   : > { %v3147_v30 = vpack.c.bf16 %v3140_v16, %v3139_v13  ;;  %v3195_v33 = vmul.f32 %v3179_v52, %v14718_v38  ;;  %v3196_v37 = vmul.f32 %v3189_v61, %v14756_v4  ;;  %v3080_v57 = vmul.f32 %v3062_v0, %v14757_v42  ;;  %3631 = vmatpush.bf16.msrb.mxu2 %v7868_v25  ;;  %v7843_v58 = vld [vmem:[#allocation2] sm:$0xf]  ;;  %v14761_v52 = vld [vmem:[#allocation54_spill] sm:$0xff]  ;;  %v14762_v0 = vld [vmem:[#allocation56_spill] sm:$0xff] }
 0x54b   : > { %3659 = vmatpush.bf16.msra.mxu0 %v7872_v23  ;;  %v7844_v59 = vor.u32 %v8993_v1, %v7843_v58  ;;  %v11941_v17 = vor.u32 %v8989_v40, %v7835_v43  ;;  %v14759_v45 = vld [vmem:[#allocation55_spill] sm:$0xff]  ;;  %v14760_v23 = vld [vmem:[#allocation53_spill] sm:$0xff] }
 0x54c   : > { %3153 = vst [vmem:[#allocation2 + $0x140] sm:$0xff] %v3147_v30  ;;  %v3205_v56 = vpack.c.bf16 %v3196_v37, %v3195_v33  ;;  %v3087_v50 = vpack.c.bf16 %v3080_v57, %v3079_v7 }
 0x54e   : > { %3211 = vst [vmem:[#allocation2 + $0x160] sm:$0xff] %v3205_v56  ;;  %v3052_v63 = vpop.permute.xlu0 %3051  ;;  %3632 = vmatpush.bf16.msrb.mxu2 %v7844_v59  ;;  %v14763_v59 = vld [vmem:[#allocation31_spill] sm:$0xff] }
 0x54f   : > { %3093 = vst [vmem:[#allocation2 + $0x110] sm:$0xff] %v3087_v50  ;;  %v3061_v20 = vsel %vm921_vm4, %v3048_v10, %v3052_v63  ;;  %3660 = vmatpush.bf16.msra.mxu0 %v7848_v31 }
 0x550   : > { %v3074_v18 = vmul.f32 %v3061_v20, %v14757_v42  ;;  %v2974_v15 = vpop.permute.xlu2 %2973  ;;  %v3220_v27 = vpop.permute.xlu1 %3219 }
 0x551   : > { %3633 = vmatmul.bf16.vlgmr.msrb.gmra.mxu2 %v11941_v17  ;;  %v2994_v58 = vsel %vm835_vm3, %v11605_v29, %v2974_v15 }
 0x552   : > { %v3084_v44 = vpack.c.bf16 %v3074_v18, %v3073_v51  ;;  %3661 = vmatmul.bf16.vlgmr.msra.gmra.mxu0 %v11941_v17  ;;  %v14764_v18 = vld [vmem:[#allocation33_spill] sm:$0xff] }
 0x554   : > { %3090 = vst [vmem:[#allocation2 + $0xf8] sm:$0xff] %v3084_v44  ;;  %v14765_v44 = vld [vmem:[#allocation49_spill] sm:$0xff] }
 0x556   : > { %v11949_v55 = vpop.permute.xlu0 %3217 }
 0x557   : > { %v3248_v10 = vsel %vm1143_vm7, %v11949_v55, %v11902_v14 }
 0x558   : > { %v3116_v41 = vpop.permute.xlu2 %3115  ;;  %v11955_v53 = vpop.permute.xlu1 %3225  ;;  %v3257_v25 = vmul.f32 %v3248_v10, %v14759_v45 }
 0x559   : > { %v3119_v46 = vsel %vm995_vm6, %v11851_v54, %v3116_v41  ;;  %v3129_v13 = vsel %vm995_vm6, %v3116_v41, %v14758_v2  ;;  %v3246_v16 = vsel %vm1143_vm7, %v11902_v14, %v11955_v53  ;;  %v3247_v54 = vsel %vm1143_vm7, %v11892_v12, %v3220_v27  ;;  %v9036_v41 = vld [vmem:[#allocation2 + $0x16c] sm:$0xf0] }
 0x55a   : > { %v3135_v7 = vmul.f32 %v3119_v46, %v14760_v23  ;;  %v3136_v61 = vmul.f32 %v3129_v13, %v14761_v52  ;;  %v3258_v1 = vmul.f32 %v3246_v16, %v14762_v0  ;;  %v3251_v42 = vmul.f32 %v3247_v54, %v14759_v45  ;;  %v14767_v13 = vld [vmem:[#allocation42_spill] sm:$0xff] }
 0x55c   : > { %v3145_v30 = vpack.c.bf16 %v3136_v61, %v3135_v7  ;;  %v3266_v33 = vpack.c.bf16 %v3258_v1, %v3257_v25  ;;  %v14768_v25 = vld [vmem:[#allocation34_spill] sm:$0xff]  ;;  %v7837_v1 = vld [vmem:[%s14467_s3 + $0x8] sm:$0xf0] }
 0x55e   : > { %3151 = vst [vmem:[#allocation2 + $0x130] sm:$0xff] %v3145_v30  ;;  %v11974_v37 = vpop.permute.xlu0 %3223 }
 0x55f   : > { %3272 = vst [vmem:[#allocation2 + $0x198] sm:$0xff] %v3266_v33  ;;  %v3245_v14 = vsel %vm1143_vm7, %v3220_v27, %v11974_v37  ;;  %v3007_v27 = vmul.f32 %v2994_v58, %v14764_v18  ;;  %v9033_v58 = vld [vmem:[#allocation2 + $0x15c] sm:$0xf] }
 0x560   : > { %v3252_v57 = vmul.f32 %v3245_v14, %v14762_v0  ;;  %v11981_v5 = vpop.permute.xlu2 %2913  ;;  %v2972_v43 = vpop.permute.xlu1 %2971 }
 0x562   : > { %v3263_v40 = vpack.c.bf16 %v3252_v57, %v3251_v42 }
 0x564   : > { %3269 = vst [vmem:[#allocation2 + $0x180] sm:$0xff] %v3263_v40  ;;  %v8019_v40 = vld [vmem:[#allocation2 + $0x158] sm:$0xf] }
 0x566   : > { %v3178_v56 = vpop.permute.xlu0 %3177  ;;  %v9041_v61 = vld [vmem:[#allocation2 + $0x194] sm:$0xf0]  ;;  %v8037_v33 = vld [vmem:[#allocation2 + $0x198] sm:$0xf0] }
 0x567   : > { %v3180_v50 = vsel %vm1069_vm5, %v11859_v22, %v3178_v56  ;;  %v3190_v6 = vsel %vm1069_vm5, %v3178_v56, %v14763_v59  ;;  %v2993_v56 = vsel %vm835_vm3, %v11505_v3, %v2972_v43 }
 0x568   : > { %v3201_v39 = vmul.f32 %v3180_v50, %v14718_v38  ;;  %v3202_v31 = vmul.f32 %v3190_v6, %v14756_v4  ;;  %v3056_v20 = vpop.permute.xlu2 %3055  ;;  %v11994_v51 = vpop.permute.xlu1 %2977  ;;  %v8021_v38 = vld [vmem:[#allocation2 + $0x170] sm:$0xf0]  ;;  %v8020_v50 = vor.u32 %v9036_v41, %v8019_v40  ;;  %v9027_v41 = vld [vmem:[#allocation2 + $0x12c] sm:$0xf] }
 0x569   : > { %v3059_v29 = vsel %vm921_vm4, %v3052_v63, %v3056_v20  ;;  %v3069_v22 = vsel %vm921_vm4, %v3056_v20, %v14765_v44  ;;  %v2992_v10 = vsel %vm835_vm3, %v2974_v15, %v11994_v51  ;;  %v14766_v4 = vld [vmem:[#allocation41_spill] sm:$0xff]  ;;  %v8988_v63 = vld [vmem:[%s14467_s3 + $0x4] sm:$0xf]  ;;  %v8024_v59 = vor.u32 %v9033_v58, %v8021_v38 }
 0x56a   : > { %v3208_v46 = vpack.c.bf16 %v3202_v31, %v3201_v39  ;;  %v3075_v2 = vmul.f32 %v3059_v29, %v14766_v4  ;;  %v3076_v16 = vmul.f32 %v3069_v22, %v14767_v13  ;;  %v3008_v7 = vmul.f32 %v2992_v10, %v14768_v25  ;;  %v9030_v31 = vld [vmem:[#allocation2 + $0x13c] sm:$0xf0]  ;;  %v7997_v20 = vld [vmem:[#allocation2 + $0x140] sm:$0xf0]  ;;  %v7995_v10 = vld [vmem:[#allocation2 + $0x128] sm:$0xf] }
 0x56b   : > { %v8035_v30 = vld [vmem:[#allocation2 + $0x180] sm:$0xf]  ;;  %v9038_v15 = vld [vmem:[#allocation2 + $0x184] sm:$0xf]  ;;  %v12017_v6 = vor.u32 %v8988_v63, %v7837_v1  ;;  %v3001_v29 = vmul.f32 %v2993_v56, %v14764_v18  ;;  %v7996_v38 = vor.u32 %v9030_v31, %v7995_v10  ;;  %v9015_v40 = vld [vmem:[#allocation2 + $0xcc] sm:$0xf] }
 0x56c   : > { %3214 = vst [vmem:[#allocation2 + $0x178] sm:$0xff] %v3208_v46  ;;  %v3085_v54 = vpack.c.bf16 %v3076_v16, %v3075_v2  ;;  %v3015_v14 = vpack.c.bf16 %v3008_v7, %v3007_v27  ;;  %v8036_v42 = vor.u32 %v9041_v61, %v8035_v30  ;;  %v8040_v57 = vor.u32 %v9038_v15, %v8037_v33  ;;  %v7971_v2 = vld [vmem:[#allocation2 + $0xf8] sm:$0xf]  ;;  %v9021_v16 = vld [vmem:[#allocation2 + $0xfc] sm:$0xf]  ;;  %v3331_v18 = vld [vmem:[%s14470_s6] sm:$0xff] }
 0x56d   : > { %v8000_v46 = vor.u32 %v9027_v41, %v7997_v20  ;;  %v7973_v7 = vld [vmem:[#allocation2 + $0x110] sm:$0xf0]  ;;  %3335 = vperm.xlu2 %9341, %v3331_v18   ;;  %v9018_v1 = vld [vmem:[#allocation2 + $0xdc] sm:$0xf0]  ;;  %v7949_v30 = vld [vmem:[#allocation2 + $0xe0] sm:$0xf0]  ;;  %v2934_v15 = vsel %vm761_vm2, %v11885_v32, %v11981_v5 }
 0x56e   : > { %3091 = vst [vmem:[#allocation2 + $0x100] sm:$0xff] %v3085_v54  ;;  %v2976_v39 = vpop.permute.xlu0 %2975  ;;  %3646 = vmatpush.bf16.msra.mxu3 %v8036_v42  ;;  %3674 = vmatpush.bf16.msrb.mxu1 %v8040_v57  ;;  %v7976_v63 = vor.u32 %v9021_v16, %v7973_v7  ;;  %v7947_v57 = vld [vmem:[#allocation2 + $0xc8] sm:$0xf]  ;;  %v7952_v31 = vor.u32 %v9015_v40, %v7949_v30  ;;  %v14770_v20 = vld [vmem:[#allocation27_spill] sm:$0xff] }
 0x56f   : > { %3021 = vst [vmem:[#allocation2 + $0xb0] sm:$0xff] %v3015_v14  ;;  %v2991_v27 = vsel %vm835_vm3, %v2972_v43, %v2976_v39  ;;  %v14769_v14 = vld [vmem:[#allocation39_spill] sm:$0xff]  ;;  %v7948_v32 = vor.u32 %v9018_v1, %v7947_v57  ;;  %v14772_v41 = vld [vmem:[#allocation36_spill] sm:$0xff]  ;;  %v14774_v57 = vld [vmem:[#allocation29_spill] sm:$0xff] }
 0x570   : > { %v3002_v3 = vmul.f32 %v2991_v27, %v14768_v25  ;;  %v12023_v44 = vpop.permute.xlu2 %3229  ;;  %v2912_v22 = vpop.permute.xlu1 %2911  ;;  %v9024_v25 = vld [vmem:[#allocation2 + $0x10c] sm:$0xf0]  ;;  %v2947_v27 = vmul.f32 %v2934_v15, %v14770_v20  ;;  %v14771_v10 = vld [vmem:[#allocation35_spill] sm:$0xff] }
 0x571   : > { %8057 = vmatmul.msk.bf16.vlgmr.msra.gmra.mxu3 %vm1540_vm8, %v12017_v6  ;;  %8058 = vmatmul.msk.bf16.vlgmr.msrb.gmra.mxu1 %vm1540_vm8, %v12017_v6  ;;  %v7972_v61 = vor.u32 %v9024_v25, %v7971_v2 }
 0x572   : > { %3681 = vmatpush.bf16.msrb.mxu3 %v8020_v50  ;;  %3709 = vmatpush.bf16.msra.mxu1 %v8024_v59  ;;  %v3012_v43 = vpack.c.bf16 %v3002_v3, %v3001_v29 }
 0x574   : > { %3018 = vst [vmem:[#allocation2 + $0x98] sm:$0xff] %v3012_v43 }
 0x576   : > { %3682 = vmatpush.bf16.msrb.mxu3 %v7996_v38  ;;  %3710 = vmatpush.bf16.msra.mxu1 %v8000_v46  ;;  %v3118_v33 = vpop.permute.xlu0 %3117  ;;  %v14773_v46 = vld [vmem:[#allocation28_spill] sm:$0xff]  ;;  %v9012_v2 = vld [vmem:[#allocation2 + $0xac] sm:$0xf0] }
 0x577   : > { %v3120_v54 = vsel %vm995_vm6, %v11910_v47, %v3118_v33  ;;  %v3130_v42 = vsel %vm995_vm6, %v3118_v33, %v14769_v14 }
 0x578   : > { %v3141_v58 = vmul.f32 %v3120_v54, %v14760_v23  ;;  %v3142_v56 = vmul.f32 %v3130_v42, %v14761_v52  ;;  %v2980_v50 = vpop.permute.xlu2 %2979  ;;  %v2918_v59 = vpop.permute.xlu1 %2917 }
 0x579   : > { %v2987_v47 = vsel %vm835_vm3, %v2980_v50, %v11711_v60  ;;  %v2989_v29 = vsel %vm835_vm3, %v2976_v39, %v2980_v50  ;;  %v2932_v3 = vsel %vm761_vm2, %v11981_v5, %v2918_v59  ;;  %v7925_v60 = vld [vmem:[#allocation2 + $0xb0] sm:$0xf0]  ;;  %v2933_v5 = vsel %vm761_vm2, %v11709_v48, %v2912_v22 }
 0x57a   : > { %3683 = vmatpush.bf16.msrb.mxu3 %v7972_v61  ;;  %3711 = vmatpush.bf16.msra.mxu1 %v7976_v63  ;;  %v3148_v23 = vpack.c.bf16 %v3142_v56, %v3141_v58  ;;  %v3003_v52 = vmul.f32 %v2989_v29, %v14771_v10  ;;  %v3004_v38 = vmul.f32 %v2987_v47, %v14772_v41  ;;  %v14775_v58 = vld [vmem:[#allocation30_spill] sm:$0xff] }
 0x57b   : > { %v2948_v43 = vmul.f32 %v2932_v3, %v14773_v46  ;;  %v7923_v16 = vld [vmem:[#allocation2 + $0x98] sm:$0xf]  ;;  %v9009_v18 = vld [vmem:[#allocation2 + $0x9c] sm:$0xf]  ;;  %v2941_v30 = vmul.f32 %v2933_v5, %v14770_v20  ;;  %v14777_v3 = vld [vmem:[#allocation57_spill] sm:$0xff] }
 0x57c   : > { %3154 = vst [vmem:[#allocation2 + $0x148] sm:$0xff] %v3148_v23  ;;  %v3013_v25 = vpack.c.bf16 %v3004_v38, %v3003_v52  ;;  %v7924_v7 = vor.u32 %v9012_v2, %v7923_v16  ;;  %v7928_v61 = vor.u32 %v9009_v18, %v7925_v60  ;;  %v14778_v52 = vld [vmem:[#allocation58_spill] sm:$0xff]  ;;  %v9000_v60 = vld [vmem:[#allocation2 + $0x4c] sm:$0xf0] }
 0x57d   : > { %v2955_v39 = vpack.c.bf16 %v2948_v43, %v2947_v27 }
 0x57e   : > { %3684 = vmatpush.bf16.msrb.mxu3 %v7948_v32  ;;  %3712 = vmatpush.bf16.msra.mxu1 %v7952_v31  ;;  %3019 = vst [vmem:[#allocation2 + $0xa0] sm:$0xff] %v3013_v25  ;;  %v2916_v63 = vpop.permute.xlu0 %2915  ;;  %v3244_v32 = vsel %vm1143_vm7, %v11955_v53, %v12023_v44  ;;  %v14776_v31 = vld [vmem:[#allocation67_spill] sm:$0xff]  ;;  %v7877_v25 = vld [vmem:[#allocation2 + $0x50] sm:$0xf0] }
 0x57f   : > { %2961 = vst [vmem:[#allocation2 + $0x80] sm:$0xff] %v2955_v39  ;;  %v2931_v1 = vsel %vm761_vm2, %v2912_v22, %v2916_v63  ;;  %v3259_v23 = vmul.f32 %v3244_v32, %v14777_v3 }
 0x580   : > { %v2942_v15 = vmul.f32 %v2931_v1, %v14773_v46  ;;  %v2922_v33 = vpop.permute.xlu2 %2921  ;;  %v3228_v54 = vpop.permute.xlu1 %3227 }
 0x581   : > { %v2928_v14 = vsel %vm761_vm2, %v2922_v33, %v11826_v11  ;;  %v2930_v48 = vsel %vm761_vm2, %v2918_v59, %v2922_v33 }
 0x582   : > { %3685 = vmatpush.bf16.msrb.mxu3 %v7924_v7  ;;  %3713 = vmatpush.bf16.msra.mxu1 %v7928_v61  ;;  %v2952_v42 = vpack.c.bf16 %v2942_v15, %v2941_v30  ;;  %v2949_v40 = vmul.f32 %v2930_v48, %v14774_v57  ;;  %v2950_v22 = vmul.f32 %v2928_v14, %v14775_v58  ;;  %v7875_v7 = vld [vmem:[#allocation2 + $0x38] sm:$0xf]  ;;  %v8997_v61 = vld [vmem:[#allocation2 + $0x3c] sm:$0xf]  ;;  %v8994_v48 = vld [vmem:[#allocation2 + $0x1c] sm:$0xf0] }
 0x583   : > { %v7876_v15 = vor.u32 %v9000_v60, %v7875_v7  ;;  %v9031_v60 = vld [vmem:[#allocation2 + $0x144] sm:$0xf0] }
 0x584   : > { %2958 = vst [vmem:[#allocation2 + $0x68] sm:$0xff] %v2952_v42  ;;  %v2956_v56 = vpack.c.bf16 %v2950_v22, %v2949_v40  ;;  %v7853_v42 = vld [vmem:[#allocation2 + $0x20] sm:$0xf0] }
 0x586   : > { %2962 = vst [vmem:[#allocation2 + $0x88] sm:$0xff] %v2956_v56  ;;  %v3058_v50 = vpop.permute.xlu0 %3057  ;;  %v9006_v46 = vld [vmem:[#allocation2 + $0x7c] sm:$0xf0]  ;;  %v7901_v2 = vld [vmem:[#allocation2 + $0x80] sm:$0xf0] }
 0x587   : > { %v3060_v11 = vsel %vm921_vm4, %v11917_v34, %v3058_v50  ;;  %v3070_v59 = vsel %vm921_vm4, %v3058_v50, %v14776_v31  ;;  %v7851_v56 = vld [vmem:[#allocation2 + $0x8] sm:$0xf]  ;;  %v8991_v50 = vld [vmem:[#allocation2 + $0xc] sm:$0xf] }
 0x588   : > { %v3081_v20 = vmul.f32 %v3060_v11, %v14766_v4  ;;  %v3082_v27 = vmul.f32 %v3070_v59, %v14767_v13  ;;  %v3234_v47 = vpop.permute.xlu1 %3233  ;;  %v3243_v13 = vsel %vm1143_vm7, %v11974_v37, %v3228_v54  ;;  %v7880_v37 = vor.u32 %v8997_v61, %v7877_v25  ;;  %v8005_v25 = vld [vmem:[#allocation2 + $0x148] sm:$0xf0] }
 0x589   : > { %v3242_v29 = vsel %vm1143_vm7, %v12023_v44, %v3234_v47  ;;  %v3253_v5 = vmul.f32 %v3243_v13, %v14777_v3  ;;  %v7852_v11 = vor.u32 %v8994_v48, %v7851_v56  ;;  %v7856_v31 = vor.u32 %v8991_v50, %v7853_v42  ;;  %v14779_v3 = vld [vmem:[#allocation60_spill] sm:$0xff]  ;;  %v7955_v56 = vld [vmem:[#allocation2 + $0xd0] sm:$0xf]  ;;  %v9016_v50 = vld [vmem:[#allocation2 + $0xd4] sm:$0xf] }
 0x58a   : > { %v3088_v53 = vpack.c.bf16 %v3082_v27, %v3081_v20  ;;  %v3260_v38 = vmul.f32 %v3242_v29, %v14778_v52  ;;  %v9022_v48 = vld [vmem:[#allocation2 + $0x104] sm:$0xf] }
 0x58b   : > { %v7899_v34 = vld [vmem:[#allocation2 + $0x68] sm:$0xf]  ;;  %v9003_v43 = vld [vmem:[#allocation2 + $0x6c] sm:$0xf] }
 0x58c   : > { %3094 = vst [vmem:[#allocation2 + $0x118] sm:$0xff] %v3088_v53  ;;  %v3267_v16 = vpack.c.bf16 %v3260_v38, %v3259_v23  ;;  %v7900_v18 = vor.u32 %v9006_v46, %v7899_v34  ;;  %v7904_v4 = vor.u32 %v9003_v43, %v7901_v2 }
 0x58e   : > { %3273 = vst [vmem:[#allocation2 + $0x1a0] sm:$0xff] %v3267_v16  ;;  %v12090_v44 = vpop.permute.xlu0 %3231  ;;  %3686 = vmatpush.bf16.msrb.mxu3 %v7900_v18  ;;  %3714 = vmatpush.bf16.msra.mxu1 %v7904_v4  ;;  %v9034_v16 = vld [vmem:[#allocation2 + $0x164] sm:$0xf] }
 0x58f   : > { %v3241_v39 = vsel %vm1143_vm7, %v3228_v54, %v12090_v44 }
 0x590   : > { %v3254_v1 = vmul.f32 %v3241_v39, %v14778_v52  ;;  %v2920_v30 = vpop.permute.xlu1 %2919  ;;  %v9037_v52 = vld [vmem:[#allocation2 + $0x174] sm:$0xf0] }
 0x591   : > { %v2927_v33 = vsel %vm761_vm2, %v2920_v30, %v11871_v28  ;;  %v2929_v14 = vsel %vm761_vm2, %v2916_v63, %v2920_v30  ;;  %v9028_v30 = vld [vmem:[#allocation2 + $0x134] sm:$0xf] }
 0x592   : > { %v3264_v40 = vpack.c.bf16 %v3254_v1, %v3253_v5  ;;  %v2943_v54 = vmul.f32 %v2929_v14, %v14774_v57  ;;  %v2944_v22 = vmul.f32 %v2927_v33, %v14775_v58  ;;  %3687 = vmatpush.bf16.msrb.mxu3 %v7876_v15  ;;  %3715 = vmatpush.bf16.msra.mxu1 %v7880_v37  ;;  %v8003_v1 = vld [vmem:[#allocation2 + $0x130] sm:$0xf] }
 0x593   : > { %v8004_v15 = vor.u32 %v9031_v60, %v8003_v1  ;;  %v9025_v33 = vld [vmem:[#allocation2 + $0x114] sm:$0xf0]  ;;  %v7981_v14 = vld [vmem:[#allocation2 + $0x118] sm:$0xf0] }
 0x594   : > { %3270 = vst [vmem:[#allocation2 + $0x188] sm:$0xff] %v3264_v40  ;;  %v2953_v32 = vpack.c.bf16 %v2944_v22, %v2943_v54  ;;  %v7984_v40 = vor.u32 %v9022_v48, %v7981_v14  ;;  %v9019_v54 = vld [vmem:[#allocation2 + $0xe4] sm:$0xf0]  ;;  %v7957_v22 = vld [vmem:[#allocation2 + $0xe8] sm:$0xf0] }
 0x595   : > { %v8045_v34 = vld [vmem:[#allocation2 + $0x1a0] sm:$0xf0] }
 0x596   : > { %2959 = vst [vmem:[#allocation2 + $0x70] sm:$0xff] %v2953_v32  ;;  %v2982_v28 = vpop.permute.xlu0 %2981  ;;  %3688 = vmatpush.bf16.msrb.mxu3 %v7852_v11  ;;  %3716 = vmatpush.bf16.msra.mxu1 %v7856_v31  ;;  %v7956_v32 = vor.u32 %v9019_v54, %v7955_v56  ;;  %v7960_v11 = vor.u32 %v9016_v50, %v7957_v22 }
 0x597   : > { %v2988_v63 = vsel %vm835_vm3, %v2982_v28, %v11738_v35  ;;  %v2990_v57 = vsel %vm835_vm3, %v11994_v51, %v2982_v28  ;;  %v14780_v51 = vld [vmem:[#allocation59_spill] sm:$0xff] }
 0x598   : > { %v3009_v58 = vmul.f32 %v2990_v57, %v14771_v10  ;;  %v3010_v59 = vmul.f32 %v2988_v63, %v14772_v41  ;;  %v3238_v20 = vpop.permute.xlu1 %3237  ;;  %v9042_v10 = vld [vmem:[#allocation2 + $0x19c] sm:$0xf0]  ;;  %v8029_v41 = vld [vmem:[#allocation2 + $0x178] sm:$0xf0] }
 0x599   : > { %v3240_v27 = vsel %vm1143_vm7, %v3234_v47, %v3238_v20  ;;  %v3250_v29 = vsel %vm1143_vm7, %v3238_v20, %v11949_v55  ;;  %3689 = vmatmul.bf16.vlgmr.msrb.gmra.mxu3 %v11941_v17  ;;  %3717 = vmatmul.bf16.vlgmr.msra.gmra.mxu1 %v11941_v17  ;;  %v8027_v55 = vld [vmem:[#allocation2 + $0x160] sm:$0xf]  ;;  %v8032_v4 = vor.u32 %v9034_v16, %v8029_v41  ;;  %v8995_v16 = vld [vmem:[#allocation2 + $0x24] sm:$0xf0] }
 0x59a   : > { %v3016_v35 = vpack.c.bf16 %v3010_v59, %v3009_v58  ;;  %v3261_v23 = vmul.f32 %v3240_v27, %v14779_v3  ;;  %v3262_v53 = vmul.f32 %v3250_v29, %v14780_v51  ;;  %v8028_v18 = vor.u32 %v9037_v52, %v8027_v55  ;;  %v7931_v29 = vld [vmem:[#allocation2 + $0xa0] sm:$0xf]  ;;  %v7909_v52 = vld [vmem:[#allocation2 + $0x88] sm:$0xf0] }
 0x59b   : > { %v8043_v38 = vld [vmem:[#allocation2 + $0x188] sm:$0xf]  ;;  %v9039_v46 = vld [vmem:[#allocation2 + $0x18c] sm:$0xf] }
 0x59c   : > { %3022 = vst [vmem:[#allocation2 + $0xb8] sm:$0xff] %v3016_v35  ;;  %v3268_v47 = vpack.c.bf16 %v3262_v53, %v3261_v23  ;;  %v8044_v43 = vor.u32 %v9042_v10, %v8043_v38  ;;  %v8048_v2 = vor.u32 %v9039_v46, %v8045_v34  ;;  %v9010_v35 = vld [vmem:[#allocation2 + $0xa4] sm:$0xf]  ;;  %v9007_v10 = vld [vmem:[#allocation2 + $0x84] sm:$0xf0] }
 0x59d   : > { %v9004_v53 = vld [vmem:[#allocation2 + $0x74] sm:$0xf]  ;;  %v9001_v46 = vld [vmem:[#allocation2 + $0x54] sm:$0xf0]  ;;  %v7885_v34 = vld [vmem:[#allocation2 + $0x58] sm:$0xf0] }
 0x59e   : > { %3274 = vst [vmem:[#allocation2 + $0x1a8] sm:$0xff] %v3268_v47  ;;  %v3236_v13 = vpop.permute.xlu0 %3235  ;;  %3702 = vmatpush.bf16.msra.mxu2 %v8044_v43  ;;  %3730 = vmatpush.bf16.msrb.mxu0 %v8048_v2  ;;  %v7912_v38 = vor.u32 %v9004_v53, %v7909_v52  ;;  %v7883_v47 = vld [vmem:[#allocation2 + $0x40] sm:$0xf]  ;;  %v8998_v43 = vld [vmem:[#allocation2 + $0x44] sm:$0xf] }
 0x59f   : > { %v3239_v39 = vsel %vm1143_vm7, %v12090_v44, %v3236_v13  ;;  %v3249_v7 = vsel %vm1143_vm7, %v3236_v13, %v11892_v12  ;;  %v8008_v44 = vor.u32 %v9028_v30, %v8005_v25  ;;  %v7979_v12 = vld [vmem:[#allocation2 + $0x100] sm:$0xf]  ;;  %v7884_v2 = vor.u32 %v9001_v46, %v7883_v47  ;;  %v8992_v13 = vld [vmem:[#allocation2 + $0x14] sm:$0xf] }
 0x5a0   : > { %v3255_v61 = vmul.f32 %v3239_v39, %v14779_v3  ;;  %v3256_v5 = vmul.f32 %v3249_v7, %v14780_v51  ;;  %v7980_v42 = vor.u32 %v9025_v33, %v7979_v12  ;;  %v7907_v51 = vld [vmem:[#allocation2 + $0x70] sm:$0xf]  ;;  %v7888_v55 = vor.u32 %v8998_v43, %v7885_v34  ;;  %v14781_v30 = vld [vmem:[#allocation62_spill] sm:$0xff] }
 0x5a1   : > { %8059 = vmatmul.msk.bf16.vlgmr.msra.gmra.mxu2 %vm1540_vm8, %v12017_v6  ;;  %8060 = vmatmul.msk.bf16.vlgmr.msrb.gmra.mxu0 %vm1540_vm8, %v12017_v6  ;;  %v7908_v41 = vor.u32 %v9007_v10, %v7907_v51  ;;  %v14782_v12 = vld [vmem:[#allocation61_spill] sm:$0xff]  ;;  %v14784_v10 = vld [vmem:[#allocation63_spill] sm:$0xff] }
 0x5a2   : > { %3737 = vmatpush.bf16.msrb.mxu2 %v8028_v18  ;;  %3765 = vmatpush.bf16.msra.mxu0 %v8032_v4  ;;  %v3265_v37 = vpack.c.bf16 %v3256_v5, %v3255_v61  ;;  %v7861_v18 = vld [vmem:[#allocation2 + $0x28] sm:$0xf0]  ;;  %v7859_v4 = vld [vmem:[#allocation2 + $0x10] sm:$0xf] }
 0x5a3   : > { %v9013_v28 = vld [vmem:[#allocation2 + $0xb4] sm:$0xf0]  ;;  %v7933_v63 = vld [vmem:[#allocation2 + $0xb8] sm:$0xf0]  ;;  %v7860_v60 = vor.u32 %v8995_v16, %v7859_v4  ;;  %v7864_v25 = vor.u32 %v8992_v13, %v7861_v18 }
 0x5a4   : > { %3271 = vst [vmem:[#allocation2 + $0x190] sm:$0xff] %v3265_v37  ;;  %v7932_v3 = vor.u32 %v9013_v28, %v7931_v29  ;;  %v7936_v23 = vor.u32 %v9010_v35, %v7933_v63  ;;  %v14783_v29 = vld [vmem:[#allocation66_spill] sm:$0xff] }
 0x5a5   : > { %v9043_v31 = vld [vmem:[#allocation2 + $0x1a4] sm:$0xf0]  ;;  %v8053_v59 = vld [vmem:[#allocation2 + $0x1a8] sm:$0xf0] }
 0x5a6   : > { %3738 = vmatpush.bf16.msrb.mxu2 %v8004_v15  ;;  %3766 = vmatpush.bf16.msra.mxu0 %v8008_v44  ;;  %v12152_v14 = vpop.permute.xlu0 %3340 }
 0x5aa   : > { %3739 = vmatpush.bf16.msrb.mxu2 %v7980_v42  ;;  %3767 = vmatpush.bf16.msra.mxu0 %v7984_v40 }
 0x5ab   : > { %v8051_v57 = vld [vmem:[#allocation2 + $0x190] sm:$0xf]  ;;  %v9040_v58 = vld [vmem:[#allocation2 + $0x194] sm:$0xf] }
 0x5ac   : > { %v8052_v20 = vor.u32 %v9043_v31, %v8051_v57  ;;  %v8056_v27 = vor.u32 %v9040_v58, %v8053_v59 }
 0x5ae   : > { %3740 = vmatpush.bf16.msrb.mxu2 %v7956_v32  ;;  %3768 = vmatpush.bf16.msra.mxu0 %v7960_v11 }
 0x5af   : > { %3758 = vmatpush.bf16.msra.mxu3 %v8052_v20  ;;  %3786 = vmatpush.bf16.msrb.mxu1 %v8056_v27 }
 0x5b2   : > { %3741 = vmatpush.bf16.msrb.mxu2 %v7932_v3  ;;  %3769 = vmatpush.bf16.msra.mxu0 %v7936_v23 }
 0x5b3   : > { %8061 = vmatmul.msk.bf16.vlgmr.msra.gmra.mxu3 %vm1540_vm8, %v12017_v6  ;;  %8062 = vmatmul.msk.bf16.vlgmr.msrb.gmra.mxu1 %vm1540_vm8, %v12017_v6 }
 0x5b6   : > { %3742 = vmatpush.bf16.msrb.mxu2 %v7908_v41  ;;  %3770 = vmatpush.bf16.msra.mxu0 %v7912_v38 }
 0x5ba   : > { %3743 = vmatpush.bf16.msrb.mxu2 %v7884_v2  ;;  %3771 = vmatpush.bf16.msra.mxu0 %v7888_v55 }
 0x5be   : > { %3744 = vmatpush.bf16.msrb.mxu2 %v7860_v60  ;;  %3772 = vmatpush.bf16.msra.mxu0 %v7864_v25 }
 0x5c1   : > { %3745 = vmatmul.bf16.vlgmr.msrb.gmra.mxu2 %v11941_v17  ;;  %3773 = vmatmul.bf16.vlgmr.msra.gmra.mxu0 %v11941_v17 }
 0x5c7   : > { %v12139_v6 = vpop.permute.xlu2 %3335 }
 0x5cf   : > { %v3662_v39 = vpop.f32.mrf.mxu0 }
 0x5d0   : > { %v3663_v7 = vadd.f32 %v3662_v39, %v12139_v6 }
 0x5d4   : > { %v3634_v61 = vpop.f32.mrf.mxu2 }
 0x5d5   : > { %v3635_v44 = vadd.f32 %v3634_v61, %v12139_v6 }
 0x5d7   : > { %v3664_v33 = vpop.f32.mrf.mxu0 }
 0x5d8   : > { %v3665_v54 = vadd.f32 %v3664_v33, %v12152_v14  ;;  %v14786_v33 = vld [vmem:[#allocation64_spill] sm:$0xff] }
 0x5dc   : > { %v3636_v42 = vpop.f32.mrf.mxu2 }
 0x5dd   : > { %v3637_v56 = vadd.f32 %v3636_v42, %v12152_v14 }
 0x5ee   : > { %v3676_v5 = vpop.f32.mrf.mxu1 }
 0x5ef   : > { %v3677_v1 = vadd.f32 %v3676_v5, %v3663_v7 }
 0x5f1   : > { %v12143_v15 = vmul.f32 %v3677_v1, %v14781_v30 }
 0x5f3   : > { %4069 = vrot.lane.b32.xlu0 %v12143_v15, %s9555_s28  ;;  %3937 = vrot.lane.b32.xlu2 %v12143_v15, %s9553_s29 }
 0x5f4   : > { %3817 = vrot.lane.b32.xlu1 %v12143_v15, %s9551_s9  ;;  %v3648_v17 = vpop.f32.mrf.mxu3 }
 0x5f5   : > { %v3649_v37 = vadd.f32 %v3648_v17, %v3635_v44  ;;  %v14785_v17 = vld [vmem:[#allocation65_spill] sm:$0xff] }
 0x5f6   : > { %v3678_v40 = vpop.f32.mrf.mxu1 }
 0x5f7   : > { %v12155_v48 = vmul.f32 %v3649_v37, %v14782_v12  ;;  %v3679_v50 = vadd.f32 %v3678_v40, %v3665_v54 }
 0x5f9   : > { %v4045_v22 = vpack.c.bf16 %v12143_v15, %v12155_v48  ;;  %v12168_v31 = vmul.f32 %v3679_v50, %v14781_v30 }
 0x5fb   : > { %4189 = vrot.lane.b32.xlu0 %v12143_v15, %s9557_s12  ;;  %3865 = vrot.lane.b32.xlu2 %v12155_v48, %s9552_s24  ;;  %4051 = vst [vmem:[#allocation3 + $0xc0] sm:$0xff] %v4045_v22 }
 0x5fc   : > { %3877 = vrot.lane.b32.xlu1 %v12143_v15, %s9552_s24  ;;  %v3650_v32 = vpop.f32.mrf.mxu3 }
 0x5fd   : > { %v3651_v11 = vadd.f32 %v3650_v32, %v3637_v56 }
 0x5ff   : > { %v12171_v28 = vmul.f32 %v3651_v11, %v14782_v12 }
 0x601   : > { %v4046_v63 = vpack.c.bf16 %v12168_v31, %v12171_v28 }
 0x603   : > { %3997 = vrot.lane.b32.xlu0 %v12143_v15, %s9554_s8  ;;  %4117 = vrot.lane.b32.xlu2 %v12155_v48, %s9556_s16  ;;  %4052 = vst [vmem:[#allocation3 + $0xc8] sm:$0xff] %v4046_v63 }
 0x604   : > { %3805 = vrot.lane.b32.xlu1 %v12155_v48, %s9551_s9 }
 0x60b   : > { %3925 = vrot.lane.b32.xlu0 %v12155_v48, %s9553_s29  ;;  %3819 = vrot.lane.b32.xlu2 %v12168_v31, %s9551_s9 }
 0x60c   : > { %4057 = vrot.lane.b32.xlu1 %v12155_v48, %s9555_s28 }
 0x613   : > { %3939 = vrot.lane.b32.xlu0 %v12168_v31, %s9553_s29  ;;  %3879 = vrot.lane.b32.xlu2 %v12168_v31, %s9552_s24 }
 0x614   : > { %4177 = vrot.lane.b32.xlu1 %v12155_v48, %s9557_s12 }
 0x616   : > { %v3718_v57 = vpop.f32.mrf.mxu1 }
 0x617   : > { %v3719_v58 = vadd.f32 %v3718_v57, %v12139_v6 }
 0x61b   : > { %3867 = vrot.lane.b32.xlu0 %v12171_v28, %s9552_s24  ;;  %3807 = vrot.lane.b32.xlu2 %v12171_v28, %s9551_s9 }
 0x61c   : > { %3985 = vrot.lane.b32.xlu1 %v12155_v48, %s9554_s8  ;;  %v3690_v59 = vpop.f32.mrf.mxu3 }
 0x61d   : > { %v3691_v3 = vadd.f32 %v3690_v59, %v12139_v6 }
 0x61e   : > { %v3732_v20 = vpop.f32.mrf.mxu0  ;;  %v3720_v53 = vpop.f32.mrf.mxu1 }
 0x61f   : > { %v3733_v27 = vadd.f32 %v3732_v20, %v3719_v58  ;;  %v3721_v46 = vadd.f32 %v3720_v53, %v12152_v14 }
 0x621   : > { %v12201_v35 = vmul.f32 %v3733_v27, %v14783_v29 }
 0x623   : > { %3821 = vrot.lane.b32.xlu0 %v12201_v35, %s9551_s9  ;;  %4059 = vrot.lane.b32.xlu2 %v12171_v28, %s9555_s28 }
 0x624   : > { %4071 = vrot.lane.b32.xlu1 %v12168_v31, %s9555_s28  ;;  %v3704_v23 = vpop.f32.mrf.mxu2  ;;  %v3692_v41 = vpop.f32.mrf.mxu3 }
 0x625   : > { %v3705_v51 = vadd.f32 %v3704_v23, %v3691_v3  ;;  %v3693_v47 = vadd.f32 %v3692_v41, %v12152_v14 }
 0x626   : > { %v3734_v38 = vpop.f32.mrf.mxu0 }
 0x627   : > { %v12211_v52 = vmul.f32 %v3705_v51, %v14784_v10  ;;  %v3735_v43 = vadd.f32 %v3734_v38, %v3721_v46 }
 0x629   : > { %v4047_v34 = vpack.c.bf16 %v12201_v35, %v12211_v52  ;;  %v12224_v16 = vmul.f32 %v3735_v43, %v14783_v29 }
 0x62b   : > { %3809 = vrot.lane.b32.xlu0 %v12211_v52, %s9551_s9  ;;  %4179 = vrot.lane.b32.xlu2 %v12171_v28, %s9557_s12  ;;  %4053 = vst [vmem:[#allocation3 + $0xd0] sm:$0xff] %v4047_v34 }
 0x62c   : > { %4191 = vrot.lane.b32.xlu1 %v12168_v31, %s9557_s12  ;;  %v3706_v2 = vpop.f32.mrf.mxu2 }
 0x62d   : > { %v3707_v55 = vadd.f32 %v3706_v2, %v3693_v47 }
 0x62f   : > { %v12227_v18 = vmul.f32 %v3707_v55, %v14784_v10 }
 0x630   : > { %v3788_v60 = vpop.f32.mrf.mxu1 }
 0x631   : > { %v4048_v4 = vpack.c.bf16 %v12224_v16, %v12227_v18 }
 0x633   : > { %3869 = vrot.lane.b32.xlu0 %v12211_v52, %s9552_s24  ;;  %3987 = vrot.lane.b32.xlu2 %v12171_v28, %s9554_s8  ;;  %4054 = vst [vmem:[#allocation3 + $0xd8] sm:$0xff] %v4048_v4 }
 0x634   : > { %3999 = vrot.lane.b32.xlu1 %v12168_v31, %s9554_s8 }
 0x636   : > { %v3760_v39 = vpop.f32.mrf.mxu3 }
 0x63b   : > { %4181 = vrot.lane.b32.xlu0 %v12211_v52, %s9557_s12  ;;  %3881 = vrot.lane.b32.xlu2 %v12201_v35, %s9552_s24 }
 0x63c   : > { %3927 = vrot.lane.b32.xlu1 %v12171_v28, %s9553_s29 }
 0x63e   : > { %v3774_v13 = vpop.f32.mrf.mxu0  ;;  %v3762_v56 = vpop.f32.mrf.mxu3 }
 0x63f   : > { %v3775_v25 = vadd.f32 %v3774_v13, %v12139_v6 }
 0x641   : > { %v3789_v61 = vadd.f32 %v3788_v60, %v3775_v25 }
 0x643   : > { %3883 = vrot.lane.b32.xlu0 %v12224_v16, %s9552_s24  ;;  %4193 = vrot.lane.b32.xlu2 %v12201_v35, %s9557_s12  ;;  %v12252_v37 = vmul.f32 %v3789_v61, %v14785_v17 }
 0x644   : > { %v3746_v7 = vpop.f32.mrf.mxu2  ;;  %3941 = vrot.lane.b32.xlu1 %v12201_v35, %s9553_s29 }
 0x645   : > { %v3747_v5 = vadd.f32 %v3746_v7, %v12139_v6  ;;  %v3790_v6 = vpop.f32.mrf.mxu1 }
 0x646   : > { %v3776_v1 = vpop.f32.mrf.mxu0 }
 0x647   : > { %v3761_v44 = vadd.f32 %v3760_v39, %v3747_v5  ;;  %v3777_v40 = vadd.f32 %v3776_v1, %v12152_v14 }
 0x649   : > { %v12255_v42 = vmul.f32 %v3761_v44, %v14786_v33  ;;  %v3791_v50 = vadd.f32 %v3790_v6, %v3777_v40 }
 0x64b   : > { %v4049_v54 = vpack.c.bf16 %v12252_v37, %v12255_v42  ;;  %4195 = vrot.lane.b32.xlu0 %v12224_v16, %s9557_s12  ;;  %3929 = vrot.lane.b32.xlu2 %v12211_v52, %s9553_s29  ;;  %v12268_v57 = vmul.f32 %v3791_v50, %v14785_v17 }
 0x64c   : > { %v3748_v22 = vpop.f32.mrf.mxu2  ;;  %4001 = vrot.lane.b32.xlu1 %v12201_v35, %s9554_s8 }
 0x64d   : > { %v3749_v32 = vadd.f32 %v3748_v22, %v12152_v14  ;;  %4055 = vst [vmem:[#allocation3 + $0xe0] sm:$0xff] %v4049_v54  ;;  %v3938_v63 = vpop.permute.xlu2 %3937 }
 0x64f   : > { %v3763_v11 = vadd.f32 %v3762_v56, %v3749_v32  ;;  %v14787_v32 = vld [vmem:[#allocation37_spill] sm:$0xff] }
 0x651   : > { %v12271_v58 = vmul.f32 %v3763_v11, %v14786_v33 }
 0x653   : > { %v4050_v14 = vpack.c.bf16 %v12268_v57, %v12271_v58  ;;  %3931 = vrot.lane.b32.xlu0 %v12227_v18, %s9553_s29  ;;  %3989 = vrot.lane.b32.xlu2 %v12211_v52, %s9554_s8 }
 0x654   : > { %4133 = vrot.lane.b32.xlu1 %v12201_v35, %s9556_s16 }
 0x655   : > { %4056 = vst [vmem:[#allocation3 + $0xe8] sm:$0xff] %v4050_v14  ;;  %v3866_v59 = vpop.permute.xlu2 %3865  ;;  %v14788_v14 = vld [vmem:[#allocation38_spill] sm:$0xff] }
 0x65b   : > { %4197 = vrot.lane.b32.xlu0 %v12252_v37, %s9557_s12  ;;  %4121 = vrot.lane.b32.xlu2 %v12211_v52, %s9556_s16 }
 0x65c   : > { %3823 = vrot.lane.b32.xlu1 %v12224_v16, %s9551_s9 }
 0x65d   : > { %v12287_v20 = vpop.permute.xlu2 %4117 }
 0x663   : > { %3991 = vrot.lane.b32.xlu0 %v12227_v18, %s9554_s8  ;;  %3943 = vrot.lane.b32.xlu2 %v12224_v16, %s9553_s29 }
 0x664   : > { %3811 = vrot.lane.b32.xlu1 %v12227_v18, %s9551_s9 }
 0x665   : > { %v4070_v27 = vpop.permute.xlu0 %4069  ;;  %v3820_v29 = vpop.permute.xlu2 %3819 }
 0x666   : > { %v3818_v3 = vpop.permute.xlu1 %3817 }
 0x66b   : > { %4123 = vrot.lane.b32.xlu0 %v12227_v18, %s9556_s16  ;;  %4003 = vrot.lane.b32.xlu2 %v12224_v16, %s9554_s8 }
 0x66c   : > { %3885 = vrot.lane.b32.xlu1 %v12252_v37, %s9552_s24 }
 0x66d   : > { %v4190_v23 = vpop.permute.xlu0 %4189  ;;  %v12301_v51 = vpop.permute.xlu2 %3879 }
 0x66e   : > { %v3878_v53 = vpop.permute.xlu1 %3877 }
 0x66f   : > { %v3889_v10 = vsel %vm687_vm1, %v3866_v59, %v3878_v53  ;;  %v3895_v41 = vsel %vm687_vm1, %v3878_v53, %v3866_v59 }
 0x670   : > { %v3901_v38 = vmul.f32 %v3895_v41, %v14748_v36  ;;  %v3902_v46 = vmul.f32 %v3889_v10, %v9990_v26 }
 0x672   : > { %v3913_v34 = vpack.c.bf16 %v3902_v46, %v3901_v38  ;;  %v14789_v38 = vld [vmem:[#allocation43_spill] sm:$0xff] }
 0x673   : > { %3945 = vrot.lane.b32.xlu0 %v12252_v37, %s9553_s29  ;;  %4135 = vrot.lane.b32.xlu2 %v12224_v16, %s9556_s16 }
 0x674   : > { %3919 = vst [vmem:[#allocation3 + $0x30] sm:$0xff] %v3913_v34  ;;  %3871 = vrot.lane.b32.xlu1 %v12227_v18, %s9552_s24  ;;  %v14790_v34 = vld [vmem:[#allocation44_spill] sm:$0xff] }
 0x675   : > { %v3998_v47 = vpop.permute.xlu0 %3997  ;;  %v3808_v43 = vpop.permute.xlu2 %3807 }
 0x676   : > { %v3830_v2 = vsel %vm613_vm0, %v3808_v43, %v3820_v29  ;;  %v3836_v55 = vsel %vm613_vm0, %v3820_v29, %v3808_v43  ;;  %v3806_v4 = vpop.permute.xlu1 %3805 }
 0x677   : > { %v3843_v13 = vmul.f32 %v3836_v55, %v9902_v21  ;;  %v3844_v60 = vmul.f32 %v3830_v2, %v9909_v24  ;;  %v3829_v25 = vsel %vm613_vm0, %v3806_v4, %v3818_v3  ;;  %v3835_v39 = vsel %vm613_vm0, %v3818_v3, %v3806_v4 }
 0x678   : > { %v3841_v7 = vmul.f32 %v3835_v39, %v9902_v21  ;;  %v3842_v61 = vmul.f32 %v3829_v25, %v9909_v24 }
 0x679   : > { %v3854_v5 = vpack.c.bf16 %v3844_v60, %v3843_v13 }
 0x67a   : > { %v3853_v1 = vpack.c.bf16 %v3842_v61, %v3841_v7 }
 0x67b   : > { %3860 = vst [vmem:[#allocation3 + $0x8] sm:$0xff] %v3854_v5  ;;  %3993 = vrot.lane.b32.xlu0 %v12255_v42, %s9554_s8  ;;  %4005 = vrot.lane.b32.xlu2 %v12252_v37, %s9554_s8 }
 0x67c   : > { %3859 = vst [vmem:[#allocation3] sm:$0xff] %v3853_v1  ;;  %4183 = vrot.lane.b32.xlu1 %v12227_v18, %s9557_s12 }
 0x67d   : > { %v3926_v44 = vpop.permute.xlu0 %3925  ;;  %v4060_v17 = vpop.permute.xlu2 %4059 }
 0x67e   : > { %v3949_v33 = vsel %vm761_vm2, %v3926_v44, %v3938_v63  ;;  %v3955_v40 = vsel %vm761_vm2, %v3938_v63, %v3926_v44  ;;  %v4058_v6 = vpop.permute.xlu1 %4057 }
 0x67f   : > { %v3961_v54 = vmul.f32 %v3955_v40, %v14753_v9  ;;  %v3962_v22 = vmul.f32 %v3949_v33, %v14752_v49  ;;  %v4081_v56 = vsel %vm921_vm4, %v4058_v6, %v4070_v27  ;;  %v4087_v50 = vsel %vm921_vm4, %v4070_v27, %v4058_v6 }
 0x680   : > { %v4093_v11 = vmul.f32 %v4081_v56, %v14787_v32  ;;  %v4094_v59 = vmul.f32 %v4087_v50, %v14788_v14 }
 0x681   : > { %v3973_v29 = vpack.c.bf16 %v3962_v22, %v3961_v54 }
 0x682   : > { %v4105_v3 = vpack.c.bf16 %v4094_v59, %v4093_v11 }
 0x683   : > { %3979 = vst [vmem:[#allocation3 + $0x60] sm:$0xff] %v3973_v29  ;;  %4125 = vrot.lane.b32.xlu0 %v12255_v42, %s9556_s16  ;;  %4137 = vrot.lane.b32.xlu2 %v12252_v37, %s9556_s16 }
 0x684   : > { %4111 = vst [vmem:[#allocation3 + $0xf0] sm:$0xff] %v4105_v3  ;;  %3825 = vrot.lane.b32.xlu1 %v12252_v37, %s9551_s9 }
 0x685   : > { %v12351_v63 = vpop.permute.xlu0 %3939  ;;  %v4180_v27 = vpop.permute.xlu2 %4179 }
 0x686   : > { %v4178_v53 = vpop.permute.xlu1 %4177 }
 0x687   : > { %v4201_v10 = vsel %vm1069_vm5, %v4178_v53, %v4190_v23  ;;  %v4207_v41 = vsel %vm1069_vm5, %v4190_v23, %v4178_v53 }
 0x688   : > { %v4213_v46 = vmul.f32 %v4201_v10, %v14789_v38  ;;  %v4214_v43 = vmul.f32 %v4207_v41, %v14790_v34 }
 0x68a   : > { %v4225_v2 = vpack.c.bf16 %v4214_v43, %v4213_v46 }
 0x68b   : > { %4245 = vrot.lane.b32.xlu0 %v12255_v42, %s9558_s15  ;;  %4257 = vrot.lane.b32.xlu2 %v12252_v37, %s9558_s15 }
 0x68c   : > { %4231 = vst [vmem:[#allocation3 + $0x150] sm:$0xff] %v4225_v2  ;;  %4185 = vrot.lane.b32.xlu1 %v12255_v42, %s9557_s12 }
 0x68d   : > { %v3868_v55 = vpop.permute.xlu0 %3867  ;;  %v3988_v4 = vpop.permute.xlu2 %3987 }
 0x68e   : > { %v3890_v23 = vsel %vm687_vm1, %v3868_v55, %v12301_v51  ;;  %v3896_v13 = vsel %vm687_vm1, %v12301_v51, %v3868_v55  ;;  %v3986_v60 = vpop.permute.xlu1 %3985 }
 0x68f   : > { %v3903_v25 = vmul.f32 %v3896_v13, %v14748_v36  ;;  %v3904_v39 = vmul.f32 %v3890_v23, %v9990_v26  ;;  %v4009_v7 = vsel %vm835_vm3, %v3986_v60, %v3998_v47  ;;  %v4015_v61 = vsel %vm835_vm3, %v3998_v47, %v3986_v60  ;;  %v8233_v13 = vld [vmem:[#allocation3 + $0xf0] sm:$0xf] }
 0x690   : > { %v4021_v5 = vmul.f32 %v4015_v61, %v14711_v62  ;;  %v4022_v1 = vmul.f32 %v4009_v7, %v14710_v8  ;;  %v9085_v7 = vld [vmem:[#allocation3 + $0xe4] sm:$0xf0] }
 0x691   : > { %v3914_v44 = vpack.c.bf16 %v3904_v39, %v3903_v25 }
 0x692   : > { %v4033_v33 = vpack.c.bf16 %v4022_v1, %v4021_v5 }
 0x693   : > { %3920 = vst [vmem:[#allocation3 + $0x38] sm:$0xff] %v3914_v44  ;;  %4007 = vrot.lane.b32.xlu0 %v12268_v57, %s9554_s8  ;;  %3813 = vrot.lane.b32.xlu2 %v12255_v42, %s9551_s9 }
 0x694   : > { %4039 = vst [vmem:[#allocation3 + $0x90] sm:$0xff] %v4033_v33  ;;  %3933 = vrot.lane.b32.xlu1 %v12255_v42, %s9553_s29 }
 0x695   : > { %v3822_v51 = vpop.permute.xlu0 %3821  ;;  %v3882_v40 = vpop.permute.xlu2 %3881 }
 0x696   : > { %v4072_v47 = vpop.permute.xlu1 %4071 }
 0x697   : > { %v4082_v6 = vsel %vm921_vm4, %v4060_v17, %v4072_v47  ;;  %v4088_v54 = vsel %vm921_vm4, %v4072_v47, %v4060_v17 }
 0x698   : > { %v4095_v22 = vmul.f32 %v4082_v6, %v14787_v32  ;;  %v4096_v56 = vmul.f32 %v4088_v54, %v14788_v14  ;;  %v8225_v6 = vld [vmem:[#allocation3 + $0xe0] sm:$0xf] }
 0x69a   : > { %v4106_v50 = vpack.c.bf16 %v4096_v56, %v4095_v22  ;;  %v8226_v56 = vor.u32 %v9085_v7, %v8225_v6 }
 0x69b   : > { %4139 = vrot.lane.b32.xlu0 %v12268_v57, %s9556_s16  ;;  %3873 = vrot.lane.b32.xlu2 %v12255_v42, %s9552_s24 }
 0x69c   : > { %4112 = vst [vmem:[#allocation3 + $0xf8] sm:$0xff] %v4106_v50  ;;  %4199 = vrot.lane.b32.xlu1 %v12268_v57, %s9557_s12 }
 0x69d   : > { %v3810_v11 = vpop.permute.xlu0 %3809  ;;  %v4194_v59 = vpop.permute.xlu2 %4193 }
 0x69e   : > { %v3831_v17 = vsel %vm613_vm0, %v3810_v11, %v3822_v51  ;;  %v3837_v29 = vsel %vm613_vm0, %v3822_v51, %v3810_v11  ;;  %v4192_v3 = vpop.permute.xlu1 %4191 }
 0x69f   : > { %v3845_v53 = vmul.f32 %v3837_v29, %v9902_v21  ;;  %v3846_v10 = vmul.f32 %v3831_v17, %v9909_v24  ;;  %v4202_v41 = vsel %vm1069_vm5, %v4180_v27, %v4192_v3  ;;  %v4208_v46 = vsel %vm1069_vm5, %v4192_v3, %v4180_v27  ;;  %v8217_v17 = vld [vmem:[#allocation3 + $0xd0] sm:$0xf] }
 0x6a0   : > { %v4215_v43 = vmul.f32 %v4202_v41, %v14789_v38  ;;  %v4216_v2 = vmul.f32 %v4208_v46, %v14790_v34 }
 0x6a1   : > { %v3855_v55 = vpack.c.bf16 %v3846_v10, %v3845_v53  ;;  %v9081_v53 = vld [vmem:[#allocation3 + $0xc4] sm:$0xf0] }
 0x6a2   : > { %v4226_v23 = vpack.c.bf16 %v4216_v2, %v4215_v43 }
 0x6a3   : > { %3861 = vst [vmem:[#allocation3 + $0x10] sm:$0xff] %v3855_v55  ;;  %4259 = vrot.lane.b32.xlu0 %v12268_v57, %s9558_s15  ;;  %3887 = vrot.lane.b32.xlu2 %v12268_v57, %s9552_s24  ;;  %v9087_v60 = vld [vmem:[#allocation3 + $0xf4] sm:$0xf0] }
 0x6a4   : > { %4232 = vst [vmem:[#allocation3 + $0x158] sm:$0xff] %v4226_v23  ;;  %3947 = vrot.lane.b32.xlu1 %v12268_v57, %s9553_s29  ;;  %v8234_v27 = vor.u32 %v9087_v60, %v8233_v13  ;;  %v8209_v13 = vld [vmem:[#allocation3 + $0xc0] sm:$0xf] }
 0x6a5   : > { %v3870_v25 = vpop.permute.xlu0 %3869  ;;  %v3930_v39 = vpop.permute.xlu2 %3929 }
 0x6a6   : > { %v3891_v61 = vsel %vm687_vm1, %v3870_v25, %v3882_v40  ;;  %v3897_v5 = vsel %vm687_vm1, %v3882_v40, %v3870_v25  ;;  %4760 = vmatpush.bf16.msra.mxu2 %v8234_v27  ;;  %v4000_v1 = vpop.permute.xlu1 %3999  ;;  %v9083_v40 = vld [vmem:[#allocation3 + $0xd4] sm:$0xf0] }
 0x6a7   : > { %v3905_v44 = vmul.f32 %v3897_v5, %v14748_v36  ;;  %v3906_v33 = vmul.f32 %v3891_v61, %v9990_v26  ;;  %v4010_v51 = vsel %vm835_vm3, %v3988_v4, %v4000_v1  ;;  %v4016_v47 = vsel %vm835_vm3, %v4000_v1, %v3988_v4 }
 0x6a8   : > { %v4023_v54 = vmul.f32 %v4016_v47, %v14711_v62  ;;  %v4024_v22 = vmul.f32 %v4010_v51, %v14710_v8  ;;  %v8218_v4 = vor.u32 %v9083_v40, %v8217_v17 }
 0x6a9   : > { %v3915_v50 = vpack.c.bf16 %v3906_v33, %v3905_v44 }
 0x6aa   : > { %v4034_v11 = vpack.c.bf16 %v4024_v22, %v4023_v54  ;;  %4761 = vmatpush.bf16.msra.mxu2 %v8226_v56 }
 0x6ab   : > { %3921 = vst [vmem:[#allocation3 + $0x40] sm:$0xff] %v3915_v50  ;;  %3815 = vrot.lane.b32.xlu0 %v12271_v58, %s9551_s9  ;;  %3827 = vrot.lane.b32.xlu2 %v12268_v57, %s9551_s9 }
 0x6ac   : > { %4040 = vst [vmem:[#allocation3 + $0x98] sm:$0xff] %v4034_v11  ;;  %3995 = vrot.lane.b32.xlu1 %v12271_v58, %s9554_s8 }
 0x6ad   : > { %v4182_v29 = vpop.permute.xlu0 %4181  ;;  %v3990_v3 = vpop.permute.xlu2 %3989 }
 0x6ae   : > { %v4203_v10 = vsel %vm1069_vm5, %v4182_v29, %v4194_v59  ;;  %v4209_v41 = vsel %vm1069_vm5, %v4194_v59, %v4182_v29  ;;  %4762 = vmatpush.bf16.msra.mxu2 %v8218_v4  ;;  %v3928_v46 = vpop.permute.xlu1 %3927  ;;  %v8210_v59 = vor.u32 %v9081_v53, %v8209_v13 }
 0x6af   : > { %v4217_v43 = vmul.f32 %v4203_v10, %v14789_v38  ;;  %v4218_v2 = vmul.f32 %v4209_v41, %v14790_v34  ;;  %v3950_v55 = vsel %vm761_vm2, %v3928_v46, %v12351_v63  ;;  %v3956_v23 = vsel %vm761_vm2, %v12351_v63, %v3928_v46 }
 0x6b0   : > { %v3963_v60 = vmul.f32 %v3956_v23, %v14753_v9  ;;  %v3964_v27 = vmul.f32 %v3950_v55, %v14752_v49  ;;  %v14792_v23 = vld [vmem:[#allocation48_spill] sm:$0xff] }
 0x6b1   : > { %v4227_v25 = vpack.c.bf16 %v4218_v2, %v4217_v43  ;;  %v14791_v2 = vld [vmem:[#allocation47_spill] sm:$0xff] }
 0x6b2   : > { %v3974_v7 = vpack.c.bf16 %v3964_v27, %v3963_v60  ;;  %4763 = vmatpush.bf16.msra.mxu2 %v8210_v59 }
 0x6b3   : > { %4233 = vst [vmem:[#allocation3 + $0x160] sm:$0xff] %v4227_v25  ;;  %3875 = vrot.lane.b32.xlu0 %v12271_v58, %s9552_s24  ;;  %4187 = vrot.lane.b32.xlu2 %v12271_v58, %s9557_s12 }
 0x6b4   : > { %3980 = vst [vmem:[#allocation3 + $0x68] sm:$0xff] %v3974_v7  ;;  %4127 = vrot.lane.b32.xlu1 %v12271_v58, %s9556_s16 }
 0x6b5   : > { %v12453_v63 = vpop.permute.xlu0 %3883  ;;  %v4122_v61 = vpop.permute.xlu2 %4121 }
 0x6b6   : > { %v3942_v5 = vpop.permute.xlu1 %3941 }
 0x6b7   : > { %v3951_v1 = vsel %vm761_vm2, %v3930_v39, %v3942_v5  ;;  %v3957_v44 = vsel %vm761_vm2, %v3942_v5, %v3930_v39 }
 0x6b8   : > { %v3965_v33 = vmul.f32 %v3957_v44, %v14753_v9  ;;  %v3966_v51 = vmul.f32 %v3951_v1, %v14752_v49 }
 0x6ba   : > { %v3975_v47 = vpack.c.bf16 %v3966_v51, %v3965_v33 }
 0x6bb   : > { %4119 = vrot.lane.b32.xlu0 %v12171_v28, %s9556_s16  ;;  %3935 = vrot.lane.b32.xlu2 %v12271_v58, %s9553_s29  ;;  %v9069_v44 = vld [vmem:[#allocation3 + $0x64] sm:$0xf0] }
 0x6bc   : > { %3981 = vst [vmem:[#allocation3 + $0x70] sm:$0xff] %v3975_v47  ;;  %4247 = vrot.lane.b32.xlu1 %v12271_v58, %s9558_s15  ;;  %v8161_v47 = vld [vmem:[#allocation3 + $0x60] sm:$0xf] }
 0x6bd   : > { %v12467_v6 = vpop.permute.xlu0 %4195  ;;  %v3944_v54 = vpop.permute.xlu2 %3943 }
 0x6be   : > { %v4002_v22 = vpop.permute.xlu1 %4001 }
 0x6bf   : > { %v4011_v39 = vsel %vm835_vm3, %v3990_v3, %v4002_v22  ;;  %v4017_v56 = vsel %vm835_vm3, %v4002_v22, %v3990_v3 }
 0x6c0   : > { %v4025_v50 = vmul.f32 %v4017_v56, %v14711_v62  ;;  %v4026_v40 = vmul.f32 %v4011_v39, %v14710_v8 }
 0x6c2   : > { %v4035_v11 = vpack.c.bf16 %v4026_v40, %v4025_v50 }
 0x6c3   : > { %4241 = vrot.lane.b32.xlu0 %v12211_v52, %s9558_s15  ;;  %4131 = vrot.lane.b32.xlu2 %v12168_v31, %s9556_s16 }
 0x6c4   : > { %4041 = vst [vmem:[#allocation3 + $0xa0] sm:$0xff] %v4035_v11  ;;  %4129 = vrot.lane.b32.xlu1 %v12143_v15, %s9556_s16 }
 0x6c5   : > { %v3932_v17 = vpop.permute.xlu0 %3931  ;;  %v4004_v4 = vpop.permute.xlu2 %4003 }
 0x6c6   : > { %v3952_v29 = vsel %vm761_vm2, %v3932_v17, %v3944_v54  ;;  %v3958_v3 = vsel %vm761_vm2, %v3944_v54, %v3932_v17  ;;  %v4134_v53 = vpop.permute.xlu1 %4133 }
 0x6c7   : > { %v3967_v10 = vmul.f32 %v3958_v3, %v14753_v9  ;;  %v3968_v41 = vmul.f32 %v3952_v29, %v14752_v49  ;;  %v4143_v46 = vsel %vm995_vm6, %v4122_v61, %v4134_v53  ;;  %v4149_v43 = vsel %vm995_vm6, %v4134_v53, %v4122_v61  ;;  %v8169_v61 = vld [vmem:[#allocation3 + $0x70] sm:$0xf] }
 0x6c8   : > { %v4157_v55 = vmul.f32 %v4143_v46, %v14791_v2  ;;  %v4158_v13 = vmul.f32 %v4149_v43, %v14792_v23 }
 0x6c9   : > { %v3976_v60 = vpack.c.bf16 %v3968_v41, %v3967_v10 }
 0x6ca   : > { %v4167_v27 = vpack.c.bf16 %v4158_v13, %v4157_v55 }
 0x6cb   : > { %3982 = vst [vmem:[#allocation3 + $0x78] sm:$0xff] %v3976_v60  ;;  %4255 = vrot.lane.b32.xlu0 %v12224_v16, %s9558_s15  ;;  %4253 = vrot.lane.b32.xlu2 %v12201_v35, %s9558_s15 }
 0x6cc   : > { %4173 = vst [vmem:[#allocation3 + $0x130] sm:$0xff] %v4167_v27  ;;  %4243 = vrot.lane.b32.xlu1 %v12227_v18, %s9558_s15 }
 0x6cd   : > { %v12499_v59 = vpop.permute.xlu0 %4197  ;;  %v4136_v25 = vpop.permute.xlu2 %4135 }
 0x6ce   : > { %v3824_v7 = vpop.permute.xlu1 %3823 }
 0x6d2   : > { %v9071_v5 = vld [vmem:[#allocation3 + $0x74] sm:$0xf0] }
 0x6d3   : > { %4077 = vrot.lane.b32.xlu0 %v12252_v37, %s9555_s28  ;;  %4067 = vrot.lane.b32.xlu2 %v12271_v58, %s9555_s28  ;;  %v8170_v1 = vor.u32 %v9071_v5, %v8169_v61  ;;  %v8162_v37 = vor.u32 %v9069_v44, %v8161_v47 }
 0x6d4   : > { %4065 = vrot.lane.b32.xlu1 %v12255_v42, %s9555_s28 }
 0x6d5   : > { %v3992_v33 = vpop.permute.xlu0 %3991  ;;  %v4006_v51 = vpop.permute.xlu2 %4005  ;;  %4736 = vmatpush.bf16.msrb.mxu3 %v8170_v1 }
 0x6d6   : > { %v4012_v54 = vsel %vm835_vm3, %v3992_v33, %v4004_v4  ;;  %v4018_v22 = vsel %vm835_vm3, %v4004_v4, %v3992_v33  ;;  %v3812_v39 = vpop.permute.xlu1 %3811  ;;  %v4366_v33 = vld [vmem:[%s14474_s10 + $0x18] sm:$0xff] }
 0x6d7   : > { %v4027_v56 = vmul.f32 %v4018_v22, %v14711_v62  ;;  %v4028_v58 = vmul.f32 %v4012_v54, %v14710_v8  ;;  %v3832_v50 = vsel %vm613_vm0, %v3812_v39, %v3824_v7  ;;  %v3838_v42 = vsel %vm613_vm0, %v3824_v7, %v3812_v39  ;;  %v4363_v54 = vld [vmem:[%s14474_s10] sm:$0xff] }
 0x6d8   : > { %v3847_v40 = vmul.f32 %v3838_v42, %v9902_v21  ;;  %v3848_v11 = vmul.f32 %v3832_v50, %v9909_v24 }
 0x6d9   : > { %v4036_v17 = vpack.c.bf16 %v4028_v58, %v4027_v56  ;;  %4737 = vmatpush.bf16.msrb.mxu3 %v8162_v37 }
 0x6da   : > { %v3856_v29 = vpack.c.bf16 %v3848_v11, %v3847_v40 }
 0x6db   : > { %4042 = vst [vmem:[#allocation3 + $0xa8] sm:$0xff] %v4036_v17  ;;  %4239 = vrot.lane.b32.xlu0 %v12171_v28, %s9558_s15  ;;  %4237 = vrot.lane.b32.xlu2 %v12155_v48, %s9558_s15 }
 0x6dc   : > { %3862 = vst [vmem:[#allocation3 + $0x18] sm:$0xff] %v3856_v29  ;;  %4079 = vrot.lane.b32.xlu1 %v12268_v57, %s9555_s28 }
 0x6dd   : > { %v4124_v4 = vpop.permute.xlu0 %4123  ;;  %v4138_v3 = vpop.permute.xlu2 %4137 }
 0x6de   : > { %v4144_v53 = vsel %vm995_vm6, %v4124_v4, %v4136_v25  ;;  %v4150_v10 = vsel %vm995_vm6, %v4136_v25, %v4124_v4  ;;  %v3886_v41 = vpop.permute.xlu1 %3885 }
 0x6df   : > { %v4159_v46 = vmul.f32 %v4144_v53, %v14791_v2  ;;  %v4160_v28 = vmul.f32 %v4150_v10, %v14792_v23  ;;  %v4368_v53 = vld [vmem:[%s14474_s10 + $0x28] sm:$0xff]  ;;  %v4367_v10 = vld [vmem:[%s14474_s10 + $0x20] sm:$0xff] }
 0x6e1   : > { %v4168_v43 = vpack.c.bf16 %v4160_v28, %v4159_v46 }
 0x6e3   : > { %4174 = vst [vmem:[#allocation3 + $0x138] sm:$0xff] %v4168_v43  ;;  %4061 = vrot.lane.b32.xlu0 %v12211_v52, %s9555_s28  ;;  %4251 = vrot.lane.b32.xlu2 %v12168_v31, %s9558_s15 }
 0x6e4   : > { %4249 = vrot.lane.b32.xlu1 %v12143_v15, %s9558_s15 }
 0x6e5   : > { %v12537_v48 = vpop.permute.xlu0 %3945  ;;  %v12539_v57 = vpop.permute.xlu2 %4257 }
 0x6e6   : > { %v3872_v55 = vpop.permute.xlu1 %3871 }
 0x6e7   : > { %v3892_v13 = vsel %vm687_vm1, %v3872_v55, %v12453_v63  ;;  %v3898_v60 = vsel %vm687_vm1, %v12453_v63, %v3872_v55  ;;  %v4364_v55 = vld [vmem:[%s14474_s10 + $0x8] sm:$0xff] }
 0x6e8   : > { %v3907_v52 = vmul.f32 %v3898_v60, %v14748_v36  ;;  %v3908_v31 = vmul.f32 %v3892_v13, %v9990_v26 }
 0x6ea   : > { %v3916_v27 = vpack.c.bf16 %v3908_v31, %v3907_v52 }
 0x6eb   : > { %4075 = vrot.lane.b32.xlu0 %v12224_v16, %s9555_s28  ;;  %4073 = vrot.lane.b32.xlu2 %v12201_v35, %s9555_s28 }
 0x6ec   : > { %3922 = vst [vmem:[#allocation3 + $0x48] sm:$0xff] %v3916_v27  ;;  %4063 = vrot.lane.b32.xlu1 %v12227_v18, %s9555_s28 }
 0x6ed   : > { %v3994_v15 = vpop.permute.xlu0 %3993  ;;  %v3814_v25 = vpop.permute.xlu2 %3813 }
 0x6ee   : > { %v4013_v63 = vsel %vm835_vm3, %v3994_v15, %v4006_v51  ;;  %v4019_v7 = vsel %vm835_vm3, %v4006_v51, %v3994_v15  ;;  %v4184_v61 = vpop.permute.xlu1 %4183  ;;  %v4365_v51 = vld [vmem:[%s14474_s10 + $0x10] sm:$0xff] }
 0x6ef   : > { %v4029_v5 = vmul.f32 %v4019_v7, %v14711_v62  ;;  %v4030_v16 = vmul.f32 %v4013_v63, %v14710_v8  ;;  %v4204_v35 = vsel %vm1069_vm5, %v4184_v61, %v12467_v6  ;;  %v4210_v18 = vsel %vm1069_vm5, %v12467_v6, %v4184_v61 }
 0x6f0   : > { %v4219_v1 = vmul.f32 %v4204_v35, %v14789_v38  ;;  %v4220_v44 = vmul.f32 %v4210_v18, %v14790_v34 }
 0x6f1   : > { %v4037_v47 = vpack.c.bf16 %v4030_v16, %v4029_v5 }
 0x6f2   : > { %v4228_v22 = vpack.c.bf16 %v4220_v44, %v4219_v1 }
 0x6f3   : > { %4043 = vst [vmem:[#allocation3 + $0xb0] sm:$0xff] %v4037_v47  ;;  %4386 = vperm.xlu0 %9339, %v4366_v33   ;;  %4381 = vperm.xlu2 %9341, %v4365_v51  }
 0x6f4   : > { %4234 = vst [vmem:[#allocation3 + $0x168] sm:$0xff] %v4228_v22  ;;  %4371 = vperm.xlu1 %9340, %v4363_v54  }
 0x6f5   : > { %v4126_v6 = vpop.permute.xlu0 %4125  ;;  %v3874_v39 = vpop.permute.xlu2 %3873 }
 0x6f6   : > { %v4145_v37 = vsel %vm995_vm6, %v4126_v6, %v4138_v3  ;;  %v4151_v56 = vsel %vm995_vm6, %v4138_v3, %v4126_v6  ;;  %v3893_v58 = vsel %vm687_vm1, %v3874_v39, %v3886_v41  ;;  %v3899_v50 = vsel %vm687_vm1, %v3886_v41, %v3874_v39  ;;  %v3826_v42 = vpop.permute.xlu1 %3825 }
 0x6f7   : > { %v4161_v40 = vmul.f32 %v4145_v37, %v14791_v2  ;;  %v4162_v11 = vmul.f32 %v4151_v56, %v14792_v23  ;;  %v3909_v17 = vmul.f32 %v3899_v50, %v14748_v36  ;;  %v3910_v29 = vmul.f32 %v3893_v58, %v9990_v26 }
 0x6f8   : > { %v3833_v4 = vsel %vm613_vm0, %v3814_v25, %v3826_v42  ;;  %v3839_v3 = vsel %vm613_vm0, %v3826_v42, %v3814_v25 }
 0x6f9   : > { %v4169_v41 = vpack.c.bf16 %v4162_v11, %v4161_v40  ;;  %v3917_v46 = vpack.c.bf16 %v3910_v29, %v3909_v17  ;;  %v3849_v28 = vmul.f32 %v3839_v3, %v9902_v21  ;;  %v3850_v43 = vmul.f32 %v3833_v4, %v9909_v24 }
 0x6fb   : > { %4175 = vst [vmem:[#allocation3 + $0x140] sm:$0xff] %v4169_v41  ;;  %v3857_v13 = vpack.c.bf16 %v3850_v43, %v3849_v28  ;;  %4396 = vperm.xlu0 %9339, %v4368_v53   ;;  %4391 = vperm.xlu2 %9341, %v4367_v10   ;;  %v9101_v43 = vld [vmem:[#allocation3 + $0x164] sm:$0xf0] }
 0x6fc   : > { %3923 = vst [vmem:[#allocation3 + $0x50] sm:$0xff] %v3917_v46  ;;  %4376 = vperm.xlu1 %9340, %v4364_v55  }
 0x6fd   : > { %3863 = vst [vmem:[#allocation3 + $0x20] sm:$0xff] %v3857_v13  ;;  %v4246_v60 = vpop.permute.xlu0 %4245  ;;  %v12605_v52 = vpop.permute.xlu2 %3887 }
 0x6fe   : > { %v4265_v31 = vsel %vm1143_vm7, %v4246_v60, %v12539_v57  ;;  %v4271_v27 = vsel %vm1143_vm7, %v12539_v57, %v4246_v60  ;;  %v4186_v15 = vpop.permute.xlu1 %4185 }
 0x6ff   : > { %v4281_v25 = vmul.f32 %v4265_v31, %v14759_v45  ;;  %v4282_v63 = vmul.f32 %v4271_v27, %v14762_v0  ;;  %v4205_v7 = vsel %vm1069_vm5, %v4186_v15, %v12499_v59  ;;  %v4211_v61 = vsel %vm1069_vm5, %v12499_v59, %v4186_v15 }
 0x700   : > { %v4221_v5 = vmul.f32 %v4205_v7, %v14789_v38  ;;  %v4222_v16 = vmul.f32 %v4211_v61, %v14790_v34 }
 0x701   : > { %v4289_v35 = vpack.c.bf16 %v4282_v63, %v4281_v25  ;;  %v8289_v63 = vld [vmem:[#allocation3 + $0x160] sm:$0xf] }
 0x702   : > { %v4229_v18 = vpack.c.bf16 %v4222_v16, %v4221_v5  ;;  %v8290_v5 = vor.u32 %v9101_v43, %v8289_v63  ;;  %v8193_v43 = vld [vmem:[#allocation3 + $0xa0] sm:$0xf] }
 0x703   : > { %4295 = vst [vmem:[#allocation3 + $0x1a0] sm:$0xff] %v4289_v35  ;;  %v9099_v35 = vld [vmem:[#allocation3 + $0x154] sm:$0xf0]  ;;  %v8153_v63 = vld [vmem:[#allocation3 + $0x50] sm:$0xf] }
 0x704   : > { %4235 = vst [vmem:[#allocation3 + $0x170] sm:$0xff] %v4229_v18 }
 0x705   : > { %v4008_v57 = vpop.permute.xlu0 %4007  ;;  %v3828_v1 = vpop.permute.xlu2 %3827 }
 0x706   : > { %v3934_v44 = vpop.permute.xlu1 %3933 }
 0x707   : > { %v3953_v33 = vsel %vm761_vm2, %v3934_v44, %v12537_v48  ;;  %v3959_v51 = vsel %vm761_vm2, %v12537_v48, %v3934_v44  ;;  %v8281_v44 = vld [vmem:[#allocation3 + $0x150] sm:$0xf] }
 0x708   : > { %v3969_v59 = vmul.f32 %v3959_v51, %v14753_v9  ;;  %v3970_v47 = vmul.f32 %v3953_v33, %v14752_v49  ;;  %v8282_v33 = vor.u32 %v9099_v35, %v8281_v44  ;;  %v8145_v44 = vld [vmem:[#allocation3 + $0x40] sm:$0xf] }
 0x70a   : > { %v3977_v54 = vpack.c.bf16 %v3970_v47, %v3969_v59 }
 0x70b   : > { %v8297_v10 = vld [vmem:[#allocation3 + $0x170] sm:$0xf] }
 0x70c   : > { %3983 = vst [vmem:[#allocation3 + $0x80] sm:$0xff] %v3977_v54 }
 0x70d   : > { %v4140_v22 = vpop.permute.xlu0 %4139  ;;  %v4188_v6 = vpop.permute.xlu2 %4187 }
 0x70e   : > { %v4200_v39 = vpop.permute.xlu1 %4199 }
 0x70f   : > { %v4206_v37 = vsel %vm1069_vm5, %v4188_v6, %v4200_v39  ;;  %v4212_v56 = vsel %vm1069_vm5, %v4200_v39, %v4188_v6 }
 0x710   : > { %v4223_v58 = vmul.f32 %v4206_v37, %v14789_v38  ;;  %v4224_v50 = vmul.f32 %v4212_v56, %v14790_v34 }
 0x712   : > { %v4230_v48 = vpack.c.bf16 %v4224_v50, %v4223_v58 }
 0x714   : > { %4236 = vst [vmem:[#allocation3 + $0x178] sm:$0xff] %v4230_v48 }
 0x715   : > { %v12637_v42 = vpop.permute.xlu0 %4259  ;;  %v3936_v40 = vpop.permute.xlu2 %3935 }
 0x716   : > { %v3948_v11 = vpop.permute.xlu1 %3947 }
 0x717   : > { %v3954_v17 = vsel %vm761_vm2, %v3936_v40, %v3948_v11  ;;  %v3960_v29 = vsel %vm761_vm2, %v3948_v11, %v3936_v40 }
 0x718   : > { %v3971_v4 = vmul.f32 %v3960_v29, %v14753_v9  ;;  %v3972_v3 = vmul.f32 %v3954_v17, %v14752_v49 }
 0x71a   : > { %v3978_v53 = vpack.c.bf16 %v3972_v3, %v3971_v4  ;;  %v9077_v4 = vld [vmem:[#allocation3 + $0xa4] sm:$0xf0] }
 0x71b   : > { %v9103_v41 = vld [vmem:[#allocation3 + $0x174] sm:$0xf0] }
 0x71c   : > { %3984 = vst [vmem:[#allocation3 + $0x88] sm:$0xff] %v3978_v53  ;;  %v8298_v46 = vor.u32 %v9103_v41, %v8297_v10 }
 0x71d   : > { %v3816_v28 = vpop.permute.xlu0 %3815 }
 0x71e   : > { %v3834_v55 = vsel %vm613_vm0, %v3816_v28, %v3828_v1  ;;  %v3840_v13 = vsel %vm613_vm0, %v3828_v1, %v3816_v28  ;;  %4784 = vmatpush.bf16.msra.mxu1 %v8298_v46  ;;  %v3996_v60 = vpop.permute.xlu1 %3995  ;;  %v4132_v1 = vpop.permute.xlu2 %4131 }
 0x71f   : > { %v3851_v31 = vmul.f32 %v3840_v13, %v9902_v21  ;;  %v3852_v27 = vmul.f32 %v3834_v55, %v9909_v24  ;;  %v4014_v15 = vsel %vm835_vm3, %v3996_v60, %v4008_v57  ;;  %v4020_v25 = vsel %vm835_vm3, %v4008_v57, %v3996_v60 }
 0x720   : > { %v4031_v7 = vmul.f32 %v4020_v25, %v14711_v62  ;;  %v4032_v61 = vmul.f32 %v4014_v15, %v14710_v8  ;;  %v8194_v60 = vor.u32 %v9077_v4, %v8193_v43  ;;  %v9075_v15 = vld [vmem:[#allocation3 + $0x94] sm:$0xf0]  ;;  %v8137_v43 = vld [vmem:[#allocation3 + $0x30] sm:$0xf] }
 0x721   : > { %v3858_v16 = vpack.c.bf16 %v3852_v27, %v3851_v31  ;;  %v8185_v27 = vld [vmem:[#allocation3 + $0x90] sm:$0xf] }
 0x722   : > { %v4038_v18 = vpack.c.bf16 %v4032_v61, %v4031_v7  ;;  %4785 = vmatpush.bf16.msra.mxu1 %v8290_v5  ;;  %v9065_v61 = vld [vmem:[#allocation3 + $0x44] sm:$0xf0] }
 0x723   : > { %3864 = vst [vmem:[#allocation3 + $0x28] sm:$0xff] %v3858_v16  ;;  %v8273_v16 = vld [vmem:[#allocation3 + $0x140] sm:$0xf] }
 0x724   : > { %4044 = vst [vmem:[#allocation3 + $0xb8] sm:$0xff] %v4038_v18  ;;  %v8186_v18 = vor.u32 %v9075_v15, %v8185_v27  ;;  %v9100_v27 = vld [vmem:[#allocation3 + $0x164] sm:$0xf] }
 0x725   : > { %v3876_v51 = vpop.permute.xlu0 %3875 }
 0x726   : > { %v3894_v57 = vsel %vm687_vm1, %v3876_v51, %v12605_v52  ;;  %v3900_v59 = vsel %vm687_vm1, %v12605_v52, %v3876_v51  ;;  %4786 = vmatpush.bf16.msra.mxu1 %v8282_v33  ;;  %v4128_v47 = vpop.permute.xlu1 %4127  ;;  %v8201_v52 = vld [vmem:[#allocation3 + $0xb0] sm:$0xf]  ;;  %v4254_v17 = vpop.permute.xlu2 %4253  ;;  %v9073_v33 = vld [vmem:[#allocation3 + $0x84] sm:$0xf0]  ;;  %v9095_v51 = vld [vmem:[#allocation3 + $0x134] sm:$0xf0] }
 0x727   : > { %v3911_v54 = vmul.f32 %v3900_v59, %v14748_v36  ;;  %v3912_v6 = vmul.f32 %v3894_v57, %v9990_v26  ;;  %v4146_v39 = vsel %vm995_vm6, %v4128_v47, %v4140_v22  ;;  %v4152_v37 = vsel %vm995_vm6, %v4140_v22, %v4128_v47 }
 0x728   : > { %v4163_v56 = vmul.f32 %v4146_v39, %v14791_v2  ;;  %v4164_v58 = vmul.f32 %v4152_v37, %v14792_v23  ;;  %v9044_v39 = vld [vmem:[%s14471_s7 + $0x4] sm:$0xf]  ;;  %v8067_v37 = vld [vmem:[%s14471_s7 + $0x10] sm:$0xf0] }
 0x729   : > { %v3918_v50 = vpack.c.bf16 %v3912_v6, %v3911_v54  ;;  %v8146_v54 = vor.u32 %v9065_v61, %v8145_v44  ;;  %v8299_v6 = vld [vmem:[#allocation3 + $0x178] sm:$0xf0]  ;;  %v8129_v61 = vld [vmem:[#allocation3 + $0x20] sm:$0xf]  ;;  %v9098_v44 = vld [vmem:[#allocation3 + $0x154] sm:$0xf] }
 0x72a   : > { %v4170_v48 = vpack.c.bf16 %v4164_v58, %v4163_v56  ;;  %v9061_v15 = vld [vmem:[#allocation3 + $0x24] sm:$0xf0] }
 0x72b   : > { %3924 = vst [vmem:[#allocation3 + $0x58] sm:$0xff] %v3918_v50  ;;  %v9079_v40 = vld [vmem:[#allocation3 + $0xb4] sm:$0xf0] }
 0x72c   : > { %4176 = vst [vmem:[#allocation3 + $0x148] sm:$0xff] %v4170_v48  ;;  %v8202_v11 = vor.u32 %v9079_v40, %v8201_v52  ;;  %v8177_v40 = vld [vmem:[#allocation3 + $0x80] sm:$0xf] }
 0x72d   : > { %v4120_v29 = vpop.permute.xlu0 %4119  ;;  %v8178_v4 = vor.u32 %v9073_v33, %v8177_v40  ;;  %v9059_v33 = vld [vmem:[#allocation3 + $0x14] sm:$0xf0] }
 0x72e   : > { %v4142_v3 = vsel %vm995_vm6, %v4120_v29, %v4132_v1  ;;  %v4148_v22 = vsel %vm995_vm6, %v4132_v1, %v4120_v29  ;;  %v4248_v53 = vpop.permute.xlu1 %4247  ;;  %4764 = vmatpush.bf16.msra.mxu2 %v8202_v11  ;;  %v12695_v56 = vpop.permute.xlu2 %4067  ;;  %v8265_v11 = vld [vmem:[#allocation3 + $0x130] sm:$0xf] }
 0x72f   : > { %v4155_v10 = vmul.f32 %v4142_v3, %v14791_v2  ;;  %v4156_v41 = vmul.f32 %v4148_v22, %v14792_v23  ;;  %v4266_v46 = vsel %vm1143_vm7, %v4248_v53, %v12637_v42  ;;  %v4272_v28 = vsel %vm1143_vm7, %v12637_v42, %v4248_v53  ;;  %v9102_v22 = vld [vmem:[#allocation3 + $0x174] sm:$0xf]  ;;  %v9063_v53 = vld [vmem:[#allocation3 + $0x34] sm:$0xf0] }
 0x730   : > { %v4283_v55 = vmul.f32 %v4266_v46, %v14759_v45  ;;  %v4284_v13 = vmul.f32 %v4272_v28, %v14762_v0  ;;  %v8266_v3 = vor.u32 %v9095_v51, %v8265_v11  ;;  %v12707_v46 = vor.u32 %v9044_v39, %v8067_v37 }
 0x731   : > { %v4166_v31 = vpack.c.bf16 %v4156_v41, %v4155_v10  ;;  %v8302_v41 = vor.u32 %v9102_v22, %v8299_v6  ;;  %v8267_v22 = vld [vmem:[#allocation3 + $0x138] sm:$0xf0] }
 0x732   : > { %v4290_v25 = vpack.c.bf16 %v4284_v13, %v4283_v55  ;;  %4765 = vmatpush.bf16.msra.mxu2 %v8194_v60  ;;  %v9067_v7 = vld [vmem:[#allocation3 + $0x54] sm:$0xf0]  ;;  %v8138_v55 = vor.u32 %v9063_v53, %v8137_v43  ;;  %v8321_v13 = vld [vmem:[#allocation3 + $0x1a0] sm:$0xf]  ;;  %v9048_v53 = vld [vmem:[%s14471_s7 + $0x24] sm:$0xf] }
 0x733   : > { %4172 = vst [vmem:[#allocation3 + $0x128] sm:$0xff] %v4166_v31  ;;  %v8154_v5 = vor.u32 %v9067_v7, %v8153_v63  ;;  %v9097_v35 = vld [vmem:[#allocation3 + $0x144] sm:$0xf0] }
 0x734   : > { %4296 = vst [vmem:[#allocation3 + $0x1a8] sm:$0xff] %v4290_v25  ;;  %v8274_v42 = vor.u32 %v9097_v35, %v8273_v16 }
 0x735   : > { %v4242_v1 = vpop.permute.xlu0 %4241  ;;  %4738 = vmatpush.bf16.msrb.mxu3 %v8154_v5  ;;  %v8283_v5 = vld [vmem:[#allocation3 + $0x158] sm:$0xf0] }
 0x736   : > { %v4263_v57 = vsel %vm1143_vm7, %v4242_v1, %v4254_v17  ;;  %v4269_v59 = vsel %vm1143_vm7, %v4254_v17, %v4242_v1  ;;  %4787 = vmatpush.bf16.msra.mxu1 %v8274_v42  ;;  %v4130_v47 = vpop.permute.xlu1 %4129  ;;  %4766 = vmatpush.bf16.msra.mxu2 %v8186_v18  ;;  %v8130_v42 = vor.u32 %v9061_v15, %v8129_v61  ;;  %v12716_v51 = vpop.permute.xlu2 %4237 }
 0x737   : > { %v4277_v58 = vmul.f32 %v4263_v57, %v14759_v45  ;;  %v4278_v50 = vmul.f32 %v4269_v59, %v14762_v0  ;;  %v4141_v48 = vsel %vm995_vm6, %v12287_v20, %v4130_v47  ;;  %v4147_v52 = vsel %vm995_vm6, %v4130_v47, %v12287_v20  ;;  %v8291_v20 = vld [vmem:[#allocation3 + $0x168] sm:$0xf0]  ;;  %v8121_v47 = vld [vmem:[#allocation3 + $0x10] sm:$0xf] }
 0x738   : > { %v4153_v17 = vmul.f32 %v4141_v48, %v14791_v2  ;;  %v4154_v29 = vmul.f32 %v4147_v52, %v14792_v23  ;;  %v8294_v63 = vor.u32 %v9100_v27, %v8291_v20  ;;  %v8286_v57 = vor.u32 %v9098_v44, %v8283_v5  ;;  %v9096_v48 = vld [vmem:[#allocation3 + $0x144] sm:$0xf]  ;;  %v8113_v52 = vld [vmem:[#allocation3] sm:$0xf]  ;;  %v9070_v20 = vld [vmem:[#allocation3 + $0x74] sm:$0xf] }
 0x739   : > { %v4287_v10 = vpack.c.bf16 %v4278_v50, %v4277_v58  ;;  %4739 = vmatpush.bf16.msrb.mxu3 %v8146_v54  ;;  %v8275_v54 = vld [vmem:[#allocation3 + $0x148] sm:$0xf0]  ;;  %v8122_v6 = vor.u32 %v9059_v33, %v8121_v47  ;;  %v9057_v58 = vld [vmem:[#allocation3 + $0x4] sm:$0xf0] }
 0x73a   : > { %v4165_v28 = vpack.c.bf16 %v4154_v29, %v4153_v17  ;;  %4767 = vmatpush.bf16.msra.mxu2 %v8178_v4  ;;  %4788 = vmatpush.bf16.msra.mxu1 %v8266_v3  ;;  %v9093_v37 = vld [vmem:[#allocation3 + $0x124] sm:$0xf0]  ;;  %v8278_v11 = vor.u32 %v9096_v48, %v8275_v54  ;;  %v8171_v17 = vld [vmem:[#allocation3 + $0x78] sm:$0xf0]  ;;  %v8065_v29 = vld [vmem:[%s14471_s7] sm:$0xf]  ;;  %v8114_v43 = vor.u32 %v9057_v58, %v8113_v52 }
 0x73b   : > { %4293 = vst [vmem:[#allocation3 + $0x190] sm:$0xff] %v4287_v10  ;;  %v9109_v60 = vld [vmem:[#allocation3 + $0x1a4] sm:$0xf0]  ;;  %v9046_v4 = vld [vmem:[%s14471_s7 + $0xc] sm:$0xf0] }
 0x73c   : > { %4171 = vst [vmem:[#allocation3 + $0x120] sm:$0xff] %v4165_v28  ;;  %v8322_v31 = vor.u32 %v9109_v60, %v8321_v13  ;;  %v8083_v10 = vld [vmem:[%s14471_s7 + $0x30] sm:$0xf0]  ;;  %v8174_v60 = vor.u32 %v9070_v20, %v8171_v17  ;;  %v12736_v27 = vor.u32 %v9046_v4, %v8065_v29  ;;  %v8259_v44 = vld [vmem:[#allocation3 + $0x128] sm:$0xf0] }
 0x73d   : > { %v4256_v25 = vpop.permute.xlu0 %4255  ;;  %4740 = vmatpush.bf16.msrb.mxu3 %v8138_v55  ;;  %4768 = vmatmul.bf16.vlgmr.msra.gmra.mxu2 %v12707_v46  ;;  %v9066_v48 = vld [vmem:[#allocation3 + $0x54] sm:$0xf]  ;;  %v8147_v29 = vld [vmem:[#allocation3 + $0x48] sm:$0xf0] }
 0x73e   : > { %4880 = vmatpush.bf16.msrb.mxu2 %v8302_v41  ;;  %4813 = vmatpush.bf16.msrb.mxu0 %v8322_v31  ;;  %v4244_v7 = vpop.permute.xlu1 %4243  ;;  %v9094_v31 = vld [vmem:[#allocation3 + $0x134] sm:$0xf]  ;;  %v4252_v5 = vpop.permute.xlu2 %4251 }
 0x73f   : > { %v4264_v16 = vsel %vm1143_vm7, %v4244_v7, %v4256_v25  ;;  %v4270_v35 = vsel %vm1143_vm7, %v4256_v25, %v4244_v7  ;;  %v8270_v15 = vor.u32 %v9094_v31, %v8267_v22  ;;  %v8163_v25 = vld [vmem:[#allocation3 + $0x68] sm:$0xf0] }
 0x740   : > { %v4279_v18 = vmul.f32 %v4264_v16, %v14759_v45  ;;  %v4280_v1 = vmul.f32 %v4270_v35, %v14762_v0 }
 0x741   : > { %4741 = vmatpush.bf16.msrb.mxu3 %v8130_v42  ;;  %v9068_v42 = vld [vmem:[#allocation3 + $0x64] sm:$0xf] }
 0x742   : > { %4881 = vmatpush.bf16.msrb.mxu2 %v8294_v63  ;;  %v4288_v59 = vpack.c.bf16 %v4280_v1, %v4279_v18  ;;  %v12738_v63 = vor.u32 %v9048_v53, %v8083_v10  ;;  %v8313_v16 = vld [vmem:[#allocation3 + $0x190] sm:$0xf]  ;;  %v8166_v1 = vor.u32 %v9068_v42, %v8163_v25 }
 0x743   : > { %v8257_v39 = vld [vmem:[#allocation3 + $0x120] sm:$0xf]  ;;  %v9092_v61 = vld [vmem:[#allocation3 + $0x124] sm:$0xf] }
 0x744   : > { %4294 = vst [vmem:[#allocation3 + $0x198] sm:$0xff] %v4288_v59  ;;  %v8258_v50 = vor.u32 %v9093_v37, %v8257_v39  ;;  %v8155_v59 = vld [vmem:[#allocation3 + $0x58] sm:$0xf0] }
 0x745   : > { %v4078_v40 = vpop.permute.xlu0 %4077  ;;  %4742 = vmatpush.bf16.msrb.mxu3 %v8122_v6 }
 0x746   : > { %4882 = vmatpush.bf16.msrb.mxu2 %v8286_v57  ;;  %4789 = vmatpush.bf16.msra.mxu1 %v8258_v50  ;;  %v4066_v3 = vpop.permute.xlu1 %4065  ;;  %v8262_v57 = vor.u32 %v9092_v61, %v8259_v44  ;;  %v4074_v53 = vpop.permute.xlu2 %4073  ;;  %v9062_v61 = vld [vmem:[#allocation3 + $0x34] sm:$0xf] }
 0x747   : > { %v4085_v41 = vsel %vm921_vm4, %v4066_v3, %v4078_v40  ;;  %v4091_v28 = vsel %vm921_vm4, %v4078_v40, %v4066_v3  ;;  %v9064_v3 = vld [vmem:[#allocation3 + $0x44] sm:$0xf] }
 0x748   : > { %v4101_v55 = vmul.f32 %v4085_v41, %v14787_v32  ;;  %v4102_v13 = vmul.f32 %v4091_v28, %v14788_v14  ;;  %v8150_v22 = vor.u32 %v9064_v3, %v8147_v29  ;;  %v8139_v41 = vld [vmem:[#allocation3 + $0x38] sm:$0xf0]  ;;  %v9050_v28 = vld [vmem:[%s14471_s7 + $0x2c] sm:$0xf0]  ;;  %v9058_v29 = vld [vmem:[#allocation3 + $0x14] sm:$0xf] }
 0x749   : > { %4743 = vmatpush.bf16.msrb.mxu3 %v8114_v43  ;;  %v9056_v3 = vld [vmem:[#allocation3 + $0x4] sm:$0xf] }
 0x74a   : > { %4883 = vmatpush.bf16.msrb.mxu2 %v8278_v11  ;;  %v4109_v7 = vpack.c.bf16 %v4102_v13, %v4101_v55  ;;  %v8158_v11 = vor.u32 %v9066_v48, %v8155_v59  ;;  %v9052_v13 = vld [vmem:[%s14471_s7 + $0x44] sm:$0xf]  ;;  %v8131_v59 = vld [vmem:[#allocation3 + $0x28] sm:$0xf0]  ;;  %v8123_v48 = vld [vmem:[#allocation3 + $0x18] sm:$0xf0] }
 0x74b   : > { %v9107_v35 = vld [vmem:[#allocation3 + $0x194] sm:$0xf0] }
 0x74c   : > { %4115 = vst [vmem:[#allocation3 + $0x110] sm:$0xff] %v4109_v7  ;;  %4744 = vmatmul.bf16.vlgmr.msrb.gmra.mxu3 %v12736_v27  ;;  %v8314_v18 = vor.u32 %v9107_v35, %v8313_v16  ;;  %v8142_v35 = vor.u32 %v9062_v61, %v8139_v41  ;;  %v9045_v41 = vld [vmem:[%s14471_s7 + $0xc] sm:$0xf]  ;;  %v9084_v61 = vld [vmem:[#allocation3 + $0xe4] sm:$0xf] }
 0x74d   : > { %4832 = vmatpush.bf16.msra.mxu3 %v8174_v60  ;;  %v4240_v33 = vpop.permute.xlu0 %4239  ;;  %4773 = vmatmul.bf16.gmra.mxu2 %v12738_v63  ;;  %v8099_v60 = vld [vmem:[%s14471_s7 + $0x50] sm:$0xf0] }
 0x74e   : > { %4884 = vmatpush.bf16.msrb.mxu2 %v8270_v15  ;;  %v4262_v47 = vsel %vm1143_vm7, %v4240_v33, %v4252_v5  ;;  %v4268_v54 = vsel %vm1143_vm7, %v4252_v5, %v4240_v33  ;;  %4814 = vmatpush.bf16.msrb.mxu0 %v8314_v18  ;;  %v4080_v6 = vpop.permute.xlu1 %4079 }
 0x74f   : > { %v4275_v39 = vmul.f32 %v4262_v47, %v14759_v45  ;;  %v4276_v37 = vmul.f32 %v4268_v54, %v14762_v0  ;;  %v4086_v58 = vsel %vm921_vm4, %v12695_v56, %v4080_v6  ;;  %v4092_v50 = vsel %vm921_vm4, %v4080_v6, %v12695_v56  ;;  %v8081_v56 = vld [vmem:[%s14471_s7 + $0x20] sm:$0xf] }
 0x750   : > { %v4103_v52 = vmul.f32 %v4086_v58, %v14787_v32  ;;  %v4104_v40 = vmul.f32 %v4092_v50, %v14788_v14  ;;  %v12782_v42 = vor.u32 %v9050_v28, %v8081_v56  ;;  %v8075_v56 = vld [vmem:[%s14471_s7 + $0x18] sm:$0xf0] }
 0x751   : > { %4833 = vmatpush.bf16.msra.mxu3 %v8166_v1  ;;  %v4286_v17 = vpack.c.bf16 %v4276_v37, %v4275_v39  ;;  %v12784_v1 = vor.u32 %v9052_v13, %v8099_v60  ;;  %v9060_v39 = vld [vmem:[#allocation3 + $0x24] sm:$0xf] }
 0x752   : > { %4885 = vmatpush.bf16.msrb.mxu2 %v8262_v57  ;;  %v4110_v4 = vpack.c.bf16 %v4104_v40, %v4103_v52  ;;  %v8134_v58 = vor.u32 %v9060_v39, %v8131_v59  ;;  %v9082_v39 = vld [vmem:[#allocation3 + $0xd4] sm:$0xf] }
 0x753   : > { %4292 = vst [vmem:[#allocation3 + $0x188] sm:$0xff] %v4286_v17  ;;  %v8249_v33 = vld [vmem:[#allocation3 + $0x110] sm:$0xf]  ;;  %v9090_v57 = vld [vmem:[#allocation3 + $0x114] sm:$0xf] }
 0x754   : > { %4116 = vst [vmem:[#allocation3 + $0x118] sm:$0xff] %v4110_v4  ;;  %v8126_v4 = vor.u32 %v9058_v29, %v8123_v48 }
 0x755   : > { %4834 = vmatpush.bf16.msra.mxu3 %v8158_v11  ;;  %v4062_v10 = vpop.permute.xlu0 %4061 }
 0x756   : > { %v4083_v43 = vsel %vm921_vm4, %v4062_v10, %v4074_v53  ;;  %v4089_v20 = vsel %vm921_vm4, %v4074_v53, %v4062_v10  ;;  %v4250_v55 = vpop.permute.xlu1 %4249  ;;  %v8235_v10 = vld [vmem:[#allocation3 + $0xf8] sm:$0xf0] }
 0x757   : > { %v4097_v31 = vmul.f32 %v4083_v43, %v14787_v32  ;;  %v4098_v15 = vmul.f32 %v4089_v20, %v14788_v14  ;;  %v4261_v25 = vsel %vm1143_vm7, %v12716_v51, %v4250_v55  ;;  %v4267_v7 = vsel %vm1143_vm7, %v4250_v55, %v12716_v51  ;;  %v9086_v55 = vld [vmem:[#allocation3 + $0xf4] sm:$0xf] }
 0x758   : > { %v4273_v5 = vmul.f32 %v4261_v25, %v14759_v45  ;;  %v4274_v16 = vmul.f32 %v4267_v7, %v14762_v0  ;;  %v8238_v60 = vor.u32 %v9086_v55, %v8235_v10  ;;  %v9054_v25 = vld [vmem:[%s14471_s7 + $0x4c] sm:$0xf0]  ;;  %v8227_v7 = vld [vmem:[#allocation3 + $0xe8] sm:$0xf0] }
 0x759   : > { %4835 = vmatpush.bf16.msra.mxu3 %v8150_v22  ;;  %v4107_v18 = vpack.c.bf16 %v4098_v15, %v4097_v31  ;;  %v8115_v22 = vld [vmem:[#allocation3 + $0x8] sm:$0xf0]  ;;  %v12800_v31 = vor.u32 %v9045_v41, %v8075_v56  ;;  %v8097_v15 = vld [vmem:[%s14471_s7 + $0x40] sm:$0xf]  ;;  %v9078_v41 = vld [vmem:[#allocation3 + $0xb4] sm:$0xf] }
 0x75a   : > { %v4285_v44 = vpack.c.bf16 %v4274_v16, %v4273_v5  ;;  %v9105_v43 = vld [vmem:[#allocation3 + $0x184] sm:$0xf0]  ;;  %v8118_v13 = vor.u32 %v9056_v3, %v8115_v22  ;;  %v12808_v5 = vor.u32 %v9054_v25, %v8097_v15  ;;  %v8230_v16 = vor.u32 %v9084_v61, %v8227_v7  ;;  %v8203_v3 = vld [vmem:[#allocation3 + $0xb8] sm:$0xf0]  ;;  %v8091_v10 = vld [vmem:[%s14471_s7 + $0x38] sm:$0xf0] }
 0x75b   : > { %4113 = vst [vmem:[#allocation3 + $0x100] sm:$0xff] %v4107_v18  ;;  %v9091_v47 = vld [vmem:[#allocation3 + $0x114] sm:$0xf0]  ;;  %v8251_v54 = vld [vmem:[#allocation3 + $0x118] sm:$0xf0] }
 0x75c   : > { %4291 = vst [vmem:[#allocation3 + $0x180] sm:$0xff] %v4285_v44  ;;  %4749 = vmatmul.bf16.gmra.mxu3 %v12782_v42  ;;  %v8250_v51 = vor.u32 %v9091_v47, %v8249_v33  ;;  %v8254_v6 = vor.u32 %v9090_v57, %v8251_v54  ;;  %v8323_v18 = vld [vmem:[#allocation3 + $0x1a8] sm:$0xf0]  ;;  %v8073_v33 = vld [vmem:[%s14471_s7 + $0x8] sm:$0xf] }
 0x75d   : > { %4836 = vmatpush.bf16.msra.mxu3 %v8142_v35  ;;  %v4076_v37 = vpop.permute.xlu0 %4075  ;;  %4778 = vmatmul.bf16.gmra.mxu2 %v12784_v1  ;;  %v8219_v35 = vld [vmem:[#allocation3 + $0xd8] sm:$0xf0]  ;;  %v9047_v57 = vld [vmem:[%s14471_s7 + $0x14] sm:$0xf0]  ;;  %v8307_v56 = vld [vmem:[#allocation3 + $0x188] sm:$0xf0] }
 0x75e   : > { %4790 = vmatpush.bf16.msra.mxu1 %v8250_v51  ;;  %v4064_v50 = vpop.permute.xlu1 %4063  ;;  %4886 = vmatpush.bf16.msrb.mxu2 %v8254_v6  ;;  %v8074_v48 = vor.u32 %v9047_v57, %v8073_v33  ;;  %v8195_v55 = vld [vmem:[#allocation3 + $0xa8] sm:$0xf0]  ;;  %v8187_v15 = vld [vmem:[#allocation3 + $0x98] sm:$0xf0]  ;;  %v8089_v25 = vld [vmem:[%s14471_s7 + $0x28] sm:$0xf] }
 0x75f   : > { %v4084_v52 = vsel %vm921_vm4, %v4064_v50, %v4076_v37  ;;  %v4090_v40 = vsel %vm921_vm4, %v4076_v37, %v4064_v50  ;;  %v9108_v37 = vld [vmem:[#allocation3 + $0x1a4] sm:$0xf]  ;;  %v9051_v7 = vld [vmem:[%s14471_s7 + $0x34] sm:$0xf0]  ;;  %v9074_v61 = vld [vmem:[#allocation3 + $0x94] sm:$0xf] }
 0x760   : > { %v4099_v11 = vmul.f32 %v4084_v52, %v14787_v32  ;;  %v4100_v17 = vmul.f32 %v4090_v40, %v14788_v14  ;;  %v8326_v50 = vor.u32 %v9108_v37, %v8323_v18  ;;  %v8211_v52 = vld [vmem:[#allocation3 + $0xc8] sm:$0xf0]  ;;  %v8315_v40 = vld [vmem:[#allocation3 + $0x198] sm:$0xf0] }
 0x761   : > { %4837 = vmatpush.bf16.msra.mxu3 %v8134_v58  ;;  %v8222_v58 = vor.u32 %v9082_v39, %v8219_v35  ;;  %v8090_v35 = vor.u32 %v9051_v7, %v8089_v25  ;;  %v8179_v18 = vld [vmem:[#allocation3 + $0x88] sm:$0xf0]  ;;  %v9053_v57 = vld [vmem:[%s14471_s7 + $0x4c] sm:$0xf]  ;;  %v4382_v7 = vpop.permute.xlu2 %4381 }
 0x762   : > { %v4108_v53 = vpack.c.bf16 %v4100_v17, %v4099_v11  ;;  %v8241_v44 = vld [vmem:[#allocation3 + $0x100] sm:$0xf]  ;;  %v9088_v47 = vld [vmem:[#allocation3 + $0x104] sm:$0xf]  ;;  %v9106_v17 = vld [vmem:[#allocation3 + $0x194] sm:$0xf] }
 0x763   : > { %v8305_v28 = vld [vmem:[#allocation3 + $0x180] sm:$0xf]  ;;  %v9080_v11 = vld [vmem:[#allocation3 + $0xc4] sm:$0xf] }
 0x764   : > { %4114 = vst [vmem:[#allocation3 + $0x108] sm:$0xff] %v4108_v53  ;;  %v8306_v20 = vor.u32 %v9105_v43, %v8305_v28  ;;  %v8214_v29 = vor.u32 %v9080_v11, %v8211_v52  ;;  %v9104_v22 = vld [vmem:[#allocation3 + $0x184] sm:$0xf]  ;;  %v9049_v53 = vld [vmem:[%s14471_s7 + $0x2c] sm:$0xf]  ;;  %v8206_v28 = vor.u32 %v9078_v41, %v8203_v3 }
 0x765   : > { %4838 = vmatpush.bf16.msra.mxu3 %v8126_v4  ;;  %v8318_v4 = vor.u32 %v9106_v17, %v8315_v40  ;;  %v8310_v43 = vor.u32 %v9104_v22, %v8307_v56 }
 0x766   : > { %4815 = vmatpush.bf16.msrb.mxu0 %v8306_v20  ;;  %v8094_v20 = vor.u32 %v9049_v53, %v8091_v10 }
 0x769   : > { %4839 = vmatpush.bf16.msra.mxu3 %v8118_v13  ;;  %8327 = vmatmul.msk.bf16.vlgmr.msrb.gmra.mxu0 %vm4726_vm9, %v12800_v31  ;;  %v9076_v13 = vld [vmem:[#allocation3 + $0xa4] sm:$0xf] }
 0x76a   : > { %4856 = vmatpush.bf16.msra.mxu0 %v8238_v60  ;;  %v8198_v60 = vor.u32 %v9076_v13, %v8195_v55 }
 0x76b   : > { %v9089_v59 = vld [vmem:[#allocation3 + $0x104] sm:$0xf0]  ;;  %v8243_v54 = vld [vmem:[#allocation3 + $0x108] sm:$0xf0] }
 0x76c   : > { %4754 = vmatmul.bf16.gmra.mxu3 %v12808_v5  ;;  %v8242_v51 = vor.u32 %v9089_v59, %v8241_v44  ;;  %v8246_v6 = vor.u32 %v9088_v47, %v8243_v54  ;;  %v9072_v44 = vld [vmem:[#allocation3 + $0x84] sm:$0xf]  ;;  %v8107_v59 = vld [vmem:[%s14471_s7 + $0x58] sm:$0xf0]  ;;  %v9055_v54 = vld [vmem:[%s14471_s7 + $0x54] sm:$0xf0] }
 0x76d   : > { %v8182_v33 = vor.u32 %v9072_v44, %v8179_v18  ;;  %v8110_v47 = vor.u32 %v9053_v57, %v8107_v59  ;;  %v4387_v59 = vpop.permute.xlu0 %4386 }
 0x76e   : > { %4857 = vmatpush.bf16.msra.mxu0 %v8230_v16  ;;  %4791 = vmatpush.bf16.msra.mxu1 %v8242_v51  ;;  %v8190_v16 = vor.u32 %v9074_v61, %v8187_v15 }
 0x76f   : > { %4887 = vmatpush.bf16.msrb.mxu2 %v8246_v6 }
 0x771   : > { %4792 = vmatmul.bf16.vlgmr.msra.gmra.mxu1 %v8074_v48 }
 0x772   : > { %4858 = vmatpush.bf16.msra.mxu0 %v8222_v58  ;;  %4909 = vmatpush.bf16.msrb.mxu1 %v8326_v50  ;;  %v4372_v50 = vpop.permute.xlu1 %4371 }
 0x773   : > { %4888 = vmatmul.bf16.vlgmr.msrb.gmra.mxu2 %v8074_v48 }
 0x776   : > { %4859 = vmatpush.bf16.msra.mxu0 %v8214_v29  ;;  %4910 = vmatpush.bf16.msrb.mxu1 %v8318_v4 }
 0x779   : > { %8328 = vmatmul.msk.bf16.gmra.mxu0 %vm4726_vm9, %v8094_v20 }
 0x77a   : > { %4860 = vmatpush.bf16.msra.mxu0 %v8206_v28  ;;  %4911 = vmatpush.bf16.msrb.mxu1 %v8310_v43  ;;  %v12855_v17 = vpop.permute.xlu1 %4376 }
 0x77c   : > { %4840 = vmatmul.bf16.vlgmr.msra.gmra.mxu3 %v12736_v27  ;;  %v8105_v27 = vld [vmem:[%s14471_s7 + $0x48] sm:$0xf] }
 0x77d   : > { %v8106_v51 = vor.u32 %v9055_v54, %v8105_v27 }
 0x77e   : > { %4861 = vmatpush.bf16.msra.mxu0 %v8198_v60 }
 0x781   : > { %4797 = vmatmul.bf16.gmra.mxu1 %v8090_v35 }
 0x782   : > { %4862 = vmatpush.bf16.msra.mxu0 %v8190_v16 }
 0x783   : > { %4893 = vmatmul.bf16.gmra.mxu2 %v8090_v35 }
 0x786   : > { %4863 = vmatpush.bf16.msra.mxu0 %v8182_v33 }
 0x789   : > { %8329 = vmatmul.msk.bf16.gmra.mxu0 %vm4726_vm9, %v8110_v47 }
 0x78c   : > { %4845 = vmatmul.bf16.gmra.mxu3 %v12782_v42 }
 0x791   : > { %4802 = vmatmul.bf16.gmra.mxu1 %v8106_v51 }
 0x793   : > { %4898 = vmatmul.bf16.gmra.mxu2 %v8106_v51 }
 0x799   : > { %4864 = vmatmul.bf16.vlgmr.msra.gmra.mxu0 %v12707_v46 }
 0x79c   : > { %4850 = vmatmul.bf16.gmra.mxu3 %v12808_v5 }
 0x7a1   : > { %8330 = vmatmul.msk.bf16.vlgmr.msrb.gmra.mxu1 %vm4726_vm9, %v12800_v31 }
 0x7a9   : > { %4869 = vmatmul.bf16.gmra.mxu0 %v12738_v63 }
 0x7b1   : > { %8331 = vmatmul.msk.bf16.gmra.mxu1 %vm4726_vm9, %v8094_v20 }
 0x7b9   : > { %4874 = vmatmul.bf16.gmra.mxu0 %v12784_v1 }
 0x7c0   : > { %v4769_v42 = vpop.f32.mrf.mxu2 }
 0x7c1   : > { %8332 = vmatmul.msk.bf16.gmra.mxu1 %vm4726_vm9, %v8110_v47 }
 0x7c8   : > { %v4771_v37 = vpop.f32.mrf.mxu2 }
 0x7cf   : > { %v4745_v6 = vpop.f32.mrf.mxu3 }
 0x7d0   : > { %v4746_v48 = vadd.f32 %v4745_v6, %v4372_v50  ;;  %v4774_v5 = vpop.f32.mrf.mxu2 }
 0x7d2   : > { %v4770_v40 = vadd.f32 %v4769_v42, %v4746_v48 }
 0x7d7   : > { %v4747_v39 = vpop.f32.mrf.mxu3 }
 0x7d8   : > { %v4748_v1 = vadd.f32 %v4747_v39, %v12855_v17  ;;  %v4776_v4 = vpop.f32.mrf.mxu2 }
 0x7da   : > { %v4772_v22 = vadd.f32 %v4771_v37, %v4748_v1 }
 0x7df   : > { %v4750_v58 = vpop.f32.mrf.mxu3 }
 0x7e0   : > { %v12867_v55 = vpop.f32.mrf.mxu2  ;;  %v4751_v61 = vadd.f32 %v4750_v58, %v4382_v7 }
 0x7e2   : > { %v4775_v18 = vadd.f32 %v4774_v5, %v4751_v61 }
 0x7e6   : > { %v4817_v46 = vpop.f32.mrf.mxu0 }
 0x7e7   : > { %v4752_v52 = vpop.f32.mrf.mxu3 }
 0x7e8   : > { %v12882_v44 = vpop.f32.mrf.mxu2  ;;  %v4753_v47 = vadd.f32 %v4752_v52, %v4387_v59 }
 0x7ea   : > { %v4777_v6 = vadd.f32 %v4776_v4, %v4753_v47 }
 0x7ee   : > { %v4793_v31 = vpop.f32.mrf.mxu1  ;;  %v4819_v11 = vpop.f32.mrf.mxu0 }
 0x7ef   : > { %v4794_v63 = vadd.f32 %v4793_v31, %v4770_v40  ;;  %v12861_v10 = vpop.f32.mrf.mxu3 }
 0x7f1   : > { %v4818_v29 = vadd.f32 %v4817_v46, %v4794_v63 }
 0x7f3   : > { %v4928_v3 = vmax.f32 %v4818_v29, 0.0 }
 0x7f5   : > { %v12859_v53 = vmul.f32 %v4928_v3, %v14782_v12 }
 0x7f6   : > { %v4795_v41 = vpop.f32.mrf.mxu1  ;;  %v4822_v56 = vpop.f32.mrf.mxu0 }
 0x7f7   : > { %v4796_v28 = vadd.f32 %v4795_v41, %v4772_v22  ;;  %5072 = vrot.lane.b32.xlu0 %v12859_v53, %s9553_s29  ;;  %4952 = vrot.lane.b32.xlu1 %v12859_v53, %s9551_s9  ;;  %v12872_v25 = vpop.f32.mrf.mxu3  ;;  %v4889_v42 = vpop.f32.mrf.mxu2 }
 0x7f9   : > { %v4820_v43 = vadd.f32 %v4819_v11, %v4796_v28 }
 0x7fb   : > { %v4930_v20 = vmax.f32 %v4820_v43, 0.0 }
 0x7fd   : > { %v12870_v13 = vmul.f32 %v4930_v20, %v14782_v12 }
 0x7fe   : > { %v4798_v60 = vpop.f32.mrf.mxu1  ;;  %v4824_v15 = vpop.f32.mrf.mxu0 }
 0x7ff   : > { %4954 = vrot.lane.b32.xlu2 %v12870_v13, %s9551_s9  ;;  %5204 = vrot.lane.b32.xlu0 %v12859_v53, %s9555_s28  ;;  %v4799_v33 = vadd.f32 %v4798_v60, %v4775_v18  ;;  %v4841_v57 = vpop.f32.mrf.mxu3  ;;  %v4891_v63 = vpop.f32.mrf.mxu2 }
 0x800   : > { %5012 = vrot.lane.b32.xlu1 %v12859_v53, %s9552_s24  ;;  %v4842_v40 = vadd.f32 %v4841_v57, %v4372_v50 }
 0x801   : > { %v4823_v27 = vadd.f32 %v4822_v56, %v4799_v33 }
 0x803   : > { %v4932_v39 = vmax.f32 %v4823_v27, 0.0  ;;  %v4392_v27 = vpop.permute.xlu2 %4391 }
 0x805   : > { %v12901_v46 = vmul.f32 %v4932_v39, %v14782_v12 }
 0x806   : > { %v4800_v16 = vpop.f32.mrf.mxu1  ;;  %v12880_v35 = vpop.f32.mrf.mxu0 }
 0x807   : > { %5014 = vrot.lane.b32.xlu2 %v12870_v13, %s9552_s24  ;;  %5324 = vrot.lane.b32.xlu0 %v12859_v53, %s9557_s12  ;;  %v4801_v37 = vadd.f32 %v4800_v16, %v4777_v6  ;;  %v4843_v58 = vpop.f32.mrf.mxu3  ;;  %v4894_v20 = vpop.f32.mrf.mxu2 }
 0x808   : > { %5132 = vrot.lane.b32.xlu1 %v12859_v53, %s9554_s8  ;;  %v4844_v50 = vadd.f32 %v4843_v58, %v12855_v17 }
 0x809   : > { %v4825_v48 = vadd.f32 %v4824_v15, %v4801_v37 }
 0x80b   : > { %v4934_v31 = vmax.f32 %v4825_v48, 0.0 }
 0x80d   : > { %v12912_v1 = vmul.f32 %v4934_v31, %v14782_v12 }
 0x80e   : > { %v12890_v54 = vpop.f32.mrf.mxu1  ;;  %v12892_v51 = vpop.f32.mrf.mxu0 }
 0x80f   : > { %5134 = vrot.lane.b32.xlu2 %v12870_v13, %s9554_s8  ;;  %5264 = vrot.lane.b32.xlu0 %v12859_v53, %s9556_s16  ;;  %v4846_v29 = vpop.f32.mrf.mxu3  ;;  %v4896_v37 = vpop.f32.mrf.mxu2 }
 0x810   : > { %5074 = vrot.lane.b32.xlu1 %v12870_v13, %s9553_s29  ;;  %v4847_v16 = vadd.f32 %v4846_v29, %v4382_v7  ;;  %v4756_v7 = vadd.f32 %v12861_v10, %v4392_v27 }
 0x812   : > { %v4780_v31 = vadd.f32 %v12867_v55, %v4756_v7 }
 0x816   : > { %v12903_v5 = vpop.f32.mrf.mxu1  ;;  %v4865_v52 = vpop.f32.mrf.mxu0 }
 0x817   : > { %5076 = vrot.lane.b32.xlu2 %v12901_v46, %s9553_s29  ;;  %4956 = vrot.lane.b32.xlu0 %v12901_v46, %s9551_s9  ;;  %v4866_v11 = vadd.f32 %v4865_v52, %v4842_v40  ;;  %v4848_v33 = vpop.f32.mrf.mxu3 }
 0x818   : > { %5206 = vrot.lane.b32.xlu1 %v12870_v13, %s9555_s28  ;;  %v4849_v52 = vadd.f32 %v4848_v33, %v4387_v59 }
 0x819   : > { %v4890_v4 = vadd.f32 %v4889_v42, %v4866_v11 }
 0x81e   : > { %v4867_v3 = vpop.f32.mrf.mxu0  ;;  %v4913_v22 = vpop.f32.mrf.mxu1 }
 0x81f   : > { %v4914_v41 = vadd.f32 %v4913_v22, %v4890_v4  ;;  %5016 = vrot.lane.b32.xlu2 %v12901_v46, %s9552_s24  ;;  %5078 = vrot.lane.b32.xlu0 %v12912_v1, %s9553_s29  ;;  %v4868_v56 = vadd.f32 %v4867_v3, %v4844_v50  ;;  %v4851_v29 = vpop.f32.mrf.mxu3  ;;  %v4397_v4 = vpop.permute.xlu0 %4396 }
 0x820   : > { %5326 = vrot.lane.b32.xlu1 %v12870_v13, %s9557_s12  ;;  %v4758_v3 = vadd.f32 %v12872_v25, %v4397_v4  ;;  %v4899_v25 = vpop.f32.mrf.mxu2 }
 0x821   : > { %v4929_v28 = vmax.f32 %v4914_v41, 0.0  ;;  %v4892_v17 = vadd.f32 %v4891_v63, %v4868_v56  ;;  %v4804_v63 = vadd.f32 %v12890_v54, %v4780_v31 }
 0x822   : > { %v4782_v54 = vadd.f32 %v12882_v44, %v4758_v3 }
 0x823   : > { %v12922_v43 = vmul.f32 %v4929_v28, %v14781_v30  ;;  %v4828_v55 = vadd.f32 %v12880_v35, %v4804_v63  ;;  %v4852_v28 = vadd.f32 %v4851_v29, %v4392_v27 }
 0x825   : > { %v5192_v60 = vpack.c.bf16 %v12922_v43, %v12859_v53  ;;  %v4936_v35 = vmax.f32 %v4828_v55, 0.0 }
 0x826   : > { %v4870_v15 = vpop.f32.mrf.mxu0  ;;  %v4915_v61 = vpop.f32.mrf.mxu1 }
 0x827   : > { %5198 = vst [vmem:[#allocation3 + $0xc0] sm:$0xff] %v5192_v60  ;;  %v4916_v18 = vadd.f32 %v4915_v61, %v4892_v17  ;;  %5268 = vrot.lane.b32.xlu2 %v12901_v46, %s9556_s16  ;;  %5018 = vrot.lane.b32.xlu0 %v12912_v1, %s9552_s24  ;;  %v4871_v57 = vadd.f32 %v4870_v15, %v4847_v16  ;;  %v4853_v16 = vpop.f32.mrf.mxu3 }
 0x828   : > { %5266 = vrot.lane.b32.xlu1 %v12870_v13, %s9556_s16  ;;  %v4806_v15 = vadd.f32 %v12903_v5, %v4782_v54  ;;  %v4854_v7 = vadd.f32 %v4853_v16, %v4397_v4 }
 0x829   : > { %v4931_v47 = vmax.f32 %v4916_v18, 0.0  ;;  %v4895_v39 = vadd.f32 %v4894_v20, %v4871_v57  ;;  %v12967_v57 = vmul.f32 %v4936_v35, %v14782_v12 }
 0x82a   : > { %v4830_v44 = vadd.f32 %v12892_v51, %v4806_v15 }
 0x82b   : > { %v12933_v6 = vmul.f32 %v4931_v47, %v14781_v30 }
 0x82d   : > { %v5193_v42 = vpack.c.bf16 %v12933_v6, %v12870_v13 }
 0x82e   : > { %v4872_v58 = vpop.f32.mrf.mxu0  ;;  %v4918_v48 = vpop.f32.mrf.mxu1 }
 0x82f   : > { %5199 = vst [vmem:[#allocation3 + $0xc8] sm:$0xff] %v5193_v42  ;;  %v4919_v40 = vadd.f32 %v4918_v48, %v4895_v39  ;;  %5136 = vrot.lane.b32.xlu2 %v12901_v46, %s9554_s8  ;;  %5270 = vrot.lane.b32.xlu0 %v12912_v1, %s9556_s16  ;;  %v4873_v10 = vadd.f32 %v4872_v58, %v4849_v52  ;;  %v4901_v58 = vpop.f32.mrf.mxu2 }
 0x830   : > { %5328 = vrot.lane.b32.xlu1 %v12901_v46, %s9557_s12 }
 0x831   : > { %v4933_v11 = vmax.f32 %v4919_v40, 0.0  ;;  %v4897_v50 = vadd.f32 %v4896_v37, %v4873_v10  ;;  %v4938_v37 = vmax.f32 %v4830_v44, 0.0 }
 0x833   : > { %v12947_v59 = vmul.f32 %v4933_v11, %v14781_v30  ;;  %v12982_v40 = vmul.f32 %v4938_v37, %v14782_v12 }
 0x835   : > { %v5194_v22 = vpack.c.bf16 %v12947_v59, %v12901_v46 }
 0x836   : > { %v4875_v41 = vpop.f32.mrf.mxu0  ;;  %v4920_v56 = vpop.f32.mrf.mxu1 }
 0x837   : > { %5200 = vst [vmem:[#allocation3 + $0xd0] sm:$0xff] %v5194_v22  ;;  %v4921_v20 = vadd.f32 %v4920_v56, %v4897_v50  ;;  %5208 = vrot.lane.b32.xlu2 %v12901_v46, %s9555_s28  ;;  %5138 = vrot.lane.b32.xlu0 %v12912_v1, %s9554_s8  ;;  %v4876_v60 = vadd.f32 %v4875_v41, %v4852_v28 }
 0x838   : > { %4958 = vrot.lane.b32.xlu1 %v12912_v1, %s9551_s9 }
 0x839   : > { %v4935_v17 = vmax.f32 %v4921_v20, 0.0  ;;  %v4900_v33 = vadd.f32 %v4899_v25, %v4876_v60 }
 0x83b   : > { %v12962_v61 = vmul.f32 %v4935_v17, %v14781_v30 }
 0x83d   : > { %v5195_v18 = vpack.c.bf16 %v12962_v61, %v12912_v1 }
 0x83e   : > { %v4877_v47 = vpop.f32.mrf.mxu0  ;;  %v4923_v27 = vpop.f32.mrf.mxu1 }
 0x83f   : > { %5201 = vst [vmem:[#allocation3 + $0xd8] sm:$0xff] %v5195_v18  ;;  %v4924_v42 = vadd.f32 %v4923_v27, %v4900_v33  ;;  %5330 = vrot.lane.b32.xlu2 %v12912_v1, %s9557_s12  ;;  %5210 = vrot.lane.b32.xlu0 %v12912_v1, %s9555_s28  ;;  %v4878_v5 = vadd.f32 %v4877_v47, %v4854_v7 }
 0x840   : > { %5332 = vrot.lane.b32.xlu1 %v12967_v57, %s9557_s12 }
 0x841   : > { %v4937_v39 = vmax.f32 %v4924_v42, 0.0  ;;  %v4902_v52 = vadd.f32 %v4901_v58, %v4878_v5 }
 0x843   : > { %v12977_v51 = vmul.f32 %v4937_v39, %v14781_v30 }
 0x845   : > { %v5196_v48 = vpack.c.bf16 %v12977_v51, %v12967_v57 }
 0x846   : > { %v4925_v31 = vpop.f32.mrf.mxu1 }
 0x847   : > { %5202 = vst [vmem:[#allocation3 + $0xe0] sm:$0xff] %v5196_v48  ;;  %v4926_v10 = vadd.f32 %v4925_v31, %v4902_v52  ;;  %4960 = vrot.lane.b32.xlu2 %v12967_v57, %s9551_s9  ;;  %5212 = vrot.lane.b32.xlu0 %v12967_v57, %s9555_s28 }
 0x848   : > { %5214 = vrot.lane.b32.xlu1 %v12982_v40, %s9555_s28 }
 0x849   : > { %v4939_v11 = vmax.f32 %v4926_v10, 0.0 }
 0x84b   : > { %v12991_v63 = vmul.f32 %v4939_v11, %v14781_v30 }
 0x84d   : > { %v5197_v29 = vpack.c.bf16 %v12991_v63, %v12982_v40 }
 0x84f   : > { %5203 = vst [vmem:[#allocation3 + $0xe8] sm:$0xff] %v5197_v29  ;;  %5020 = vrot.lane.b32.xlu2 %v12967_v57, %s9552_s24  ;;  %5392 = vrot.lane.b32.xlu0 %v12967_v57, %s9558_s15 }
 0x850   : > { %5394 = vrot.lane.b32.xlu1 %v12982_v40, %s9558_s15 }
 0x857   : > { %5272 = vrot.lane.b32.xlu2 %v12967_v57, %s9556_s16  ;;  %4962 = vrot.lane.b32.xlu0 %v12982_v40, %s9551_s9 }
 0x858   : > { %4964 = vrot.lane.b32.xlu1 %v12922_v43, %s9551_s9 }
 0x859   : > { %v13007_v4 = vpop.permute.xlu2 %4954 }
 0x85f   : > { %5140 = vrot.lane.b32.xlu2 %v12967_v57, %s9554_s8  ;;  %5022 = vrot.lane.b32.xlu0 %v12982_v40, %s9552_s24 }
 0x860   : > { %5026 = vrot.lane.b32.xlu1 %v12933_v6, %s9552_s24 }
 0x861   : > { %v13015_v3 = vpop.permute.xlu2 %5014 }
 0x867   : > { %5334 = vrot.lane.b32.xlu2 %v12982_v40, %s9557_s12  ;;  %5274 = vrot.lane.b32.xlu0 %v12982_v40, %s9556_s16 }
 0x868   : > { %4966 = vrot.lane.b32.xlu1 %v12933_v6, %s9551_s9 }
 0x869   : > { %v13023_v22 = vpop.permute.xlu2 %5134  ;;  %v13025_v50 = vpop.permute.xlu0 %5072 }
 0x86a   : > { %v13027_v55 = vpop.permute.xlu1 %4952 }
 0x86f   : > { %5142 = vrot.lane.b32.xlu0 %v12982_v40, %s9554_s8  ;;  %5084 = vrot.lane.b32.xlu2 %v12922_v43, %s9553_s29 }
 0x870   : > { %5146 = vrot.lane.b32.xlu1 %v12933_v6, %s9554_s8 }
 0x871   : > { %v13035_v41 = vpop.permute.xlu2 %5076  ;;  %v13037_v56 = vpop.permute.xlu0 %5204 }
 0x872   : > { %v13039_v28 = vpop.permute.xlu1 %5012 }
 0x877   : > { %5024 = vrot.lane.b32.xlu0 %v12922_v43, %s9552_s24  ;;  %5216 = vrot.lane.b32.xlu2 %v12922_v43, %s9555_s28 }
 0x878   : > { %5088 = vrot.lane.b32.xlu1 %v12947_v59, %s9553_s29 }
 0x879   : > { %v13047_v20 = vpop.permute.xlu2 %5016  ;;  %v13049_v54 = vpop.permute.xlu0 %5324 }
 0x87a   : > { %v13051_v25 = vpop.permute.xlu1 %5132 }
 0x87f   : > { %5144 = vrot.lane.b32.xlu0 %v12922_v43, %s9554_s8  ;;  %5336 = vrot.lane.b32.xlu2 %v12922_v43, %s9557_s12 }
 0x880   : > { %5028 = vrot.lane.b32.xlu1 %v12947_v59, %s9552_s24 }
 0x881   : > { %v13059_v60 = vpop.permute.xlu2 %5268  ;;  %v13061_v17 = vpop.permute.xlu0 %5264 }
 0x882   : > { %v13063_v35 = vpop.permute.xlu1 %5074 }
 0x887   : > { %5086 = vrot.lane.b32.xlu0 %v12933_v6, %s9553_s29  ;;  %5276 = vrot.lane.b32.xlu2 %v12922_v43, %s9556_s16 }
 0x888   : > { %5280 = vrot.lane.b32.xlu1 %v12947_v59, %s9556_s16 }
 0x889   : > { %v13071_v15 = vpop.permute.xlu2 %5136  ;;  %v13073_v16 = vpop.permute.xlu0 %4956 }
 0x88a   : > { %14793 = vst [vmem:[#allocation23_spill] sm:$0xff] %v13073_v16  ;;  %v13075_v18 = vpop.permute.xlu1 %5206 }
 0x88f   : > { %5218 = vrot.lane.b32.xlu0 %v12933_v6, %s9555_s28  ;;  %5090 = vrot.lane.b32.xlu2 %v12962_v61, %s9553_s29 }
 0x890   : > { %5148 = vrot.lane.b32.xlu1 %v12947_v59, %s9554_s8 }
 0x891   : > { %v13083_v33 = vpop.permute.xlu2 %5208  ;;  %v13085_v44 = vpop.permute.xlu0 %5078 }
 0x892   : > { %v13087_v47 = vpop.permute.xlu1 %5326 }
 0x897   : > { %5338 = vrot.lane.b32.xlu0 %v12933_v6, %s9557_s12  ;;  %5030 = vrot.lane.b32.xlu2 %v12962_v61, %s9552_s24 }
 0x898   : > { %5220 = vrot.lane.b32.xlu1 %v12947_v59, %s9555_s28 }
 0x899   : > { %v13095_v27 = vpop.permute.xlu2 %5330  ;;  %v13097_v7 = vpop.permute.xlu0 %5018 }
 0x89a   : > { %v13099_v42 = vpop.permute.xlu1 %5266 }
 0x89f   : > { %5278 = vrot.lane.b32.xlu0 %v12933_v6, %s9556_s16  ;;  %5282 = vrot.lane.b32.xlu2 %v12962_v61, %s9556_s16 }
 0x8a0   : > { %5342 = vrot.lane.b32.xlu1 %v12962_v61, %s9557_s12 }
 0x8a1   : > { %v13107_v5 = vpop.permute.xlu2 %4960  ;;  %v13109_v39 = vpop.permute.xlu0 %5270 }
 0x8a2   : > { %14794 = vst [vmem:[#allocation22_spill] sm:$0xff] %v13107_v5  ;;  %v13111_v37 = vpop.permute.xlu1 %5328 }
 0x8a7   : > { %5340 = vrot.lane.b32.xlu0 %v12947_v59, %s9557_s12  ;;  %5150 = vrot.lane.b32.xlu2 %v12962_v61, %s9554_s8 }
 0x8a8   : > { %4970 = vrot.lane.b32.xlu1 %v12962_v61, %s9551_s9 }
 0x8a9   : > { %v13119_v58 = vpop.permute.xlu2 %5020  ;;  %v13121_v48 = vpop.permute.xlu0 %5138 }
 0x8aa   : > { %14795 = vst [vmem:[#allocation24_spill] sm:$0xff] %v13119_v58  ;;  %v13123_v52 = vpop.permute.xlu1 %4958 }
 0x8ab   : > { %14796 = vst [vmem:[#allocation45_spill] sm:$0xff] %v13123_v52 }
 0x8af   : > { %4968 = vrot.lane.b32.xlu0 %v12947_v59, %s9551_s9  ;;  %5222 = vrot.lane.b32.xlu2 %v12962_v61, %s9555_s28 }
 0x8b0   : > { %5032 = vrot.lane.b32.xlu1 %v12977_v51, %s9552_s24 }
 0x8b1   : > { %v13131_v31 = vpop.permute.xlu2 %5272  ;;  %v13133_v10 = vpop.permute.xlu0 %5210 }
 0x8b2   : > { %14797 = vst [vmem:[#allocation46_spill] sm:$0xff] %v13131_v31  ;;  %v13135_v11 = vpop.permute.xlu1 %5332 }
 0x8b3   : > { %14798 = vst [vmem:[#allocation26_spill] sm:$0xff] %v13135_v11 }
 0x8b7   : > { %5344 = vrot.lane.b32.xlu0 %v12977_v51, %s9557_s12  ;;  %5224 = vrot.lane.b32.xlu2 %v12977_v51, %s9555_s28 }
 0x8b8   : > { %5284 = vrot.lane.b32.xlu1 %v12977_v51, %s9556_s16 }
 0x8b9   : > { %v13143_v29 = vpop.permute.xlu2 %5140  ;;  %v13145_v30 = vpop.permute.xlu0 %5212 }
 0x8ba   : > { %14799 = vst [vmem:[#allocation25_spill] sm:$0xff] %v13143_v29  ;;  %v13147_v12 = vpop.permute.xlu1 %5214 }
 0x8bb   : > { %14800 = vst [vmem:[#allocation51_spill] sm:$0xff] %v13147_v12 }
 0x8bf   : > { %4972 = vrot.lane.b32.xlu0 %v12977_v51, %s9551_s9  ;;  %5404 = vrot.lane.b32.xlu2 %v12977_v51, %s9558_s15 }
 0x8c0   : > { %5152 = vrot.lane.b32.xlu1 %v12977_v51, %s9554_s8 }
 0x8c1   : > { %v13155_v5 = vpop.permute.xlu2 %5334  ;;  %v13157_v31 = vpop.permute.xlu0 %5392 }
 0x8c2   : > { %14801 = vst [vmem:[#allocation52_spill] sm:$0xff] %v13155_v5  ;;  %v13159_v11 = vpop.permute.xlu1 %5394 }
 0x8c3   : > { %14802 = vst [vmem:[#allocation50_spill] sm:$0xff] %v13157_v31 }
 0x8c4   : > { %14803 = vst [vmem:[#allocation40_spill] sm:$0xff] %v13159_v11 }
 0x8c7   : > { %5092 = vrot.lane.b32.xlu0 %v12977_v51, %s9553_s29  ;;  %5082 = vrot.lane.b32.xlu2 %v12982_v40, %s9553_s29 }
 0x8c8   : > { %5346 = vrot.lane.b32.xlu1 %v12991_v63, %s9557_s12 }
 0x8c9   : > { %v13167_v12 = vpop.permute.xlu0 %4962  ;;  %v5085_v29 = vpop.permute.xlu2 %5084 }
 0x8ca   : > { %14804 = vst [vmem:[#allocation32_spill] sm:$0xff] %v13167_v12  ;;  %v5096_v5 = vsel %vm761_vm2, %v13025_v50, %v5085_v29  ;;  %v5102_v11 = vsel %vm761_vm2, %v5085_v29, %v13025_v50  ;;  %v4965_v58 = vpop.permute.xlu1 %4964 }
 0x8cb   : > { %v5108_v51 = vmul.f32 %v5102_v11, %v14753_v9  ;;  %v5109_v16 = vmul.f32 %v5096_v5, %v14752_v49  ;;  %v4976_v40 = vsel %vm613_vm0, %v13027_v55, %v4965_v58  ;;  %v4982_v12 = vsel %vm613_vm0, %v4965_v58, %v13027_v55 }
 0x8cc   : > { %v4988_v52 = vmul.f32 %v4982_v12, %v9902_v21  ;;  %v4989_v0 = vmul.f32 %v4976_v40, %v9909_v24 }
 0x8cd   : > { %v5120_v45 = vpack.c.bf16 %v5109_v16, %v5108_v51 }
 0x8ce   : > { %v5000_v31 = vpack.c.bf16 %v4989_v0, %v4988_v52 }
 0x8cf   : > { %5126 = vst [vmem:[#allocation3 + $0x60] sm:$0xff] %v5120_v45  ;;  %5390 = vrot.lane.b32.xlu0 %v12912_v1, %s9558_s15  ;;  %5388 = vrot.lane.b32.xlu2 %v12901_v46, %s9558_s15 }
 0x8d0   : > { %5006 = vst [vmem:[#allocation3] sm:$0xff] %v5000_v31  ;;  %5080 = vrot.lane.b32.xlu1 %v12967_v57, %s9553_s29 }
 0x8d1   : > { %v13191_v50 = vpop.permute.xlu0 %5022  ;;  %v5217_v55 = vpop.permute.xlu2 %5216 }
 0x8d2   : > { %v5228_v12 = vsel %vm921_vm4, %v13037_v56, %v5217_v55  ;;  %v5234_v45 = vsel %vm921_vm4, %v5217_v55, %v13037_v56  ;;  %v5027_v0 = vpop.permute.xlu1 %5026 }
 0x8d3   : > { %v5240_v1 = vmul.f32 %v5228_v12, %v14787_v32  ;;  %v5241_v46 = vmul.f32 %v5234_v45, %v14788_v14  ;;  %v5037_v57 = vsel %vm687_vm1, %v13015_v3, %v5027_v0  ;;  %v5043_v16 = vsel %vm687_vm1, %v5027_v0, %v13015_v3 }
 0x8d4   : > { %v5050_v5 = vmul.f32 %v5043_v16, %v14748_v36  ;;  %v5051_v58 = vmul.f32 %v5037_v57, %v9990_v26 }
 0x8d5   : > { %v5252_v52 = vpack.c.bf16 %v5241_v46, %v5240_v1 }
 0x8d6   : > { %v5061_v31 = vpack.c.bf16 %v5051_v58, %v5050_v5 }
 0x8d7   : > { %5258 = vst [vmem:[#allocation3 + $0xf0] sm:$0xff] %v5252_v52  ;;  %5384 = vrot.lane.b32.xlu0 %v12859_v53, %s9558_s15  ;;  %5034 = vrot.lane.b32.xlu2 %v12991_v63, %s9552_s24 }
 0x8d8   : > { %5067 = vst [vmem:[#allocation3 + $0x38] sm:$0xff] %v5061_v31  ;;  %4974 = vrot.lane.b32.xlu1 %v12991_v63, %s9551_s9 }
 0x8d9   : > { %v13215_v56 = vpop.permute.xlu0 %5274  ;;  %v5337_v3 = vpop.permute.xlu2 %5336 }
 0x8da   : > { %v5348_v11 = vsel %vm1069_vm5, %v13049_v54, %v5337_v3  ;;  %v5354_v29 = vsel %vm1069_vm5, %v5337_v3, %v13049_v54  ;;  %v4967_v51 = vpop.permute.xlu1 %4966 }
 0x8db   : > { %v5360_v53 = vmul.f32 %v5348_v11, %v14789_v38  ;;  %v5361_v40 = vmul.f32 %v5354_v29, %v14790_v34  ;;  %v4977_v55 = vsel %vm613_vm0, %v13007_v4, %v4967_v51  ;;  %v4983_v12 = vsel %vm613_vm0, %v4967_v51, %v13007_v4 }
 0x8dc   : > { %v4990_v45 = vmul.f32 %v4983_v12, %v9902_v21  ;;  %v4991_v0 = vmul.f32 %v4977_v55, %v9909_v24 }
 0x8dd   : > { %v5372_v1 = vpack.c.bf16 %v5361_v40, %v5360_v53 }
 0x8de   : > { %v5001_v46 = vpack.c.bf16 %v4991_v0, %v4990_v45 }
 0x8df   : > { %5378 = vst [vmem:[#allocation3 + $0x150] sm:$0xff] %v5372_v1  ;;  %5226 = vrot.lane.b32.xlu0 %v12991_v63, %s9555_s28  ;;  %5286 = vrot.lane.b32.xlu2 %v12991_v63, %s9556_s16 }
 0x8e0   : > { %5007 = vst [vmem:[#allocation3 + $0x8] sm:$0xff] %v5001_v46  ;;  %5400 = vrot.lane.b32.xlu1 %v12947_v59, %s9558_s15 }
 0x8e1   : > { %v13239_v54 = vpop.permute.xlu0 %5142  ;;  %v5277_v4 = vpop.permute.xlu2 %5276 }
 0x8e2   : > { %v5288_v57 = vsel %vm995_vm6, %v13061_v17, %v5277_v4  ;;  %v5294_v16 = vsel %vm995_vm6, %v5277_v4, %v13061_v17  ;;  %v5147_v5 = vpop.permute.xlu1 %5146 }
 0x8e3   : > { %v5300_v58 = vmul.f32 %v5288_v57, %v14791_v2  ;;  %v5301_v52 = vmul.f32 %v5294_v16, %v14792_v23  ;;  %v5157_v59 = vsel %vm835_vm3, %v13023_v22, %v5147_v5  ;;  %v5163_v31 = vsel %vm835_vm3, %v5147_v5, %v13023_v22 }
 0x8e4   : > { %v5170_v3 = vmul.f32 %v5163_v31, %v14711_v62  ;;  %v5171_v11 = vmul.f32 %v5157_v59, %v14710_v8 }
 0x8e5   : > { %v5312_v29 = vpack.c.bf16 %v5301_v52, %v5300_v58 }
 0x8e6   : > { %v5181_v51 = vpack.c.bf16 %v5171_v11, %v5170_v3 }
 0x8e7   : > { %5318 = vst [vmem:[#allocation3 + $0x120] sm:$0xff] %v5312_v29  ;;  %5406 = vrot.lane.b32.xlu0 %v12991_v63, %s9558_s15  ;;  %5154 = vrot.lane.b32.xlu2 %v12991_v63, %s9554_s8 }
 0x8e8   : > { %5187 = vst [vmem:[#allocation3 + $0x98] sm:$0xff] %v5181_v51  ;;  %5094 = vrot.lane.b32.xlu1 %v12991_v63, %s9553_s29 }
 0x8e9   : > { %v5025_v17 = vpop.permute.xlu0 %5024  ;;  %v5091_v53 = vpop.permute.xlu2 %5090 }
 0x8ea   : > { %v5036_v22 = vsel %vm687_vm1, %v13039_v28, %v5025_v17  ;;  %v5042_v40 = vsel %vm687_vm1, %v5025_v17, %v13039_v28  ;;  %v5099_v55 = vsel %vm761_vm2, %v13085_v44, %v5091_v53  ;;  %v5105_v12 = vsel %vm761_vm2, %v5091_v53, %v13085_v44  ;;  %v5089_v45 = vpop.permute.xlu1 %5088 }
 0x8eb   : > { %v5048_v63 = vmul.f32 %v5042_v40, %v14748_v36  ;;  %v5049_v0 = vmul.f32 %v5036_v22, %v9990_v26  ;;  %v5114_v1 = vmul.f32 %v5105_v12, %v14753_v9  ;;  %v5115_v46 = vmul.f32 %v5099_v55, %v14752_v49  ;;  %v5512_v12 = vld [vmem:[%s14805_s14 + $0x10] sm:$0xff] }
 0x8ec   : > { %v5098_v28 = vsel %vm761_vm2, %v13035_v41, %v5089_v45  ;;  %v5104_v4 = vsel %vm761_vm2, %v5089_v45, %v13035_v41 }
 0x8ed   : > { %v5060_v57 = vpack.c.bf16 %v5049_v0, %v5048_v63  ;;  %v5123_v16 = vpack.c.bf16 %v5115_v46, %v5114_v1  ;;  %v5112_v44 = vmul.f32 %v5104_v4, %v14753_v9  ;;  %v5113_v5 = vmul.f32 %v5098_v28, %v14752_v49 }
 0x8ef   : > { %5066 = vst [vmem:[#allocation3 + $0x30] sm:$0xff] %v5060_v57  ;;  %v5122_v58 = vpack.c.bf16 %v5113_v5, %v5112_v44  ;;  %5398 = vrot.lane.b32.xlu0 %v12933_v6, %s9558_s15  ;;  %5402 = vrot.lane.b32.xlu2 %v12962_v61, %s9558_s15 }
 0x8f0   : > { %5129 = vst [vmem:[#allocation3 + $0x78] sm:$0xff] %v5123_v16  ;;  %5386 = vrot.lane.b32.xlu1 %v12870_v13, %s9558_s15 }
 0x8f1   : > { %5128 = vst [vmem:[#allocation3 + $0x70] sm:$0xff] %v5122_v58  ;;  %v5145_v41 = vpop.permute.xlu0 %5144  ;;  %v5031_v52 = vpop.permute.xlu2 %5030 }
 0x8f2   : > { %v5156_v59 = vsel %vm835_vm3, %v13051_v25, %v5145_v41  ;;  %v5162_v31 = vsel %vm835_vm3, %v5145_v41, %v13051_v25  ;;  %v5039_v6 = vsel %vm687_vm1, %v13097_v7, %v5031_v52  ;;  %v5045_v61 = vsel %vm687_vm1, %v5031_v52, %v13097_v7  ;;  %v5029_v13 = vpop.permute.xlu1 %5028  ;;  %v5510_v7 = vld [vmem:[%s14805_s14] sm:$0xff] }
 0x8f3   : > { %v5168_v3 = vmul.f32 %v5162_v31, %v14711_v62  ;;  %v5169_v11 = vmul.f32 %v5156_v59, %v14710_v8  ;;  %v5054_v29 = vmul.f32 %v5045_v61, %v14748_v36  ;;  %v5055_v51 = vmul.f32 %v5039_v6, %v9990_v26  ;;  %v5513_v59 = vld [vmem:[%s14805_s14 + $0x18] sm:$0xff] }
 0x8f4   : > { %v5038_v25 = vsel %vm687_vm1, %v13047_v20, %v5029_v13  ;;  %v5044_v17 = vsel %vm687_vm1, %v5029_v13, %v13047_v20 }
 0x8f5   : > { %v5180_v53 = vpack.c.bf16 %v5169_v11, %v5168_v3  ;;  %v5063_v22 = vpack.c.bf16 %v5055_v51, %v5054_v29  ;;  %v5052_v40 = vmul.f32 %v5044_v17, %v14748_v36  ;;  %v5053_v55 = vmul.f32 %v5038_v25, %v9990_v26  ;;  %v5511_v3 = vld [vmem:[%s14805_s14 + $0x8] sm:$0xff] }
 0x8f7   : > { %5186 = vst [vmem:[#allocation3 + $0x90] sm:$0xff] %v5180_v53  ;;  %v5062_v45 = vpack.c.bf16 %v5053_v55, %v5052_v40  ;;  %5518 = vperm.xlu0 %9339, %v5510_v7   ;;  %5396 = vrot.lane.b32.xlu2 %v12922_v43, %s9558_s15  ;;  %v9137_v20 = vld [vmem:[#allocation3 + $0x74] sm:$0xf0] }
 0x8f8   : > { %5069 = vst [vmem:[#allocation3 + $0x48] sm:$0xff] %v5063_v22  ;;  %5528 = vperm.xlu1 %9340, %v5512_v12   ;;  %v8439_v63 = vld [vmem:[#allocation3 + $0x70] sm:$0xf] }
 0x8f9   : > { %5068 = vst [vmem:[#allocation3 + $0x40] sm:$0xff] %v5062_v45  ;;  %v5087_v0 = vpop.permute.xlu0 %5086  ;;  %v5283_v1 = vpop.permute.xlu2 %5282  ;;  %v8440_v46 = vor.u32 %v9137_v20, %v8439_v63 }
 0x8fa   : > { %v5097_v28 = vsel %vm761_vm2, %v13063_v35, %v5087_v0  ;;  %v5103_v4 = vsel %vm761_vm2, %v5087_v0, %v13063_v35  ;;  %v5291_v43 = vsel %vm995_vm6, %v13109_v39, %v5283_v1  ;;  %v5297_v57 = vsel %vm995_vm6, %v5283_v1, %v13109_v39  ;;  %v5281_v16 = vpop.permute.xlu1 %5280  ;;  %v5515_v39 = vld [vmem:[%s14805_s14 + $0x28] sm:$0xff] }
 0x8fb   : > { %v5110_v44 = vmul.f32 %v5103_v4, %v14753_v9  ;;  %v5111_v5 = vmul.f32 %v5097_v28, %v14752_v49  ;;  %v5306_v58 = vmul.f32 %v5291_v43, %v14791_v2  ;;  %v5307_v41 = vmul.f32 %v5297_v57, %v14792_v23  ;;  %5882 = vmatpush.bf16.msrb.mxu3 %v8440_v46  ;;  %v8431_v46 = vld [vmem:[#allocation3 + $0x60] sm:$0xf] }
 0x8fc   : > { %v5290_v35 = vsel %vm995_vm6, %v13059_v60, %v5281_v16  ;;  %v5296_v52 = vsel %vm995_vm6, %v5281_v16, %v13059_v60 }
 0x8fd   : > { %v5121_v31 = vpack.c.bf16 %v5111_v5, %v5110_v44  ;;  %v5315_v6 = vpack.c.bf16 %v5307_v41, %v5306_v58  ;;  %v5304_v61 = vmul.f32 %v5290_v35, %v14791_v2  ;;  %v5305_v13 = vmul.f32 %v5296_v52, %v14792_v23 }
 0x8ff   : > { %5127 = vst [vmem:[#allocation3 + $0x68] sm:$0xff] %v5121_v31  ;;  %v5314_v60 = vpack.c.bf16 %v5305_v13, %v5304_v61  ;;  %5543 = vperm.xlu0 %9339, %v5515_v39   ;;  %5533 = vperm.xlu2 %9341, %v5513_v59  }
 0x900   : > { %5321 = vst [vmem:[#allocation3 + $0x138] sm:$0xff] %v5315_v6  ;;  %5523 = vperm.xlu1 %9340, %v5511_v3   ;;  %v8503_v3 = vld [vmem:[#allocation3 + $0xf0] sm:$0xf] }
 0x901   : > { %5320 = vst [vmem:[#allocation3 + $0x130] sm:$0xff] %v5314_v60  ;;  %v5219_v11 = vpop.permute.xlu0 %5218  ;;  %v5151_v29 = vpop.permute.xlu2 %5150 }
 0x902   : > { %v5229_v51 = vsel %vm921_vm4, %v13075_v18, %v5219_v11  ;;  %v5235_v25 = vsel %vm921_vm4, %v5219_v11, %v13075_v18  ;;  %v5159_v17 = vsel %vm835_vm3, %v13121_v48, %v5151_v29  ;;  %v5165_v7 = vsel %vm835_vm3, %v5151_v29, %v13121_v48  ;;  %v5149_v53 = vpop.permute.xlu1 %5148  ;;  %v5514_v48 = vld [vmem:[%s14805_s14 + $0x20] sm:$0xff]  ;;  %v9151_v11 = vld [vmem:[#allocation3 + $0xe4] sm:$0xf0] }
 0x903   : > { %v5242_v22 = vmul.f32 %v5229_v51, %v14787_v32  ;;  %v5243_v40 = vmul.f32 %v5235_v25, %v14788_v14  ;;  %v5174_v55 = vmul.f32 %v5165_v7, %v14711_v62  ;;  %v5175_v12 = vmul.f32 %v5159_v17, %v14710_v8  ;;  %v8495_v25 = vld [vmem:[#allocation3 + $0xe0] sm:$0xf] }
 0x904   : > { %v5158_v18 = vsel %vm835_vm3, %v13071_v15, %v5149_v53  ;;  %v5164_v45 = vsel %vm835_vm3, %v5149_v53, %v13071_v15  ;;  %v8496_v53 = vor.u32 %v9151_v11, %v8495_v25 }
 0x905   : > { %v5253_v20 = vpack.c.bf16 %v5243_v40, %v5242_v22  ;;  %v5183_v63 = vpack.c.bf16 %v5175_v12, %v5174_v55  ;;  %v5172_v0 = vmul.f32 %v5164_v45, %v14711_v62  ;;  %v5173_v1 = vmul.f32 %v5158_v18, %v14710_v8 }
 0x906   : > { %v9135_v28 = vld [vmem:[#allocation3 + $0x64] sm:$0xf0] }
 0x907   : > { %5259 = vst [vmem:[#allocation3 + $0xf8] sm:$0xff] %v5253_v20  ;;  %v5182_v4 = vpack.c.bf16 %v5173_v1, %v5172_v0  ;;  %5538 = vperm.xlu2 %9341, %v5514_v48   ;;  %v8432_v43 = vor.u32 %v9135_v28, %v8431_v46  ;;  %v9149_v0 = vld [vmem:[#allocation3 + $0xd4] sm:$0xf0] }
 0x908   : > { %5189 = vst [vmem:[#allocation3 + $0xa8] sm:$0xff] %v5183_v63 }
 0x909   : > { %5188 = vst [vmem:[#allocation3 + $0xa0] sm:$0xff] %v5182_v4  ;;  %v5339_v57 = vpop.permute.xlu0 %5338  ;;  %v5223_v15 = vpop.permute.xlu2 %5222  ;;  %5883 = vmatpush.bf16.msrb.mxu3 %v8432_v43  ;;  %v8487_v4 = vld [vmem:[#allocation3 + $0xd0] sm:$0xf]  ;;  %v9147_v43 = vld [vmem:[#allocation3 + $0xc4] sm:$0xf0] }
 0x90a   : > { %v5349_v16 = vsel %vm1069_vm5, %v13087_v47, %v5339_v57  ;;  %v5355_v44 = vsel %vm1069_vm5, %v5339_v57, %v13087_v47  ;;  %v5231_v5 = vsel %vm921_vm4, %v13133_v10, %v5223_v15  ;;  %v5237_v58 = vsel %vm921_vm4, %v5223_v15, %v13133_v10  ;;  %v5221_v41 = vpop.permute.xlu1 %5220 }
 0x90b   : > { %v5362_v35 = vmul.f32 %v5349_v16, %v14789_v38  ;;  %v5363_v52 = vmul.f32 %v5355_v44, %v14790_v34  ;;  %v5246_v39 = vmul.f32 %v5231_v5, %v14787_v32  ;;  %v5247_v59 = vmul.f32 %v5237_v58, %v14788_v14  ;;  %v8479_v16 = vld [vmem:[#allocation3 + $0xc0] sm:$0xf] }
 0x90c   : > { %v5230_v47 = vsel %vm921_vm4, %v13083_v33, %v5221_v41  ;;  %v5236_v31 = vsel %vm921_vm4, %v5221_v41, %v13083_v33  ;;  %v8488_v15 = vor.u32 %v9149_v0, %v8487_v4 }
 0x90d   : > { %v5373_v6 = vpack.c.bf16 %v5363_v52, %v5362_v35  ;;  %v5255_v61 = vpack.c.bf16 %v5247_v59, %v5246_v39  ;;  %v5244_v10 = vmul.f32 %v5230_v47, %v14787_v32  ;;  %v5245_v13 = vmul.f32 %v5236_v31, %v14788_v14  ;;  %v14806_v35 = vld [vmem:[#allocation50_spill] sm:$0xff] }
 0x90e   : > { %v9153_v60 = vld [vmem:[#allocation3 + $0xf4] sm:$0xf0] }
 0x90f   : > { %5379 = vst [vmem:[#allocation3 + $0x158] sm:$0xff] %v5373_v6  ;;  %v5254_v29 = vpack.c.bf16 %v5245_v13, %v5244_v10  ;;  %v8504_v51 = vor.u32 %v9153_v60, %v8503_v3  ;;  %v14807_v6 = vld [vmem:[#allocation55_spill] sm:$0xff]  ;;  %v14808_v10 = vld [vmem:[#allocation56_spill] sm:$0xff]  ;;  %v14809_v3 = vld [vmem:[#allocation45_spill] sm:$0xff] }
 0x910   : > { %5261 = vst [vmem:[#allocation3 + $0x108] sm:$0xff] %v5255_v61 }
 0x911   : > { %5260 = vst [vmem:[#allocation3 + $0x100] sm:$0xff] %v5254_v29  ;;  %v5279_v17 = vpop.permute.xlu0 %5278  ;;  %5906 = vmatpush.bf16.msrb.mxu0 %v8504_v51  ;;  %v5225_v7 = vpop.permute.xlu2 %5224 }
 0x912   : > { %v5289_v33 = vsel %vm995_vm6, %v13099_v42, %v5279_v17  ;;  %v5295_v22 = vsel %vm995_vm6, %v5279_v17, %v13099_v42  ;;  %v5232_v40 = vsel %vm921_vm4, %v13145_v30, %v5225_v7  ;;  %v5238_v55 = vsel %vm921_vm4, %v5225_v7, %v13145_v30  ;;  %v5343_v12 = vpop.permute.xlu1 %5342 }
 0x913   : > { %v5302_v18 = vmul.f32 %v5289_v33, %v14791_v2  ;;  %v5303_v45 = vmul.f32 %v5295_v22, %v14792_v23  ;;  %v5248_v48 = vmul.f32 %v5232_v40, %v14787_v32  ;;  %v5249_v20 = vmul.f32 %v5238_v55, %v14788_v14  ;;  %v14810_v33 = vld [vmem:[#allocation23_spill] sm:$0xff] }
 0x914   : > { %v5351_v42 = vsel %vm1069_vm5, %v13095_v27, %v5343_v12  ;;  %v5357_v63 = vsel %vm1069_vm5, %v5343_v12, %v13095_v27  ;;  %v8480_v27 = vor.u32 %v9147_v43, %v8479_v16 }
 0x915   : > { %v5313_v1 = vpack.c.bf16 %v5303_v45, %v5302_v18  ;;  %v5256_v30 = vpack.c.bf16 %v5249_v20, %v5248_v48  ;;  %v5366_v46 = vmul.f32 %v5351_v42, %v14789_v38  ;;  %v5367_v28 = vmul.f32 %v5357_v63, %v14790_v34  ;;  %5907 = vmatpush.bf16.msrb.mxu0 %v8496_v53  ;;  %v14811_v45 = vld [vmem:[#allocation24_spill] sm:$0xff] }
 0x917   : > { %5319 = vst [vmem:[#allocation3 + $0x128] sm:$0xff] %v5313_v1  ;;  %v5375_v57 = vpack.c.bf16 %v5367_v28, %v5366_v46  ;;  %v14812_v28 = vld [vmem:[#allocation26_spill] sm:$0xff] }
 0x918   : > { %5262 = vst [vmem:[#allocation3 + $0x110] sm:$0xff] %v5256_v30 }
 0x919   : > { %5381 = vst [vmem:[#allocation3 + $0x168] sm:$0xff] %v5375_v57  ;;  %v5341_v44 = vpop.permute.xlu0 %5340  ;;  %5908 = vmatpush.bf16.msrb.mxu0 %v8488_v15  ;;  %v5405_v5 = vpop.permute.xlu2 %5404 }
 0x91a   : > { %v5350_v58 = vsel %vm1069_vm5, %v13111_v37, %v5341_v44  ;;  %v5356_v41 = vsel %vm1069_vm5, %v5341_v44, %v13111_v37  ;;  %v5412_v52 = vsel %vm1143_vm7, %v14806_v35, %v5405_v5  ;;  %v5418_v39 = vsel %vm1143_vm7, %v5405_v5, %v14806_v35  ;;  %v4971_v59 = vpop.permute.xlu1 %4970  ;;  %v14813_v44 = vld [vmem:[#allocation46_spill] sm:$0xff] }
 0x91b   : > { %v5364_v47 = vmul.f32 %v5350_v58, %v14789_v38  ;;  %v5365_v31 = vmul.f32 %v5356_v41, %v14790_v34  ;;  %v5428_v61 = vmul.f32 %v5412_v52, %v14807_v6  ;;  %v5429_v13 = vmul.f32 %v5418_v39, %v14808_v10 }
 0x91c   : > { %v4979_v37 = vsel %vm613_vm0, %v14809_v3, %v4971_v59  ;;  %v4985_v60 = vsel %vm613_vm0, %v4971_v59, %v14809_v3 }
 0x91d   : > { %v5374_v11 = vpack.c.bf16 %v5365_v31, %v5364_v47  ;;  %v5436_v29 = vpack.c.bf16 %v5429_v13, %v5428_v61  ;;  %v4994_v51 = vmul.f32 %v4985_v60, %v9902_v21  ;;  %v4995_v25 = vmul.f32 %v4979_v37, %v9909_v24  ;;  %5909 = vmatpush.bf16.msrb.mxu0 %v8480_v27  ;;  %v14814_v47 = vld [vmem:[#allocation22_spill] sm:$0xff] }
 0x91f   : > { %5380 = vst [vmem:[#allocation3 + $0x160] sm:$0xff] %v5374_v11  ;;  %v5003_v17 = vpack.c.bf16 %v4995_v25, %v4994_v51  ;;  %v14815_v25 = vld [vmem:[#allocation25_spill] sm:$0xff] }
 0x920   : > { %5442 = vst [vmem:[#allocation3 + $0x1a0] sm:$0xff] %v5436_v29 }
 0x921   : > { %5009 = vst [vmem:[#allocation3 + $0x18] sm:$0xff] %v5003_v17  ;;  %v4969_v7 = vpop.permute.xlu0 %4968  ;;  %v13457_v53 = vpop.permute.xlu2 %5082 }
 0x922   : > { %v4978_v22 = vsel %vm613_vm0, %v14810_v33, %v4969_v7  ;;  %v4984_v40 = vsel %vm613_vm0, %v4969_v7, %v14810_v33  ;;  %v5033_v55 = vpop.permute.xlu1 %5032 }
 0x923   : > { %v4992_v12 = vmul.f32 %v4984_v40, %v9902_v21  ;;  %v4993_v18 = vmul.f32 %v4978_v22, %v9909_v24  ;;  %v5040_v48 = vsel %vm687_vm1, %v14811_v45, %v5033_v55  ;;  %v5046_v20 = vsel %vm687_vm1, %v5033_v55, %v14811_v45 }
 0x924   : > { %v5056_v42 = vmul.f32 %v5046_v20, %v14748_v36  ;;  %v5057_v63 = vmul.f32 %v5040_v48, %v9990_v26 }
 0x925   : > { %v5002_v0 = vpack.c.bf16 %v4993_v18, %v4992_v12 }
 0x926   : > { %v5064_v1 = vpack.c.bf16 %v5057_v63, %v5056_v42 }
 0x927   : > { %5008 = vst [vmem:[#allocation3 + $0x10] sm:$0xff] %v5002_v0  ;;  %v14816_v0 = vld [vmem:[#allocation52_spill] sm:$0xff] }
 0x928   : > { %5070 = vst [vmem:[#allocation3 + $0x50] sm:$0xff] %v5064_v1 }
 0x929   : > { %v5345_v30 = vpop.permute.xlu0 %5344  ;;  %v13475_v46 = vpop.permute.xlu2 %5388 }
 0x92a   : > { %v5352_v4 = vsel %vm1069_vm5, %v14812_v28, %v5345_v30  ;;  %v5358_v43 = vsel %vm1069_vm5, %v5345_v30, %v14812_v28  ;;  %v5285_v57 = vpop.permute.xlu1 %5284 }
 0x92b   : > { %v5368_v15 = vmul.f32 %v5352_v4, %v14789_v38  ;;  %v5369_v16 = vmul.f32 %v5358_v43, %v14790_v34  ;;  %v5292_v5 = vsel %vm995_vm6, %v14813_v44, %v5285_v57  ;;  %v5298_v27 = vsel %vm995_vm6, %v5285_v57, %v14813_v44 }
 0x92c   : > { %v5308_v58 = vmul.f32 %v5292_v5, %v14791_v2  ;;  %v5309_v41 = vmul.f32 %v5298_v27, %v14792_v23  ;;  %v8415_v27 = vld [vmem:[#allocation3 + $0x40] sm:$0xf] }
 0x92d   : > { %v5376_v35 = vpack.c.bf16 %v5369_v16, %v5368_v15 }
 0x92e   : > { %v5316_v52 = vpack.c.bf16 %v5309_v41, %v5308_v58  ;;  %v9131_v58 = vld [vmem:[#allocation3 + $0x44] sm:$0xf0] }
 0x92f   : > { %5382 = vst [vmem:[#allocation3 + $0x170] sm:$0xff] %v5376_v35 }
 0x930   : > { %5322 = vst [vmem:[#allocation3 + $0x140] sm:$0xff] %v5316_v52 }
 0x931   : > { %v4973_v39 = vpop.permute.xlu0 %4972  ;;  %v5035_v59 = vpop.permute.xlu2 %5034 }
 0x932   : > { %v4980_v31 = vsel %vm613_vm0, %v14814_v47, %v4973_v39  ;;  %v4986_v61 = vsel %vm613_vm0, %v4973_v39, %v14814_v47  ;;  %v5041_v13 = vsel %vm687_vm1, %v13191_v50, %v5035_v59  ;;  %v5047_v3 = vsel %vm687_vm1, %v5035_v59, %v13191_v50  ;;  %v5153_v37 = vpop.permute.xlu1 %5152 }
 0x933   : > { %v4996_v60 = vmul.f32 %v4986_v61, %v9902_v21  ;;  %v4997_v11 = vmul.f32 %v4980_v31, %v9909_v24  ;;  %v5058_v29 = vmul.f32 %v5047_v3, %v14748_v36  ;;  %v5059_v51 = vmul.f32 %v5041_v13, %v9990_v26 }
 0x934   : > { %v5160_v17 = vsel %vm835_vm3, %v14815_v25, %v5153_v37  ;;  %v5166_v7 = vsel %vm835_vm3, %v5153_v37, %v14815_v25  ;;  %v8416_v3 = vor.u32 %v9131_v58, %v8415_v27 }
 0x935   : > { %v5004_v33 = vpack.c.bf16 %v4997_v11, %v4996_v60  ;;  %v5065_v22 = vpack.c.bf16 %v5059_v51, %v5058_v29  ;;  %v5176_v50 = vmul.f32 %v5166_v7, %v14711_v62  ;;  %v5177_v40 = vmul.f32 %v5160_v17, %v14710_v8  ;;  %v8407_v60 = vld [vmem:[#allocation3 + $0x30] sm:$0xf]  ;;  %v9129_v11 = vld [vmem:[#allocation3 + $0x34] sm:$0xf0] }
 0x936   : > { %v8567_v29 = vld [vmem:[#allocation3 + $0x170] sm:$0xf]  ;;  %v8408_v25 = vor.u32 %v9129_v11, %v8407_v60 }
 0x937   : > { %5010 = vst [vmem:[#allocation3 + $0x20] sm:$0xff] %v5004_v33  ;;  %v5184_v55 = vpack.c.bf16 %v5177_v40, %v5176_v50 }
 0x938   : > { %5071 = vst [vmem:[#allocation3 + $0x58] sm:$0xff] %v5065_v22  ;;  %v8559_v22 = vld [vmem:[#allocation3 + $0x160] sm:$0xf] }
 0x939   : > { %5190 = vst [vmem:[#allocation3 + $0xb0] sm:$0xff] %v5184_v55  ;;  %v5093_v12 = vpop.permute.xlu0 %5092  ;;  %v5287_v18 = vpop.permute.xlu2 %5286 }
 0x93a   : > { %v5293_v45 = vsel %vm995_vm6, %v13215_v56, %v5287_v18  ;;  %v5299_v48 = vsel %vm995_vm6, %v5287_v18, %v13215_v56  ;;  %v5347_v20 = vpop.permute.xlu1 %5346  ;;  %v8423_v56 = vld [vmem:[#allocation3 + $0x50] sm:$0xf] }
 0x93b   : > { %v5310_v42 = vmul.f32 %v5293_v45, %v14791_v2  ;;  %v5311_v63 = vmul.f32 %v5299_v48, %v14792_v23  ;;  %v5353_v1 = vsel %vm1069_vm5, %v14816_v0, %v5347_v20  ;;  %v5359_v30 = vsel %vm1069_vm5, %v5347_v20, %v14816_v0  ;;  %v14817_v45 = vld [vmem:[#allocation32_spill] sm:$0xff] }
 0x93c   : > { %v5370_v28 = vmul.f32 %v5353_v1, %v14789_v38  ;;  %v5371_v4 = vmul.f32 %v5359_v30, %v14790_v34 }
 0x93d   : > { %v5317_v43 = vpack.c.bf16 %v5311_v63, %v5310_v42  ;;  %v9167_v42 = vld [vmem:[#allocation3 + $0x164] sm:$0xf0] }
 0x93e   : > { %v5377_v57 = vpack.c.bf16 %v5371_v4, %v5370_v28  ;;  %v8560_v1 = vor.u32 %v9167_v42, %v8559_v22  ;;  %v9165_v28 = vld [vmem:[#allocation3 + $0x154] sm:$0xf0]  ;;  %v9143_v4 = vld [vmem:[#allocation3 + $0xa4] sm:$0xf0] }
 0x93f   : > { %5323 = vst [vmem:[#allocation3 + $0x148] sm:$0xff] %v5317_v43  ;;  %v9133_v15 = vld [vmem:[#allocation3 + $0x54] sm:$0xf0] }
 0x940   : > { %5383 = vst [vmem:[#allocation3 + $0x178] sm:$0xff] %v5377_v57  ;;  %v8424_v16 = vor.u32 %v9133_v15, %v8423_v56  ;;  %v8471_v57 = vld [vmem:[#allocation3 + $0xb0] sm:$0xf]  ;;  %v8463_v15 = vld [vmem:[#allocation3 + $0xa0] sm:$0xf] }
 0x941   : > { %v5391_v44 = vpop.permute.xlu0 %5390  ;;  %v5155_v5 = vpop.permute.xlu2 %5154 }
 0x942   : > { %v5161_v41 = vsel %vm835_vm3, %v13239_v54, %v5155_v5  ;;  %v5167_v35 = vsel %vm835_vm3, %v5155_v5, %v13239_v54  ;;  %5884 = vmatpush.bf16.msrb.mxu3 %v8424_v16  ;;  %v5081_v52 = vpop.permute.xlu1 %5080  ;;  %v8551_v16 = vld [vmem:[#allocation3 + $0x150] sm:$0xf] }
 0x943   : > { %v5178_v39 = vmul.f32 %v5167_v35, %v14711_v62  ;;  %v5179_v59 = vmul.f32 %v5161_v41, %v14710_v8  ;;  %v5100_v47 = vsel %vm761_vm2, %v5081_v52, %v5093_v12  ;;  %v5106_v31 = vsel %vm761_vm2, %v5093_v12, %v5081_v52  ;;  %v14818_v52 = vld [vmem:[#allocation51_spill] sm:$0xff] }
 0x944   : > { %v5116_v61 = vmul.f32 %v5106_v31, %v14753_v9  ;;  %v5117_v13 = vmul.f32 %v5100_v47, %v14752_v49  ;;  %v8552_v5 = vor.u32 %v9165_v28, %v8551_v16  ;;  %v8464_v41 = vor.u32 %v9143_v4, %v8463_v15  ;;  %v9125_v16 = vld [vmem:[#allocation3 + $0x14] sm:$0xf0] }
 0x945   : > { %v5185_v37 = vpack.c.bf16 %v5179_v59, %v5178_v39 }
 0x946   : > { %v5124_v54 = vpack.c.bf16 %v5117_v13, %v5116_v61  ;;  %5885 = vmatpush.bf16.msrb.mxu3 %v8416_v3  ;;  %v9163_v35 = vld [vmem:[#allocation3 + $0x144] sm:$0xf0] }
 0x947   : > { %5191 = vst [vmem:[#allocation3 + $0xb8] sm:$0xff] %v5185_v37  ;;  %v9169_v51 = vld [vmem:[#allocation3 + $0x174] sm:$0xf0] }
 0x948   : > { %5130 = vst [vmem:[#allocation3 + $0x80] sm:$0xff] %v5124_v54  ;;  %v8568_v17 = vor.u32 %v9169_v51, %v8567_v29  ;;  %v8543_v54 = vld [vmem:[#allocation3 + $0x140] sm:$0xf] }
 0x949   : > { %v5385_v7 = vpop.permute.xlu0 %5384  ;;  %v5403_v33 = vpop.permute.xlu2 %5402  ;;  %v8544_v51 = vor.u32 %v9163_v35, %v8543_v54  ;;  %v9123_v35 = vld [vmem:[#allocation3 + $0x4] sm:$0xf0] }
 0x94a   : > { %v5411_v50 = vsel %vm1143_vm7, %v5391_v44, %v5403_v33  ;;  %v5417_v40 = vsel %vm1143_vm7, %v5403_v33, %v5391_v44  ;;  %5886 = vmatpush.bf16.msrb.mxu3 %v8408_v25  ;;  %5930 = vmatpush.bf16.msra.mxu2 %v8568_v17  ;;  %v4975_v55 = vpop.permute.xlu1 %4974  ;;  %v8455_v25 = vld [vmem:[#allocation3 + $0x90] sm:$0xf] }
 0x94b   : > { %v5426_v12 = vmul.f32 %v5411_v50, %v14807_v6  ;;  %v5427_v18 = vmul.f32 %v5417_v40, %v14808_v10  ;;  %v4981_v48 = vsel %vm613_vm0, %v14817_v45, %v4975_v55  ;;  %v4987_v20 = vsel %vm613_vm0, %v4975_v55, %v14817_v45  ;;  %v8535_v50 = vld [vmem:[#allocation3 + $0x130] sm:$0xf]  ;;  %v9161_v40 = vld [vmem:[#allocation3 + $0x134] sm:$0xf0] }
 0x94c   : > { %v4998_v63 = vmul.f32 %v4987_v20, %v9902_v21  ;;  %v4999_v0 = vmul.f32 %v4981_v48, %v9909_v24  ;;  %v9141_v55 = vld [vmem:[#allocation3 + $0x94] sm:$0xf0]  ;;  %v8536_v20 = vor.u32 %v9161_v40, %v8535_v50  ;;  %v9113_v50 = vld [vmem:[#allocation7 + $0x14] sm:$0xf0] }
 0x94d   : > { %v5435_v30 = vpack.c.bf16 %v5427_v18, %v5426_v12  ;;  %v8399_v18 = vld [vmem:[#allocation3 + $0x20] sm:$0xf]  ;;  %v8456_v48 = vor.u32 %v9141_v55, %v8455_v25  ;;  %v9155_v25 = vld [vmem:[#allocation3 + $0x104] sm:$0xf0] }
 0x94e   : > { %v5005_v43 = vpack.c.bf16 %v4999_v0, %v4998_v63  ;;  %5931 = vmatpush.bf16.msra.mxu2 %v8560_v1  ;;  %v9145_v56 = vld [vmem:[#allocation3 + $0xb4] sm:$0xf0]  ;;  %v8391_v63 = vld [vmem:[#allocation3 + $0x10] sm:$0xf]  ;;  %v9159_v0 = vld [vmem:[#allocation3 + $0x124] sm:$0xf0] }
 0x94f   : > { %5441 = vst [vmem:[#allocation3 + $0x198] sm:$0xff] %v5435_v30  ;;  %v8472_v44 = vor.u32 %v9145_v56, %v8471_v57  ;;  %v14819_v1 = vld [vmem:[#allocation40_spill] sm:$0xff] }
 0x950   : > { %5011 = vst [vmem:[#allocation3 + $0x28] sm:$0xff] %v5005_v43 }
 0x951   : > { %v5227_v27 = vpop.permute.xlu0 %5226  ;;  %v5397_v58 = vpop.permute.xlu2 %5396  ;;  %5910 = vmatpush.bf16.msrb.mxu0 %v8472_v44  ;;  %v8527_v44 = vld [vmem:[#allocation3 + $0x120] sm:$0xf] }
 0x952   : > { %v5233_v39 = vsel %vm921_vm4, %v14818_v52, %v5227_v27  ;;  %v5239_v59 = vsel %vm921_vm4, %v5227_v27, %v14818_v52  ;;  %v5408_v47 = vsel %vm1143_vm7, %v5385_v7, %v5397_v58  ;;  %v5414_v31 = vsel %vm1143_vm7, %v5397_v58, %v5385_v7  ;;  %5932 = vmatpush.bf16.msra.mxu2 %v8552_v5  ;;  %v5401_v61 = vpop.permute.xlu1 %5400 }
 0x953   : > { %v5250_v13 = vmul.f32 %v5233_v39, %v14787_v32  ;;  %v5251_v3 = vmul.f32 %v5239_v59, %v14788_v14  ;;  %v5420_v37 = vmul.f32 %v5408_v47, %v14807_v6  ;;  %v5421_v60 = vmul.f32 %v5414_v31, %v14808_v10  ;;  %v8519_v39 = vld [vmem:[#allocation3 + $0x110] sm:$0xf]  ;;  %v9136_v59 = vld [vmem:[#allocation3 + $0x74] sm:$0xf]  ;;  %v8441_v47 = vld [vmem:[#allocation3 + $0x78] sm:$0xf0] }
 0x954   : > { %v5410_v11 = vsel %vm1143_vm7, %v13475_v46, %v5401_v61  ;;  %v5416_v29 = vsel %vm1143_vm7, %v5401_v61, %v13475_v46  ;;  %v8392_v58 = vor.u32 %v9125_v16, %v8391_v63  ;;  %v8447_v16 = vld [vmem:[#allocation3 + $0x80] sm:$0xf] }
 0x955   : > { %v5257_v17 = vpack.c.bf16 %v5251_v3, %v5250_v13  ;;  %v5432_v7 = vpack.c.bf16 %v5421_v60, %v5420_v37  ;;  %v5424_v33 = vmul.f32 %v5410_v11, %v14807_v6  ;;  %v5425_v22 = vmul.f32 %v5416_v29, %v14808_v10  ;;  %5911 = vmatpush.bf16.msrb.mxu0 %v8464_v41  ;;  %v8335_v13 = vld [vmem:[#allocation7] sm:$0xf]  ;;  %v9112_v3 = vld [vmem:[#allocation7 + $0xc] sm:$0xf0] }
 0x956   : > { %5933 = vmatpush.bf16.msra.mxu2 %v8544_v51  ;;  %v8528_v41 = vor.u32 %v9159_v0, %v8527_v44  ;;  %v8444_v11 = vor.u32 %v9136_v59, %v8441_v47  ;;  %v13599_v29 = vor.u32 %v9112_v3, %v8335_v13  ;;  %v8511_v51 = vld [vmem:[#allocation3 + $0x100] sm:$0xf]  ;;  %v8497_v47 = vld [vmem:[#allocation3 + $0xe8] sm:$0xf0]  ;;  %v9130_v13 = vld [vmem:[#allocation3 + $0x44] sm:$0xf] }
 0x957   : > { %5263 = vst [vmem:[#allocation3 + $0x118] sm:$0xff] %v5257_v17  ;;  %v5434_v12 = vpack.c.bf16 %v5425_v22, %v5424_v33  ;;  %v9127_v45 = vld [vmem:[#allocation3 + $0x24] sm:$0xf0]  ;;  %v8433_v17 = vld [vmem:[#allocation3 + $0x68] sm:$0xf0] }
 0x958   : > { %5438 = vst [vmem:[#allocation3 + $0x180] sm:$0xff] %v5432_v7  ;;  %v8400_v46 = vor.u32 %v9127_v45, %v8399_v18  ;;  %v8569_v33 = vld [vmem:[#allocation3 + $0x178] sm:$0xf0]  ;;  %v8343_v22 = vld [vmem:[#allocation7 + $0x8] sm:$0xf]  ;;  %v8512_v45 = vor.u32 %v9155_v25, %v8511_v51 }
 0x959   : > { %5440 = vst [vmem:[#allocation3 + $0x190] sm:$0xff] %v5434_v12  ;;  %v5407_v42 = vpop.permute.xlu0 %5406  ;;  %5912 = vmatpush.bf16.msrb.mxu0 %v8456_v48  ;;  %v9134_v48 = vld [vmem:[#allocation3 + $0x64] sm:$0xf]  ;;  %v13608_v63 = vor.u32 %v9113_v50, %v8343_v22  ;;  %v8591_v0 = vld [vmem:[#allocation3 + $0x1a0] sm:$0xf] }
 0x95a   : > { %v5413_v30 = vsel %vm1143_vm7, %v14819_v1, %v5407_v42  ;;  %v5419_v28 = vsel %vm1143_vm7, %v5407_v42, %v14819_v1  ;;  %5887 = vmatpush.bf16.msrb.mxu3 %v8400_v46  ;;  %5934 = vmatpush.bf16.msra.mxu2 %v8536_v20  ;;  %v5095_v4 = vpop.permute.xlu1 %5094  ;;  %v9168_v46 = vld [vmem:[#allocation3 + $0x174] sm:$0xf]  ;;  %v8436_v20 = vor.u32 %v9134_v48, %v8433_v17  ;;  %v8425_v1 = vld [vmem:[#allocation3 + $0x58] sm:$0xf0]  ;;  %v8417_v3 = vld [vmem:[#allocation3 + $0x48] sm:$0xf0] }
 0x95b   : > { %v5430_v43 = vmul.f32 %v5413_v30, %v14807_v6  ;;  %v5431_v57 = vmul.f32 %v5419_v28, %v14808_v10  ;;  %v5101_v56 = vsel %vm761_vm2, %v13457_v53, %v5095_v4  ;;  %v5107_v15 = vsel %vm761_vm2, %v5095_v4, %v13457_v53  ;;  %v8383_v53 = vld [vmem:[#allocation3] sm:$0xf]  ;;  %v8505_v30 = vld [vmem:[#allocation3 + $0xf8] sm:$0xf0]  ;;  %v9128_v17 = vld [vmem:[#allocation3 + $0x34] sm:$0xf] }
 0x95c   : > { %v5118_v5 = vmul.f32 %v5107_v15, %v14753_v9  ;;  %v5119_v27 = vmul.f32 %v5101_v56, %v14752_v49  ;;  %v8384_v60 = vor.u32 %v9123_v35, %v8383_v53  ;;  %v8572_v42 = vor.u32 %v9168_v46, %v8569_v33  ;;  %v8337_v56 = vld [vmem:[#allocation7 + $0x10] sm:$0xf0]  ;;  %v8351_v33 = vld [vmem:[#allocation7 + $0x20] sm:$0xf]  ;;  %v9116_v50 = vld [vmem:[#allocation7 + $0x2c] sm:$0xf0] }
 0x95d   : > { %v5437_v52 = vpack.c.bf16 %v5431_v57, %v5430_v43  ;;  %v9152_v43 = vld [vmem:[#allocation3 + $0xf4] sm:$0xf]  ;;  %v8420_v51 = vor.u32 %v9130_v13, %v8417_v3  ;;  %v8409_v46 = vld [vmem:[#allocation3 + $0x38] sm:$0xf0] }
 0x95e   : > { %v5125_v31 = vpack.c.bf16 %v5119_v27, %v5118_v5  ;;  %5888 = vmatpush.bf16.msrb.mxu3 %v8392_v58  ;;  %5935 = vmatpush.bf16.msra.mxu2 %v8528_v41  ;;  %v9157_v61 = vld [vmem:[#allocation3 + $0x114] sm:$0xf0]  ;;  %v9110_v57 = vld [vmem:[#allocation7 + $0x4] sm:$0xf]  ;;  %v9166_v5 = vld [vmem:[#allocation3 + $0x164] sm:$0xf] }
 0x95f   : > { %5443 = vst [vmem:[#allocation3 + $0x1a8] sm:$0xff] %v5437_v52  ;;  %v8520_v37 = vor.u32 %v9157_v61, %v8519_v39  ;;  %v9132_v58 = vld [vmem:[#allocation3 + $0x54] sm:$0xf]  ;;  %v8508_v52 = vor.u32 %v9152_v43, %v8505_v30  ;;  %v8561_v39 = vld [vmem:[#allocation3 + $0x168] sm:$0xf0]  ;;  %v13611_v59 = vor.u32 %v9110_v57, %v8337_v56 }
 0x960   : > { %5131 = vst [vmem:[#allocation3 + $0x88] sm:$0xff] %v5125_v31  ;;  %v8583_v41 = vld [vmem:[#allocation3 + $0x190] sm:$0xf]  ;;  %v8428_v35 = vor.u32 %v9132_v58, %v8425_v1  ;;  %v8564_v31 = vor.u32 %v9166_v5, %v8561_v39  ;;  %v9173_v61 = vld [vmem:[#allocation3 + $0x194] sm:$0xf0] }
 0x961   : > { %v5399_v54 = vpop.permute.xlu0 %5398  ;;  %v8584_v53 = vor.u32 %v9173_v61, %v8583_v41  ;;  %v9162_v1 = vld [vmem:[#allocation3 + $0x144] sm:$0xf]  ;;  %v8481_v43 = vld [vmem:[#allocation3 + $0xc8] sm:$0xf0]  ;;  %v9160_v5 = vld [vmem:[#allocation3 + $0x134] sm:$0xf] }
 0x962   : > { %5889 = vmatpush.bf16.msrb.mxu3 %v8384_v60  ;;  %5936 = vmatpush.bf16.msra.mxu2 %v8520_v37  ;;  %v5387_v7 = vpop.permute.xlu1 %5386  ;;  %v8553_v37 = vld [vmem:[#allocation3 + $0x158] sm:$0xf0]  ;;  %v9150_v60 = vld [vmem:[#allocation3 + $0xe4] sm:$0xf]  ;;  %v9172_v58 = vld [vmem:[#allocation3 + $0x194] sm:$0xf] }
 0x963   : > { %v5409_v40 = vsel %vm1143_vm7, %v5387_v7, %v5399_v54  ;;  %v5415_v55 = vsel %vm1143_vm7, %v5399_v54, %v5387_v7  ;;  %v9164_v54 = vld [vmem:[#allocation3 + $0x154] sm:$0xf]  ;;  %v8500_v25 = vor.u32 %v9150_v60, %v8497_v47  ;;  %v8545_v7 = vld [vmem:[#allocation3 + $0x148] sm:$0xf0]  ;;  %v9174_v30 = vld [vmem:[#allocation3 + $0x1a4] sm:$0xf] }
 0x964   : > { %v5422_v12 = vmul.f32 %v5409_v40, %v14807_v6  ;;  %v5423_v18 = vmul.f32 %v5415_v55, %v14808_v10  ;;  %v8556_v22 = vor.u32 %v9164_v54, %v8553_v37  ;;  %v9111_v40 = vld [vmem:[#allocation7 + $0xc] sm:$0xf]  ;;  %v8345_v55 = vld [vmem:[#allocation7 + $0x18] sm:$0xf0]  ;;  %v8548_v57 = vor.u32 %v9162_v1, %v8545_v7  ;;  %v9126_v41 = vld [vmem:[#allocation3 + $0x24] sm:$0xf] }
 0x965   : > { %5890 = vmatmul.bf16.vlgmr.msrb.gmra.mxu3 %v13599_v29  ;;  %v8585_v47 = vld [vmem:[#allocation3 + $0x198] sm:$0xf0]  ;;  %v9124_v61 = vld [vmem:[#allocation3 + $0x14] sm:$0xf]  ;;  %v8353_v60 = vld [vmem:[#allocation7 + $0x30] sm:$0xf0] }
 0x966   : > { %5978 = vmatpush.bf16.msra.mxu3 %v8444_v11  ;;  %v5433_v28 = vpack.c.bf16 %v5423_v18, %v5422_v12  ;;  %5937 = vmatpush.bf16.msra.mxu2 %v8512_v45  ;;  %v9175_v4 = vld [vmem:[#allocation3 + $0x1a4] sm:$0xf0]  ;;  %v8489_v11 = vld [vmem:[#allocation3 + $0xd8] sm:$0xf0]  ;;  %v8575_v12 = vld [vmem:[#allocation3 + $0x180] sm:$0xf]  ;;  %v8588_v3 = vor.u32 %v9172_v58, %v8585_v47 }
 0x967   : > { %v8592_v15 = vor.u32 %v9175_v4, %v8591_v0  ;;  %v9139_v44 = vld [vmem:[#allocation3 + $0x84] sm:$0xf0]  ;;  %v8593_v45 = vld [vmem:[#allocation3 + $0x1a8] sm:$0xf0]  ;;  %v13616_v4 = vor.u32 %v9111_v40, %v8345_v55  ;;  %v9114_v37 = vld [vmem:[#allocation7 + $0x24] sm:$0xf] }
 0x968   : > { %5439 = vst [vmem:[#allocation3 + $0x188] sm:$0xff] %v5433_v28  ;;  %v8448_v27 = vor.u32 %v9139_v44, %v8447_v16  ;;  %v13614_v28 = vor.u32 %v9116_v50, %v8351_v33  ;;  %v8596_v56 = vor.u32 %v9174_v30, %v8593_v45  ;;  %v8359_v16 = vld [vmem:[#allocation7 + $0x28] sm:$0xf]  ;;  %v9117_v44 = vld [vmem:[#allocation7 + $0x34] sm:$0xf0]  ;;  %v8356_v50 = vor.u32 %v9114_v37, %v8353_v60 }
 0x969   : > { %5938 = vmatmul.bf16.vlgmr.msra.gmra.mxu2 %v13608_v63  ;;  %5959 = vmatpush.bf16.msra.mxu1 %v8592_v15  ;;  %v8401_v15 = vld [vmem:[#allocation3 + $0x28] sm:$0xf0]  ;;  %v9158_v33 = vld [vmem:[#allocation3 + $0x124] sm:$0xf]  ;;  %v9140_v1 = vld [vmem:[#allocation3 + $0x94] sm:$0xf] }
 0x96a   : > { %5979 = vmatpush.bf16.msra.mxu3 %v8436_v20  ;;  %6026 = vmatpush.bf16.msrb.mxu2 %v8572_v42  ;;  %v9148_v20 = vld [vmem:[#allocation3 + $0xd4] sm:$0xf]  ;;  %v8412_v42 = vor.u32 %v9128_v17, %v8409_v46  ;;  %v8529_v54 = vld [vmem:[#allocation3 + $0x128] sm:$0xf0]  ;;  %v9122_v46 = vld [vmem:[#allocation3 + $0x4] sm:$0xf] }
 0x96b   : > { %5913 = vmatpush.bf16.msrb.mxu0 %v8448_v27  ;;  %v8492_v0 = vor.u32 %v9148_v20, %v8489_v11  ;;  %v8537_v27 = vld [vmem:[#allocation3 + $0x138] sm:$0xf0]  ;;  %v8532_v40 = vor.u32 %v9158_v33, %v8529_v54  ;;  %v8465_v45 = vld [vmem:[#allocation3 + $0xa8] sm:$0xf0]  ;;  %v8367_v30 = vld [vmem:[#allocation7 + $0x40] sm:$0xf] }
 0x96c   : > { %v8540_v13 = vor.u32 %v9160_v5, %v8537_v27  ;;  %v8457_v5 = vld [vmem:[#allocation3 + $0x98] sm:$0xf0]  ;;  %v9121_v47 = vld [vmem:[#allocation7 + $0x54] sm:$0xf0]  ;;  %v8369_v37 = vld [vmem:[#allocation7 + $0x50] sm:$0xf0] }
 0x96d   : > { %5960 = vmatpush.bf16.msra.mxu1 %v8584_v53  ;;  %v8473_v53 = vld [vmem:[#allocation3 + $0xb8] sm:$0xf0]  ;;  %v8460_v27 = vor.u32 %v9140_v1, %v8457_v5 }
 0x96e   : > { %5980 = vmatpush.bf16.msra.mxu3 %v8428_v35  ;;  %6027 = vmatpush.bf16.msrb.mxu2 %v8564_v31  ;;  %v9146_v35 = vld [vmem:[#allocation3 + $0xc4] sm:$0xf]  ;;  %v13621_v31 = vor.u32 %v9117_v44, %v8359_v16  ;;  %v8513_v44 = vld [vmem:[#allocation3 + $0x108] sm:$0xf0]  ;;  %v9119_v54 = vld [vmem:[#allocation7 + $0x4c] sm:$0xf] }
 0x96f   : > { %6002 = vmatpush.bf16.msra.mxu0 %v8508_v52  ;;  %v9171_v18 = vld [vmem:[#allocation3 + $0x184] sm:$0xf0]  ;;  %v8404_v52 = vor.u32 %v9126_v41, %v8401_v15  ;;  %v8484_v39 = vor.u32 %v9146_v35, %v8481_v43  ;;  %v8577_v11 = vld [vmem:[#allocation3 + $0x188] sm:$0xf0]  ;;  %v9154_v16 = vld [vmem:[#allocation3 + $0x104] sm:$0xf] }
 0x970   : > { %5914 = vmatmul.bf16.vlgmr.msrb.gmra.mxu0 %v13611_v59  ;;  %v8576_v48 = vor.u32 %v9171_v18, %v8575_v12  ;;  %v8385_v12 = vld [vmem:[#allocation3 + $0x8] sm:$0xf0]  ;;  %v9142_v18 = vld [vmem:[#allocation3 + $0xa4] sm:$0xf]  ;;  %v8516_v35 = vor.u32 %v9154_v16, %v8513_v44 }
 0x971   : > { %v8388_v20 = vor.u32 %v9122_v46, %v8385_v12  ;;  %v8361_v15 = vld [vmem:[#allocation7 + $0x38] sm:$0xf0] }
 0x972   : > { %5981 = vmatpush.bf16.msra.mxu3 %v8420_v51  ;;  %6028 = vmatpush.bf16.msrb.mxu2 %v8556_v22  ;;  %v8393_v51 = vld [vmem:[#allocation3 + $0x18] sm:$0xf0]  ;;  %v9170_v22 = vld [vmem:[#allocation3 + $0x184] sm:$0xf] }
 0x973   : > { %6003 = vmatpush.bf16.msra.mxu0 %v8500_v25  ;;  %5961 = vmatpush.bf16.msra.mxu1 %v8576_v48  ;;  %v9144_v25 = vld [vmem:[#allocation3 + $0xb4] sm:$0xf]  ;;  %v8396_v17 = vor.u32 %v9124_v61, %v8393_v51  ;;  %v8580_v55 = vor.u32 %v9170_v22, %v8577_v11  ;;  %v8521_v48 = vld [vmem:[#allocation3 + $0x118] sm:$0xf0]  ;;  %v9138_v61 = vld [vmem:[#allocation3 + $0x84] sm:$0xf] }
 0x974   : > { %v8476_v7 = vor.u32 %v9144_v25, %v8473_v53  ;;  %v9118_v53 = vld [vmem:[#allocation7 + $0x44] sm:$0xf]  ;;  %v8377_v11 = vld [vmem:[#allocation7 + $0x58] sm:$0xf0] }
 0x975   : > { %5895 = vmatmul.bf16.gmra.mxu3 %v13614_v28  ;;  %v8372_v60 = vor.u32 %v9118_v53, %v8369_v37  ;;  %v8380_v51 = vor.u32 %v9119_v54, %v8377_v11 }
 0x976   : > { %5982 = vmatpush.bf16.msra.mxu3 %v8412_v42  ;;  %6029 = vmatpush.bf16.msrb.mxu2 %v8548_v57  ;;  %v8468_v42 = vor.u32 %v9142_v18, %v8465_v45  ;;  %v9120_v57 = vld [vmem:[#allocation7 + $0x4c] sm:$0xf0] }
 0x977   : > { %6004 = vmatpush.bf16.msra.mxu0 %v8492_v0  ;;  %6055 = vmatpush.bf16.msrb.mxu1 %v8596_v56  ;;  %v9156_v0 = vld [vmem:[#allocation3 + $0x114] sm:$0xf]  ;;  %v9115_v56 = vld [vmem:[#allocation7 + $0x2c] sm:$0xf]  ;;  %v8368_v58 = vor.u32 %v9120_v57, %v8367_v30 }
 0x978   : > { %8597 = vmatmul.msk.bf16.vlgmr.msra.gmra.mxu1 %vm4726_vm9, %v13616_v4  ;;  %v8524_v43 = vor.u32 %v9156_v0, %v8521_v48  ;;  %v8364_v41 = vor.u32 %v9115_v56, %v8361_v15  ;;  %v14820_v48 = vld [vmem:[#allocation61_spill] sm:$0xff] }
 0x979   : > { %5943 = vmatmul.bf16.gmra.mxu2 %v13621_v31 }
 0x97a   : > { %5983 = vmatpush.bf16.msra.mxu3 %v8404_v52  ;;  %6030 = vmatpush.bf16.msrb.mxu2 %v8540_v13  ;;  %v8449_v52 = vld [vmem:[#allocation3 + $0x88] sm:$0xf0] }
 0x97b   : > { %6005 = vmatpush.bf16.msra.mxu0 %v8484_v39  ;;  %6056 = vmatpush.bf16.msrb.mxu1 %v8588_v3  ;;  %v8375_v39 = vld [vmem:[#allocation7 + $0x48] sm:$0xf]  ;;  %v8452_v13 = vor.u32 %v9138_v61, %v8449_v52 }
 0x97c   : > { %v8376_v3 = vor.u32 %v9121_v47, %v8375_v39 }
 0x97e   : > { %5984 = vmatpush.bf16.msra.mxu3 %v8396_v17  ;;  %6031 = vmatpush.bf16.msrb.mxu2 %v8532_v40 }
 0x97f   : > { %6006 = vmatpush.bf16.msra.mxu0 %v8476_v7  ;;  %6057 = vmatpush.bf16.msrb.mxu1 %v8580_v55 }
 0x980   : > { %5919 = vmatmul.bf16.gmra.mxu0 %v8356_v50 }
 0x982   : > { %5985 = vmatpush.bf16.msra.mxu3 %v8388_v20  ;;  %6032 = vmatpush.bf16.msrb.mxu2 %v8524_v43 }
 0x983   : > { %6007 = vmatpush.bf16.msra.mxu0 %v8468_v42 }
 0x985   : > { %5900 = vmatmul.bf16.gmra.mxu3 %v8368_v58 }
 0x986   : > { %6033 = vmatpush.bf16.msrb.mxu2 %v8516_v35 }
 0x987   : > { %6008 = vmatpush.bf16.msra.mxu0 %v8460_v27 }
 0x988   : > { %8598 = vmatmul.msk.bf16.gmra.mxu1 %vm4726_vm9, %v8364_v41 }
 0x989   : > { %5948 = vmatmul.bf16.gmra.mxu2 %v8376_v3 }
 0x98b   : > { %6009 = vmatpush.bf16.msra.mxu0 %v8452_v13 }
 0x990   : > { %5924 = vmatmul.bf16.gmra.mxu0 %v8372_v60 }
 0x995   : > { %5986 = vmatmul.bf16.vlgmr.msra.gmra.mxu3 %v13599_v29  ;;  %v13635_v29 = vpop.permute.xlu1 %5528 }
 0x998   : > { %8599 = vmatmul.msk.bf16.gmra.mxu1 %vm4726_vm9, %v8380_v51 }
 0x999   : > { %6034 = vmatmul.bf16.vlgmr.msrb.gmra.mxu2 %v13608_v63  ;;  %v5519_v63 = vpop.permute.xlu0 %5518 }
 0x99d   : > { %v13637_v33 = vpop.permute.xlu1 %5523 }
 0x9a0   : > { %6010 = vmatmul.bf16.vlgmr.msra.gmra.mxu0 %v13611_v59 }
 0x9a5   : > { %5991 = vmatmul.bf16.gmra.mxu3 %v13614_v28 }
 0x9a8   : > { %8600 = vmatmul.msk.bf16.vlgmr.msrb.gmra.mxu1 %vm4726_vm9, %v13616_v4 }
 0x9a9   : > { %6039 = vmatmul.bf16.gmra.mxu2 %v13621_v31 }
 0x9b0   : > { %6015 = vmatmul.bf16.gmra.mxu0 %v8356_v50 }
 0x9b5   : > { %5996 = vmatmul.bf16.gmra.mxu3 %v8368_v58 }
 0x9b8   : > { %8601 = vmatmul.msk.bf16.gmra.mxu1 %vm4726_vm9, %v8364_v41 }
 0x9b9   : > { %6044 = vmatmul.bf16.gmra.mxu2 %v8376_v3  ;;  %v5534_v3 = vpop.permute.xlu2 %5533 }
 0x9c0   : > { %6020 = vmatmul.bf16.gmra.mxu0 %v8372_v60 }
 0x9c8   : > { %8602 = vmatmul.msk.bf16.gmra.mxu1 %vm4726_vm9, %v8380_v51 }
 0x9e8   : > { %v5891_v25 = vpop.f32.mrf.mxu3 }
 0x9e9   : > { %v5892_v59 = vadd.f32 %v5891_v25, %v5519_v63 }
 0x9ec   : > { %v5939_v28 = vpop.f32.mrf.mxu2 }
 0x9ed   : > { %v5915_v17 = vpop.f32.mrf.mxu0 }
 0x9ee   : > { %v5916_v7 = vadd.f32 %v5915_v17, %v5892_v59 }
 0x9f0   : > { %v5893_v4 = vpop.f32.mrf.mxu3  ;;  %v5940_v31 = vadd.f32 %v5939_v28, %v5916_v7 }
 0x9f1   : > { %v5894_v22 = vadd.f32 %v5893_v4, %v13637_v33 }
 0x9f4   : > { %v5941_v12 = vpop.f32.mrf.mxu2 }
 0x9f5   : > { %v5917_v50 = vpop.f32.mrf.mxu0  ;;  %v5963_v40 = vpop.f32.mrf.mxu1 }
 0x9f6   : > { %v5964_v55 = vadd.f32 %v5963_v40, %v5940_v31  ;;  %v5918_v18 = vadd.f32 %v5917_v50, %v5894_v22 }
 0x9f8   : > { %v6074_v45 = vmax.f32 %v5964_v55, 0.0  ;;  %v5896_v20 = vpop.f32.mrf.mxu3  ;;  %v5942_v42 = vadd.f32 %v5941_v12, %v5918_v18 }
 0x9f9   : > { %v5897_v56 = vadd.f32 %v5896_v20, %v13635_v29 }
 0x9fa   : > { %v13641_v46 = vmul.f32 %v6074_v45, %v14820_v48 }
 0x9fc   : > { %6158 = vrot.lane.b32.xlu0 %v13641_v46, %s9552_s24  ;;  %6218 = vrot.lane.b32.xlu2 %v13641_v46, %s9553_s29  ;;  %v5944_v43 = vpop.f32.mrf.mxu2 }
 0x9fd   : > { %6098 = vrot.lane.b32.xlu1 %v13641_v46, %s9551_s9  ;;  %v5920_v0 = vpop.f32.mrf.mxu0  ;;  %v5965_v1 = vpop.f32.mrf.mxu1 }
 0x9fe   : > { %v5966_v30 = vadd.f32 %v5965_v1, %v5942_v42  ;;  %v5921_v44 = vadd.f32 %v5920_v0, %v5897_v56  ;;  %v5539_v1 = vpop.permute.xlu2 %5538  ;;  %v14821_v56 = vld [vmem:[#allocation62_spill] sm:$0xff] }
 0xa00   : > { %v6076_v57 = vmax.f32 %v5966_v30, 0.0  ;;  %v5898_v16 = vpop.f32.mrf.mxu3  ;;  %v5945_v41 = vadd.f32 %v5944_v43, %v5921_v44 }
 0xa01   : > { %v5899_v53 = vadd.f32 %v5898_v16, %v5534_v3 }
 0xa02   : > { %v13651_v15 = vmul.f32 %v6076_v57, %v14820_v48 }
 0xa04   : > { %6220 = vrot.lane.b32.xlu0 %v13651_v15, %s9553_s29  ;;  %6350 = vrot.lane.b32.xlu2 %v13641_v46, %s9555_s28  ;;  %v5946_v58 = vpop.f32.mrf.mxu2 }
 0xa05   : > { %6278 = vrot.lane.b32.xlu1 %v13641_v46, %s9554_s8  ;;  %v5922_v5 = vpop.f32.mrf.mxu0  ;;  %v5968_v27 = vpop.f32.mrf.mxu1 }
 0xa06   : > { %v5969_v35 = vadd.f32 %v5968_v27, %v5945_v41  ;;  %v5923_v54 = vadd.f32 %v5922_v5, %v5899_v53 }
 0xa08   : > { %v5901_v52 = vpop.f32.mrf.mxu3  ;;  %v6078_v61 = vmax.f32 %v5969_v35, 0.0  ;;  %v5947_v59 = vadd.f32 %v5946_v58, %v5923_v54 }
 0xa09   : > { %v5902_v57 = vadd.f32 %v5901_v52, %v5539_v1 }
 0xa0a   : > { %v13666_v37 = vmul.f32 %v6078_v61, %v14820_v48 }
 0xa0c   : > { %6352 = vrot.lane.b32.xlu0 %v13651_v15, %s9555_s28  ;;  %6470 = vrot.lane.b32.xlu2 %v13641_v46, %s9557_s12  ;;  %v5949_v13 = vpop.f32.mrf.mxu2 }
 0xa0d   : > { %6160 = vrot.lane.b32.xlu1 %v13651_v15, %s9552_s24  ;;  %v5925_v39 = vpop.f32.mrf.mxu0  ;;  %v5970_v47 = vpop.f32.mrf.mxu1 }
 0xa0e   : > { %v5971_v17 = vadd.f32 %v5970_v47, %v5947_v59  ;;  %v5926_v58 = vadd.f32 %v5925_v39, %v5902_v57 }
 0xa10   : > { %v13668_v60 = vpop.f32.mrf.mxu3  ;;  %v6080_v22 = vmax.f32 %v5971_v17, 0.0  ;;  %v5950_v54 = vadd.f32 %v5949_v13, %v5926_v58 }
 0xa12   : > { %v13689_v55 = vmul.f32 %v6080_v22, %v14820_v48 }
 0xa14   : > { %6472 = vrot.lane.b32.xlu0 %v13651_v15, %s9557_s12  ;;  %6410 = vrot.lane.b32.xlu2 %v13641_v46, %s9556_s16  ;;  %v13678_v25 = vpop.f32.mrf.mxu2 }
 0xa15   : > { %6222 = vrot.lane.b32.xlu1 %v13666_v37, %s9553_s29  ;;  %v13676_v11 = vpop.f32.mrf.mxu0  ;;  %v5973_v51 = vpop.f32.mrf.mxu1 }
 0xa16   : > { %v5974_v59 = vadd.f32 %v5973_v51, %v5950_v54 }
 0xa18   : > { %v5987_v28 = vpop.f32.mrf.mxu3  ;;  %v6082_v51 = vmax.f32 %v5974_v59, 0.0 }
 0xa19   : > { %v5988_v7 = vadd.f32 %v5987_v28, %v5519_v63 }
 0xa1c   : > { %6412 = vrot.lane.b32.xlu0 %v13651_v15, %s9556_s16  ;;  %6100 = vrot.lane.b32.xlu2 %v13651_v15, %s9551_s9  ;;  %v6035_v50 = vpop.f32.mrf.mxu2 }
 0xa1d   : > { %6162 = vrot.lane.b32.xlu1 %v13666_v37, %s9552_s24  ;;  %v13686_v4 = vpop.f32.mrf.mxu1  ;;  %v6011_v31 = vpop.f32.mrf.mxu0 }
 0xa1e   : > { %v6012_v40 = vadd.f32 %v6011_v31, %v5988_v7 }
 0xa20   : > { %v5989_v12 = vpop.f32.mrf.mxu3  ;;  %v6036_v63 = vadd.f32 %v6035_v50, %v6012_v40 }
 0xa21   : > { %v5990_v18 = vadd.f32 %v5989_v12, %v13637_v33 }
 0xa24   : > { %6102 = vrot.lane.b32.xlu0 %v13666_v37, %s9551_s9  ;;  %6280 = vrot.lane.b32.xlu2 %v13651_v15, %s9554_s8  ;;  %v6037_v0 = vpop.f32.mrf.mxu2 }
 0xa25   : > { %6476 = vrot.lane.b32.xlu1 %v13689_v55, %s9557_s12  ;;  %v6013_v45 = vpop.f32.mrf.mxu0  ;;  %v6059_v20 = vpop.f32.mrf.mxu1 }
 0xa26   : > { %v6060_v42 = vadd.f32 %v6059_v20, %v6036_v63  ;;  %v6014_v30 = vadd.f32 %v6013_v45, %v5990_v18 }
 0xa28   : > { %v6075_v43 = vmax.f32 %v6060_v42, 0.0  ;;  %v5992_v33 = vpop.f32.mrf.mxu3  ;;  %v6038_v5 = vadd.f32 %v6037_v0, %v6014_v30 }
 0xa29   : > { %v5993_v27 = vadd.f32 %v5992_v33, %v13635_v29 }
 0xa2a   : > { %v13699_v16 = vmul.f32 %v6075_v43, %v14821_v56  ;;  %v5544_v43 = vpop.permute.xlu0 %5543 }
 0xa2b   : > { %v5904_v33 = vadd.f32 %v13668_v60, %v5544_v43 }
 0xa2c   : > { %v6338_v44 = vpack.c.bf16 %v13699_v16, %v13641_v46  ;;  %6474 = vrot.lane.b32.xlu0 %v13666_v37, %s9557_s12  ;;  %6282 = vrot.lane.b32.xlu2 %v13666_v37, %s9554_s8  ;;  %v6040_v47 = vpop.f32.mrf.mxu2 }
 0xa2d   : > { %6416 = vrot.lane.b32.xlu1 %v13689_v55, %s9556_s16  ;;  %v6016_v41 = vpop.f32.mrf.mxu0  ;;  %v6061_v35 = vpop.f32.mrf.mxu1  ;;  %v5928_v58 = vadd.f32 %v13676_v11, %v5904_v33 }
 0xa2e   : > { %6344 = vst [vmem:[#allocation3 + $0xc0] sm:$0xff] %v6338_v44  ;;  %v6062_v52 = vadd.f32 %v6061_v35, %v6038_v5  ;;  %v6017_v61 = vadd.f32 %v6016_v41, %v5993_v27 }
 0xa2f   : > { %v5952_v11 = vadd.f32 %v13678_v25, %v5928_v58 }
 0xa30   : > { %v6077_v53 = vmax.f32 %v6062_v52, 0.0  ;;  %v5994_v17 = vpop.f32.mrf.mxu3  ;;  %v6041_v39 = vadd.f32 %v6040_v47, %v6017_v61 }
 0xa31   : > { %v5995_v7 = vadd.f32 %v5994_v17, %v5534_v3  ;;  %v6094_v3 = vmul.f32 %v6082_v51, %v14820_v48 }
 0xa32   : > { %v13711_v29 = vmul.f32 %v6077_v53, %v14821_v56 }
 0xa34   : > { %v6339_v28 = vpack.c.bf16 %v13711_v29, %v13651_v15  ;;  %6414 = vrot.lane.b32.xlu0 %v13666_v37, %s9556_s16  ;;  %6354 = vrot.lane.b32.xlu2 %v13666_v37, %s9555_s28  ;;  %v6042_v50 = vpop.f32.mrf.mxu2 }
 0xa35   : > { %6104 = vrot.lane.b32.xlu1 %v13689_v55, %s9551_s9  ;;  %v6018_v13 = vpop.f32.mrf.mxu0  ;;  %v6064_v31 = vpop.f32.mrf.mxu1 }
 0xa36   : > { %6345 = vst [vmem:[#allocation3 + $0xc8] sm:$0xff] %v6339_v28  ;;  %v6065_v22 = vadd.f32 %v6064_v31, %v6041_v39  ;;  %v6019_v40 = vadd.f32 %v6018_v13, %v5995_v7  ;;  %v5976_v28 = vadd.f32 %v13686_v4, %v5952_v11 }
 0xa38   : > { %v6079_v12 = vmax.f32 %v6065_v22, 0.0  ;;  %v5997_v18 = vpop.f32.mrf.mxu3  ;;  %v6043_v20 = vadd.f32 %v6042_v50, %v6019_v40  ;;  %v6084_v22 = vmax.f32 %v5976_v28, 0.0 }
 0xa39   : > { %v5998_v42 = vadd.f32 %v5997_v18, %v5539_v1 }
 0xa3a   : > { %v13722_v63 = vmul.f32 %v6079_v12, %v14821_v56  ;;  %v6096_v50 = vmul.f32 %v6084_v22, %v14820_v48 }
 0xa3c   : > { %v6340_v45 = vpack.c.bf16 %v13722_v63, %v13666_v37  ;;  %6284 = vrot.lane.b32.xlu0 %v13689_v55, %s9554_s8  ;;  %6224 = vrot.lane.b32.xlu2 %v13689_v55, %s9553_s29  ;;  %v6045_v44 = vpop.f32.mrf.mxu2 }
 0xa3d   : > { %6166 = vrot.lane.b32.xlu1 %v6094_v3, %s9552_s24  ;;  %v6021_v0 = vpop.f32.mrf.mxu0  ;;  %v6066_v30 = vpop.f32.mrf.mxu1 }
 0xa3e   : > { %6346 = vst [vmem:[#allocation3 + $0xd0] sm:$0xff] %v6340_v45  ;;  %v6067_v57 = vadd.f32 %v6066_v30, %v6043_v20  ;;  %v6022_v5 = vadd.f32 %v6021_v0, %v5998_v42 }
 0xa40   : > { %v6081_v27 = vmax.f32 %v6067_v57, 0.0  ;;  %v5999_v41 = vpop.f32.mrf.mxu3  ;;  %v6046_v52 = vadd.f32 %v6045_v44, %v6022_v5 }
 0xa41   : > { %v6000_v47 = vadd.f32 %v5999_v41, %v5544_v43 }
 0xa42   : > { %v13734_v1 = vmul.f32 %v6081_v27, %v14821_v56 }
 0xa44   : > { %v6341_v35 = vpack.c.bf16 %v13734_v1, %v13689_v55  ;;  %6356 = vrot.lane.b32.xlu0 %v13689_v55, %s9555_s28  ;;  %6164 = vrot.lane.b32.xlu2 %v13689_v55, %s9552_s24  ;;  %v6047_v17 = vpop.f32.mrf.mxu2 }
 0xa45   : > { %6418 = vrot.lane.b32.xlu1 %v6094_v3, %s9556_s16  ;;  %v6023_v60 = vpop.f32.mrf.mxu0  ;;  %v6069_v61 = vpop.f32.mrf.mxu1 }
 0xa46   : > { %6347 = vst [vmem:[#allocation3 + $0xd8] sm:$0xff] %v6341_v35  ;;  %v6070_v53 = vadd.f32 %v6069_v61, %v6046_v52  ;;  %v6024_v54 = vadd.f32 %v6023_v60, %v6000_v47 }
 0xa48   : > { %v6083_v59 = vmax.f32 %v6070_v53, 0.0  ;;  %v6048_v13 = vadd.f32 %v6047_v17, %v6024_v54 }
 0xa4a   : > { %v13747_v39 = vmul.f32 %v6083_v59, %v14821_v56 }
 0xa4c   : > { %v6342_v7 = vpack.c.bf16 %v13747_v39, %v6094_v3  ;;  %6478 = vrot.lane.b32.xlu0 %v6094_v3, %s9557_s12  ;;  %6106 = vrot.lane.b32.xlu2 %v6094_v3, %s9551_s9 }
 0xa4d   : > { %6286 = vrot.lane.b32.xlu1 %v6094_v3, %s9554_s8  ;;  %v6071_v31 = vpop.f32.mrf.mxu1 }
 0xa4e   : > { %6348 = vst [vmem:[#allocation3 + $0xe0] sm:$0xff] %v6342_v7  ;;  %v6072_v25 = vadd.f32 %v6071_v31, %v6048_v13 }
 0xa50   : > { %v6085_v51 = vmax.f32 %v6072_v25, 0.0 }
 0xa52   : > { %v13755_v4 = vmul.f32 %v6085_v51, %v14821_v56 }
 0xa54   : > { %v6343_v40 = vpack.c.bf16 %v13755_v4, %v6096_v50  ;;  %6358 = vrot.lane.b32.xlu0 %v6094_v3, %s9555_s28  ;;  %6168 = vrot.lane.b32.xlu2 %v6096_v50, %s9552_s24 }
 0xa55   : > { %6226 = vrot.lane.b32.xlu1 %v6094_v3, %s9553_s29 }
 0xa56   : > { %6349 = vst [vmem:[#allocation3 + $0xe8] sm:$0xff] %v6343_v40  ;;  %v13761_v12 = vpop.permute.xlu2 %6218 }
 0xa5c   : > { %6538 = vrot.lane.b32.xlu0 %v6094_v3, %s9558_s15  ;;  %6420 = vrot.lane.b32.xlu2 %v6096_v50, %s9556_s16 }
 0xa5d   : > { %6480 = vrot.lane.b32.xlu1 %v6096_v50, %s9557_s12 }
 0xa5e   : > { %v13766_v18 = vpop.permute.xlu2 %6350 }
 0xa64   : > { %6108 = vrot.lane.b32.xlu0 %v6096_v50, %s9551_s9  ;;  %6288 = vrot.lane.b32.xlu2 %v6096_v50, %s9554_s8 }
 0xa65   : > { %6360 = vrot.lane.b32.xlu1 %v6096_v50, %s9555_s28 }
 0xa66   : > { %v13771_v45 = vpop.permute.xlu2 %6470 }
 0xa6c   : > { %6228 = vrot.lane.b32.xlu2 %v6096_v50, %s9553_s29  ;;  %6110 = vrot.lane.b32.xlu0 %v13699_v16, %s9551_s9 }
 0xa6d   : > { %6540 = vrot.lane.b32.xlu1 %v6096_v50, %s9558_s15 }
 0xa6e   : > { %v13777_v3 = vpop.permute.xlu0 %6158  ;;  %v13779_v20 = vpop.permute.xlu2 %6410 }
 0xa6f   : > { %v13781_v42 = vpop.permute.xlu1 %6098 }
 0xa74   : > { %6290 = vrot.lane.b32.xlu0 %v13699_v16, %s9554_s8  ;;  %6170 = vrot.lane.b32.xlu2 %v13699_v16, %s9552_s24 }
 0xa75   : > { %6230 = vrot.lane.b32.xlu1 %v13699_v16, %s9553_s29 }
 0xa76   : > { %v13789_v0 = vpop.permute.xlu0 %6220  ;;  %v13791_v30 = vpop.permute.xlu2 %6100 }
 0xa77   : > { %v13793_v43 = vpop.permute.xlu1 %6278 }
 0xa7c   : > { %6172 = vrot.lane.b32.xlu0 %v13711_v29, %s9552_s24  ;;  %6232 = vrot.lane.b32.xlu2 %v13711_v29, %s9553_s29 }
 0xa7d   : > { %6362 = vrot.lane.b32.xlu1 %v13699_v16, %s9555_s28 }
 0xa7e   : > { %v13801_v57 = vpop.permute.xlu0 %6352  ;;  %v13803_v33 = vpop.permute.xlu2 %6280 }
 0xa7f   : > { %v13805_v44 = vpop.permute.xlu1 %6160 }
 0xa84   : > { %6234 = vrot.lane.b32.xlu0 %v13722_v63, %s9553_s29  ;;  %6364 = vrot.lane.b32.xlu2 %v13711_v29, %s9555_s28 }
 0xa85   : > { %6482 = vrot.lane.b32.xlu1 %v13699_v16, %s9557_s12 }
 0xa86   : > { %v13813_v5 = vpop.permute.xlu0 %6472  ;;  %v13815_v27 = vpop.permute.xlu2 %6282 }
 0xa87   : > { %v13817_v58 = vpop.permute.xlu1 %6222 }
 0xa8c   : > { %6174 = vrot.lane.b32.xlu0 %v13722_v63, %s9552_s24  ;;  %6484 = vrot.lane.b32.xlu2 %v13711_v29, %s9557_s12 }
 0xa8d   : > { %6422 = vrot.lane.b32.xlu1 %v13699_v16, %s9556_s16 }
 0xa8e   : > { %v13825_v41 = vpop.permute.xlu0 %6412  ;;  %v13827_v35 = vpop.permute.xlu2 %6354 }
 0xa8f   : > { %v13829_v52 = vpop.permute.xlu1 %6162 }
 0xa94   : > { %6488 = vrot.lane.b32.xlu0 %v13734_v1, %s9557_s12  ;;  %6424 = vrot.lane.b32.xlu2 %v13711_v29, %s9556_s16 }
 0xa95   : > { %6112 = vrot.lane.b32.xlu1 %v13711_v29, %s9551_s9 }
 0xa96   : > { %v13837_v47 = vpop.permute.xlu0 %6102  ;;  %v13839_v60 = vpop.permute.xlu2 %6224 }
 0xa97   : > { %14822 = vst [vmem:[#allocation53_spill] sm:$0xff] %v13839_v60  ;;  %v13841_v61 = vpop.permute.xlu1 %6476 }
 0xa9c   : > { %6428 = vrot.lane.b32.xlu0 %v13734_v1, %s9556_s16  ;;  %6486 = vrot.lane.b32.xlu2 %v13722_v63, %s9557_s12 }
 0xa9d   : > { %6292 = vrot.lane.b32.xlu1 %v13711_v29, %s9554_s8 }
 0xa9e   : > { %v13849_v53 = vpop.permute.xlu0 %6474  ;;  %v13851_v11 = vpop.permute.xlu2 %6164 }
 0xa9f   : > { %14823 = vst [vmem:[#allocation54_spill] sm:$0xff] %v13851_v11  ;;  %v13853_v54 = vpop.permute.xlu1 %6416 }
 0xaa4   : > { %6116 = vrot.lane.b32.xlu0 %v13734_v1, %s9551_s9  ;;  %6426 = vrot.lane.b32.xlu2 %v13722_v63, %s9556_s16 }
 0xaa5   : > { %6294 = vrot.lane.b32.xlu1 %v13722_v63, %s9554_s8 }
 0xaa6   : > { %v13861_v59 = vpop.permute.xlu0 %6414  ;;  %v13863_v17 = vpop.permute.xlu2 %6106 }
 0xaa7   : > { %14824 = vst [vmem:[#allocation31_spill] sm:$0xff] %v13863_v17  ;;  %v13865_v28 = vpop.permute.xlu1 %6104 }
 0xaac   : > { %6178 = vrot.lane.b32.xlu0 %v13747_v39, %s9552_s24  ;;  %6114 = vrot.lane.b32.xlu2 %v13722_v63, %s9551_s9 }
 0xaad   : > { %6366 = vrot.lane.b32.xlu1 %v13722_v63, %s9555_s28 }
 0xaae   : > { %v13873_v7 = vpop.permute.xlu0 %6284  ;;  %v13875_v13 = vpop.permute.xlu2 %6168 }
 0xaaf   : > { %14825 = vst [vmem:[#allocation33_spill] sm:$0xff] %v13875_v13  ;;  %v13877_v31 = vpop.permute.xlu1 %6166 }
 0xab4   : > { %6430 = vrot.lane.b32.xlu0 %v13747_v39, %s9556_s16  ;;  %6296 = vrot.lane.b32.xlu2 %v13734_v1, %s9554_s8 }
 0xab5   : > { %6236 = vrot.lane.b32.xlu1 %v13734_v1, %s9553_s29 }
 0xab6   : > { %v13885_v22 = vpop.permute.xlu0 %6356  ;;  %v13887_v25 = vpop.permute.xlu2 %6420 }
 0xab7   : > { %14826 = vst [vmem:[#allocation49_spill] sm:$0xff] %v13887_v25  ;;  %v13889_v51 = vpop.permute.xlu1 %6418 }
 0xabc   : > { %6298 = vrot.lane.b32.xlu0 %v13747_v39, %s9554_s8  ;;  %6368 = vrot.lane.b32.xlu2 %v13734_v1, %s9555_s28 }
 0xabd   : > { %6176 = vrot.lane.b32.xlu1 %v13734_v1, %s9552_s24 }
 0xabe   : > { %v13897_v50 = vpop.permute.xlu0 %6478  ;;  %v13899_v40 = vpop.permute.xlu2 %6288 }
 0xabf   : > { %14827 = vst [vmem:[#allocation41_spill] sm:$0xff] %v13899_v40  ;;  %v13901_v56 = vpop.permute.xlu1 %6286 }
 0xac0   : > { %14828 = vst [vmem:[#allocation42_spill] sm:$0xff] %v13901_v56 }
 0xac4   : > { %6238 = vrot.lane.b32.xlu0 %v13747_v39, %s9553_s29  ;;  %6490 = vrot.lane.b32.xlu2 %v13747_v39, %s9557_s12 }
 0xac5   : > { %6118 = vrot.lane.b32.xlu1 %v13747_v39, %s9551_s9 }
 0xac6   : > { %v13909_v48 = vpop.permute.xlu0 %6358  ;;  %v13911_v25 = vpop.permute.xlu2 %6228 }
 0xac7   : > { %14829 = vst [vmem:[#allocation34_spill] sm:$0xff] %v13911_v25  ;;  %v13913_v13 = vpop.permute.xlu1 %6226 }
 0xac8   : > { %14830 = vst [vmem:[#allocation39_spill] sm:$0xff] %v13913_v13 }
 0xacc   : > { %6492 = vrot.lane.b32.xlu0 %v13755_v4, %s9557_s12  ;;  %6370 = vrot.lane.b32.xlu2 %v13747_v39, %s9555_s28  ;;  %s14850_s12 = sld [smem:[#allocation73_spill]] }
 0xacd   : > { %6180 = vrot.lane.b32.xlu1 %v13755_v4, %s9552_s24 }
 0xace   : > { %v13921_v40 = vpop.permute.xlu0 %6538  ;;  %v6171_v17 = vpop.permute.xlu2 %6170 }
 0xacf   : > { %14831 = vst [vmem:[#allocation27_spill] sm:$0xff] %v13921_v40  ;;  %v13923_v11 = vpop.permute.xlu1 %6480  ;;  %v6182_v25 = vsel %vm687_vm1, %v13777_v3, %v6171_v17  ;;  %v6188_v13 = vsel %vm687_vm1, %v6171_v17, %v13777_v3 }
 0xad0   : > { %14832 = vst [vmem:[#allocation35_spill] sm:$0xff] %v13923_v11  ;;  %v6194_v10 = vmul.f32 %v6188_v13, %v14748_v36  ;;  %v6195_v6 = vmul.f32 %v6182_v25, %v9990_v26 }
 0xad2   : > { %v6206_v56 = vpack.c.bf16 %v6195_v6, %v6194_v10 }
 0xad4   : > { %6212 = vst [vmem:[#allocation3 + $0x30] sm:$0xff] %v6206_v56  ;;  %6536 = vrot.lane.b32.xlu0 %v13689_v55, %s9558_s15  ;;  %6550 = vrot.lane.b32.xlu2 %v13747_v39, %s9558_s15 }
 0xad5   : > { %6432 = vrot.lane.b32.xlu1 %v13755_v4, %s9556_s16 }
 0xad6   : > { %v13939_v11 = vpop.permute.xlu0 %6108  ;;  %v6233_v40 = vpop.permute.xlu2 %6232 }
 0xad7   : > { %v13941_v60 = vpop.permute.xlu1 %6360  ;;  %v6243_v3 = vsel %vm761_vm2, %v13789_v0, %v6233_v40  ;;  %v6249_v6 = vsel %vm761_vm2, %v6233_v40, %v13789_v0 }
 0xad8   : > { %v6256_v10 = vmul.f32 %v6249_v6, %v14753_v9  ;;  %v6257_v55 = vmul.f32 %v6243_v3, %v14752_v49 }
 0xada   : > { %v6267_v56 = vpack.c.bf16 %v6257_v55, %v6256_v10 }
 0xadc   : > { %6273 = vst [vmem:[#allocation3 + $0x68] sm:$0xff] %v6267_v56  ;;  %6530 = vrot.lane.b32.xlu0 %v13641_v46, %s9558_s15  ;;  %6120 = vrot.lane.b32.xlu2 %v13755_v4, %s9551_s9  ;;  %s14394_s9 = scalar_lea.vmem [#allocation12], %s14848_s30  ;;  %s9486_s30 = scalar_lea.hbm %s14850_s12, 192 }
 0xadd   : > { %6546 = vrot.lane.b32.xlu1 %v13722_v63, %s9558_s15  ;;  %s7257_s17 = sshll.u32 %s14394_s9, 4  ;;  %s7258_s17 = int_to_ptr.vmem [resolvable:$true] %s7257_s17 }
 0xade   : > { %v6111_v39 = vpop.permute.xlu0 %6110  ;;  %v6365_v17 = vpop.permute.xlu2 %6364 }
 0xadf   : > { %v13957_v13 = vpop.permute.xlu1 %6540  ;;  %v6122_v0 = vsel %vm613_vm0, %v13781_v42, %v6111_v39  ;;  %v6128_v25 = vsel %vm613_vm0, %v6111_v39, %v13781_v42  ;;  %v6375_v46 = vsel %vm921_vm4, %v13801_v57, %v6365_v17  ;;  %v6381_v63 = vsel %vm921_vm4, %v6365_v17, %v13801_v57 }
 0xae0   : > { %v6134_v40 = vmul.f32 %v6128_v25, %v9902_v21  ;;  %v6135_v3 = vmul.f32 %v6122_v0, %v9909_v24  ;;  %v6388_v6 = vmul.f32 %v6375_v46, %v14787_v32  ;;  %v6389_v10 = vmul.f32 %v6381_v63, %v14788_v14 }
 0xae2   : > { %v6146_v55 = vpack.c.bf16 %v6135_v3, %v6134_v40  ;;  %v6399_v56 = vpack.c.bf16 %v6389_v10, %v6388_v6 }
 0xae4   : > { %6152 = vst [vmem:[#allocation3] sm:$0xff] %v6146_v55  ;;  %6372 = vrot.lane.b32.xlu0 %v13755_v4, %s9555_s28  ;;  %6534 = vrot.lane.b32.xlu2 %v13666_v37, %s9558_s15 }
 0xae5   : > { %6405 = vst [vmem:[#allocation3 + $0xf8] sm:$0xff] %v6399_v56  ;;  %6300 = vrot.lane.b32.xlu1 %v13755_v4, %s9554_s8  ;;  %s14833_s8 = sld [smem:[#allocation71_spill]] }
 0xae6   : > { %v6291_v42 = vpop.permute.xlu0 %6290  ;;  %v6485_v57 = vpop.permute.xlu2 %6484 }
 0xae7   : > { %v6302_v39 = vsel %vm835_vm3, %v13793_v43, %v6291_v42  ;;  %v6308_v17 = vsel %vm835_vm3, %v6291_v42, %v13793_v43  ;;  %v6495_v0 = vsel %vm1069_vm5, %v13813_v5, %v6485_v57  ;;  %v6501_v37 = vsel %vm1069_vm5, %v6485_v57, %v13813_v5  ;;  %v6231_v25 = vpop.permute.xlu1 %6230 }
 0xae8   : > { %v6314_v46 = vmul.f32 %v6308_v17, %v14711_v62  ;;  %v6315_v63 = vmul.f32 %v6302_v39, %v14710_v8  ;;  %v6508_v40 = vmul.f32 %v6495_v0, %v14789_v38  ;;  %v6509_v3 = vmul.f32 %v6501_v37, %v14790_v34 }
 0xae9   : > { %v6242_v43 = vsel %vm761_vm2, %v13761_v12, %v6231_v25  ;;  %v6248_v6 = vsel %vm761_vm2, %v6231_v25, %v13761_v12 }
 0xaea   : > { %v6326_v10 = vpack.c.bf16 %v6315_v63, %v6314_v46  ;;  %v6519_v55 = vpack.c.bf16 %v6509_v3, %v6508_v40  ;;  %v6254_v5 = vmul.f32 %v6248_v6, %v14753_v9  ;;  %v6255_v56 = vmul.f32 %v6242_v43, %v14752_v49 }
 0xaec   : > { %6332 = vst [vmem:[#allocation3 + $0x90] sm:$0xff] %v6326_v10  ;;  %v6266_v42 = vpack.c.bf16 %v6255_v56, %v6254_v5  ;;  %6552 = vrot.lane.b32.xlu0 %v13755_v4, %s9558_s15  ;;  %6548 = vrot.lane.b32.xlu2 %v13734_v1, %s9558_s15 }
 0xaed   : > { %6525 = vst [vmem:[#allocation3 + $0x158] sm:$0xff] %v6519_v55  ;;  %6240 = vrot.lane.b32.xlu1 %v13755_v4, %s9553_s29  ;;  %s9245_s29 = smul.u32 96, %s9662_s22  ;;  %s7245_s22 = scalar_lea.sflag [#allocation6], %s9750_s26 }
 0xaee   : > { %6272 = vst [vmem:[#allocation3 + $0x60] sm:$0xff] %v6266_v42  ;;  %v6173_v12 = vpop.permute.xlu0 %6172  ;;  %v6425_v57 = vpop.permute.xlu2 %6424 }
 0xaef   : > { %v6183_v39 = vsel %vm687_vm1, %v13805_v44, %v6173_v12  ;;  %v6189_v17 = vsel %vm687_vm1, %v6173_v12, %v13805_v44  ;;  %v6435_v0 = vsel %vm995_vm6, %v13825_v41, %v6425_v57  ;;  %v6441_v1 = vsel %vm995_vm6, %v6425_v57, %v13825_v41  ;;  %v6363_v4 = vpop.permute.xlu1 %6362 }
 0xaf0   : > { %v6196_v37 = vmul.f32 %v6189_v17, %v14748_v36  ;;  %v6197_v25 = vmul.f32 %v6183_v39, %v9990_v26  ;;  %v6448_v46 = vmul.f32 %v6435_v0, %v14791_v2  ;;  %v6449_v63 = vmul.f32 %v6441_v1, %v14792_v23  ;;  %v6657_v0 = vld [vmem:[%s14833_s8 + $0x8] sm:$0xff] }
 0xaf1   : > { %v6374_v44 = vsel %vm921_vm4, %v13766_v18, %v6363_v4  ;;  %v6380_v40 = vsel %vm921_vm4, %v6363_v4, %v13766_v18 }
 0xaf2   : > { %v6207_v3 = vpack.c.bf16 %v6197_v25, %v6196_v37  ;;  %v6459_v43 = vpack.c.bf16 %v6449_v63, %v6448_v46  ;;  %v6386_v41 = vmul.f32 %v6374_v44, %v14787_v32  ;;  %v6387_v6 = vmul.f32 %v6380_v40, %v14788_v14  ;;  %v6656_v46 = vld [vmem:[%s14833_s8] sm:$0xff]  ;;  %v9219_v44 = vld [vmem:[#allocation3 + $0xf4] sm:$0xf0] }
 0xaf4   : > { %6213 = vst [vmem:[#allocation3 + $0x38] sm:$0xff] %v6207_v3  ;;  %v6398_v10 = vpack.c.bf16 %v6387_v6, %v6386_v41  ;;  %6544 = vrot.lane.b32.xlu0 %v13711_v29, %s9558_s15  ;;  %6542 = vrot.lane.b32.xlu2 %v13699_v16, %s9558_s15  ;;  %v9217_v41 = vld [vmem:[#allocation3 + $0xe4] sm:$0xf0] }
 0xaf5   : > { %6465 = vst [vmem:[#allocation3 + $0x128] sm:$0xff] %v6459_v43  ;;  %6532 = vrot.lane.b32.xlu1 %v13651_v15, %s9558_s15  ;;  %s7256_s15 = scalar_lea.hbm %s14850_s12, %s9245_s29 }
 0xaf6   : > { %6404 = vst [vmem:[#allocation3 + $0xf0] sm:$0xff] %v6398_v10  ;;  %v6235_v18 = vpop.permute.xlu0 %6234  ;;  %v6487_v55 = vpop.permute.xlu2 %6486  ;;  %s7259_s27 = sshll.u32 %s7256_s15, 4  ;;  %s7260_s27 = int_to_ptr.hbm [resolvable:$true] %s7259_s27 }
 0xaf7   : > { %v6244_v5 = vsel %vm761_vm2, %v13817_v58, %v6235_v18  ;;  %v6250_v56 = vsel %vm761_vm2, %v6235_v18, %v13817_v58  ;;  %v6496_v29 = vsel %vm1069_vm5, %v13849_v53, %v6487_v55  ;;  %v6502_v16 = vsel %vm1069_vm5, %v6487_v55, %v13849_v53  ;;  %v6483_v15 = vpop.permute.xlu1 %6482  ;;  %v6658_v53 = vld [vmem:[%s14833_s8 + $0x10] sm:$0xff]  ;;  %s9480_s23 = sshra.s32 %s7260_s27, 4  ;;  %s9481_s23 = int_to_ptr.hbm [resolvable:$true] %s9480_s23 }
 0xaf8   : > { %v6258_v42 = vmul.f32 %v6250_v56, %v14753_v9  ;;  %v6259_v12 = vmul.f32 %v6244_v5, %v14752_v49  ;;  %v6510_v57 = vmul.f32 %v6496_v29, %v14789_v38  ;;  %v6511_v39 = vmul.f32 %v6502_v16, %v14790_v34  ;;  %s9482_s25 = scalar_lea.hbm %s9481_s23, 96  ;;  %p9487_p11 = scmp.lt.s32.totalorder %s9481_s23, %s14850_s12 }
 0xaf9   : > { %v6494_v58 = vsel %vm1069_vm5, %v13771_v45, %v6483_v15  ;;  %v6500_v17 = vsel %vm1069_vm5, %v6483_v15, %v13771_v45  ;;  %p9483_p1 = scmp.ne.s32.totalorder %s9481_s23, %s9482_s25  ;;  %p9488_p9 = scmp.lt.s32.totalorder %s9486_s30, %s9482_s25 }
 0xafa   : > { %v6268_v1 = vpack.c.bf16 %v6259_v12, %v6258_v42  ;;  %v6520_v4 = vpack.c.bf16 %v6511_v39, %v6510_v57  ;;  %v6506_v37 = vmul.f32 %v6494_v58, %v14789_v38  ;;  %v6507_v25 = vmul.f32 %v6500_v17, %v14790_v34  ;;  %v8765_v42 = vld [vmem:[#allocation3 + $0xe0] sm:$0xf]  ;;  %v6661_v57 = vld [vmem:[%s14833_s8 + $0x28] sm:$0xff] }
 0xafb   : > { %p9484_p4 = pnand %p9483_p1, %p9724_p7  ;;  %p9489_p2 = por %p9488_p9, %p9487_p11 }
 0xafc   : > { %6274 = vst [vmem:[#allocation3 + $0x70] sm:$0xff] %v6268_v1  ;;  %v6518_v45 = vpack.c.bf16 %v6507_v25, %v6506_v37  ;;  %6674 = vperm.xlu0 %9339, %v6658_v53   ;;  %6669 = vperm.xlu2 %9341, %v6657_v0   ;;  %v6660_v0 = vld [vmem:[%s14833_s8 + $0x20] sm:$0xff]  ;;  %v6659_v1 = vld [vmem:[%s14833_s8 + $0x18] sm:$0xff] }
 0xafd   : > { %6526 = vst [vmem:[#allocation3 + $0x160] sm:$0xff] %v6520_v4  ;;  %6664 = vperm.xlu1 %9340, %v6656_v46   ;;  %v8773_v63 = vld [vmem:[#allocation3 + $0xf0] sm:$0xf]  ;;  %p9485_p8 = pneg %p9484_p4 }
 0xafe   : > { %6524 = vst [vmem:[#allocation3 + $0x150] sm:$0xff] %v6518_v45  ;;  %v6175_v40 = vpop.permute.xlu0 %6174  ;;  %v6427_v3 = vpop.permute.xlu2 %6426  ;;  %v8774_v43 = vor.u32 %v9219_v44, %v8773_v63  ;;  %v8757_v37 = vld [vmem:[#allocation3 + $0xd0] sm:$0xf]  ;;  %v9213_v63 = vld [vmem:[#allocation3 + $0xc4] sm:$0xf0] }
 0xaff   : > { %v6184_v6 = vsel %vm687_vm1, %v13829_v52, %v6175_v40  ;;  %v6190_v10 = vsel %vm687_vm1, %v6175_v40, %v13829_v52  ;;  %v6436_v18 = vsel %vm995_vm6, %v13861_v59, %v6427_v3  ;;  %v6442_v55 = vsel %vm995_vm6, %v6427_v3, %v13861_v59  ;;  %v6423_v5 = vpop.permute.xlu1 %6422  ;;  %p9490_p10 = pnand %p9489_p2, %p9485_p8 }
 0xb00   : > { %v6198_v56 = vmul.f32 %v6190_v10, %v14748_v36  ;;  %v6199_v29 = vmul.f32 %v6184_v6, %v9990_v26  ;;  %v6450_v16 = vmul.f32 %v6436_v18, %v14791_v2  ;;  %v6451_v15 = vmul.f32 %v6442_v55, %v14792_v23  ;;  %7052 = vmatpush.bf16.msrb.mxu0 %v8774_v43 }
 0xb01   : > { %v6434_v52 = vsel %vm995_vm6, %v13779_v20, %v6423_v5  ;;  %v6440_v12 = vsel %vm995_vm6, %v6423_v5, %v13779_v20  ;;  %v8766_v59 = vor.u32 %v9217_v41, %v8765_v42  ;;  %v9215_v20 = vld [vmem:[#allocation3 + $0xd4] sm:$0xf0]  ;;  %v8749_v5 = vld [vmem:[#allocation3 + $0xc0] sm:$0xf] }
 0xb02   : > { %v6208_v39 = vpack.c.bf16 %v6199_v29, %v6198_v56  ;;  %v6460_v58 = vpack.c.bf16 %v6451_v15, %v6450_v16  ;;  %v6446_v17 = vmul.f32 %v6434_v52, %v14791_v2  ;;  %v6447_v53 = vmul.f32 %v6440_v12, %v14792_v23 }
 0xb03   : > { %v8758_v45 = vor.u32 %v9215_v20, %v8757_v37 }
 0xb04   : > { %6214 = vst [vmem:[#allocation3 + $0x40] sm:$0xff] %v6208_v39  ;;  %v6458_v4 = vpack.c.bf16 %v6447_v53, %v6446_v17  ;;  %7053 = vmatpush.bf16.msrb.mxu0 %v8766_v59  ;;  %6689 = vperm.xlu0 %9339, %v6661_v57  }
 0xb05   : > { %6466 = vst [vmem:[#allocation3 + $0x130] sm:$0xff] %v6460_v58  ;;  %6684 = vperm.xlu2 %9341, %v6660_v0   ;;  %6679 = vperm.xlu1 %9340, %v6659_v1  }
 0xb06   : > { %6464 = vst [vmem:[#allocation3 + $0x120] sm:$0xff] %v6458_v4  ;;  %v6489_v25 = vpop.permute.xlu0 %6488  ;;  %v6115_v46 = vpop.permute.xlu2 %6114 }
 0xb07   : > { %v6497_v44 = vsel %vm1069_vm5, %v13841_v61, %v6489_v25  ;;  %v6503_v40 = vsel %vm1069_vm5, %v6489_v25, %v13841_v61  ;;  %v6124_v3 = vsel %vm613_vm0, %v13837_v47, %v6115_v46  ;;  %v6130_v43 = vsel %vm613_vm0, %v6115_v46, %v13837_v47  ;;  %v6113_v41 = vpop.permute.xlu1 %6112 }
 0xb08   : > { %v6512_v6 = vmul.f32 %v6497_v44, %v14789_v38  ;;  %v6513_v10 = vmul.f32 %v6503_v40, %v14790_v34  ;;  %v6138_v18 = vmul.f32 %v6130_v43, %v9902_v21  ;;  %v6139_v55 = vmul.f32 %v6124_v3, %v9909_v24  ;;  %7054 = vmatpush.bf16.msrb.mxu0 %v8758_v45 }
 0xb09   : > { %v6123_v61 = vsel %vm613_vm0, %v13791_v30, %v6113_v41  ;;  %v6129_v56 = vsel %vm613_vm0, %v6113_v41, %v13791_v30  ;;  %v8750_v47 = vor.u32 %v9213_v63, %v8749_v5 }
 0xb0a   : > { %v6521_v29 = vpack.c.bf16 %v6513_v10, %v6512_v6  ;;  %v6148_v16 = vpack.c.bf16 %v6139_v55, %v6138_v18  ;;  %v6136_v15 = vmul.f32 %v6129_v56, %v9902_v21  ;;  %v6137_v42 = vmul.f32 %v6123_v61, %v9909_v24 }
 0xb0c   : > { %6527 = vst [vmem:[#allocation3 + $0x168] sm:$0xff] %v6521_v29  ;;  %v6147_v52 = vpack.c.bf16 %v6137_v42, %v6136_v15  ;;  %7055 = vmatpush.bf16.msrb.mxu0 %v8750_v47 }
 0xb0d   : > { %6154 = vst [vmem:[#allocation3 + $0x10] sm:$0xff] %v6148_v16 }
 0xb0e   : > { %6153 = vst [vmem:[#allocation3 + $0x8] sm:$0xff] %v6147_v52  ;;  %v6429_v12 = vpop.permute.xlu0 %6428  ;;  %v6297_v59 = vpop.permute.xlu2 %6296 }
 0xb0f   : > { %v6437_v57 = vsel %vm995_vm6, %v13853_v54, %v6429_v12  ;;  %v6443_v30 = vsel %vm995_vm6, %v6429_v12, %v13853_v54  ;;  %v6305_v39 = vsel %vm835_vm3, %v13873_v7, %v6297_v59  ;;  %v6311_v58 = vsel %vm835_vm3, %v6297_v59, %v13873_v7  ;;  %v6293_v17 = vpop.permute.xlu1 %6292 }
 0xb10   : > { %v6452_v53 = vmul.f32 %v6437_v57, %v14791_v2  ;;  %v6453_v0 = vmul.f32 %v6443_v30, %v14792_v23  ;;  %v6320_v1 = vmul.f32 %v6311_v58, %v14711_v62  ;;  %v6321_v20 = vmul.f32 %v6305_v39, %v14710_v8 }
 0xb11   : > { %v6303_v54 = vsel %vm835_vm3, %v13803_v33, %v6293_v17  ;;  %v6309_v4 = vsel %vm835_vm3, %v6293_v17, %v13803_v33 }
 0xb12   : > { %v6461_v37 = vpack.c.bf16 %v6453_v0, %v6452_v53  ;;  %v6329_v25 = vpack.c.bf16 %v6321_v20, %v6320_v1  ;;  %v6316_v7 = vmul.f32 %v6309_v4, %v14711_v62  ;;  %v6317_v46 = vmul.f32 %v6303_v54, %v14710_v8 }
 0xb14   : > { %6467 = vst [vmem:[#allocation3 + $0x138] sm:$0xff] %v6461_v37  ;;  %v6327_v45 = vpack.c.bf16 %v6317_v46, %v6316_v7 }
 0xb15   : > { %6335 = vst [vmem:[#allocation3 + $0xa8] sm:$0xff] %v6329_v25 }
 0xb16   : > { %6333 = vst [vmem:[#allocation3 + $0x98] sm:$0xff] %v6327_v45  ;;  %v6117_v63 = vpop.permute.xlu0 %6116  ;;  %v6369_v44 = vpop.permute.xlu2 %6368 }
 0xb17   : > { %v6125_v40 = vsel %vm613_vm0, %v13865_v28, %v6117_v63  ;;  %v6131_v33 = vsel %vm613_vm0, %v6117_v63, %v13865_v28  ;;  %v6377_v3 = vsel %vm921_vm4, %v13885_v22, %v6369_v44  ;;  %v6383_v43 = vsel %vm921_vm4, %v6369_v44, %v13885_v22  ;;  %v6295_v41 = vpop.permute.xlu1 %6294 }
 0xb18   : > { %v6140_v6 = vmul.f32 %v6131_v33, %v9902_v21  ;;  %v6141_v10 = vmul.f32 %v6125_v40, %v9909_v24  ;;  %v6392_v18 = vmul.f32 %v6377_v3, %v14787_v32  ;;  %v6393_v55 = vmul.f32 %v6383_v43, %v14788_v14  ;;  %v14834_v33 = vld [vmem:[#allocation53_spill] sm:$0xff] }
 0xb19   : > { %v6304_v28 = vsel %vm835_vm3, %v13815_v27, %v6295_v41  ;;  %v6310_v5 = vsel %vm835_vm3, %v6295_v41, %v13815_v27 }
 0xb1a   : > { %v6149_v61 = vpack.c.bf16 %v6141_v10, %v6140_v6  ;;  %v6401_v56 = vpack.c.bf16 %v6393_v55, %v6392_v18  ;;  %v6318_v22 = vmul.f32 %v6310_v5, %v14711_v62  ;;  %v6319_v47 = vmul.f32 %v6304_v28, %v14710_v8  ;;  %v14835_v28 = vld [vmem:[#allocation42_spill] sm:$0xff] }
 0xb1c   : > { %6155 = vst [vmem:[#allocation3 + $0x18] sm:$0xff] %v6149_v61  ;;  %v6328_v29 = vpack.c.bf16 %v6319_v47, %v6318_v22 }
 0xb1d   : > { %6407 = vst [vmem:[#allocation3 + $0x108] sm:$0xff] %v6401_v56  ;;  %v14836_v56 = vld [vmem:[#allocation27_spill] sm:$0xff] }
 0xb1e   : > { %6334 = vst [vmem:[#allocation3 + $0xa0] sm:$0xff] %v6328_v29  ;;  %v6179_v16 = vpop.permute.xlu0 %6178  ;;  %v6491_v15 = vpop.permute.xlu2 %6490 }
 0xb1f   : > { %v6186_v42 = vsel %vm687_vm1, %v13877_v31, %v6179_v16  ;;  %v6192_v27 = vsel %vm687_vm1, %v6179_v16, %v13877_v31  ;;  %v6498_v52 = vsel %vm1069_vm5, %v13897_v50, %v6491_v15  ;;  %v6504_v12 = vsel %vm1069_vm5, %v6491_v15, %v13897_v50  ;;  %v6367_v59 = vpop.permute.xlu1 %6366 }
 0xb20   : > { %v6202_v57 = vmul.f32 %v6192_v27, %v14748_v36  ;;  %v6203_v30 = vmul.f32 %v6186_v42, %v9990_v26  ;;  %v6514_v39 = vmul.f32 %v6498_v52, %v14789_v38  ;;  %v6515_v58 = vmul.f32 %v6504_v12, %v14790_v34  ;;  %v14837_v42 = vld [vmem:[#allocation55_spill] sm:$0xff]  ;;  %v14838_v52 = vld [vmem:[#allocation56_spill] sm:$0xff] }
 0xb21   : > { %v6376_v31 = vsel %vm921_vm4, %v13827_v35, %v6367_v59  ;;  %v6382_v17 = vsel %vm921_vm4, %v6367_v59, %v13827_v35  ;;  %v14839_v59 = vld [vmem:[#allocation54_spill] sm:$0xff] }
 0xb22   : > { %v6210_v53 = vpack.c.bf16 %v6203_v30, %v6202_v57  ;;  %v6522_v0 = vpack.c.bf16 %v6515_v58, %v6514_v39  ;;  %v6390_v50 = vmul.f32 %v6376_v31, %v14787_v32  ;;  %v6391_v1 = vmul.f32 %v6382_v17, %v14788_v14 }
 0xb24   : > { %6216 = vst [vmem:[#allocation3 + $0x50] sm:$0xff] %v6210_v53  ;;  %v6400_v20 = vpack.c.bf16 %v6391_v1, %v6390_v50 }
 0xb25   : > { %6528 = vst [vmem:[#allocation3 + $0x170] sm:$0xff] %v6522_v0  ;;  %v8709_v0 = vld [vmem:[#allocation3 + $0x70] sm:$0xf] }
 0xb26   : > { %6406 = vst [vmem:[#allocation3 + $0x100] sm:$0xff] %v6400_v20  ;;  %v6431_v54 = vpop.permute.xlu0 %6430  ;;  %v6371_v4 = vpop.permute.xlu2 %6370 }
 0xb27   : > { %v6438_v37 = vsel %vm995_vm6, %v13889_v51, %v6431_v54  ;;  %v6444_v35 = vsel %vm995_vm6, %v6431_v54, %v13889_v51  ;;  %v6378_v25 = vsel %vm921_vm4, %v13909_v48, %v6371_v4  ;;  %v6384_v7 = vsel %vm921_vm4, %v6371_v4, %v13909_v48  ;;  %v6237_v46 = vpop.permute.xlu1 %6236  ;;  %v8701_v4 = vld [vmem:[#allocation3 + $0x60] sm:$0xf] }
 0xb28   : > { %v6454_v45 = vmul.f32 %v6438_v37, %v14791_v2  ;;  %v6455_v63 = vmul.f32 %v6444_v35, %v14792_v23  ;;  %v6394_v44 = vmul.f32 %v6378_v25, %v14787_v32  ;;  %v6395_v40 = vmul.f32 %v6384_v7, %v14788_v14  ;;  %v14840_v37 = vld [vmem:[#allocation39_spill] sm:$0xff] }
 0xb29   : > { %v6245_v51 = vsel %vm761_vm2, %v14834_v33, %v6237_v46  ;;  %v6251_v3 = vsel %vm761_vm2, %v6237_v46, %v14834_v33 }
 0xb2a   : > { %v6462_v43 = vpack.c.bf16 %v6455_v63, %v6454_v45  ;;  %v6402_v41 = vpack.c.bf16 %v6395_v40, %v6394_v44  ;;  %v6260_v48 = vmul.f32 %v6251_v3, %v14753_v9  ;;  %v6261_v6 = vmul.f32 %v6245_v51, %v14752_v49  ;;  %v9201_v51 = vld [vmem:[#allocation3 + $0x64] sm:$0xf0]  ;;  %v14841_v3 = vld [vmem:[#allocation31_spill] sm:$0xff] }
 0xb2c   : > { %6468 = vst [vmem:[#allocation3 + $0x140] sm:$0xff] %v6462_v43  ;;  %v6269_v10 = vpack.c.bf16 %v6261_v6, %v6260_v48 }
 0xb2d   : > { %6408 = vst [vmem:[#allocation3 + $0x110] sm:$0xff] %v6402_v41 }
 0xb2e   : > { %6275 = vst [vmem:[#allocation3 + $0x78] sm:$0xff] %v6269_v10  ;;  %v6299_v18 = vpop.permute.xlu0 %6298  ;;  %v6551_v55 = vpop.permute.xlu2 %6550 }
 0xb2f   : > { %v6306_v5 = vsel %vm835_vm3, %v14835_v28, %v6299_v18  ;;  %v6312_v61 = vsel %vm835_vm3, %v6299_v18, %v14835_v28  ;;  %v6558_v22 = vsel %vm1143_vm7, %v14836_v56, %v6551_v55  ;;  %v6564_v47 = vsel %vm1143_vm7, %v6551_v55, %v14836_v56  ;;  %v6177_v29 = vpop.permute.xlu1 %6176 }
 0xb30   : > { %v6322_v16 = vmul.f32 %v6312_v61, %v14711_v62  ;;  %v6323_v15 = vmul.f32 %v6306_v5, %v14710_v8  ;;  %v6574_v27 = vmul.f32 %v6558_v22, %v14837_v42  ;;  %v6575_v12 = vmul.f32 %v6564_v47, %v14838_v52  ;;  %v14842_v61 = vld [vmem:[#allocation35_spill] sm:$0xff] }
 0xb31   : > { %v6185_v57 = vsel %vm687_vm1, %v14839_v59, %v6177_v29  ;;  %v6191_v30 = vsel %vm687_vm1, %v6177_v29, %v14839_v59  ;;  %v14843_v29 = vld [vmem:[#allocation33_spill] sm:$0xff] }
 0xb32   : > { %v6330_v39 = vpack.c.bf16 %v6323_v15, %v6322_v16  ;;  %v6582_v58 = vpack.c.bf16 %v6575_v12, %v6574_v27  ;;  %v6200_v31 = vmul.f32 %v6191_v30, %v14748_v36  ;;  %v6201_v17 = vmul.f32 %v6185_v57, %v9990_v26 }
 0xb34   : > { %6336 = vst [vmem:[#allocation3 + $0xb0] sm:$0xff] %v6330_v39  ;;  %v6209_v53 = vpack.c.bf16 %v6201_v17, %v6200_v31 }
 0xb35   : > { %6588 = vst [vmem:[#allocation3 + $0x1a0] sm:$0xff] %v6582_v58  ;;  %v9203_v50 = vld [vmem:[#allocation3 + $0x74] sm:$0xf0] }
 0xb36   : > { %6215 = vst [vmem:[#allocation3 + $0x48] sm:$0xff] %v6209_v53  ;;  %v6239_v1 = vpop.permute.xlu0 %6238  ;;  %v6121_v20 = vpop.permute.xlu2 %6120  ;;  %v8710_v54 = vor.u32 %v9203_v50, %v8709_v0 }
 0xb37   : > { %v6246_v35 = vsel %vm761_vm2, %v14840_v37, %v6239_v1  ;;  %v6252_v25 = vsel %vm761_vm2, %v6239_v1, %v14840_v37  ;;  %v6127_v7 = vsel %vm613_vm0, %v13939_v11, %v6121_v20  ;;  %v6133_v46 = vsel %vm613_vm0, %v6121_v20, %v13939_v11  ;;  %v6119_v45 = vpop.permute.xlu1 %6118  ;;  %v9233_v37 = vld [vmem:[#allocation3 + $0x164] sm:$0xf0] }
 0xb38   : > { %v6262_v63 = vmul.f32 %v6252_v25, %v14753_v9  ;;  %v6263_v44 = vmul.f32 %v6246_v35, %v14752_v49  ;;  %v6144_v40 = vmul.f32 %v6133_v46, %v9902_v21  ;;  %v6145_v33 = vmul.f32 %v6127_v7, %v9909_v24  ;;  %7028 = vmatpush.bf16.msrb.mxu3 %v8710_v54  ;;  %v8837_v54 = vld [vmem:[#allocation3 + $0x170] sm:$0xf] }
 0xb39   : > { %v6126_v43 = vsel %vm613_vm0, %v14841_v3, %v6119_v45  ;;  %v6132_v41 = vsel %vm613_vm0, %v6119_v45, %v14841_v3  ;;  %v8702_v11 = vor.u32 %v9201_v51, %v8701_v4  ;;  %v8693_v25 = vld [vmem:[#allocation3 + $0x50] sm:$0xf] }
 0xb3a   : > { %v6270_v48 = vpack.c.bf16 %v6263_v44, %v6262_v63  ;;  %v6151_v6 = vpack.c.bf16 %v6145_v33, %v6144_v40  ;;  %v6142_v10 = vmul.f32 %v6132_v41, %v9902_v21  ;;  %v6143_v18 = vmul.f32 %v6126_v43, %v9909_v24  ;;  %v8829_v40 = vld [vmem:[#allocation3 + $0x160] sm:$0xf] }
 0xb3b   : > { %v8830_v51 = vor.u32 %v9233_v37, %v8829_v40  ;;  %v9189_v37 = vld [vmem:[#allocation3 + $0x4] sm:$0xf0] }
 0xb3c   : > { %6276 = vst [vmem:[#allocation3 + $0x80] sm:$0xff] %v6270_v48  ;;  %v6150_v55 = vpack.c.bf16 %v6143_v18, %v6142_v10  ;;  %7029 = vmatpush.bf16.msrb.mxu3 %v8702_v11  ;;  %v8685_v48 = vld [vmem:[#allocation3 + $0x40] sm:$0xf] }
 0xb3d   : > { %6157 = vst [vmem:[#allocation3 + $0x28] sm:$0xff] %v6151_v6  ;;  %v9197_v44 = vld [vmem:[#allocation3 + $0x44] sm:$0xf0]  ;;  %v8861_v19 = vld [vmem:[#allocation3 + $0x1a0] sm:$0xf] }
 0xb3e   : > { %6156 = vst [vmem:[#allocation3 + $0x20] sm:$0xff] %v6150_v55  ;;  %v6493_v28 = vpop.permute.xlu0 %6492  ;;  %v6535_v5 = vpop.permute.xlu2 %6534  ;;  %v8686_v18 = vor.u32 %v9197_v44, %v8685_v48  ;;  %v8821_v55 = vld [vmem:[#allocation3 + $0x150] sm:$0xf] }
 0xb3f   : > { %v6499_v56 = vsel %vm1069_vm5, %v14842_v61, %v6493_v28  ;;  %v6505_v22 = vsel %vm1069_vm5, %v6493_v28, %v14842_v61  ;;  %v6181_v47 = vpop.permute.xlu1 %6180  ;;  %v9195_v61 = vld [vmem:[#allocation3 + $0x34] sm:$0xf0] }
 0xb40   : > { %v6516_v21 = vmul.f32 %v6499_v56, %v14789_v38  ;;  %v6517_v24 = vmul.f32 %v6505_v22, %v14790_v34  ;;  %v6187_v16 = vsel %vm687_vm1, %v14843_v29, %v6181_v47  ;;  %v6193_v15 = vsel %vm687_vm1, %v6181_v47, %v14843_v29  ;;  %v9231_v22 = vld [vmem:[#allocation3 + $0x154] sm:$0xf0]  ;;  %v8677_v47 = vld [vmem:[#allocation3 + $0x30] sm:$0xf] }
 0xb41   : > { %v6204_v27 = vmul.f32 %v6193_v15, %v14748_v36  ;;  %v6205_v12 = vmul.f32 %v6187_v16, %v9990_v26  ;;  %v14844_v36 = vld [vmem:[#allocation49_spill] sm:$0xff]  ;;  %v8678_v29 = vor.u32 %v9195_v61, %v8677_v47  ;;  %v8703_v61 = vld [vmem:[#allocation3 + $0x68] sm:$0xf0] }
 0xb42   : > { %v6523_v59 = vpack.c.bf16 %v6517_v24, %v6516_v21  ;;  %v8822_v21 = vor.u32 %v9231_v22, %v8821_v55  ;;  %v8741_v22 = vld [vmem:[#allocation3 + $0xb0] sm:$0xf]  ;;  %v8733_v47 = vld [vmem:[#allocation3 + $0xa0] sm:$0xf] }
 0xb43   : > { %v6211_v57 = vpack.c.bf16 %v6205_v12, %v6204_v27  ;;  %v8813_v27 = vld [vmem:[#allocation3 + $0x140] sm:$0xf] }
 0xb44   : > { %6529 = vst [vmem:[#allocation3 + $0x178] sm:$0xff] %v6523_v59  ;;  %v9193_v15 = vld [vmem:[#allocation3 + $0x24] sm:$0xf0] }
 0xb45   : > { %6217 = vst [vmem:[#allocation3 + $0x58] sm:$0xff] %v6211_v57  ;;  %v8669_v16 = vld [vmem:[#allocation3 + $0x20] sm:$0xf] }
 0xb46   : > { %v6537_v30 = vpop.permute.xlu0 %6536  ;;  %v6549_v38 = vpop.permute.xlu2 %6548 }
 0xb47   : > { %v6557_v34 = vsel %vm1143_vm7, %v6537_v30, %v6549_v38  ;;  %v6563_v39 = vsel %vm1143_vm7, %v6549_v38, %v6537_v30  ;;  %v6433_v58 = vpop.permute.xlu1 %6432 }
 0xb48   : > { %v6572_v31 = vmul.f32 %v6557_v34, %v14837_v42  ;;  %v6573_v17 = vmul.f32 %v6563_v39, %v14838_v52  ;;  %v6439_v26 = vsel %vm995_vm6, %v14844_v36, %v6433_v58  ;;  %v6445_v53 = vsel %vm995_vm6, %v6433_v58, %v14844_v36  ;;  %v14845_v39 = vld [vmem:[#allocation41_spill] sm:$0xff] }
 0xb49   : > { %v6456_v0 = vmul.f32 %v6439_v26, %v14791_v2  ;;  %v6457_v50 = vmul.f32 %v6445_v53, %v14792_v23  ;;  %v9227_v26 = vld [vmem:[#allocation3 + $0x134] sm:$0xf0] }
 0xb4a   : > { %v6581_v1 = vpack.c.bf16 %v6573_v17, %v6572_v31 }
 0xb4b   : > { %v6463_v20 = vpack.c.bf16 %v6457_v50, %v6456_v0  ;;  %v9235_v4 = vld [vmem:[#allocation3 + $0x174] sm:$0xf0]  ;;  %v8661_v50 = vld [vmem:[#allocation3 + $0x10] sm:$0xf] }
 0xb4c   : > { %6587 = vst [vmem:[#allocation3 + $0x198] sm:$0xff] %v6581_v1  ;;  %v8838_v35 = vor.u32 %v9235_v4, %v8837_v54  ;;  %v9199_v7 = vld [vmem:[#allocation3 + $0x54] sm:$0xf0] }
 0xb4d   : > { %6469 = vst [vmem:[#allocation3 + $0x148] sm:$0xff] %v6463_v20  ;;  %v8694_v46 = vor.u32 %v9199_v7, %v8693_v25  ;;  %v9191_v0 = vld [vmem:[#allocation3 + $0x14] sm:$0xf0]  ;;  %v8797_v20 = vld [vmem:[#allocation3 + $0x120] sm:$0xf] }
 0xb4e   : > { %v6531_v45 = vpop.permute.xlu0 %6530  ;;  %7076 = vmatpush.bf16.msra.mxu2 %v8838_v35  ;;  %v6543_v63 = vpop.permute.xlu2 %6542  ;;  %v8662_v54 = vor.u32 %v9191_v0, %v8661_v50  ;;  %v9207_v0 = vld [vmem:[#allocation3 + $0x94] sm:$0xf0] }
 0xb4f   : > { %v6554_v2 = vsel %vm1143_vm7, %v6531_v45, %v6543_v63  ;;  %v6560_v23 = vsel %vm1143_vm7, %v6543_v63, %v6531_v45  ;;  %7030 = vmatpush.bf16.msrb.mxu3 %v8694_v46  ;;  %v6547_v33 = vpop.permute.xlu1 %6546  ;;  %v8711_v46 = vld [vmem:[#allocation3 + $0x78] sm:$0xf0]  ;;  %v8605_v45 = vld [vmem:[#allocation9] sm:$0xf]  ;;  %v9178_v63 = vld [vmem:[#allocation9 + $0xc] sm:$0xf0] }
 0xb50   : > { %v6566_v3 = vmul.f32 %v6554_v2, %v14837_v42  ;;  %v6567_v43 = vmul.f32 %v6560_v23, %v14838_v52  ;;  %v6556_v41 = vsel %vm1143_vm7, %v6535_v5, %v6547_v33  ;;  %v6562_v11 = vsel %vm1143_vm7, %v6547_v33, %v6535_v5  ;;  %v14846_v2 = vld [vmem:[#allocation34_spill] sm:$0xff] }
 0xb51   : > { %v6570_v6 = vmul.f32 %v6556_v41, %v14837_v42  ;;  %v6571_v10 = vmul.f32 %v6562_v11, %v14838_v52  ;;  %v9202_v41 = vld [vmem:[#allocation3 + $0x74] sm:$0xf] }
 0xb52   : > { %v6578_v28 = vpack.c.bf16 %v6567_v43, %v6566_v3  ;;  %7077 = vmatpush.bf16.msra.mxu2 %v8830_v51  ;;  %v8653_v51 = vld [vmem:[#allocation3] sm:$0xf]  ;;  %v8714_v48 = vor.u32 %v9202_v41, %v8711_v46 }
 0xb53   : > { %v6580_v56 = vpack.c.bf16 %v6571_v10, %v6570_v6  ;;  %7031 = vmatpush.bf16.msrb.mxu3 %v8686_v18  ;;  %v8654_v43 = vor.u32 %v9189_v37, %v8653_v51  ;;  %v14349_v6 = vor.u32 %v9178_v63, %v8605_v45  ;;  %v8789_v18 = vld [vmem:[#allocation3 + $0x110] sm:$0xf]  ;;  %v9196_v37 = vld [vmem:[#allocation3 + $0x44] sm:$0xf]  ;;  %v9239_v45 = vld [vmem:[#allocation3 + $0x194] sm:$0xf0] }
 0xb54   : > { %6584 = vst [vmem:[#allocation3 + $0x180] sm:$0xff] %v6578_v28  ;;  %v9229_v24 = vld [vmem:[#allocation3 + $0x144] sm:$0xf0]  ;;  %v9200_v28 = vld [vmem:[#allocation3 + $0x64] sm:$0xf] }
 0xb55   : > { %6586 = vst [vmem:[#allocation3 + $0x190] sm:$0xff] %v6580_v56  ;;  %v8814_v30 = vor.u32 %v9229_v24, %v8813_v27  ;;  %v8621_v63 = vld [vmem:[#allocation9 + $0x20] sm:$0xf]  ;;  %v8823_v51 = vld [vmem:[#allocation3 + $0x158] sm:$0xf0] }
 0xb56   : > { %v6373_v5 = vpop.permute.xlu0 %6372  ;;  %7078 = vmatpush.bf16.msra.mxu2 %v8822_v21  ;;  %v8781_v21 = vld [vmem:[#allocation3 + $0x100] sm:$0xf] }
 0xb57   : > { %v6379_v12 = vsel %vm921_vm4, %v13941_v60, %v6373_v5  ;;  %v6385_v59 = vsel %vm921_vm4, %v6373_v5, %v13941_v60  ;;  %7032 = vmatpush.bf16.msrb.mxu3 %v8678_v29  ;;  %v6301_v57 = vpop.permute.xlu1 %6300  ;;  %v8670_v60 = vor.u32 %v9193_v15, %v8669_v16  ;;  %v8706_v29 = vor.u32 %v9200_v28, %v8703_v61  ;;  %v8839_v5 = vld [vmem:[#allocation3 + $0x178] sm:$0xf0]  ;;  %v8613_v16 = vld [vmem:[#allocation9 + $0x8] sm:$0xf]  ;;  %v9179_v15 = vld [vmem:[#allocation9 + $0x14] sm:$0xf0] }
 0xb58   : > { %v6396_v38 = vmul.f32 %v6379_v12, %v14787_v32  ;;  %v6397_v34 = vmul.f32 %v6385_v59, %v14788_v14  ;;  %v6307_v58 = vsel %vm835_vm3, %v14845_v39, %v6301_v57  ;;  %v6313_v31 = vsel %vm835_vm3, %v6301_v57, %v14845_v39  ;;  %v8805_v14 = vld [vmem:[#allocation3 + $0x130] sm:$0xf]  ;;  %v9209_v12 = vld [vmem:[#allocation3 + $0xa4] sm:$0xf0]  ;;  %v8695_v57 = vld [vmem:[#allocation3 + $0x58] sm:$0xf0] }
 0xb59   : > { %v6324_v17 = vmul.f32 %v6313_v31, %v14711_v62  ;;  %v6325_v36 = vmul.f32 %v6307_v58, %v14710_v8  ;;  %v8806_v1 = vor.u32 %v9227_v26, %v8805_v14  ;;  %v9225_v62 = vld [vmem:[#allocation3 + $0x124] sm:$0xf0]  ;;  %v9234_v58 = vld [vmem:[#allocation3 + $0x174] sm:$0xf]  ;;  %v14358_v26 = vor.u32 %v9179_v15, %v8613_v16  ;;  %v9192_v28 = vld [vmem:[#allocation3 + $0x24] sm:$0xf] }
 0xb5a   : > { %v6403_v53 = vpack.c.bf16 %v6397_v34, %v6396_v38  ;;  %7079 = vmatpush.bf16.msra.mxu2 %v8814_v30  ;;  %v8798_v7 = vor.u32 %v9225_v62, %v8797_v20  ;;  %v9221_v59 = vld [vmem:[#allocation3 + $0x104] sm:$0xf0]  ;;  %v8734_v34 = vor.u32 %v9209_v12, %v8733_v47  ;;  %v9228_v61 = vld [vmem:[#allocation3 + $0x144] sm:$0xf]  ;;  %v8807_v15 = vld [vmem:[#allocation3 + $0x138] sm:$0xf0] }
 0xb5b   : > { %v6331_v32 = vpack.c.bf16 %v6325_v36, %v6324_v17  ;;  %7033 = vmatpush.bf16.msrb.mxu3 %v8670_v60  ;;  %v8782_v39 = vor.u32 %v9221_v59, %v8781_v21  ;;  %v9198_v36 = vld [vmem:[#allocation3 + $0x54] sm:$0xf]  ;;  %v8842_v60 = vor.u32 %v9234_v58, %v8839_v5  ;;  %v8845_v47 = vld [vmem:[#allocation3 + $0x180] sm:$0xf]  ;;  %v9216_v5 = vld [vmem:[#allocation3 + $0xe4] sm:$0xf] }
 0xb5c   : > { %6409 = vst [vmem:[#allocation3 + $0x118] sm:$0xff] %v6403_v53  ;;  %v8698_v53 = vor.u32 %v9198_v36, %v8695_v57  ;;  %v9240_v59 = vld [vmem:[#allocation3 + $0x1a4] sm:$0xf]  ;;  %v8759_v58 = vld [vmem:[#allocation3 + $0xd8] sm:$0xf0] }
 0xb5d   : > { %6337 = vst [vmem:[#allocation3 + $0xb8] sm:$0xff] %v6331_v32  ;;  %v8831_v32 = vld [vmem:[#allocation3 + $0x168] sm:$0xf0]  ;;  %v9190_v36 = vld [vmem:[#allocation3 + $0x14] sm:$0xf] }
 0xb5e   : > { %v6553_v4 = vpop.permute.xlu0 %6552  ;;  %7080 = vmatpush.bf16.msra.mxu2 %v8806_v1  ;;  %v8687_v1 = vld [vmem:[#allocation3 + $0x48] sm:$0xf0] }
 0xb5f   : > { %v6559_v8 = vsel %vm1143_vm7, %v13957_v13, %v6553_v4  ;;  %v6565_v35 = vsel %vm1143_vm7, %v6553_v4, %v13957_v13  ;;  %7034 = vmatpush.bf16.msrb.mxu3 %v8662_v54  ;;  %v6241_v25 = vpop.permute.xlu1 %6240  ;;  %v8725_v54 = vld [vmem:[#allocation3 + $0x90] sm:$0xf]  ;;  %v9230_v4 = vld [vmem:[#allocation3 + $0x154] sm:$0xf] }
 0xb60   : > { %v6576_v44 = vmul.f32 %v6559_v8, %v14837_v42  ;;  %v6577_v40 = vmul.f32 %v6565_v35, %v14838_v52  ;;  %v6247_v23 = vsel %vm761_vm2, %v14846_v2, %v6241_v25  ;;  %v6253_v33 = vsel %vm761_vm2, %v6241_v25, %v14846_v2  ;;  %v8853_v8 = vld [vmem:[#allocation3 + $0x190] sm:$0xf]  ;;  %v8679_v35 = vld [vmem:[#allocation3 + $0x38] sm:$0xf0]  ;;  %v9218_v25 = vld [vmem:[#allocation3 + $0xf4] sm:$0xf] }
 0xb61   : > { %v6264_v13 = vmul.f32 %v6253_v33, %v14753_v9  ;;  %v6265_v3 = vmul.f32 %v6247_v23, %v14752_v49  ;;  %v8607_v2 = vld [vmem:[#allocation9 + $0x10] sm:$0xf0]  ;;  %v8717_v23 = vld [vmem:[#allocation3 + $0x80] sm:$0xf]  ;;  %v8854_v33 = vor.u32 %v9239_v45, %v8853_v8  ;;  %v8826_v41 = vor.u32 %v9230_v4, %v8823_v51  ;;  %v8637_v45 = vld [vmem:[#allocation9 + $0x40] sm:$0xf] }
 0xb62   : > { %v6583_v11 = vpack.c.bf16 %v6577_v40, %v6576_v44  ;;  %7081 = vmatpush.bf16.msra.mxu2 %v8798_v7  ;;  %v8690_v7 = vor.u32 %v9196_v37, %v8687_v1  ;;  %v9182_v44 = vld [vmem:[#allocation9 + $0x2c] sm:$0xf0]  ;;  %v9176_v40 = vld [vmem:[#allocation9 + $0x4] sm:$0xf]  ;;  %v9212_v37 = vld [vmem:[#allocation3 + $0xc4] sm:$0xf] }
 0xb63   : > { %v6271_v10 = vpack.c.bf16 %v6265_v3, %v6264_v13  ;;  %7035 = vmatpush.bf16.msrb.mxu3 %v8654_v43  ;;  %v9223_v55 = vld [vmem:[#allocation3 + $0x114] sm:$0xf0]  ;;  %v9194_v3 = vld [vmem:[#allocation3 + $0x34] sm:$0xf]  ;;  %v8775_v43 = vld [vmem:[#allocation3 + $0xf8] sm:$0xf0] }
 0xb64   : > { %6589 = vst [vmem:[#allocation3 + $0x1a8] sm:$0xff] %v6583_v11  ;;  %v8790_v56 = vor.u32 %v9223_v55, %v8789_v18  ;;  %v9211_v9 = vld [vmem:[#allocation3 + $0xb4] sm:$0xf0]  ;;  %v8767_v11 = vld [vmem:[#allocation3 + $0xe8] sm:$0xf0]  ;;  %v14361_v18 = vor.u32 %v9182_v44, %v8621_v63  ;;  %v14363_v55 = vor.u32 %v9176_v40, %v8607_v2 }
 0xb65   : > { %6277 = vst [vmem:[#allocation3 + $0x88] sm:$0xff] %v6271_v10  ;;  %v8742_v49 = vor.u32 %v9211_v9, %v8741_v22  ;;  %v8778_v10 = vor.u32 %v9218_v25, %v8775_v43  ;;  %v8671_v22 = vld [vmem:[#allocation3 + $0x28] sm:$0xf0]  ;;  %v9177_v9 = vld [vmem:[#allocation9 + $0xc] sm:$0xf]  ;;  %v8770_v12 = vor.u32 %v9216_v5, %v8767_v11 }
 0xb66   : > { %7036 = vmatmul.bf16.vlgmr.msrb.gmra.mxu3 %v14349_v6  ;;  %v6545_v24 = vpop.permute.xlu0 %6544  ;;  %7082 = vmatpush.bf16.msra.mxu2 %v8790_v56  ;;  %v8815_v56 = vld [vmem:[#allocation3 + $0x148] sm:$0xf0]  ;;  %v9236_v8 = vld [vmem:[#allocation3 + $0x184] sm:$0xf]  ;;  %v9186_v44 = vld [vmem:[#allocation9 + $0x4c] sm:$0xf0] }
 0xb67   : > { %7124 = vmatpush.bf16.msra.mxu3 %v8714_v48  ;;  %v6533_v27 = vpop.permute.xlu1 %6532  ;;  %7056 = vmatpush.bf16.msrb.mxu0 %v8742_v49  ;;  %v8682_v48 = vor.u32 %v9194_v3, %v8679_v35  ;;  %v8615_v49 = vld [vmem:[#allocation9 + $0x18] sm:$0xf0]  ;;  %v8818_v16 = vor.u32 %v9228_v61, %v8815_v56  ;;  %v9180_v40 = vld [vmem:[#allocation9 + $0x24] sm:$0xf]  ;;  %v8623_v2 = vld [vmem:[#allocation9 + $0x30] sm:$0xf0]  ;;  %v8638_v3 = vor.u32 %v9186_v44, %v8637_v45 }
 0xb68   : > { %v6555_v30 = vsel %vm1143_vm7, %v6533_v27, %v6545_v24  ;;  %v6561_v38 = vsel %vm1143_vm7, %v6545_v24, %v6533_v27  ;;  %v8674_v27 = vor.u32 %v9192_v28, %v8671_v22  ;;  %v14367_v57 = vor.u32 %v9177_v9, %v8615_v49  ;;  %v9208_v11 = vld [vmem:[#allocation3 + $0xa4] sm:$0xf]  ;;  %v8783_v28 = vld [vmem:[#allocation3 + $0x108] sm:$0xf0]  ;;  %v8645_v49 = vld [vmem:[#allocation9 + $0x48] sm:$0xf] }
 0xb69   : > { %v6568_v31 = vmul.f32 %v6555_v30, %v14837_v42  ;;  %v6569_v17 = vmul.f32 %v6561_v38, %v14838_v52  ;;  %v9232_v42 = vld [vmem:[#allocation3 + $0x164] sm:$0xf]  ;;  %v8726_v52 = vor.u32 %v9207_v0, %v8725_v54  ;;  %v8629_v30 = vld [vmem:[#allocation9 + $0x28] sm:$0xf]  ;;  %v9183_v38 = vld [vmem:[#allocation9 + $0x34] sm:$0xf0]  ;;  %v8626_v43 = vor.u32 %v9180_v40, %v8623_v2 }
 0xb6a   : > { %7083 = vmatpush.bf16.msra.mxu2 %v8782_v39  ;;  %v8834_v62 = vor.u32 %v9232_v42, %v8831_v32  ;;  %v8663_v39 = vld [vmem:[#allocation3 + $0x18] sm:$0xf0]  ;;  %v14369_v0 = vor.u32 %v9183_v38, %v8629_v30  ;;  %v8751_v54 = vld [vmem:[#allocation3 + $0xc8] sm:$0xf0] }
 0xb6b   : > { %7125 = vmatpush.bf16.msra.mxu3 %v8706_v29  ;;  %v6579_v14 = vpack.c.bf16 %v6569_v17, %v6568_v31  ;;  %7057 = vmatpush.bf16.msrb.mxu0 %v8734_v34  ;;  %v9241_v50 = vld [vmem:[#allocation3 + $0x1a4] sm:$0xf0]  ;;  %v8863_v24 = vld [vmem:[#allocation3 + $0x1a8] sm:$0xf0]  ;;  %v9226_v31 = vld [vmem:[#allocation3 + $0x134] sm:$0xf]  ;;  %v8666_v32 = vor.u32 %v9190_v36, %v8663_v39  ;;  %v8754_v25 = vor.u32 %v9212_v37, %v8751_v54 }
 0xb6c   : > { %v8862_v20 = vor.u32 %v9241_v50, %v8861_v19  ;;  %v9205_v46 = vld [vmem:[#allocation3 + $0x84] sm:$0xf0]  ;;  %v8866_v34 = vor.u32 %v9240_v59, %v8863_v24  ;;  %v9238_v17 = vld [vmem:[#allocation3 + $0x194] sm:$0xf]  ;;  %v8855_v19 = vld [vmem:[#allocation3 + $0x198] sm:$0xf0] }
 0xb6d   : > { %6585 = vst [vmem:[#allocation3 + $0x188] sm:$0xff] %v6579_v14  ;;  %7084 = vmatmul.bf16.vlgmr.msra.gmra.mxu2 %v14358_v26  ;;  %v8718_v13 = vor.u32 %v9205_v46, %v8717_v23  ;;  %v9224_v50 = vld [vmem:[#allocation3 + $0x124] sm:$0xf]  ;;  %v8858_v1 = vor.u32 %v9238_v17, %v8855_v19  ;;  %v8799_v42 = vld [vmem:[#allocation3 + $0x128] sm:$0xf0] }
 0xb6e   : > { %7172 = vmatpush.bf16.msrb.mxu2 %v8842_v60  ;;  %7105 = vmatpush.bf16.msra.mxu1 %v8862_v20  ;;  %v9214_v60 = vld [vmem:[#allocation3 + $0xd4] sm:$0xf]  ;;  %v8655_v20 = vld [vmem:[#allocation3 + $0x8] sm:$0xf0]  ;;  %v8791_v46 = vld [vmem:[#allocation3 + $0x118] sm:$0xf0]  ;;  %v14397_v37 = vpop.permute.xlu0 %6674 }
 0xb6f   : > { %7126 = vmatpush.bf16.msra.mxu3 %v8698_v53  ;;  %7058 = vmatpush.bf16.msrb.mxu0 %v8726_v52  ;;  %v8810_v53 = vor.u32 %v9226_v31, %v8807_v15  ;;  %v8762_v14 = vor.u32 %v9214_v60, %v8759_v58  ;;  %v9188_v52 = vld [vmem:[#allocation3 + $0x4] sm:$0xf]  ;;  %v9222_v23 = vld [vmem:[#allocation3 + $0x114] sm:$0xf]  ;;  %v8735_v61 = vld [vmem:[#allocation3 + $0xa8] sm:$0xf0]  ;;  %v14385_v58 = vpop.permute.xlu1 %6664 }
 0xb70   : > { %v8658_v35 = vor.u32 %v9188_v52, %v8655_v20  ;;  %v8794_v51 = vor.u32 %v9222_v23, %v8791_v46  ;;  %v8738_v22 = vor.u32 %v9208_v11, %v8735_v61  ;;  %v9206_v24 = vld [vmem:[#allocation3 + $0x94] sm:$0xf]  ;;  %v9204_v15 = vld [vmem:[#allocation3 + $0x84] sm:$0xf]  ;;  %v9185_v38 = vld [vmem:[#allocation9 + $0x4c] sm:$0xf] }
 0xb71   : > { %v8639_v59 = vld [vmem:[#allocation9 + $0x50] sm:$0xf0] }
 0xb72   : > { %7173 = vmatpush.bf16.msrb.mxu2 %v8834_v62  ;;  %7106 = vmatpush.bf16.msra.mxu1 %v8854_v33  ;;  %v8802_v62 = vor.u32 %v9224_v50, %v8799_v42  ;;  %v9210_v33 = vld [vmem:[#allocation3 + $0xb4] sm:$0xf]  ;;  %v14847_v19 = vld [vmem:[#allocation61_spill] sm:$0xff] }
 0xb73   : > { %7127 = vmatpush.bf16.msra.mxu3 %v8690_v7  ;;  %7059 = vmatpush.bf16.msrb.mxu0 %v8718_v13  ;;  %v8743_v7 = vld [vmem:[#allocation3 + $0xb8] sm:$0xf0] }
 0xb74   : > { %v9237_v21 = vld [vmem:[#allocation3 + $0x184] sm:$0xf0]  ;;  %v8847_v4 = vld [vmem:[#allocation3 + $0x188] sm:$0xf0]  ;;  %v8746_v13 = vor.u32 %v9210_v33, %v8743_v7 }
 0xb75   : > { %v8846_v29 = vor.u32 %v9237_v21, %v8845_v47  ;;  %v8850_v63 = vor.u32 %v9236_v8, %v8847_v4  ;;  %v9187_v47 = vld [vmem:[#allocation9 + $0x54] sm:$0xf0]  ;;  %v8727_v21 = vld [vmem:[#allocation3 + $0x98] sm:$0xf0] }
 0xb76   : > { %7174 = vmatpush.bf16.msrb.mxu2 %v8826_v41  ;;  %7041 = vmatmul.bf16.gmra.mxu3 %v14361_v18  ;;  %v9220_v41 = vld [vmem:[#allocation3 + $0x104] sm:$0xf]  ;;  %v8730_v5 = vor.u32 %v9206_v24, %v8727_v21  ;;  %v6690_v24 = vpop.permute.xlu0 %6689 }
 0xb77   : > { %7128 = vmatpush.bf16.msra.mxu3 %v8682_v48  ;;  %7148 = vmatpush.bf16.msra.mxu0 %v8778_v10  ;;  %v9181_v48 = vld [vmem:[#allocation9 + $0x2c] sm:$0xf]  ;;  %v8631_v10 = vld [vmem:[#allocation9 + $0x38] sm:$0xf0]  ;;  %v8786_v56 = vor.u32 %v9220_v41, %v8783_v28  ;;  %v14402_v40 = vpop.permute.xlu1 %6679 }
 0xb78   : > { %7060 = vmatmul.bf16.vlgmr.msrb.gmra.mxu0 %v14363_v55  ;;  %7107 = vmatpush.bf16.msra.mxu1 %v8846_v29  ;;  %v8634_v9 = vor.u32 %v9181_v48, %v8631_v10  ;;  %v8646_v29 = vor.u32 %v9187_v47, %v8645_v49 }
 0xb7a   : > { %7175 = vmatpush.bf16.msrb.mxu2 %v8818_v16  ;;  %v8719_v16 = vld [vmem:[#allocation3 + $0x88] sm:$0xf0] }
 0xb7b   : > { %7129 = vmatpush.bf16.msra.mxu3 %v8674_v27  ;;  %7149 = vmatpush.bf16.msra.mxu0 %v8770_v12  ;;  %v8722_v27 = vor.u32 %v9204_v15, %v8719_v16  ;;  %v9184_v12 = vld [vmem:[#allocation9 + $0x44] sm:$0xf] }
 0xb7c   : > { %7201 = vmatpush.bf16.msrb.mxu1 %v8866_v34  ;;  %v8642_v30 = vor.u32 %v9184_v12, %v8639_v59  ;;  %v8647_v34 = vld [vmem:[#allocation9 + $0x58] sm:$0xf0] }
 0xb7d   : > { %8867 = vmatmul.msk.bf16.vlgmr.msra.gmra.mxu1 %vm4726_vm9, %v14367_v57  ;;  %7089 = vmatmul.bf16.gmra.mxu2 %v14369_v0  ;;  %v8650_v39 = vor.u32 %v9185_v38, %v8647_v34 }
 0xb7e   : > { %7176 = vmatpush.bf16.msrb.mxu2 %v8810_v53 }
 0xb7f   : > { %7130 = vmatpush.bf16.msra.mxu3 %v8666_v32  ;;  %7150 = vmatpush.bf16.msra.mxu0 %v8762_v14 }
 0xb80   : > { %7202 = vmatpush.bf16.msrb.mxu1 %v8858_v1 }
 0xb82   : > { %7177 = vmatpush.bf16.msrb.mxu2 %v8802_v62 }
 0xb83   : > { %7131 = vmatpush.bf16.msra.mxu3 %v8658_v35  ;;  %7151 = vmatpush.bf16.msra.mxu0 %v8754_v25 }
 0xb84   : > { %7203 = vmatpush.bf16.msrb.mxu1 %v8850_v63 }
 0xb86   : > { %7178 = vmatpush.bf16.msrb.mxu2 %v8794_v51  ;;  %7046 = vmatmul.bf16.gmra.mxu3 %v8638_v3 }
 0xb87   : > { %7152 = vmatpush.bf16.msra.mxu0 %v8746_v13 }
 0xb88   : > { %7065 = vmatmul.bf16.gmra.mxu0 %v8626_v43 }
 0xb8a   : > { %7179 = vmatpush.bf16.msrb.mxu2 %v8786_v56 }
 0xb8b   : > { %7153 = vmatpush.bf16.msra.mxu0 %v8738_v22 }
 0xb8d   : > { %8868 = vmatmul.msk.bf16.gmra.mxu1 %vm4726_vm9, %v8634_v9  ;;  %7094 = vmatmul.bf16.gmra.mxu2 %v8646_v29 }
 0xb8f   : > { %7154 = vmatpush.bf16.msra.mxu0 %v8730_v5 }
 0xb93   : > { %7155 = vmatpush.bf16.msra.mxu0 %v8722_v27 }
 0xb96   : > { %7132 = vmatmul.bf16.vlgmr.msra.gmra.mxu3 %v14349_v6 }
 0xb98   : > { %7070 = vmatmul.bf16.gmra.mxu0 %v8642_v30 }
 0xb9d   : > { %8869 = vmatmul.msk.bf16.gmra.mxu1 %vm4726_vm9, %v8650_v39  ;;  %7180 = vmatmul.bf16.vlgmr.msrb.gmra.mxu2 %v14358_v26 }
 0xba6   : > { %7137 = vmatmul.bf16.gmra.mxu3 %v14361_v18 }
 0xba8   : > { %7156 = vmatmul.bf16.vlgmr.msra.gmra.mxu0 %v14363_v55 }
 0xbad   : > { %8870 = vmatmul.msk.bf16.vlgmr.msrb.gmra.mxu1 %vm4726_vm9, %v14367_v57  ;;  %7185 = vmatmul.bf16.gmra.mxu2 %v14369_v0  ;;  %v14388_v0 = vpop.permute.xlu2 %6669 }
 0xbb5   : > { %v6685_v48 = vpop.permute.xlu2 %6684 }
 0xbb6   : > { %7142 = vmatmul.bf16.gmra.mxu3 %v8638_v3 }
 0xbb8   : > { %7161 = vmatmul.bf16.gmra.mxu0 %v8626_v43 }
 0xbbd   : > { %8871 = vmatmul.msk.bf16.gmra.mxu1 %vm4726_vm9, %v8634_v9  ;;  %7190 = vmatmul.bf16.gmra.mxu2 %v8646_v29 }
 0xbc8   : > { %7166 = vmatmul.bf16.gmra.mxu0 %v8642_v30 }
 0xbcd   : > { %8872 = vmatmul.msk.bf16.gmra.mxu1 %vm4726_vm9, %v8650_v39 }
 0xbe9   : > { %v7037_v6 = vpop.f32.mrf.mxu3 }
 0xbea   : > { %v7038_v55 = vadd.f32 %v7037_v6, %v14385_v58 }
 0xbf0   : > { %v7085_v26 = vpop.f32.mrf.mxu2 }
 0xbf1   : > { %v7039_v18 = vpop.f32.mrf.mxu3 }
 0xbf2   : > { %v7040_v14 = vadd.f32 %v7039_v18, %v14388_v0 }
 0xbf5   : > { %v7061_v31 = vpop.f32.mrf.mxu0 }
 0xbf6   : > { %v7062_v57 = vadd.f32 %v7061_v31, %v7038_v55 }
 0xbf8   : > { %v7086_v17 = vadd.f32 %v7085_v26, %v7062_v57  ;;  %v7087_v53 = vpop.f32.mrf.mxu2 }
 0xbf9   : > { %v7042_v32 = vpop.f32.mrf.mxu3 }
 0xbfa   : > { %v7109_v36 = vpop.f32.mrf.mxu1  ;;  %v7043_v8 = vadd.f32 %v7042_v32, %v14397_v37 }
 0xbfb   : > { %v7110_v60 = vadd.f32 %v7109_v36, %v7086_v17 }
 0xbfd   : > { %v7220_v50 = vmul.f32 %v7110_v60, %v14847_v19  ;;  %v7063_v1 = vpop.f32.mrf.mxu0 }
 0xbfe   : > { %v7064_v20 = vadd.f32 %v7063_v1, %v7040_v14 }
 0xbff   : > { %7232 = vst [vmem:[%s14394_s9] sm:$0xff] %v7220_v50 }
 0xc00   : > { %v7088_v54 = vadd.f32 %v7087_v53, %v7064_v20  ;;  %v7090_v52 = vpop.f32.mrf.mxu2  ;;  %v14849_v53 = vld [vmem:[#allocation62_spill] sm:$0xff] }
 0xc01   : > { %v7044_v62 = vpop.f32.mrf.mxu3 }
 0xc02   : > { %v7111_v42 = vpop.f32.mrf.mxu1  ;;  %v7045_v23 = vadd.f32 %v7044_v62, %v14402_v40 }
 0xc03   : > { %v7112_v4 = vadd.f32 %v7111_v42, %v7088_v54 }
 0xc05   : > { %v7222_v35 = vmul.f32 %v7112_v4, %v14847_v19  ;;  %v7066_v25 = vpop.f32.mrf.mxu0 }
 0xc06   : > { %v7067_v7 = vadd.f32 %v7066_v25, %v7043_v8 }
 0xc07   : > { %7234 = vst [vmem:[%s14394_s9 + $0x10] sm:$0xff] %v7222_v35 }
 0xc08   : > { %v7091_v46 = vadd.f32 %v7090_v52, %v7067_v7  ;;  %v7092_v44 = vpop.f32.mrf.mxu2 }
 0xc09   : > { %v7047_v2 = vpop.f32.mrf.mxu3 }
 0xc0a   : > { %v7114_v45 = vpop.f32.mrf.mxu1  ;;  %v7048_v28 = vadd.f32 %v7047_v2, %v6685_v48 }
 0xc0b   : > { %v7115_v63 = vadd.f32 %v7114_v45, %v7091_v46 }
 0xc0d   : > { %v7224_v33 = vmul.f32 %v7115_v63, %v14847_v19  ;;  %v7068_v51 = vpop.f32.mrf.mxu0 }
 0xc0e   : > { %v7069_v13 = vadd.f32 %v7068_v51, %v7045_v23 }
 0xc0f   : > { %7236 = vst [vmem:[%s14394_s9 + $0x20] sm:$0xff] %v7224_v33 }
 0xc10   : > { %v7093_v3 = vadd.f32 %v7092_v44, %v7069_v13  ;;  %v7095_v11 = vpop.f32.mrf.mxu2 }
 0xc11   : > { %v7049_v10 = vpop.f32.mrf.mxu3 }
 0xc12   : > { %v7116_v43 = vpop.f32.mrf.mxu1  ;;  %v7050_v5 = vadd.f32 %v7049_v10, %v6690_v24 }
 0xc13   : > { %v7117_v41 = vadd.f32 %v7116_v43, %v7093_v3 }
 0xc15   : > { %v7226_v61 = vmul.f32 %v7117_v41, %v14847_v19  ;;  %v7071_v56 = vpop.f32.mrf.mxu0 }
 0xc16   : > { %v7072_v22 = vadd.f32 %v7071_v56, %v7048_v28 }
 0xc17   : > { %7238 = vst [vmem:[%s14394_s9 + $0x30] sm:$0xff] %v7226_v61 }
 0xc18   : > { %v7096_v9 = vadd.f32 %v7095_v11, %v7072_v22  ;;  %v7097_v21 = vpop.f32.mrf.mxu2 }
 0xc19   : > { %v7133_v29 = vpop.f32.mrf.mxu3 }
 0xc1a   : > { %v7119_v49 = vpop.f32.mrf.mxu1  ;;  %v7134_v39 = vadd.f32 %v7133_v29, %v14385_v58 }
 0xc1b   : > { %v7120_v47 = vadd.f32 %v7119_v49, %v7096_v9 }
 0xc1d   : > { %v7228_v16 = vmul.f32 %v7120_v47, %v14847_v19  ;;  %v7073_v15 = vpop.f32.mrf.mxu0 }
 0xc1e   : > { %v7074_v27 = vadd.f32 %v7073_v15, %v7050_v5 }
 0xc1f   : > { %7240 = vst [vmem:[%s14394_s9 + $0x40] sm:$0xff] %v7228_v16 }
 0xc20   : > { %v7098_v12 = vadd.f32 %v7097_v21, %v7074_v27  ;;  %v7181_v38 = vpop.f32.mrf.mxu2 }
 0xc21   : > { %v7135_v34 = vpop.f32.mrf.mxu3 }
 0xc22   : > { %v7121_v59 = vpop.f32.mrf.mxu1  ;;  %v7136_v60 = vadd.f32 %v7135_v34, %v14388_v0 }
 0xc23   : > { %v7122_v30 = vadd.f32 %v7121_v59, %v7098_v12 }
 0xc25   : > { %v7230_v6 = vmul.f32 %v7122_v30, %v14847_v19  ;;  %v7157_v26 = vpop.f32.mrf.mxu0 }
 0xc26   : > { %v7158_v18 = vadd.f32 %v7157_v26, %v7134_v39 }
 0xc27   : > { %7242 = vst [vmem:[%s14394_s9 + $0x50] sm:$0xff] %v7230_v6 }
 0xc28   : > { %v7182_v55 = vadd.f32 %v7181_v38, %v7158_v18  ;;  %v7183_v17 = vpop.f32.mrf.mxu2 }
 0xc29   : > { %v7138_v36 = vpop.f32.mrf.mxu3 }
 0xc2a   : > { %v7205_v31 = vpop.f32.mrf.mxu1  ;;  %v7139_v54 = vadd.f32 %v7138_v36, %v14397_v37 }
 0xc2b   : > { %v7206_v57 = vadd.f32 %v7205_v31, %v7182_v55 }
 0xc2d   : > { %v7221_v32 = vmul.f32 %v7206_v57, %v14849_v53  ;;  %v7159_v14 = vpop.f32.mrf.mxu0 }
 0xc2e   : > { %v7160_v50 = vadd.f32 %v7159_v14, %v7136_v60 }
 0xc2f   : > { %7233 = vst [vmem:[%s14394_s9 + $0x8] sm:$0xff] %v7221_v32 }
 0xc30   : > { %v7184_v1 = vadd.f32 %v7183_v17, %v7160_v50  ;;  %v7186_v20 = vpop.f32.mrf.mxu2 }
 0xc31   : > { %v7140_v4 = vpop.f32.mrf.mxu3 }
 0xc32   : > { %v7207_v58 = vpop.f32.mrf.mxu1  ;;  %v7141_v7 = vadd.f32 %v7140_v4, %v14402_v40 }
 0xc33   : > { %v7208_v19 = vadd.f32 %v7207_v58, %v7184_v1 }
 0xc35   : > { %v7223_v42 = vmul.f32 %v7208_v19, %v14849_v53  ;;  %v7162_v52 = vpop.f32.mrf.mxu0 }
 0xc36   : > { %v7163_v62 = vadd.f32 %v7162_v52, %v7139_v54 }
 0xc37   : > { %7235 = vst [vmem:[%s14394_s9 + $0x18] sm:$0xff] %v7223_v42 }
 0xc38   : > { %v7187_v8 = vadd.f32 %v7186_v20, %v7163_v62  ;;  %v7188_v25 = vpop.f32.mrf.mxu2 }
 0xc39   : > { %v7143_v37 = vpop.f32.mrf.mxu3 }
 0xc3a   : > { %v7210_v0 = vpop.f32.mrf.mxu1  ;;  %v7144_v33 = vadd.f32 %v7143_v37, %v6685_v48 }
 0xc3b   : > { %v7211_v35 = vadd.f32 %v7210_v0, %v7187_v8 }
 0xc3d   : > { %v7225_v46 = vmul.f32 %v7211_v35, %v14849_v53  ;;  %v7164_v45 = vpop.f32.mrf.mxu0 }
 0xc3e   : > { %v7165_v63 = vadd.f32 %v7164_v45, %v7141_v7 }
 0xc3f   : > { %7237 = vst [vmem:[%s14394_s9 + $0x28] sm:$0xff] %v7225_v46 }
 0xc40   : > { %v7189_v44 = vadd.f32 %v7188_v25, %v7165_v63  ;;  %v7191_v3 = vpop.f32.mrf.mxu2 }
 0xc41   : > { %v7145_v41 = vpop.f32.mrf.mxu3 }
 0xc42   : > { %v7212_v2 = vpop.f32.mrf.mxu1  ;;  %v7146_v28 = vadd.f32 %v7145_v41, %v6690_v24 }
 0xc43   : > { %v7213_v23 = vadd.f32 %v7212_v2, %v7189_v44 }
 0xc45   : > { %v7227_v51 = vmul.f32 %v7213_v23, %v14849_v53  ;;  %v7167_v13 = vpop.f32.mrf.mxu0 }
 0xc46   : > { %v7168_v43 = vadd.f32 %v7167_v13, %v7144_v33 }
 0xc47   : > { %7239 = vst [vmem:[%s14394_s9 + $0x38] sm:$0xff] %v7227_v51 }
 0xc48   : > { %v7192_v40 = vadd.f32 %v7191_v3, %v7168_v43  ;;  %v7193_v22 = vpop.f32.mrf.mxu2 }
 0xc4a   : > { %v7215_v11 = vpop.f32.mrf.mxu1 }
 0xc4b   : > { %v7216_v10 = vadd.f32 %v7215_v11, %v7192_v40 }
 0xc4d   : > { %v7229_v61 = vmul.f32 %v7216_v10, %v14849_v53  ;;  %v7169_v56 = vpop.f32.mrf.mxu0 }
 0xc4e   : > { %v7170_v48 = vadd.f32 %v7169_v56, %v7146_v28 }
 0xc4f   : > { %7241 = vst [vmem:[%s14394_s9 + $0x48] sm:$0xff] %v7229_v61 }
 0xc50   : > { %v7194_v9 = vadd.f32 %v7193_v22, %v7170_v48 }
 0xc52   : > { %v7217_v49 = vpop.f32.mrf.mxu1 }
 0xc53   : > { %v7218_v47 = vadd.f32 %v7217_v49, %v7194_v9 }
 0xc55   : > { %v7231_v21 = vmul.f32 %v7218_v47, %v14849_v53 }
 0xc57   : > { %7243 = vst [vmem:[%s14394_s9 + $0x58] sm:$0xff] %v7231_v21 }
 0xc58   : > { %9493 = shalt.err (!%p9490_p10)
}
 0xc59   : > { %s9560_s26 = smov 256  }
 0xc5a   : > { %9260 = dma.vmem_to_hbm [thread:$0]  (%p9724_p7), %s7258_s17, 1536, %s7260_s27, %s7245_s22, %s9560_s26, %s9560_s26, %s9552_s24  }
 0xc5b PF: > { %s14851_s9 = sld [smem:[#allocation17_spill]]  ;;  %p14853_p12 = scmp.ge.s32.totalorder %s9540_s21, 2 }
 0xc5d   : > { %p9277_p13 = pnand %p14853_p12, %p9676_p6 }
 0xc5f   : > { %p9278_p0 = pneg %p9277_p13 }
 0xc61   : > { %s7274_s15 = sand.u32 1, %s14851_s9  }
 0xc62   : > { %s7275_s11 = scalar_lea.sflag [#allocation6], %s7274_s15 }
 0xc63   : > { %9523 = dma.done.wait (%p9278_p0), %s7275_s11, 1536  }
 0xc64   : > { %9525 = vsyncadd (%p9278_p0), %s7275_s11, 4294965760  ;;  %s14854_s21 = sld [smem:[#allocation20_spill]]  ;;  %s14857_s18 = smov %s9532_s19 }
 0xc65   : > { %s14855_s23 = sld [smem:[#allocation18_spill]] }
 0xc66   : > { %s14856_s20 = sld [smem:[#allocation21_spill]] }
 0xc6a   : > { %p30_p3 = scmp.ge.s32.totalorder %s14854_s21, 4  }
 0xc6b   : > { %s14858_s19 = smov %s14855_s23 }
 0xc6c   :  { %32 = sbr.rel (!%p30_p3) target bundleno = 14 (0xe), region = 137 }
 0xc71   :  { %7281 = vsyncpa [#allocation5], 1 }
 0xc72   :  { %7283 = vsyncpa [#allocation5 + $0x1], 1 }
 0xc73   :  { %7284 = vsyncpa [#allocation8], 1 }
 0xc74   :  { %7285 = vsyncpa [#allocation11], 1 }
 0xc75   :  { %7286 = vsyncpa [#allocation6], 1 }
 0xc76   :  { %7288 = vsyncpa [#allocation6 + $0x1], 1 }

</bundles_post_ra>
